<compile_context>
chip_gen: v6e
topology: v6e:2x2x1
jax: 0.10.0
libtpu: 0.0.40
codegen_flags: <defaults>
</compile_context>

<pallas_src>
import functools

import numpy as np

import jax
import jax.numpy as jnp
from jax.experimental import pallas as pl
from jax.experimental.pallas import tpu as pltpu


# ---------------------------------------------------------------------------
# Constant order shared by the host-side packer and the kernel unpacker
# ---------------------------------------------------------------------------

CONST_NAMES = (
    # MnistCNN.sequence[:15]
    "m_w1", "m_b1", "m_ps1", "m_pr1", "m_bn1",
    "m_w2", "m_b2", "m_ps2", "m_pr2", "m_bn2",
    "m_r3", "m_w3", "m_b3", "m_bn3",
    "m_fcw", "m_fcb", "m_bn4",
    # Naive_net.sequence[:10]
    "n_w1", "n_b1", "n_ps1", "n_pr1", "n_bn1",
    "n_w2", "n_b2", "n_ps2", "n_pr2", "n_bn2",
    # branch combination selectors
    "c_rsel", "c_ae", "c_ao",
    # post_mnist_sequence
    "pm_w1", "pm_b1", "pm_bn", "pm_w2", "pm_b2",
    # post_naive_sequence
    "pn_w1e", "pn_w1o", "pn_b1", "pn_bn", "pn_w2", "pn_b2",
    # lower_last_sequence
    "ll_w1a", "ll_w1b", "ll_w1c", "ll_b1", "ll_bn", "ll_w2", "ll_b2",
)

_BF16_NAMES = {"m_w1", "m_w2", "m_w3", "m_fcw", "n_w1", "n_w2"}


# ---------------------------------------------------------------------------
# The fused Pallas kernel
# ---------------------------------------------------------------------------

def _oo_net_kernel(bt, *refs):
    """One grid step = one batch tile of `bt` samples, full forward pass."""
    xm_ref, xn_ref = refs[0], refs[1]
    o_ref = refs[-1]
    c = dict(zip(CONST_NAMES, refs[2:-1]))

    f32 = jnp.float32
    bf16 = jnp.bfloat16
    ni = 2 * bt                      # number of MNIST digit images in the tile

    def dotf(a, b):                  # exact f32 matmul (selection / head math)
        return jnp.dot(a, b, preferred_element_type=f32)

    def dotb(a, b_ref_val):          # bf16 inputs -> f32 accumulate (MXU)
        return jnp.dot(a.astype(bf16), b_ref_val, preferred_element_type=f32)

    def conv_banded(x, w_ref, b_ref, n_img, stride, oh, relu):
        """Valid conv, stride 1, via per-kernel-row banded matmuls.

        x: [n_img*stride, W*Cin] f32 (rows = image*stride + y).
        w_ref: [KH, W*Cin, OW*Cout] bf16 banded weights.
        Returns [(n_img-1)*stride + oh, OW*Cout] f32 (rows beyond oh per image
        are junk and skipped by the following pooling row-selection).
        """
        nrows = (n_img - 1) * stride + oh
        acc = None
        for dy in range(w_ref.shape[0]):
            part = dotb(x[dy:dy + nrows, :], w_ref[dy])
            acc = part if acc is None else acc + part
        acc = acc + b_ref[...]
        return jnp.maximum(acc, 0.0) if relu else acc

    def pool_bn(x, ps_ref, pr_ref, bn_ref, relu_before_bn):
        """2x2/2 max-pool via 0/1 selection matmuls + max, then (ReLU) + BN."""
        xp = jnp.maximum(dotf(x, ps_ref[0]), dotf(x, ps_ref[1]))   # width dir
        y = jnp.maximum(dotf(pr_ref[0], xp), dotf(pr_ref[1], xp))  # height dir
        if relu_before_bn:
            y = jnp.maximum(y, 0.0)
        bn = bn_ref[...]
        return y * bn[0:1, :] + bn[1:2, :]

    def affine(y, bn_ref):
        bn = bn_ref[...]
        return y * bn[0:1, :] + bn[1:2, :]

    # ---------------- Mnist_part (both digit channels batched by rows) ------
    xm = xm_ref[0]                                                   # [ni*14, 14]
    h = conv_banded(xm, c["m_w1"], c["m_b1"], ni, 14, 12, relu=True)     # [.,384]
    h = pool_bn(h, c["m_ps1"], c["m_pr1"], c["m_bn1"], False)            # [ni*6,192]
    h = conv_banded(h, c["m_w2"], c["m_b2"], ni, 6, 4, relu=True)        # [.,256]
    h = pool_bn(h, c["m_ps2"], c["m_pr2"], c["m_bn2"], False)            # [ni*2,128]
    # Conv2d(64,128,2x2) on the 2x2 map -> one row per image.
    acc = None
    for dy in range(2):
        t = dotf(c["m_r3"][dy], h)                                       # [ni,128]
        t = dotb(t, c["m_w3"][dy])
        acc = t if acc is None else acc + t
    h = jnp.maximum(acc + c["m_b3"][...], 0.0)
    h = affine(h, c["m_bn3"])                                            # [ni,128]
    m = jnp.maximum(dotb(h, c["m_fcw"][...]) + c["m_fcb"][...], 0.0)
    m = affine(m, c["m_bn4"])                                            # [ni,64]

    # ---------------- Naive_part --------------------------------------------
    # TODO(synk): Dropout is identity here (inference mode).
    xn = xn_ref[0]                                                   # [bt*14, 28]
    g = conv_banded(xn, c["n_w1"], c["n_b1"], bt, 14, 12, relu=False)    # [.,192]
    g = pool_bn(g, c["n_ps1"], c["n_pr1"], c["n_bn1"], True)             # [bt*6,96]
    g = conv_banded(g, c["n_w2"], c["n_b2"], bt, 6, 4, relu=False)       # [.,128]
    g = pool_bn(g, c["n_ps2"], c["n_pr2"], c["n_bn2"], True)             # [bt*2,64]

    # ---------------- Combine branches (no interleave round trip) ----------
    m1 = dotf(c["c_rsel"][0], m)            # [bt,64]  Mnist features of num1
    m2 = dotf(c["c_rsel"][1], m)            # [bt,64]  Mnist features of num2
    g0 = dotf(c["c_rsel"][0], g)            # [bt,64]  Naive rows h=0
    g1 = dotf(c["c_rsel"][1], g)            # [bt,64]  Naive rows h=1
    low_e = dotf(g0, c["c_ae"][0]) + dotf(g1, c["c_ae"][1])   # lower_flat[0::2]
    low_o = dotf(g0, c["c_ao"][0]) + dotf(g1, c["c_ao"][1])   # lower_flat[1::2]
    up1 = m1 + low_e
    up2 = m2 + low_o

    # ---------------- post_mnist_sequence (shared weights) ------------------
    def post_mnist(u):
        t = jnp.maximum(dotf(u, c["pm_w1"][...]) + c["pm_b1"][...], 0.0)
        t = affine(t, c["pm_bn"])
        return dotf(t, c["pm_w2"][...]) + c["pm_b2"][...]

    u1 = post_mnist(up1)                                                # [bt,10]
    u2 = post_mnist(up2)                                                # [bt,10]

    # ---------------- post_naive_sequence (de-interleaved fc1 weights) ------
    t = dotf(up1, c["pn_w1e"][...]) + dotf(up2, c["pn_w1o"][...]) + c["pn_b1"][...]
    t = affine(jnp.maximum(t, 0.0), c["pn_bn"])
    low = dotf(t, c["pn_w2"][...]) + c["pn_b2"][...]                    # [bt,4]

    # ---------------- lower_last_sequence (fc1 weight rows split) -----------
    d = (dotf(u1, c["ll_w1a"][...]) + dotf(u2, c["ll_w1b"][...])
         + dotf(low, c["ll_w1c"][...]) + c["ll_b1"][...])
    d = affine(jnp.maximum(d, 0.0), c["ll_bn"])
    down = dotf(d, c["ll_w2"][...]) + c["ll_b2"][...]                   # [bt,2]

    # ---------------- lane-dense output slab: [u1 | u2 | down | zeros] ------
    o_ref[0] = jnp.zeros((bt, 128), f32)
    o_ref[0, :, 0:10] = u1
    o_ref[0, :, 10:20] = u2
    o_ref[0, :, 20:22] = down


# ---------------------------------------------------------------------------
# Host-side constant construction (banded conv weights, pool/select matrices)
# ---------------------------------------------------------------------------

def _banded_conv(w, w_in):
    """w: [KH,KW,Cin,Cout] -> banded mats [KH, w_in*Cin, OW*Cout] (valid conv)."""
    kh, kw, cin, cout = w.shape
    ow = w_in - kw + 1
    out = np.zeros((kh, w_in * cin, ow * cout), np.float32)
    for dy in range(kh):
        for dx in range(kw):
            for ox in range(ow):
                xx = ox + dx
                out[dy, xx * cin:(xx + 1) * cin, ox * cout:(ox + 1) * cout] = w[dy, dx]
    return out


def _pool_lane_sel(w_in, ch):
    """0/1 matrices selecting even/odd width positions: [2, w_in*ch, (w_in//2)*ch]."""
    wp = w_in // 2
    s = np.zeros((2, w_in * ch, wp * ch), np.float32)
    eye = np.eye(ch, dtype=np.float32)
    for px in range(wp):
        s[0, (2 * px) * ch:(2 * px + 1) * ch, px * ch:(px + 1) * ch] = eye
        s[1, (2 * px + 1) * ch:(2 * px + 2) * ch, px * ch:(px + 1) * ch] = eye
    return s


def _pool_row_sel(n_img, stride_in, h_valid):
    """Even/odd row selectors that also drop junk rows and repack the stride."""
    hp = h_valid // 2
    rin = (n_img - 1) * stride_in + h_valid
    r = np.zeros((2, n_img * hp, rin), np.float32)
    for i in range(n_img):
        for py in range(hp):
            r[0, i * hp + py, i * stride_in + 2 * py] = 1.0
            r[1, i * hp + py, i * stride_in + 2 * py + 1] = 1.0
    return r


def _row_sel_pairs(n_out, stride_in):
    """R[j][i, i*stride_in + j] = 1 for j in {0,1}."""
    r = np.zeros((2, n_out, n_out * stride_in), np.float32)
    for j in range(2):
        for i in range(n_out):
            r[j, i, i * stride_in + j] = 1.0
    return r


def _interleave_sel():
    """Lane selectors that reproduce the torch NCHW-flatten even/odd split."""
    ae = np.zeros((2, 64, 64), np.float32)
    ao = np.zeros((2, 64, 64), np.float32)
    for cc in range(32):
        ae[0, cc, 2 * cc] = 1.0          # h=0, w=0 -> even k
        ae[1, cc, 2 * cc + 1] = 1.0      # h=1, w=0 -> odd  k
        ao[0, 32 + cc, 2 * cc] = 1.0     # h=0, w=1 -> even k
        ao[1, 32 + cc, 2 * cc + 1] = 1.0 # h=1, w=1 -> odd  k
    return ae, ao


def pack_constants(p, bt):
    """Build all VMEM-resident constants for a batch tile of `bt` samples."""
    ni = 2 * bt
    f = lambda a: np.asarray(a, np.float32)
    tile = lambda v, n: np.tile(f(v), n)[None, :]
    bn2 = lambda st, n: np.stack([np.tile(f(st[0]), n), np.tile(f(st[1]), n)]).astype(np.float32)

    c = {}
    # --- MnistCNN.sequence[:15] ---
    c["m_w1"] = _banded_conv(f(p["m_conv1_w"]), 14)
    c["m_b1"] = tile(p["m_conv1_b"], 12)
    c["m_ps1"] = _pool_lane_sel(12, 32)
    c["m_pr1"] = _pool_row_sel(ni, 14, 12)
    c["m_bn1"] = bn2(p["m_bn1"], 6)
    c["m_w2"] = _banded_conv(f(p["m_conv2_w"]), 6)
    c["m_b2"] = tile(p["m_conv2_b"], 4)
    c["m_ps2"] = _pool_lane_sel(4, 64)
    c["m_pr2"] = _pool_row_sel(ni, 6, 4)
    c["m_bn2"] = bn2(p["m_bn2"], 2)
    c["m_r3"] = _row_sel_pairs(ni, 2)
    c["m_w3"] = _banded_conv(f(p["m_conv3_w"]), 2)
    c["m_b3"] = tile(p["m_conv3_b"], 1)
    c["m_bn3"] = bn2(p["m_bn3"], 1)
    c["m_fcw"] = f(p["m_fc_w"])
    c["m_fcb"] = f(p["m_fc_b"])[None, :]
    c["m_bn4"] = bn2(p["m_bn4"], 1)
    # --- Naive_net.sequence[:10] ---
    c["n_w1"] = _banded_conv(f(p["n_conv1_w"]), 14)
    c["n_b1"] = tile(p["n_conv1_b"], 12)
    c["n_ps1"] = _pool_lane_sel(12, 16)
    c["n_pr1"] = _pool_row_sel(bt, 14, 12)
    c["n_bn1"] = bn2(p["n_bn1"], 6)
    c["n_w2"] = _banded_conv(f(p["n_conv2_w"]), 6)
    c["n_b2"] = tile(p["n_conv2_b"], 4)
    c["n_ps2"] = _pool_lane_sel(4, 32)
    c["n_pr2"] = _pool_row_sel(bt, 6, 4)
    c["n_bn2"] = bn2(p["n_bn2"], 2)
    # --- combination selectors ---
    c["c_rsel"] = _row_sel_pairs(bt, 2)
    c["c_ae"], c["c_ao"] = _interleave_sel()
    # --- post_mnist_sequence ---
    c["pm_w1"] = f(p["pm_fc1_w"]); c["pm_b1"] = f(p["pm_fc1_b"])[None, :]
    c["pm_bn"] = bn2(p["pm_bn"], 1)
    c["pm_w2"] = f(p["pm_fc2_w"]); c["pm_b2"] = f(p["pm_fc2_b"])[None, :]
    # --- post_naive_sequence (fc1 rows de-interleaved host-side) ---
    w = f(p["pn_fc1_w"])
    c["pn_w1e"] = np.ascontiguousarray(w[0::2, :])
    c["pn_w1o"] = np.ascontiguousarray(w[1::2, :])
    c["pn_b1"] = f(p["pn_fc1_b"])[None, :]
    c["pn_bn"] = bn2(p["pn_bn"], 1)
    c["pn_w2"] = f(p["pn_fc2_w"]); c["pn_b2"] = f(p["pn_fc2_b"])[None, :]
    # --- lower_last_sequence (fc1 rows split by concat segment) ---
    w = f(p["ll_fc1_w"])
    c["ll_w1a"], c["ll_w1b"], c["ll_w1c"] = w[0:10, :], w[10:20, :], w[20:24, :]
    c["ll_b1"] = f(p["ll_fc1_b"])[None, :]
    c["ll_bn"] = bn2(p["ll_bn"], 1)
    c["ll_w2"] = f(p["ll_fc2_w"]); c["ll_b2"] = f(p["ll_fc2_b"])[None, :]

    out = []
    for name in CONST_NAMES:
        dt = jnp.bfloat16 if name in _BF16_NAMES else jnp.float32
        out.append(jnp.asarray(c[name], dtype=dt))
    return out


# ---------------------------------------------------------------------------
# Synthetic parameter initialization (deterministic)
# ---------------------------------------------------------------------------

def _bn_affine(key, ch):
    k1, k2, k3, k4 = jax.random.split(key, 4)
    gamma = jax.random.uniform(k1, (ch,), jnp.float32, 0.8, 1.2)
    beta = 0.1 * jax.random.normal(k2, (ch,), jnp.float32)
    mean = 0.1 * jax.random.normal(k3, (ch,), jnp.float32)
    var = jax.random.uniform(k4, (ch,), jnp.float32, 0.5, 1.5)
    scale = gamma / jnp.sqrt(var + 1e-5)
    shift = beta - mean * scale
    return scale, shift


def init_params(key):
    keys = iter(jax.random.split(key, 64))
    nk = lambda: next(keys)

    def conv_w(kh, kw, cin, cout):
        return (1.0 / np.sqrt(kh * kw * cin)) * jax.random.normal(
            nk(), (kh, kw, cin, cout), jnp.float32)

    def lin_w(fi, fo):
        return (1.0 / np.sqrt(fi)) * jax.random.normal(nk(), (fi, fo), jnp.float32)

    def bvec(n):
        return 0.05 * jax.random.normal(nk(), (n,), jnp.float32)

    p = {}
    # MnistCNN.sequence[:15]
    p["m_conv1_w"], p["m_conv1_b"] = conv_w(3, 3, 1, 32), bvec(32)
    p["m_bn1"] = _bn_affine(nk(), 32)
    p["m_conv2_w"], p["m_conv2_b"] = conv_w(3, 3, 32, 64), bvec(64)
    p["m_bn2"] = _bn_affine(nk(), 64)
    p["m_conv3_w"], p["m_conv3_b"] = conv_w(2, 2, 64, 128), bvec(128)
    p["m_bn3"] = _bn_affine(nk(), 128)
    p["m_fc_w"], p["m_fc_b"] = lin_w(128, 64), bvec(64)
    p["m_bn4"] = _bn_affine(nk(), 64)
    # Naive_net.sequence[:10]
    p["n_conv1_w"], p["n_conv1_b"] = conv_w(3, 3, 2, 16), bvec(16)
    p["n_bn1"] = _bn_affine(nk(), 16)
    p["n_conv2_w"], p["n_conv2_b"] = conv_w(3, 3, 16, 32), bvec(32)
    p["n_bn2"] = _bn_affine(nk(), 32)
    # post_mnist_sequence
    p["pm_fc1_w"], p["pm_fc1_b"] = lin_w(64, 32), bvec(32)
    p["pm_bn"] = _bn_affine(nk(), 32)
    p["pm_fc2_w"], p["pm_fc2_b"] = lin_w(32, 10), bvec(10)
    # post_naive_sequence
    p["pn_fc1_w"], p["pn_fc1_b"] = lin_w(128, 64), bvec(64)
    p["pn_bn"] = _bn_affine(nk(), 64)
    p["pn_fc2_w"], p["pn_fc2_b"] = lin_w(64, 4), bvec(4)
    # lower_last_sequence
    p["ll_fc1_w"], p["ll_fc1_b"] = lin_w(24, 12), bvec(12)
    p["ll_bn"] = _bn_affine(nk(), 12)
    p["ll_fc2_w"], p["ll_fc2_b"] = lin_w(12, 2), bvec(2)
    return p


# ---------------------------------------------------------------------------
# Forward wrapper: single pallas_call, grid over batch tiles
# ---------------------------------------------------------------------------

def _const_index_map(ndim):
    return lambda i: (0,) * ndim


def oO_net_forward(x, consts, *, bt):
    """x: [B, 2, 14, 14] float32 (NCHW). Returns (output_down [B,2],
    output_up [B,10,2]) -- same shapes/semantics as the PyTorch module."""
    b = x.shape[0]
    bp = ((b + bt - 1) // bt) * bt
    x = x.astype(jnp.float32)
    if bp != b:
        x = jnp.pad(x, ((0, bp - b), (0, 0), (0, 0), (0, 0)))
    t = bp // bt

    # Mnist branch input: 2*bt digit images per tile, rows = image*14 + y.
    xm = x.reshape(t, bt * 2 * 14, 14)
    # Naive branch input: rows = sample*14 + y, lanes = x*2 + channel.
    xn = jnp.transpose(x, (0, 2, 3, 1)).reshape(t, bt * 14, 28)

    const_specs = [pl.BlockSpec(a.shape, _const_index_map(a.ndim)) for a in consts]

    out = pl.pallas_call(
        functools.partial(_oo_net_kernel, bt),
        out_shape=jax.ShapeDtypeStruct((t, bt, 128), jnp.float32),
        grid=(t,),
        in_specs=[
            pl.BlockSpec((1, bt * 2 * 14, 14), lambda i: (i, 0, 0)),
            pl.BlockSpec((1, bt * 14, 28), lambda i: (i, 0, 0)),
        ] + const_specs,
        out_specs=pl.BlockSpec((1, bt, 128), lambda i: (i, 0, 0)),
        compiler_params=pltpu.CompilerParams(
            dimension_semantics=("parallel",)),
    )(xm, xn, *consts)

    slab = out.reshape(bp, 128)[:b]
    u1 = slab[:, 0:10]
    u2 = slab[:, 10:20]
    output_down = slab[:, 20:22]
    output_up = jnp.stack([u1, u2], axis=2)        # [B, 10, 2]
    return output_down, output_up


# ---------------------------------------------------------------------------

if __name__ == "__main__":
    key = jax.random.PRNGKey(0)
    k_in, k_par = jax.random.split(key)
    B = 8
    x = jax.random.normal(k_in, (B, 2, 14, 14), jnp.float32)   # MNIST-pair input
    params = init_params(k_par)

    bt = 4 if B % 4 == 0 else B            # batch tile per grid step
    consts = pack_constants(params, bt)

    fwd = jax.jit(functools.partial(oO_net_forward, bt=bt))
    out_down, out_up = fwd(x, consts)
    jax.block_until_ready((out_down, out_up))

    assert out_down.shape == (B, 2) and out_down.dtype == jnp.float32
    assert out_up.shape == (B, 10, 2) and out_up.dtype == jnp.float32
    assert bool(jnp.all(jnp.isfinite(out_down)))
    assert bool(jnp.all(jnp.isfinite(out_up)))
    print("KERNEL_OK")
</pallas_src>

<mosaic_0001>
module attributes {stable_mosaic.version = 11 : i64} {
  func.func @_oo_net_kernel(%arg0: i32, %arg1: memref<1x112x14xf32, #tpu.memory_space<vmem>>, %arg2: memref<1x56x28xf32, #tpu.memory_space<vmem>>, %arg3: memref<3x14x384xbf16, #tpu.memory_space<vmem>>, %arg4: memref<1x384xf32, #tpu.memory_space<vmem>>, %arg5: memref<2x384x192xf32, #tpu.memory_space<vmem>>, %arg6: memref<2x48x110xf32, #tpu.memory_space<vmem>>, %arg7: memref<2x192xf32, #tpu.memory_space<vmem>>, %arg8: memref<3x192x256xbf16, #tpu.memory_space<vmem>>, %arg9: memref<1x256xf32, #tpu.memory_space<vmem>>, %arg10: memref<2x256x128xf32, #tpu.memory_space<vmem>>, %arg11: memref<2x16x46xf32, #tpu.memory_space<vmem>>, %arg12: memref<2x128xf32, #tpu.memory_space<vmem>>, %arg13: memref<2x8x16xf32, #tpu.memory_space<vmem>>, %arg14: memref<2x128x128xbf16, #tpu.memory_space<vmem>>, %arg15: memref<1x128xf32, #tpu.memory_space<vmem>>, %arg16: memref<2x128xf32, #tpu.memory_space<vmem>>, %arg17: memref<128x64xbf16, #tpu.memory_space<vmem>>, %arg18: memref<1x64xf32, #tpu.memory_space<vmem>>, %arg19: memref<2x64xf32, #tpu.memory_space<vmem>>, %arg20: memref<3x28x192xbf16, #tpu.memory_space<vmem>>, %arg21: memref<1x192xf32, #tpu.memory_space<vmem>>, %arg22: memref<2x192x96xf32, #tpu.memory_space<vmem>>, %arg23: memref<2x24x54xf32, #tpu.memory_space<vmem>>, %arg24: memref<2x96xf32, #tpu.memory_space<vmem>>, %arg25: memref<3x96x128xbf16, #tpu.memory_space<vmem>>, %arg26: memref<1x128xf32, #tpu.memory_space<vmem>>, %arg27: memref<2x128x64xf32, #tpu.memory_space<vmem>>, %arg28: memref<2x8x22xf32, #tpu.memory_space<vmem>>, %arg29: memref<2x64xf32, #tpu.memory_space<vmem>>, %arg30: memref<2x4x8xf32, #tpu.memory_space<vmem>>, %arg31: memref<2x64x64xf32, #tpu.memory_space<vmem>>, %arg32: memref<2x64x64xf32, #tpu.memory_space<vmem>>, %arg33: memref<64x32xf32, #tpu.memory_space<vmem>>, %arg34: memref<1x32xf32, #tpu.memory_space<vmem>>, %arg35: memref<2x32xf32, #tpu.memory_space<vmem>>, %arg36: memref<32x10xf32, #tpu.memory_space<vmem>>, %arg37: memref<1x10xf32, #tpu.memory_space<vmem>>, %arg38: memref<64x64xf32, #tpu.memory_space<vmem>>, %arg39: memref<64x64xf32, #tpu.memory_space<vmem>>, %arg40: memref<1x64xf32, #tpu.memory_space<vmem>>, %arg41: memref<2x64xf32, #tpu.memory_space<vmem>>, %arg42: memref<64x4xf32, #tpu.memory_space<vmem>>, %arg43: memref<1x4xf32, #tpu.memory_space<vmem>>, %arg44: memref<10x12xf32, #tpu.memory_space<vmem>>, %arg45: memref<10x12xf32, #tpu.memory_space<vmem>>, %arg46: memref<4x12xf32, #tpu.memory_space<vmem>>, %arg47: memref<1x12xf32, #tpu.memory_space<vmem>>, %arg48: memref<2x12xf32, #tpu.memory_space<vmem>>, %arg49: memref<12x2xf32, #tpu.memory_space<vmem>>, %arg50: memref<1x2xf32, #tpu.memory_space<vmem>>, %arg51: memref<1x4x128xf32, #tpu.memory_space<vmem>>) attributes {dimension_semantics = [#tpu.dimension_semantics<parallel>], iteration_bounds = array<i64: 2>, scalar_prefetch = 0 : i64, scratch_operands = 0 : i64, tpu.core_type = #tpu.core_type<tc>, window_params = [{transform_indices = @transform_0, window_bounds = array<i64: 1, 112, 14>}, {transform_indices = @transform_1, window_bounds = array<i64: 1, 56, 28>}, {pipeline_mode = #tpu.pipeline_mode<synchronous>, transform_indices = @transform_2, window_bounds = array<i64: 3, 14, 384>}, {pipeline_mode = #tpu.pipeline_mode<synchronous>, transform_indices = @transform_3, window_bounds = array<i64: 1, 384>}, {pipeline_mode = #tpu.pipeline_mode<synchronous>, transform_indices = @transform_4, window_bounds = array<i64: 2, 384, 192>}, {pipeline_mode = #tpu.pipeline_mode<synchronous>, transform_indices = @transform_5, window_bounds = array<i64: 2, 48, 110>}, {pipeline_mode = #tpu.pipeline_mode<synchronous>, transform_indices = @transform_6, window_bounds = array<i64: 2, 192>}, {pipeline_mode = #tpu.pipeline_mode<synchronous>, transform_indices = @transform_7, window_bounds = array<i64: 3, 192, 256>}, {pipeline_mode = #tpu.pipeline_mode<synchronous>, transform_indices = @transform_8, window_bounds = array<i64: 1, 256>}, {pipeline_mode = #tpu.pipeline_mode<synchronous>, transform_indices = @transform_9, window_bounds = array<i64: 2, 256, 128>}, {pipeline_mode = #tpu.pipeline_mode<synchronous>, transform_indices = @transform_10, window_bounds = array<i64: 2, 16, 46>}, {pipeline_mode = #tpu.pipeline_mode<synchronous>, transform_indices = @transform_11, window_bounds = array<i64: 2, 128>}, {pipeline_mode = #tpu.pipeline_mode<synchronous>, transform_indices = @transform_12, window_bounds = array<i64: 2, 8, 16>}, {pipeline_mode = #tpu.pipeline_mode<synchronous>, transform_indices = @transform_13, window_bounds = array<i64: 2, 128, 128>}, {pipeline_mode = #tpu.pipeline_mode<synchronous>, transform_indices = @transform_14, window_bounds = array<i64: 1, 128>}, {pipeline_mode = #tpu.pipeline_mode<synchronous>, transform_indices = @transform_15, window_bounds = array<i64: 2, 128>}, {pipeline_mode = #tpu.pipeline_mode<synchronous>, transform_indices = @transform_16, window_bounds = array<i64: 128, 64>}, {pipeline_mode = #tpu.pipeline_mode<synchronous>, transform_indices = @transform_17, window_bounds = array<i64: 1, 64>}, {pipeline_mode = #tpu.pipeline_mode<synchronous>, transform_indices = @transform_18, window_bounds = array<i64: 2, 64>}, {pipeline_mode = #tpu.pipeline_mode<synchronous>, transform_indices = @transform_19, window_bounds = array<i64: 3, 28, 192>}, {pipeline_mode = #tpu.pipeline_mode<synchronous>, transform_indices = @transform_20, window_bounds = array<i64: 1, 192>}, {pipeline_mode = #tpu.pipeline_mode<synchronous>, transform_indices = @transform_21, window_bounds = array<i64: 2, 192, 96>}, {pipeline_mode = #tpu.pipeline_mode<synchronous>, transform_indices = @transform_22, window_bounds = array<i64: 2, 24, 54>}, {pipeline_mode = #tpu.pipeline_mode<synchronous>, transform_indices = @transform_23, window_bounds = array<i64: 2, 96>}, {pipeline_mode = #tpu.pipeline_mode<synchronous>, transform_indices = @transform_24, window_bounds = array<i64: 3, 96, 128>}, {pipeline_mode = #tpu.pipeline_mode<synchronous>, transform_indices = @transform_25, window_bounds = array<i64: 1, 128>}, {pipeline_mode = #tpu.pipeline_mode<synchronous>, transform_indices = @transform_26, window_bounds = array<i64: 2, 128, 64>}, {pipeline_mode = #tpu.pipeline_mode<synchronous>, transform_indices = @transform_27, window_bounds = array<i64: 2, 8, 22>}, {pipeline_mode = #tpu.pipeline_mode<synchronous>, transform_indices = @transform_28, window_bounds = array<i64: 2, 64>}, {pipeline_mode = #tpu.pipeline_mode<synchronous>, transform_indices = @transform_29, window_bounds = array<i64: 2, 4, 8>}, {pipeline_mode = #tpu.pipeline_mode<synchronous>, transform_indices = @transform_30, window_bounds = array<i64: 2, 64, 64>}, {pipeline_mode = #tpu.pipeline_mode<synchronous>, transform_indices = @transform_31, window_bounds = array<i64: 2, 64, 64>}, {pipeline_mode = #tpu.pipeline_mode<synchronous>, transform_indices = @transform_32, window_bounds = array<i64: 64, 32>}, {pipeline_mode = #tpu.pipeline_mode<synchronous>, transform_indices = @transform_33, window_bounds = array<i64: 1, 32>}, {pipeline_mode = #tpu.pipeline_mode<synchronous>, transform_indices = @transform_34, window_bounds = array<i64: 2, 32>}, {pipeline_mode = #tpu.pipeline_mode<synchronous>, transform_indices = @transform_35, window_bounds = array<i64: 32, 10>}, {pipeline_mode = #tpu.pipeline_mode<synchronous>, transform_indices = @transform_36, window_bounds = array<i64: 1, 10>}, {pipeline_mode = #tpu.pipeline_mode<synchronous>, transform_indices = @transform_37, window_bounds = array<i64: 64, 64>}, {pipeline_mode = #tpu.pipeline_mode<synchronous>, transform_indices = @transform_38, window_bounds = array<i64: 64, 64>}, {pipeline_mode = #tpu.pipeline_mode<synchronous>, transform_indices = @transform_39, window_bounds = array<i64: 1, 64>}, {pipeline_mode = #tpu.pipeline_mode<synchronous>, transform_indices = @transform_40, window_bounds = array<i64: 2, 64>}, {pipeline_mode = #tpu.pipeline_mode<synchronous>, transform_indices = @transform_41, window_bounds = array<i64: 64, 4>}, {pipeline_mode = #tpu.pipeline_mode<synchronous>, transform_indices = @transform_42, window_bounds = array<i64: 1, 4>}, {pipeline_mode = #tpu.pipeline_mode<synchronous>, transform_indices = @transform_43, window_bounds = array<i64: 10, 12>}, {pipeline_mode = #tpu.pipeline_mode<synchronous>, transform_indices = @transform_44, window_bounds = array<i64: 10, 12>}, {pipeline_mode = #tpu.pipeline_mode<synchronous>, transform_indices = @transform_45, window_bounds = array<i64: 4, 12>}, {pipeline_mode = #tpu.pipeline_mode<synchronous>, transform_indices = @transform_46, window_bounds = array<i64: 1, 12>}, {pipeline_mode = #tpu.pipeline_mode<synchronous>, transform_indices = @transform_47, window_bounds = array<i64: 2, 12>}, {pipeline_mode = #tpu.pipeline_mode<synchronous>, transform_indices = @transform_48, window_bounds = array<i64: 12, 2>}, {pipeline_mode = #tpu.pipeline_mode<synchronous>, transform_indices = @transform_49, window_bounds = array<i64: 1, 2>}, {transform_indices = @transform_50, window_bounds = array<i64: 1, 4, 128>}]} {
    %c0 = arith.constant 0 : index
    %c0_0 = arith.constant 0 : index
    %c0_1 = arith.constant 0 : index
    %0 = vector.load %arg1[%c0, %c0_0, %c0_1] : memref<1x112x14xf32, #tpu.memory_space<vmem>>, vector<1x112x14xf32>
    %1 = vector.shape_cast %0 : vector<1x112x14xf32> to vector<112x14xf32>
    %2 = vector.extract_strided_slice %1 {offsets = [0, 0], sizes = [110, 14], strides = [1, 1]} : vector<112x14xf32> to vector<110x14xf32>
    %c0_2 = arith.constant 0 : index
    %c0_3 = arith.constant 0 : index
    %c0_4 = arith.constant 0 : index
    %3 = vector.load %arg3[%c0_2, %c0_3, %c0_4] : memref<3x14x384xbf16, #tpu.memory_space<vmem>>, vector<1x14x384xbf16>
    %4 = vector.shape_cast %3 : vector<1x14x384xbf16> to vector<14x384xbf16>
    %5 = arith.truncf %2 : vector<110x14xf32> to vector<110x14xbf16>
    %cst = arith.constant dense<0.000000e+00> : vector<110x384xf32>
    %6 = tpu.matmul %5, %4, %cst {dimension_numbers = #tpu.dot_dimension_numbers<[1], [0], [0], [1], [0, 0, 1, 1], [], []>} : vector<110x14xbf16>, vector<14x384xbf16>, vector<110x384xf32> -> vector<110x384xf32>
    %7 = vector.extract_strided_slice %1 {offsets = [1, 0], sizes = [110, 14], strides = [1, 1]} : vector<112x14xf32> to vector<110x14xf32>
    %c1 = arith.constant 1 : index
    %c0_5 = arith.constant 0 : index
    %c0_6 = arith.constant 0 : index
    %8 = vector.load %arg3[%c1, %c0_5, %c0_6] : memref<3x14x384xbf16, #tpu.memory_space<vmem>>, vector<1x14x384xbf16>
    %9 = vector.shape_cast %8 : vector<1x14x384xbf16> to vector<14x384xbf16>
    %10 = arith.truncf %7 : vector<110x14xf32> to vector<110x14xbf16>
    %cst_7 = arith.constant dense<0.000000e+00> : vector<110x384xf32>
    %11 = tpu.matmul %10, %9, %cst_7 {dimension_numbers = #tpu.dot_dimension_numbers<[1], [0], [0], [1], [0, 0, 1, 1], [], []>} : vector<110x14xbf16>, vector<14x384xbf16>, vector<110x384xf32> -> vector<110x384xf32>
    %12 = arith.addf %6, %11 : vector<110x384xf32>
    %13 = vector.extract_strided_slice %1 {offsets = [2, 0], sizes = [110, 14], strides = [1, 1]} : vector<112x14xf32> to vector<110x14xf32>
    %c2 = arith.constant 2 : index
    %c0_8 = arith.constant 0 : index
    %c0_9 = arith.constant 0 : index
    %14 = vector.load %arg3[%c2, %c0_8, %c0_9] : memref<3x14x384xbf16, #tpu.memory_space<vmem>>, vector<1x14x384xbf16>
    %15 = vector.shape_cast %14 : vector<1x14x384xbf16> to vector<14x384xbf16>
    %16 = arith.truncf %13 : vector<110x14xf32> to vector<110x14xbf16>
    %cst_10 = arith.constant dense<0.000000e+00> : vector<110x384xf32>
    %17 = tpu.matmul %16, %15, %cst_10 {dimension_numbers = #tpu.dot_dimension_numbers<[1], [0], [0], [1], [0, 0, 1, 1], [], []>} : vector<110x14xbf16>, vector<14x384xbf16>, vector<110x384xf32> -> vector<110x384xf32>
    %18 = arith.addf %12, %17 : vector<110x384xf32>
    %c0_11 = arith.constant 0 : index
    %c0_12 = arith.constant 0 : index
    %19 = vector.load %arg4[%c0_11, %c0_12] : memref<1x384xf32, #tpu.memory_space<vmem>>, vector<1x384xf32>
    %20 = vector.broadcast %19 : vector<1x384xf32> to vector<110x384xf32>
    %21 = arith.addf %18, %20 : vector<110x384xf32>
    %cst_13 = arith.constant 0.000000e+00 : f32
    %22 = vector.broadcast %cst_13 : f32 to vector<110x384xf32>
    %23 = arith.maximumf %21, %22 : vector<110x384xf32>
    %c0_14 = arith.constant 0 : index
    %c0_15 = arith.constant 0 : index
    %c0_16 = arith.constant 0 : index
    %24 = vector.load %arg5[%c0_14, %c0_15, %c0_16] : memref<2x384x192xf32, #tpu.memory_space<vmem>>, vector<1x384x192xf32>
    %25 = vector.shape_cast %24 : vector<1x384x192xf32> to vector<384x192xf32>
    %cst_17 = arith.constant dense<0.000000e+00> : vector<110x192xf32>
    %26 = tpu.matmul %23, %25, %cst_17 {dimension_numbers = #tpu.dot_dimension_numbers<[1], [0], [0], [1], [0, 0, 1, 1], [], []>} : vector<110x384xf32>, vector<384x192xf32>, vector<110x192xf32> -> vector<110x192xf32>
    %c1_18 = arith.constant 1 : index
    %c0_19 = arith.constant 0 : index
    %c0_20 = arith.constant 0 : index
    %27 = vector.load %arg5[%c1_18, %c0_19, %c0_20] : memref<2x384x192xf32, #tpu.memory_space<vmem>>, vector<1x384x192xf32>
    %28 = vector.shape_cast %27 : vector<1x384x192xf32> to vector<384x192xf32>
    %cst_21 = arith.constant dense<0.000000e+00> : vector<110x192xf32>
    %29 = tpu.matmul %23, %28, %cst_21 {dimension_numbers = #tpu.dot_dimension_numbers<[1], [0], [0], [1], [0, 0, 1, 1], [], []>} : vector<110x384xf32>, vector<384x192xf32>, vector<110x192xf32> -> vector<110x192xf32>
    %30 = arith.maximumf %26, %29 : vector<110x192xf32>
    %c0_22 = arith.constant 0 : index
    %c0_23 = arith.constant 0 : index
    %c0_24 = arith.constant 0 : index
    %31 = vector.load %arg6[%c0_22, %c0_23, %c0_24] : memref<2x48x110xf32, #tpu.memory_space<vmem>>, vector<1x48x110xf32>
    %32 = vector.shape_cast %31 : vector<1x48x110xf32> to vector<48x110xf32>
    %cst_25 = arith.constant dense<0.000000e+00> : vector<48x192xf32>
    %33 = tpu.matmul %32, %30, %cst_25 {dimension_numbers = #tpu.dot_dimension_numbers<[1], [0], [0], [1], [0, 0, 1, 1], [], []>} : vector<48x110xf32>, vector<110x192xf32>, vector<48x192xf32> -> vector<48x192xf32>
    %c1_26 = arith.constant 1 : index
    %c0_27 = arith.constant 0 : index
    %c0_28 = arith.constant 0 : index
    %34 = vector.load %arg6[%c1_26, %c0_27, %c0_28] : memref<2x48x110xf32, #tpu.memory_space<vmem>>, vector<1x48x110xf32>
    %35 = vector.shape_cast %34 : vector<1x48x110xf32> to vector<48x110xf32>
    %cst_29 = arith.constant dense<0.000000e+00> : vector<48x192xf32>
    %36 = tpu.matmul %35, %30, %cst_29 {dimension_numbers = #tpu.dot_dimension_numbers<[1], [0], [0], [1], [0, 0, 1, 1], [], []>} : vector<48x110xf32>, vector<110x192xf32>, vector<48x192xf32> -> vector<48x192xf32>
    %37 = arith.maximumf %33, %36 : vector<48x192xf32>
    %c0_30 = arith.constant 0 : index
    %c0_31 = arith.constant 0 : index
    %38 = vector.load %arg7[%c0_30, %c0_31] : memref<2x192xf32, #tpu.memory_space<vmem>>, vector<2x192xf32>
    %39 = vector.extract_strided_slice %38 {offsets = [0, 0], sizes = [1, 192], strides = [1, 1]} : vector<2x192xf32> to vector<1x192xf32>
    %40 = vector.broadcast %39 : vector<1x192xf32> to vector<48x192xf32>
    %41 = arith.mulf %37, %40 : vector<48x192xf32>
    %42 = vector.extract_strided_slice %38 {offsets = [1, 0], sizes = [1, 192], strides = [1, 1]} : vector<2x192xf32> to vector<1x192xf32>
    %43 = vector.broadcast %42 : vector<1x192xf32> to vector<48x192xf32>
    %44 = arith.addf %41, %43 : vector<48x192xf32>
    %45 = vector.extract_strided_slice %44 {offsets = [0, 0], sizes = [46, 192], strides = [1, 1]} : vector<48x192xf32> to vector<46x192xf32>
    %c0_32 = arith.constant 0 : index
    %c0_33 = arith.constant 0 : index
    %c0_34 = arith.constant 0 : index
    %46 = vector.load %arg8[%c0_32, %c0_33, %c0_34] : memref<3x192x256xbf16, #tpu.memory_space<vmem>>, vector<1x192x256xbf16>
    %47 = vector.shape_cast %46 : vector<1x192x256xbf16> to vector<192x256xbf16>
    %48 = arith.truncf %45 : vector<46x192xf32> to vector<46x192xbf16>
    %cst_35 = arith.constant dense<0.000000e+00> : vector<46x256xf32>
    %49 = tpu.matmul %48, %47, %cst_35 {dimension_numbers = #tpu.dot_dimension_numbers<[1], [0], [0], [1], [0, 0, 1, 1], [], []>} : vector<46x192xbf16>, vector<192x256xbf16>, vector<46x256xf32> -> vector<46x256xf32>
    %50 = vector.extract_strided_slice %44 {offsets = [1, 0], sizes = [46, 192], strides = [1, 1]} : vector<48x192xf32> to vector<46x192xf32>
    %c1_36 = arith.constant 1 : index
    %c0_37 = arith.constant 0 : index
    %c0_38 = arith.constant 0 : index
    %51 = vector.load %arg8[%c1_36, %c0_37, %c0_38] : memref<3x192x256xbf16, #tpu.memory_space<vmem>>, vector<1x192x256xbf16>
    %52 = vector.shape_cast %51 : vector<1x192x256xbf16> to vector<192x256xbf16>
    %53 = arith.truncf %50 : vector<46x192xf32> to vector<46x192xbf16>
    %cst_39 = arith.constant dense<0.000000e+00> : vector<46x256xf32>
    %54 = tpu.matmul %53, %52, %cst_39 {dimension_numbers = #tpu.dot_dimension_numbers<[1], [0], [0], [1], [0, 0, 1, 1], [], []>} : vector<46x192xbf16>, vector<192x256xbf16>, vector<46x256xf32> -> vector<46x256xf32>
    %55 = arith.addf %49, %54 : vector<46x256xf32>
    %56 = vector.extract_strided_slice %44 {offsets = [2, 0], sizes = [46, 192], strides = [1, 1]} : vector<48x192xf32> to vector<46x192xf32>
    %c2_40 = arith.constant 2 : index
    %c0_41 = arith.constant 0 : index
    %c0_42 = arith.constant 0 : index
    %57 = vector.load %arg8[%c2_40, %c0_41, %c0_42] : memref<3x192x256xbf16, #tpu.memory_space<vmem>>, vector<1x192x256xbf16>
    %58 = vector.shape_cast %57 : vector<1x192x256xbf16> to vector<192x256xbf16>
    %59 = arith.truncf %56 : vector<46x192xf32> to vector<46x192xbf16>
    %cst_43 = arith.constant dense<0.000000e+00> : vector<46x256xf32>
    %60 = tpu.matmul %59, %58, %cst_43 {dimension_numbers = #tpu.dot_dimension_numbers<[1], [0], [0], [1], [0, 0, 1, 1], [], []>} : vector<46x192xbf16>, vector<192x256xbf16>, vector<46x256xf32> -> vector<46x256xf32>
    %61 = arith.addf %55, %60 : vector<46x256xf32>
    %c0_44 = arith.constant 0 : index
    %c0_45 = arith.constant 0 : index
    %62 = vector.load %arg9[%c0_44, %c0_45] : memref<1x256xf32, #tpu.memory_space<vmem>>, vector<1x256xf32>
    %63 = vector.broadcast %62 : vector<1x256xf32> to vector<46x256xf32>
    %64 = arith.addf %61, %63 : vector<46x256xf32>
    %cst_46 = arith.constant 0.000000e+00 : f32
    %65 = vector.broadcast %cst_46 : f32 to vector<46x256xf32>
    %66 = arith.maximumf %64, %65 : vector<46x256xf32>
    %c0_47 = arith.constant 0 : index
    %c0_48 = arith.constant 0 : index
    %c0_49 = arith.constant 0 : index
    %67 = vector.load %arg10[%c0_47, %c0_48, %c0_49] : memref<2x256x128xf32, #tpu.memory_space<vmem>>, vector<1x256x128xf32>
    %68 = vector.shape_cast %67 : vector<1x256x128xf32> to vector<256x128xf32>
    %cst_50 = arith.constant dense<0.000000e+00> : vector<46x128xf32>
    %69 = tpu.matmul %66, %68, %cst_50 {dimension_numbers = #tpu.dot_dimension_numbers<[1], [0], [0], [1], [0, 0, 1, 1], [], []>} : vector<46x256xf32>, vector<256x128xf32>, vector<46x128xf32> -> vector<46x128xf32>
    %c1_51 = arith.constant 1 : index
    %c0_52 = arith.constant 0 : index
    %c0_53 = arith.constant 0 : index
    %70 = vector.load %arg10[%c1_51, %c0_52, %c0_53] : memref<2x256x128xf32, #tpu.memory_space<vmem>>, vector<1x256x128xf32>
    %71 = vector.shape_cast %70 : vector<1x256x128xf32> to vector<256x128xf32>
    %cst_54 = arith.constant dense<0.000000e+00> : vector<46x128xf32>
    %72 = tpu.matmul %66, %71, %cst_54 {dimension_numbers = #tpu.dot_dimension_numbers<[1], [0], [0], [1], [0, 0, 1, 1], [], []>} : vector<46x256xf32>, vector<256x128xf32>, vector<46x128xf32> -> vector<46x128xf32>
    %73 = arith.maximumf %69, %72 : vector<46x128xf32>
    %c0_55 = arith.constant 0 : index
    %c0_56 = arith.constant 0 : index
    %c0_57 = arith.constant 0 : index
    %74 = vector.load %arg11[%c0_55, %c0_56, %c0_57] : memref<2x16x46xf32, #tpu.memory_space<vmem>>, vector<1x16x46xf32>
    %75 = vector.shape_cast %74 : vector<1x16x46xf32> to vector<16x46xf32>
    %cst_58 = arith.constant dense<0.000000e+00> : vector<16x128xf32>
    %76 = tpu.matmul %75, %73, %cst_58 {dimension_numbers = #tpu.dot_dimension_numbers<[1], [0], [0], [1], [0, 0, 1, 1], [], []>} : vector<16x46xf32>, vector<46x128xf32>, vector<16x128xf32> -> vector<16x128xf32>
    %c1_59 = arith.constant 1 : index
    %c0_60 = arith.constant 0 : index
    %c0_61 = arith.constant 0 : index
    %77 = vector.load %arg11[%c1_59, %c0_60, %c0_61] : memref<2x16x46xf32, #tpu.memory_space<vmem>>, vector<1x16x46xf32>
    %78 = vector.shape_cast %77 : vector<1x16x46xf32> to vector<16x46xf32>
    %cst_62 = arith.constant dense<0.000000e+00> : vector<16x128xf32>
    %79 = tpu.matmul %78, %73, %cst_62 {dimension_numbers = #tpu.dot_dimension_numbers<[1], [0], [0], [1], [0, 0, 1, 1], [], []>} : vector<16x46xf32>, vector<46x128xf32>, vector<16x128xf32> -> vector<16x128xf32>
    %80 = arith.maximumf %76, %79 : vector<16x128xf32>
    %c0_63 = arith.constant 0 : index
    %c0_64 = arith.constant 0 : index
    %81 = vector.load %arg12[%c0_63, %c0_64] : memref<2x128xf32, #tpu.memory_space<vmem>>, vector<2x128xf32>
    %82 = vector.extract_strided_slice %81 {offsets = [0, 0], sizes = [1, 128], strides = [1, 1]} : vector<2x128xf32> to vector<1x128xf32>
    %83 = vector.broadcast %82 : vector<1x128xf32> to vector<16x128xf32>
    %84 = arith.mulf %80, %83 : vector<16x128xf32>
    %85 = vector.extract_strided_slice %81 {offsets = [1, 0], sizes = [1, 128], strides = [1, 1]} : vector<2x128xf32> to vector<1x128xf32>
    %86 = vector.broadcast %85 : vector<1x128xf32> to vector<16x128xf32>
    %87 = arith.addf %84, %86 : vector<16x128xf32>
    %c0_65 = arith.constant 0 : index
    %c0_66 = arith.constant 0 : index
    %c0_67 = arith.constant 0 : index
    %88 = vector.load %arg13[%c0_65, %c0_66, %c0_67] : memref<2x8x16xf32, #tpu.memory_space<vmem>>, vector<1x8x16xf32>
    %89 = vector.shape_cast %88 : vector<1x8x16xf32> to vector<8x16xf32>
    %cst_68 = arith.constant dense<0.000000e+00> : vector<8x128xf32>
    %90 = tpu.matmul %89, %87, %cst_68 {dimension_numbers = #tpu.dot_dimension_numbers<[1], [0], [0], [1], [0, 0, 1, 1], [], []>} : vector<8x16xf32>, vector<16x128xf32>, vector<8x128xf32> -> vector<8x128xf32>
    %c0_69 = arith.constant 0 : index
    %c0_70 = arith.constant 0 : index
    %c0_71 = arith.constant 0 : index
    %91 = vector.load %arg14[%c0_69, %c0_70, %c0_71] : memref<2x128x128xbf16, #tpu.memory_space<vmem>>, vector<1x128x128xbf16>
    %92 = vector.shape_cast %91 : vector<1x128x128xbf16> to vector<128x128xbf16>
    %93 = arith.truncf %90 : vector<8x128xf32> to vector<8x128xbf16>
    %cst_72 = arith.constant dense<0.000000e+00> : vector<8x128xf32>
    %94 = tpu.matmul %93, %92, %cst_72 {dimension_numbers = #tpu.dot_dimension_numbers<[1], [0], [0], [1], [0, 0, 1, 1], [], []>} : vector<8x128xbf16>, vector<128x128xbf16>, vector<8x128xf32> -> vector<8x128xf32>
    %c1_73 = arith.constant 1 : index
    %c0_74 = arith.constant 0 : index
    %c0_75 = arith.constant 0 : index
    %95 = vector.load %arg13[%c1_73, %c0_74, %c0_75] : memref<2x8x16xf32, #tpu.memory_space<vmem>>, vector<1x8x16xf32>
    %96 = vector.shape_cast %95 : vector<1x8x16xf32> to vector<8x16xf32>
    %cst_76 = arith.constant dense<0.000000e+00> : vector<8x128xf32>
    %97 = tpu.matmul %96, %87, %cst_76 {dimension_numbers = #tpu.dot_dimension_numbers<[1], [0], [0], [1], [0, 0, 1, 1], [], []>} : vector<8x16xf32>, vector<16x128xf32>, vector<8x128xf32> -> vector<8x128xf32>
    %c1_77 = arith.constant 1 : index
    %c0_78 = arith.constant 0 : index
    %c0_79 = arith.constant 0 : index
    %98 = vector.load %arg14[%c1_77, %c0_78, %c0_79] : memref<2x128x128xbf16, #tpu.memory_space<vmem>>, vector<1x128x128xbf16>
    %99 = vector.shape_cast %98 : vector<1x128x128xbf16> to vector<128x128xbf16>
    %100 = arith.truncf %97 : vector<8x128xf32> to vector<8x128xbf16>
    %cst_80 = arith.constant dense<0.000000e+00> : vector<8x128xf32>
    %101 = tpu.matmul %100, %99, %cst_80 {dimension_numbers = #tpu.dot_dimension_numbers<[1], [0], [0], [1], [0, 0, 1, 1], [], []>} : vector<8x128xbf16>, vector<128x128xbf16>, vector<8x128xf32> -> vector<8x128xf32>
    %102 = arith.addf %94, %101 : vector<8x128xf32>
    %c0_81 = arith.constant 0 : index
    %c0_82 = arith.constant 0 : index
    %103 = vector.load %arg15[%c0_81, %c0_82] : memref<1x128xf32, #tpu.memory_space<vmem>>, vector<1x128xf32>
    %104 = vector.broadcast %103 : vector<1x128xf32> to vector<8x128xf32>
    %105 = arith.addf %102, %104 : vector<8x128xf32>
    %cst_83 = arith.constant 0.000000e+00 : f32
    %106 = vector.broadcast %cst_83 : f32 to vector<8x128xf32>
    %107 = arith.maximumf %105, %106 : vector<8x128xf32>
    %c0_84 = arith.constant 0 : index
    %c0_85 = arith.constant 0 : index
    %108 = vector.load %arg16[%c0_84, %c0_85] : memref<2x128xf32, #tpu.memory_space<vmem>>, vector<2x128xf32>
    %109 = vector.extract_strided_slice %108 {offsets = [0, 0], sizes = [1, 128], strides = [1, 1]} : vector<2x128xf32> to vector<1x128xf32>
    %110 = vector.broadcast %109 : vector<1x128xf32> to vector<8x128xf32>
    %111 = arith.mulf %107, %110 : vector<8x128xf32>
    %112 = vector.extract_strided_slice %108 {offsets = [1, 0], sizes = [1, 128], strides = [1, 1]} : vector<2x128xf32> to vector<1x128xf32>
    %113 = vector.broadcast %112 : vector<1x128xf32> to vector<8x128xf32>
    %114 = arith.addf %111, %113 : vector<8x128xf32>
    %c0_86 = arith.constant 0 : index
    %c0_87 = arith.constant 0 : index
    %115 = vector.load %arg17[%c0_86, %c0_87] : memref<128x64xbf16, #tpu.memory_space<vmem>>, vector<128x64xbf16>
    %116 = arith.truncf %114 : vector<8x128xf32> to vector<8x128xbf16>
    %cst_88 = arith.constant dense<0.000000e+00> : vector<8x64xf32>
    %117 = tpu.matmul %116, %115, %cst_88 {dimension_numbers = #tpu.dot_dimension_numbers<[1], [0], [0], [1], [0, 0, 1, 1], [], []>} : vector<8x128xbf16>, vector<128x64xbf16>, vector<8x64xf32> -> vector<8x64xf32>
    %c0_89 = arith.constant 0 : index
    %c0_90 = arith.constant 0 : index
    %118 = vector.load %arg18[%c0_89, %c0_90] : memref<1x64xf32, #tpu.memory_space<vmem>>, vector<1x64xf32>
    %119 = vector.broadcast %118 : vector<1x64xf32> to vector<8x64xf32>
    %120 = arith.addf %117, %119 : vector<8x64xf32>
    %cst_91 = arith.constant 0.000000e+00 : f32
    %121 = vector.broadcast %cst_91 : f32 to vector<8x64xf32>
    %122 = arith.maximumf %120, %121 : vector<8x64xf32>
    %c0_92 = arith.constant 0 : index
    %c0_93 = arith.constant 0 : index
    %123 = vector.load %arg19[%c0_92, %c0_93] : memref<2x64xf32, #tpu.memory_space<vmem>>, vector<2x64xf32>
    %124 = vector.extract_strided_slice %123 {offsets = [0, 0], sizes = [1, 64], strides = [1, 1]} : vector<2x64xf32> to vector<1x64xf32>
    %125 = vector.broadcast %124 : vector<1x64xf32> to vector<8x64xf32>
    %126 = arith.mulf %122, %125 : vector<8x64xf32>
    %127 = vector.extract_strided_slice %123 {offsets = [1, 0], sizes = [1, 64], strides = [1, 1]} : vector<2x64xf32> to vector<1x64xf32>
    %128 = vector.broadcast %127 : vector<1x64xf32> to vector<8x64xf32>
    %129 = arith.addf %126, %128 : vector<8x64xf32>
    %c0_94 = arith.constant 0 : index
    %c0_95 = arith.constant 0 : index
    %c0_96 = arith.constant 0 : index
    %130 = vector.load %arg2[%c0_94, %c0_95, %c0_96] : memref<1x56x28xf32, #tpu.memory_space<vmem>>, vector<1x56x28xf32>
    %131 = vector.shape_cast %130 : vector<1x56x28xf32> to vector<56x28xf32>
    %132 = vector.extract_strided_slice %131 {offsets = [0, 0], sizes = [54, 28], strides = [1, 1]} : vector<56x28xf32> to vector<54x28xf32>
    %c0_97 = arith.constant 0 : index
    %c0_98 = arith.constant 0 : index
    %c0_99 = arith.constant 0 : index
    %133 = vector.load %arg20[%c0_97, %c0_98, %c0_99] : memref<3x28x192xbf16, #tpu.memory_space<vmem>>, vector<1x28x192xbf16>
    %134 = vector.shape_cast %133 : vector<1x28x192xbf16> to vector<28x192xbf16>
    %135 = arith.truncf %132 : vector<54x28xf32> to vector<54x28xbf16>
    %cst_100 = arith.constant dense<0.000000e+00> : vector<54x192xf32>
    %136 = tpu.matmul %135, %134, %cst_100 {dimension_numbers = #tpu.dot_dimension_numbers<[1], [0], [0], [1], [0, 0, 1, 1], [], []>} : vector<54x28xbf16>, vector<28x192xbf16>, vector<54x192xf32> -> vector<54x192xf32>
    %137 = vector.extract_strided_slice %131 {offsets = [1, 0], sizes = [54, 28], strides = [1, 1]} : vector<56x28xf32> to vector<54x28xf32>
    %c1_101 = arith.constant 1 : index
    %c0_102 = arith.constant 0 : index
    %c0_103 = arith.constant 0 : index
    %138 = vector.load %arg20[%c1_101, %c0_102, %c0_103] : memref<3x28x192xbf16, #tpu.memory_space<vmem>>, vector<1x28x192xbf16>
    %139 = vector.shape_cast %138 : vector<1x28x192xbf16> to vector<28x192xbf16>
    %140 = arith.truncf %137 : vector<54x28xf32> to vector<54x28xbf16>
    %cst_104 = arith.constant dense<0.000000e+00> : vector<54x192xf32>
    %141 = tpu.matmul %140, %139, %cst_104 {dimension_numbers = #tpu.dot_dimension_numbers<[1], [0], [0], [1], [0, 0, 1, 1], [], []>} : vector<54x28xbf16>, vector<28x192xbf16>, vector<54x192xf32> -> vector<54x192xf32>
    %142 = arith.addf %136, %141 : vector<54x192xf32>
    %143 = vector.extract_strided_slice %131 {offsets = [2, 0], sizes = [54, 28], strides = [1, 1]} : vector<56x28xf32> to vector<54x28xf32>
    %c2_105 = arith.constant 2 : index
    %c0_106 = arith.constant 0 : index
    %c0_107 = arith.constant 0 : index
    %144 = vector.load %arg20[%c2_105, %c0_106, %c0_107] : memref<3x28x192xbf16, #tpu.memory_space<vmem>>, vector<1x28x192xbf16>
    %145 = vector.shape_cast %144 : vector<1x28x192xbf16> to vector<28x192xbf16>
    %146 = arith.truncf %143 : vector<54x28xf32> to vector<54x28xbf16>
    %cst_108 = arith.constant dense<0.000000e+00> : vector<54x192xf32>
    %147 = tpu.matmul %146, %145, %cst_108 {dimension_numbers = #tpu.dot_dimension_numbers<[1], [0], [0], [1], [0, 0, 1, 1], [], []>} : vector<54x28xbf16>, vector<28x192xbf16>, vector<54x192xf32> -> vector<54x192xf32>
    %148 = arith.addf %142, %147 : vector<54x192xf32>
    %c0_109 = arith.constant 0 : index
    %c0_110 = arith.constant 0 : index
    %149 = vector.load %arg21[%c0_109, %c0_110] : memref<1x192xf32, #tpu.memory_space<vmem>>, vector<1x192xf32>
    %150 = vector.broadcast %149 : vector<1x192xf32> to vector<54x192xf32>
    %151 = arith.addf %148, %150 : vector<54x192xf32>
    %c0_111 = arith.constant 0 : index
    %c0_112 = arith.constant 0 : index
    %c0_113 = arith.constant 0 : index
    %152 = vector.load %arg22[%c0_111, %c0_112, %c0_113] : memref<2x192x96xf32, #tpu.memory_space<vmem>>, vector<1x192x96xf32>
    %153 = vector.shape_cast %152 : vector<1x192x96xf32> to vector<192x96xf32>
    %cst_114 = arith.constant dense<0.000000e+00> : vector<54x96xf32>
    %154 = tpu.matmul %151, %153, %cst_114 {dimension_numbers = #tpu.dot_dimension_numbers<[1], [0], [0], [1], [0, 0, 1, 1], [], []>} : vector<54x192xf32>, vector<192x96xf32>, vector<54x96xf32> -> vector<54x96xf32>
    %c1_115 = arith.constant 1 : index
    %c0_116 = arith.constant 0 : index
    %c0_117 = arith.constant 0 : index
    %155 = vector.load %arg22[%c1_115, %c0_116, %c0_117] : memref<2x192x96xf32, #tpu.memory_space<vmem>>, vector<1x192x96xf32>
    %156 = vector.shape_cast %155 : vector<1x192x96xf32> to vector<192x96xf32>
    %cst_118 = arith.constant dense<0.000000e+00> : vector<54x96xf32>
    %157 = tpu.matmul %151, %156, %cst_118 {dimension_numbers = #tpu.dot_dimension_numbers<[1], [0], [0], [1], [0, 0, 1, 1], [], []>} : vector<54x192xf32>, vector<192x96xf32>, vector<54x96xf32> -> vector<54x96xf32>
    %158 = arith.maximumf %154, %157 : vector<54x96xf32>
    %c0_119 = arith.constant 0 : index
    %c0_120 = arith.constant 0 : index
    %c0_121 = arith.constant 0 : index
    %159 = vector.load %arg23[%c0_119, %c0_120, %c0_121] : memref<2x24x54xf32, #tpu.memory_space<vmem>>, vector<1x24x54xf32>
    %160 = vector.shape_cast %159 : vector<1x24x54xf32> to vector<24x54xf32>
    %cst_122 = arith.constant dense<0.000000e+00> : vector<24x96xf32>
    %161 = tpu.matmul %160, %158, %cst_122 {dimension_numbers = #tpu.dot_dimension_numbers<[1], [0], [0], [1], [0, 0, 1, 1], [], []>} : vector<24x54xf32>, vector<54x96xf32>, vector<24x96xf32> -> vector<24x96xf32>
    %c1_123 = arith.constant 1 : index
    %c0_124 = arith.constant 0 : index
    %c0_125 = arith.constant 0 : index
    %162 = vector.load %arg23[%c1_123, %c0_124, %c0_125] : memref<2x24x54xf32, #tpu.memory_space<vmem>>, vector<1x24x54xf32>
    %163 = vector.shape_cast %162 : vector<1x24x54xf32> to vector<24x54xf32>
    %cst_126 = arith.constant dense<0.000000e+00> : vector<24x96xf32>
    %164 = tpu.matmul %163, %158, %cst_126 {dimension_numbers = #tpu.dot_dimension_numbers<[1], [0], [0], [1], [0, 0, 1, 1], [], []>} : vector<24x54xf32>, vector<54x96xf32>, vector<24x96xf32> -> vector<24x96xf32>
    %165 = arith.maximumf %161, %164 : vector<24x96xf32>
    %cst_127 = arith.constant 0.000000e+00 : f32
    %166 = vector.broadcast %cst_127 : f32 to vector<24x96xf32>
    %167 = arith.maximumf %165, %166 : vector<24x96xf32>
    %c0_128 = arith.constant 0 : index
    %c0_129 = arith.constant 0 : index
    %168 = vector.load %arg24[%c0_128, %c0_129] : memref<2x96xf32, #tpu.memory_space<vmem>>, vector<2x96xf32>
    %169 = vector.extract_strided_slice %168 {offsets = [0, 0], sizes = [1, 96], strides = [1, 1]} : vector<2x96xf32> to vector<1x96xf32>
    %170 = vector.broadcast %169 : vector<1x96xf32> to vector<24x96xf32>
    %171 = arith.mulf %167, %170 : vector<24x96xf32>
    %172 = vector.extract_strided_slice %168 {offsets = [1, 0], sizes = [1, 96], strides = [1, 1]} : vector<2x96xf32> to vector<1x96xf32>
    %173 = vector.broadcast %172 : vector<1x96xf32> to vector<24x96xf32>
    %174 = arith.addf %171, %173 : vector<24x96xf32>
    %175 = vector.extract_strided_slice %174 {offsets = [0, 0], sizes = [22, 96], strides = [1, 1]} : vector<24x96xf32> to vector<22x96xf32>
    %c0_130 = arith.constant 0 : index
    %c0_131 = arith.constant 0 : index
    %c0_132 = arith.constant 0 : index
    %176 = vector.load %arg25[%c0_130, %c0_131, %c0_132] : memref<3x96x128xbf16, #tpu.memory_space<vmem>>, vector<1x96x128xbf16>
    %177 = vector.shape_cast %176 : vector<1x96x128xbf16> to vector<96x128xbf16>
    %178 = arith.truncf %175 : vector<22x96xf32> to vector<22x96xbf16>
    %cst_133 = arith.constant dense<0.000000e+00> : vector<22x128xf32>
    %179 = tpu.matmul %178, %177, %cst_133 {dimension_numbers = #tpu.dot_dimension_numbers<[1], [0], [0], [1], [0, 0, 1, 1], [], []>} : vector<22x96xbf16>, vector<96x128xbf16>, vector<22x128xf32> -> vector<22x128xf32>
    %180 = vector.extract_strided_slice %174 {offsets = [1, 0], sizes = [22, 96], strides = [1, 1]} : vector<24x96xf32> to vector<22x96xf32>
    %c1_134 = arith.constant 1 : index
    %c0_135 = arith.constant 0 : index
    %c0_136 = arith.constant 0 : index
    %181 = vector.load %arg25[%c1_134, %c0_135, %c0_136] : memref<3x96x128xbf16, #tpu.memory_space<vmem>>, vector<1x96x128xbf16>
    %182 = vector.shape_cast %181 : vector<1x96x128xbf16> to vector<96x128xbf16>
    %183 = arith.truncf %180 : vector<22x96xf32> to vector<22x96xbf16>
    %cst_137 = arith.constant dense<0.000000e+00> : vector<22x128xf32>
    %184 = tpu.matmul %183, %182, %cst_137 {dimension_numbers = #tpu.dot_dimension_numbers<[1], [0], [0], [1], [0, 0, 1, 1], [], []>} : vector<22x96xbf16>, vector<96x128xbf16>, vector<22x128xf32> -> vector<22x128xf32>
    %185 = arith.addf %179, %184 : vector<22x128xf32>
    %186 = vector.extract_strided_slice %174 {offsets = [2, 0], sizes = [22, 96], strides = [1, 1]} : vector<24x96xf32> to vector<22x96xf32>
    %c2_138 = arith.constant 2 : index
    %c0_139 = arith.constant 0 : index
    %c0_140 = arith.constant 0 : index
    %187 = vector.load %arg25[%c2_138, %c0_139, %c0_140] : memref<3x96x128xbf16, #tpu.memory_space<vmem>>, vector<1x96x128xbf16>
    %188 = vector.shape_cast %187 : vector<1x96x128xbf16> to vector<96x128xbf16>
    %189 = arith.truncf %186 : vector<22x96xf32> to vector<22x96xbf16>
    %cst_141 = arith.constant dense<0.000000e+00> : vector<22x128xf32>
    %190 = tpu.matmul %189, %188, %cst_141 {dimension_numbers = #tpu.dot_dimension_numbers<[1], [0], [0], [1], [0, 0, 1, 1], [], []>} : vector<22x96xbf16>, vector<96x128xbf16>, vector<22x128xf32> -> vector<22x128xf32>
    %191 = arith.addf %185, %190 : vector<22x128xf32>
    %c0_142 = arith.constant 0 : index
    %c0_143 = arith.constant 0 : index
    %192 = vector.load %arg26[%c0_142, %c0_143] : memref<1x128xf32, #tpu.memory_space<vmem>>, vector<1x128xf32>
    %193 = vector.broadcast %192 : vector<1x128xf32> to vector<22x128xf32>
    %194 = arith.addf %191, %193 : vector<22x128xf32>
    %c0_144 = arith.constant 0 : index
    %c0_145 = arith.constant 0 : index
    %c0_146 = arith.constant 0 : index
    %195 = vector.load %arg27[%c0_144, %c0_145, %c0_146] : memref<2x128x64xf32, #tpu.memory_space<vmem>>, vector<1x128x64xf32>
    %196 = vector.shape_cast %195 : vector<1x128x64xf32> to vector<128x64xf32>
    %cst_147 = arith.constant dense<0.000000e+00> : vector<22x64xf32>
    %197 = tpu.matmul %194, %196, %cst_147 {dimension_numbers = #tpu.dot_dimension_numbers<[1], [0], [0], [1], [0, 0, 1, 1], [], []>} : vector<22x128xf32>, vector<128x64xf32>, vector<22x64xf32> -> vector<22x64xf32>
    %c1_148 = arith.constant 1 : index
    %c0_149 = arith.constant 0 : index
    %c0_150 = arith.constant 0 : index
    %198 = vector.load %arg27[%c1_148, %c0_149, %c0_150] : memref<2x128x64xf32, #tpu.memory_space<vmem>>, vector<1x128x64xf32>
    %199 = vector.shape_cast %198 : vector<1x128x64xf32> to vector<128x64xf32>
    %cst_151 = arith.constant dense<0.000000e+00> : vector<22x64xf32>
    %200 = tpu.matmul %194, %199, %cst_151 {dimension_numbers = #tpu.dot_dimension_numbers<[1], [0], [0], [1], [0, 0, 1, 1], [], []>} : vector<22x128xf32>, vector<128x64xf32>, vector<22x64xf32> -> vector<22x64xf32>
    %201 = arith.maximumf %197, %200 : vector<22x64xf32>
    %c0_152 = arith.constant 0 : index
    %c0_153 = arith.constant 0 : index
    %c0_154 = arith.constant 0 : index
    %202 = vector.load %arg28[%c0_152, %c0_153, %c0_154] : memref<2x8x22xf32, #tpu.memory_space<vmem>>, vector<1x8x22xf32>
    %203 = vector.shape_cast %202 : vector<1x8x22xf32> to vector<8x22xf32>
    %cst_155 = arith.constant dense<0.000000e+00> : vector<8x64xf32>
    %204 = tpu.matmul %203, %201, %cst_155 {dimension_numbers = #tpu.dot_dimension_numbers<[1], [0], [0], [1], [0, 0, 1, 1], [], []>} : vector<8x22xf32>, vector<22x64xf32>, vector<8x64xf32> -> vector<8x64xf32>
    %c1_156 = arith.constant 1 : index
    %c0_157 = arith.constant 0 : index
    %c0_158 = arith.constant 0 : index
    %205 = vector.load %arg28[%c1_156, %c0_157, %c0_158] : memref<2x8x22xf32, #tpu.memory_space<vmem>>, vector<1x8x22xf32>
    %206 = vector.shape_cast %205 : vector<1x8x22xf32> to vector<8x22xf32>
    %cst_159 = arith.constant dense<0.000000e+00> : vector<8x64xf32>
    %207 = tpu.matmul %206, %201, %cst_159 {dimension_numbers = #tpu.dot_dimension_numbers<[1], [0], [0], [1], [0, 0, 1, 1], [], []>} : vector<8x22xf32>, vector<22x64xf32>, vector<8x64xf32> -> vector<8x64xf32>
    %208 = arith.maximumf %204, %207 : vector<8x64xf32>
    %cst_160 = arith.constant 0.000000e+00 : f32
    %209 = vector.broadcast %cst_160 : f32 to vector<8x64xf32>
    %210 = arith.maximumf %208, %209 : vector<8x64xf32>
    %c0_161 = arith.constant 0 : index
    %c0_162 = arith.constant 0 : index
    %211 = vector.load %arg29[%c0_161, %c0_162] : memref<2x64xf32, #tpu.memory_space<vmem>>, vector<2x64xf32>
    %212 = vector.extract_strided_slice %211 {offsets = [0, 0], sizes = [1, 64], strides = [1, 1]} : vector<2x64xf32> to vector<1x64xf32>
    %213 = vector.broadcast %212 : vector<1x64xf32> to vector<8x64xf32>
    %214 = arith.mulf %210, %213 : vector<8x64xf32>
    %215 = vector.extract_strided_slice %211 {offsets = [1, 0], sizes = [1, 64], strides = [1, 1]} : vector<2x64xf32> to vector<1x64xf32>
    %216 = vector.broadcast %215 : vector<1x64xf32> to vector<8x64xf32>
    %217 = arith.addf %214, %216 : vector<8x64xf32>
    %c0_163 = arith.constant 0 : index
    %c0_164 = arith.constant 0 : index
    %c0_165 = arith.constant 0 : index
    %218 = vector.load %arg30[%c0_163, %c0_164, %c0_165] : memref<2x4x8xf32, #tpu.memory_space<vmem>>, vector<1x4x8xf32>
    %219 = vector.shape_cast %218 : vector<1x4x8xf32> to vector<4x8xf32>
    %cst_166 = arith.constant dense<0.000000e+00> : vector<4x64xf32>
    %220 = tpu.matmul %219, %129, %cst_166 {dimension_numbers = #tpu.dot_dimension_numbers<[1], [0], [0], [1], [0, 0, 1, 1], [], []>} : vector<4x8xf32>, vector<8x64xf32>, vector<4x64xf32> -> vector<4x64xf32>
    %c1_167 = arith.constant 1 : index
    %c0_168 = arith.constant 0 : index
    %c0_169 = arith.constant 0 : index
    %221 = vector.load %arg30[%c1_167, %c0_168, %c0_169] : memref<2x4x8xf32, #tpu.memory_space<vmem>>, vector<1x4x8xf32>
    %222 = vector.shape_cast %221 : vector<1x4x8xf32> to vector<4x8xf32>
    %cst_170 = arith.constant dense<0.000000e+00> : vector<4x64xf32>
    %223 = tpu.matmul %222, %129, %cst_170 {dimension_numbers = #tpu.dot_dimension_numbers<[1], [0], [0], [1], [0, 0, 1, 1], [], []>} : vector<4x8xf32>, vector<8x64xf32>, vector<4x64xf32> -> vector<4x64xf32>
    %c0_171 = arith.constant 0 : index
    %c0_172 = arith.constant 0 : index
    %c0_173 = arith.constant 0 : index
    %224 = vector.load %arg30[%c0_171, %c0_172, %c0_173] : memref<2x4x8xf32, #tpu.memory_space<vmem>>, vector<1x4x8xf32>
    %225 = vector.shape_cast %224 : vector<1x4x8xf32> to vector<4x8xf32>
    %cst_174 = arith.constant dense<0.000000e+00> : vector<4x64xf32>
    %226 = tpu.matmul %225, %217, %cst_174 {dimension_numbers = #tpu.dot_dimension_numbers<[1], [0], [0], [1], [0, 0, 1, 1], [], []>} : vector<4x8xf32>, vector<8x64xf32>, vector<4x64xf32> -> vector<4x64xf32>
    %c1_175 = arith.constant 1 : index
    %c0_176 = arith.constant 0 : index
    %c0_177 = arith.constant 0 : index
    %227 = vector.load %arg30[%c1_175, %c0_176, %c0_177] : memref<2x4x8xf32, #tpu.memory_space<vmem>>, vector<1x4x8xf32>
    %228 = vector.shape_cast %227 : vector<1x4x8xf32> to vector<4x8xf32>
    %cst_178 = arith.constant dense<0.000000e+00> : vector<4x64xf32>
    %229 = tpu.matmul %228, %217, %cst_178 {dimension_numbers = #tpu.dot_dimension_numbers<[1], [0], [0], [1], [0, 0, 1, 1], [], []>} : vector<4x8xf32>, vector<8x64xf32>, vector<4x64xf32> -> vector<4x64xf32>
    %c0_179 = arith.constant 0 : index
    %c0_180 = arith.constant 0 : index
    %c0_181 = arith.constant 0 : index
    %230 = vector.load %arg31[%c0_179, %c0_180, %c0_181] : memref<2x64x64xf32, #tpu.memory_space<vmem>>, vector<1x64x64xf32>
    %231 = vector.shape_cast %230 : vector<1x64x64xf32> to vector<64x64xf32>
    %cst_182 = arith.constant dense<0.000000e+00> : vector<4x64xf32>
    %232 = tpu.matmul %226, %231, %cst_182 {dimension_numbers = #tpu.dot_dimension_numbers<[1], [0], [0], [1], [0, 0, 1, 1], [], []>} : vector<4x64xf32>, vector<64x64xf32>, vector<4x64xf32> -> vector<4x64xf32>
    %c1_183 = arith.constant 1 : index
    %c0_184 = arith.constant 0 : index
    %c0_185 = arith.constant 0 : index
    %233 = vector.load %arg31[%c1_183, %c0_184, %c0_185] : memref<2x64x64xf32, #tpu.memory_space<vmem>>, vector<1x64x64xf32>
    %234 = vector.shape_cast %233 : vector<1x64x64xf32> to vector<64x64xf32>
    %cst_186 = arith.constant dense<0.000000e+00> : vector<4x64xf32>
    %235 = tpu.matmul %229, %234, %cst_186 {dimension_numbers = #tpu.dot_dimension_numbers<[1], [0], [0], [1], [0, 0, 1, 1], [], []>} : vector<4x64xf32>, vector<64x64xf32>, vector<4x64xf32> -> vector<4x64xf32>
    %236 = arith.addf %232, %235 : vector<4x64xf32>
    %c0_187 = arith.constant 0 : index
    %c0_188 = arith.constant 0 : index
    %c0_189 = arith.constant 0 : index
    %237 = vector.load %arg32[%c0_187, %c0_188, %c0_189] : memref<2x64x64xf32, #tpu.memory_space<vmem>>, vector<1x64x64xf32>
    %238 = vector.shape_cast %237 : vector<1x64x64xf32> to vector<64x64xf32>
    %cst_190 = arith.constant dense<0.000000e+00> : vector<4x64xf32>
    %239 = tpu.matmul %226, %238, %cst_190 {dimension_numbers = #tpu.dot_dimension_numbers<[1], [0], [0], [1], [0, 0, 1, 1], [], []>} : vector<4x64xf32>, vector<64x64xf32>, vector<4x64xf32> -> vector<4x64xf32>
    %c1_191 = arith.constant 1 : index
    %c0_192 = arith.constant 0 : index
    %c0_193 = arith.constant 0 : index
    %240 = vector.load %arg32[%c1_191, %c0_192, %c0_193] : memref<2x64x64xf32, #tpu.memory_space<vmem>>, vector<1x64x64xf32>
    %241 = vector.shape_cast %240 : vector<1x64x64xf32> to vector<64x64xf32>
    %cst_194 = arith.constant dense<0.000000e+00> : vector<4x64xf32>
    %242 = tpu.matmul %229, %241, %cst_194 {dimension_numbers = #tpu.dot_dimension_numbers<[1], [0], [0], [1], [0, 0, 1, 1], [], []>} : vector<4x64xf32>, vector<64x64xf32>, vector<4x64xf32> -> vector<4x64xf32>
    %243 = arith.addf %239, %242 : vector<4x64xf32>
    %244 = arith.addf %220, %236 : vector<4x64xf32>
    %245 = arith.addf %223, %243 : vector<4x64xf32>
    %c0_195 = arith.constant 0 : index
    %c0_196 = arith.constant 0 : index
    %246 = vector.load %arg33[%c0_195, %c0_196] : memref<64x32xf32, #tpu.memory_space<vmem>>, vector<64x32xf32>
    %cst_197 = arith.constant dense<0.000000e+00> : vector<4x32xf32>
    %247 = tpu.matmul %244, %246, %cst_197 {dimension_numbers = #tpu.dot_dimension_numbers<[1], [0], [0], [1], [0, 0, 1, 1], [], []>} : vector<4x64xf32>, vector<64x32xf32>, vector<4x32xf32> -> vector<4x32xf32>
    %c0_198 = arith.constant 0 : index
    %c0_199 = arith.constant 0 : index
    %248 = vector.load %arg34[%c0_198, %c0_199] : memref<1x32xf32, #tpu.memory_space<vmem>>, vector<1x32xf32>
    %249 = vector.broadcast %248 : vector<1x32xf32> to vector<4x32xf32>
    %250 = arith.addf %247, %249 : vector<4x32xf32>
    %cst_200 = arith.constant 0.000000e+00 : f32
    %251 = vector.broadcast %cst_200 : f32 to vector<4x32xf32>
    %252 = arith.maximumf %250, %251 : vector<4x32xf32>
    %c0_201 = arith.constant 0 : index
    %c0_202 = arith.constant 0 : index
    %253 = vector.load %arg35[%c0_201, %c0_202] : memref<2x32xf32, #tpu.memory_space<vmem>>, vector<2x32xf32>
    %254 = vector.extract_strided_slice %253 {offsets = [0, 0], sizes = [1, 32], strides = [1, 1]} : vector<2x32xf32> to vector<1x32xf32>
    %255 = vector.broadcast %254 : vector<1x32xf32> to vector<4x32xf32>
    %256 = arith.mulf %252, %255 : vector<4x32xf32>
    %257 = vector.extract_strided_slice %253 {offsets = [1, 0], sizes = [1, 32], strides = [1, 1]} : vector<2x32xf32> to vector<1x32xf32>
    %258 = vector.broadcast %257 : vector<1x32xf32> to vector<4x32xf32>
    %259 = arith.addf %256, %258 : vector<4x32xf32>
    %c0_203 = arith.constant 0 : index
    %c0_204 = arith.constant 0 : index
    %260 = vector.load %arg36[%c0_203, %c0_204] : memref<32x10xf32, #tpu.memory_space<vmem>>, vector<32x10xf32>
    %cst_205 = arith.constant dense<0.000000e+00> : vector<4x10xf32>
    %261 = tpu.matmul %259, %260, %cst_205 {dimension_numbers = #tpu.dot_dimension_numbers<[1], [0], [0], [1], [0, 0, 1, 1], [], []>} : vector<4x32xf32>, vector<32x10xf32>, vector<4x10xf32> -> vector<4x10xf32>
    %c0_206 = arith.constant 0 : index
    %c0_207 = arith.constant 0 : index
    %262 = vector.load %arg37[%c0_206, %c0_207] : memref<1x10xf32, #tpu.memory_space<vmem>>, vector<1x10xf32>
    %263 = vector.broadcast %262 : vector<1x10xf32> to vector<4x10xf32>
    %264 = arith.addf %261, %263 : vector<4x10xf32>
    %c0_208 = arith.constant 0 : index
    %c0_209 = arith.constant 0 : index
    %265 = vector.load %arg33[%c0_208, %c0_209] : memref<64x32xf32, #tpu.memory_space<vmem>>, vector<64x32xf32>
    %cst_210 = arith.constant dense<0.000000e+00> : vector<4x32xf32>
    %266 = tpu.matmul %245, %265, %cst_210 {dimension_numbers = #tpu.dot_dimension_numbers<[1], [0], [0], [1], [0, 0, 1, 1], [], []>} : vector<4x64xf32>, vector<64x32xf32>, vector<4x32xf32> -> vector<4x32xf32>
    %c0_211 = arith.constant 0 : index
    %c0_212 = arith.constant 0 : index
    %267 = vector.load %arg34[%c0_211, %c0_212] : memref<1x32xf32, #tpu.memory_space<vmem>>, vector<1x32xf32>
    %268 = vector.broadcast %267 : vector<1x32xf32> to vector<4x32xf32>
    %269 = arith.addf %266, %268 : vector<4x32xf32>
    %cst_213 = arith.constant 0.000000e+00 : f32
    %270 = vector.broadcast %cst_213 : f32 to vector<4x32xf32>
    %271 = arith.maximumf %269, %270 : vector<4x32xf32>
    %c0_214 = arith.constant 0 : index
    %c0_215 = arith.constant 0 : index
    %272 = vector.load %arg35[%c0_214, %c0_215] : memref<2x32xf32, #tpu.memory_space<vmem>>, vector<2x32xf32>
    %273 = vector.extract_strided_slice %272 {offsets = [0, 0], sizes = [1, 32], strides = [1, 1]} : vector<2x32xf32> to vector<1x32xf32>
    %274 = vector.broadcast %273 : vector<1x32xf32> to vector<4x32xf32>
    %275 = arith.mulf %271, %274 : vector<4x32xf32>
    %276 = vector.extract_strided_slice %272 {offsets = [1, 0], sizes = [1, 32], strides = [1, 1]} : vector<2x32xf32> to vector<1x32xf32>
    %277 = vector.broadcast %276 : vector<1x32xf32> to vector<4x32xf32>
    %278 = arith.addf %275, %277 : vector<4x32xf32>
    %c0_216 = arith.constant 0 : index
    %c0_217 = arith.constant 0 : index
    %279 = vector.load %arg36[%c0_216, %c0_217] : memref<32x10xf32, #tpu.memory_space<vmem>>, vector<32x10xf32>
    %cst_218 = arith.constant dense<0.000000e+00> : vector<4x10xf32>
    %280 = tpu.matmul %278, %279, %cst_218 {dimension_numbers = #tpu.dot_dimension_numbers<[1], [0], [0], [1], [0, 0, 1, 1], [], []>} : vector<4x32xf32>, vector<32x10xf32>, vector<4x10xf32> -> vector<4x10xf32>
    %c0_219 = arith.constant 0 : index
    %c0_220 = arith.constant 0 : index
    %281 = vector.load %arg37[%c0_219, %c0_220] : memref<1x10xf32, #tpu.memory_space<vmem>>, vector<1x10xf32>
    %282 = vector.broadcast %281 : vector<1x10xf32> to vector<4x10xf32>
    %283 = arith.addf %280, %282 : vector<4x10xf32>
    %c0_221 = arith.constant 0 : index
    %c0_222 = arith.constant 0 : index
    %284 = vector.load %arg38[%c0_221, %c0_222] : memref<64x64xf32, #tpu.memory_space<vmem>>, vector<64x64xf32>
    %cst_223 = arith.constant dense<0.000000e+00> : vector<4x64xf32>
    %285 = tpu.matmul %244, %284, %cst_223 {dimension_numbers = #tpu.dot_dimension_numbers<[1], [0], [0], [1], [0, 0, 1, 1], [], []>} : vector<4x64xf32>, vector<64x64xf32>, vector<4x64xf32> -> vector<4x64xf32>
    %c0_224 = arith.constant 0 : index
    %c0_225 = arith.constant 0 : index
    %286 = vector.load %arg39[%c0_224, %c0_225] : memref<64x64xf32, #tpu.memory_space<vmem>>, vector<64x64xf32>
    %cst_226 = arith.constant dense<0.000000e+00> : vector<4x64xf32>
    %287 = tpu.matmul %245, %286, %cst_226 {dimension_numbers = #tpu.dot_dimension_numbers<[1], [0], [0], [1], [0, 0, 1, 1], [], []>} : vector<4x64xf32>, vector<64x64xf32>, vector<4x64xf32> -> vector<4x64xf32>
    %288 = arith.addf %285, %287 : vector<4x64xf32>
    %c0_227 = arith.constant 0 : index
    %c0_228 = arith.constant 0 : index
    %289 = vector.load %arg40[%c0_227, %c0_228] : memref<1x64xf32, #tpu.memory_space<vmem>>, vector<1x64xf32>
    %290 = vector.broadcast %289 : vector<1x64xf32> to vector<4x64xf32>
    %291 = arith.addf %288, %290 : vector<4x64xf32>
    %cst_229 = arith.constant 0.000000e+00 : f32
    %292 = vector.broadcast %cst_229 : f32 to vector<4x64xf32>
    %293 = arith.maximumf %291, %292 : vector<4x64xf32>
    %c0_230 = arith.constant 0 : index
    %c0_231 = arith.constant 0 : index
    %294 = vector.load %arg41[%c0_230, %c0_231] : memref<2x64xf32, #tpu.memory_space<vmem>>, vector<2x64xf32>
    %295 = vector.extract_strided_slice %294 {offsets = [0, 0], sizes = [1, 64], strides = [1, 1]} : vector<2x64xf32> to vector<1x64xf32>
    %296 = vector.broadcast %295 : vector<1x64xf32> to vector<4x64xf32>
    %297 = arith.mulf %293, %296 : vector<4x64xf32>
    %298 = vector.extract_strided_slice %294 {offsets = [1, 0], sizes = [1, 64], strides = [1, 1]} : vector<2x64xf32> to vector<1x64xf32>
    %299 = vector.broadcast %298 : vector<1x64xf32> to vector<4x64xf32>
    %300 = arith.addf %297, %299 : vector<4x64xf32>
    %c0_232 = arith.constant 0 : index
    %c0_233 = arith.constant 0 : index
    %301 = vector.load %arg42[%c0_232, %c0_233] : memref<64x4xf32, #tpu.memory_space<vmem>>, vector<64x4xf32>
    %cst_234 = arith.constant dense<0.000000e+00> : vector<4x4xf32>
    %302 = tpu.matmul %300, %301, %cst_234 {dimension_numbers = #tpu.dot_dimension_numbers<[1], [0], [0], [1], [0, 0, 1, 1], [], []>} : vector<4x64xf32>, vector<64x4xf32>, vector<4x4xf32> -> vector<4x4xf32>
    %c0_235 = arith.constant 0 : index
    %c0_236 = arith.constant 0 : index
    %303 = vector.load %arg43[%c0_235, %c0_236] : memref<1x4xf32, #tpu.memory_space<vmem>>, vector<1x4xf32>
    %304 = vector.broadcast %303 : vector<1x4xf32> to vector<4x4xf32>
    %305 = arith.addf %302, %304 : vector<4x4xf32>
    %c0_237 = arith.constant 0 : index
    %c0_238 = arith.constant 0 : index
    %306 = vector.load %arg44[%c0_237, %c0_238] : memref<10x12xf32, #tpu.memory_space<vmem>>, vector<10x12xf32>
    %cst_239 = arith.constant dense<0.000000e+00> : vector<4x12xf32>
    %307 = tpu.matmul %264, %306, %cst_239 {dimension_numbers = #tpu.dot_dimension_numbers<[1], [0], [0], [1], [0, 0, 1, 1], [], []>} : vector<4x10xf32>, vector<10x12xf32>, vector<4x12xf32> -> vector<4x12xf32>
    %c0_240 = arith.constant 0 : index
    %c0_241 = arith.constant 0 : index
    %308 = vector.load %arg45[%c0_240, %c0_241] : memref<10x12xf32, #tpu.memory_space<vmem>>, vector<10x12xf32>
    %cst_242 = arith.constant dense<0.000000e+00> : vector<4x12xf32>
    %309 = tpu.matmul %283, %308, %cst_242 {dimension_numbers = #tpu.dot_dimension_numbers<[1], [0], [0], [1], [0, 0, 1, 1], [], []>} : vector<4x10xf32>, vector<10x12xf32>, vector<4x12xf32> -> vector<4x12xf32>
    %310 = arith.addf %307, %309 : vector<4x12xf32>
    %c0_243 = arith.constant 0 : index
    %c0_244 = arith.constant 0 : index
    %311 = vector.load %arg46[%c0_243, %c0_244] : memref<4x12xf32, #tpu.memory_space<vmem>>, vector<4x12xf32>
    %cst_245 = arith.constant dense<0.000000e+00> : vector<4x12xf32>
    %312 = tpu.matmul %305, %311, %cst_245 {dimension_numbers = #tpu.dot_dimension_numbers<[1], [0], [0], [1], [0, 0, 1, 1], [], []>} : vector<4x4xf32>, vector<4x12xf32>, vector<4x12xf32> -> vector<4x12xf32>
    %313 = arith.addf %310, %312 : vector<4x12xf32>
    %c0_246 = arith.constant 0 : index
    %c0_247 = arith.constant 0 : index
    %314 = vector.load %arg47[%c0_246, %c0_247] : memref<1x12xf32, #tpu.memory_space<vmem>>, vector<1x12xf32>
    %315 = vector.broadcast %314 : vector<1x12xf32> to vector<4x12xf32>
    %316 = arith.addf %313, %315 : vector<4x12xf32>
    %cst_248 = arith.constant 0.000000e+00 : f32
    %317 = vector.broadcast %cst_248 : f32 to vector<4x12xf32>
    %318 = arith.maximumf %316, %317 : vector<4x12xf32>
    %c0_249 = arith.constant 0 : index
    %c0_250 = arith.constant 0 : index
    %319 = vector.load %arg48[%c0_249, %c0_250] : memref<2x12xf32, #tpu.memory_space<vmem>>, vector<2x12xf32>
    %320 = vector.extract_strided_slice %319 {offsets = [0, 0], sizes = [1, 12], strides = [1, 1]} : vector<2x12xf32> to vector<1x12xf32>
    %321 = vector.broadcast %320 : vector<1x12xf32> to vector<4x12xf32>
    %322 = arith.mulf %318, %321 : vector<4x12xf32>
    %323 = vector.extract_strided_slice %319 {offsets = [1, 0], sizes = [1, 12], strides = [1, 1]} : vector<2x12xf32> to vector<1x12xf32>
    %324 = vector.broadcast %323 : vector<1x12xf32> to vector<4x12xf32>
    %325 = arith.addf %322, %324 : vector<4x12xf32>
    %c0_251 = arith.constant 0 : index
    %c0_252 = arith.constant 0 : index
    %326 = vector.load %arg49[%c0_251, %c0_252] : memref<12x2xf32, #tpu.memory_space<vmem>>, vector<12x2xf32>
    %cst_253 = arith.constant dense<0.000000e+00> : vector<4x2xf32>
    %327 = tpu.matmul %325, %326, %cst_253 {dimension_numbers = #tpu.dot_dimension_numbers<[1], [0], [0], [1], [0, 0, 1, 1], [], []>} : vector<4x12xf32>, vector<12x2xf32>, vector<4x2xf32> -> vector<4x2xf32>
    %c0_254 = arith.constant 0 : index
    %c0_255 = arith.constant 0 : index
    %328 = vector.load %arg50[%c0_254, %c0_255] : memref<1x2xf32, #tpu.memory_space<vmem>>, vector<1x2xf32>
    %329 = vector.broadcast %328 : vector<1x2xf32> to vector<4x2xf32>
    %330 = arith.addf %327, %329 : vector<4x2xf32>
    %cst_256 = arith.constant 0.000000e+00 : f32
    %331 = vector.broadcast %cst_256 : f32 to vector<4x128xf32>
    %c0_257 = arith.constant 0 : index
    %c0_258 = arith.constant 0 : index
    %c0_259 = arith.constant 0 : index
    %332 = vector.load %arg51[%c0_257, %c0_258, %c0_259] : memref<1x4x128xf32, #tpu.memory_space<vmem>>, vector<1x4x128xf32>
    %333 = vector.shape_cast %332 : vector<1x4x128xf32> to vector<4x128xf32>
    %334 = vector.shape_cast %331 : vector<4x128xf32> to vector<1x4x128xf32>
    tpu.vector_store %arg51[%c0_257, %c0_258, %c0_259], %334 {strides = array<i32>} : memref<1x4x128xf32, #tpu.memory_space<vmem>>, vector<1x4x128xf32>,
    %c0_260 = arith.constant 0 : index
    %c0_261 = arith.constant 0 : index
    %c0_262 = arith.constant 0 : index
    %335 = vector.load %arg51[%c0_260, %c0_261, %c0_262] : memref<1x4x128xf32, #tpu.memory_space<vmem>>, vector<1x4x10xf32>
    %336 = vector.shape_cast %335 : vector<1x4x10xf32> to vector<4x10xf32>
    %337 = vector.shape_cast %264 : vector<4x10xf32> to vector<1x4x10xf32>
    tpu.vector_store %arg51[%c0_260, %c0_261, %c0_262], %337 {strides = array<i32>} : memref<1x4x128xf32, #tpu.memory_space<vmem>>, vector<1x4x10xf32>,
    %c0_263 = arith.constant 0 : index
    %c0_264 = arith.constant 0 : index
    %c10 = arith.constant 10 : index
    %338 = vector.load %arg51[%c0_263, %c0_264, %c10] : memref<1x4x128xf32, #tpu.memory_space<vmem>>, vector<1x4x10xf32>
    %339 = vector.shape_cast %338 : vector<1x4x10xf32> to vector<4x10xf32>
    %340 = vector.shape_cast %283 : vector<4x10xf32> to vector<1x4x10xf32>
    tpu.vector_store %arg51[%c0_263, %c0_264, %c10], %340 {strides = array<i32>} : memref<1x4x128xf32, #tpu.memory_space<vmem>>, vector<1x4x10xf32>,
    %c0_265 = arith.constant 0 : index
    %c0_266 = arith.constant 0 : index
    %c20 = arith.constant 20 : index
    %341 = vector.load %arg51[%c0_265, %c0_266, %c20] : memref<1x4x128xf32, #tpu.memory_space<vmem>>, vector<1x4x2xf32>
    %342 = vector.shape_cast %341 : vector<1x4x2xf32> to vector<4x2xf32>
    %343 = vector.shape_cast %330 : vector<4x2xf32> to vector<1x4x2xf32>
    tpu.vector_store %arg51[%c0_265, %c0_266, %c20], %343 {strides = array<i32>} : memref<1x4x128xf32, #tpu.memory_space<vmem>>, vector<1x4x2xf32>,
    return
  }
  func.func @transform_0(%arg0: i32) -> (i32, i32, i32) {
    %c0_i32 = arith.constant 0 : i32
    %c0_i32_0 = arith.constant 0 : i32
    %c0_i32_1 = arith.constant 0 : i32
    return %arg0, %c0_i32, %c0_i32_0 : i32, i32, i32
  }
  func.func @transform_1(%arg0: i32) -> (i32, i32, i32) {
    %c0_i32 = arith.constant 0 : i32
    %c0_i32_0 = arith.constant 0 : i32
    %c0_i32_1 = arith.constant 0 : i32
    return %arg0, %c0_i32, %c0_i32_0 : i32, i32, i32
  }
  func.func @transform_2(%arg0: i32) -> (i32, i32, i32) {
    %c0_i32 = arith.constant 0 : i32
    %c0_i32_0 = arith.constant 0 : i32
    %c0_i32_1 = arith.constant 0 : i32
    %c0_i32_2 = arith.constant 0 : i32
    return %c0_i32, %c0_i32_0, %c0_i32_1 : i32, i32, i32
  }
  func.func @transform_3(%arg0: i32) -> (i32, i32) {
    %c0_i32 = arith.constant 0 : i32
    %c0_i32_0 = arith.constant 0 : i32
    %c0_i32_1 = arith.constant 0 : i32
    return %c0_i32, %c0_i32_0 : i32, i32
  }
  func.func @transform_4(%arg0: i32) -> (i32, i32, i32) {
    %c0_i32 = arith.constant 0 : i32
    %c0_i32_0 = arith.constant 0 : i32
    %c0_i32_1 = arith.constant 0 : i32
    %c0_i32_2 = arith.constant 0 : i32
    return %c0_i32, %c0_i32_0, %c0_i32_1 : i32, i32, i32
  }
  func.func @transform_5(%arg0: i32) -> (i32, i32, i32) {
    %c0_i32 = arith.constant 0 : i32
    %c0_i32_0 = arith.constant 0 : i32
    %c0_i32_1 = arith.constant 0 : i32
    %c0_i32_2 = arith.constant 0 : i32
    return %c0_i32, %c0_i32_0, %c0_i32_1 : i32, i32, i32
  }
  func.func @transform_6(%arg0: i32) -> (i32, i32) {
    %c0_i32 = arith.constant 0 : i32
    %c0_i32_0 = arith.constant 0 : i32
    %c0_i32_1 = arith.constant 0 : i32
    return %c0_i32, %c0_i32_0 : i32, i32
  }
  func.func @transform_7(%arg0: i32) -> (i32, i32, i32) {
    %c0_i32 = arith.constant 0 : i32
    %c0_i32_0 = arith.constant 0 : i32
    %c0_i32_1 = arith.constant 0 : i32
    %c0_i32_2 = arith.constant 0 : i32
    return %c0_i32, %c0_i32_0, %c0_i32_1 : i32, i32, i32
  }
  func.func @transform_8(%arg0: i32) -> (i32, i32) {
    %c0_i32 = arith.constant 0 : i32
    %c0_i32_0 = arith.constant 0 : i32
    %c0_i32_1 = arith.constant 0 : i32
    return %c0_i32, %c0_i32_0 : i32, i32
  }
  func.func @transform_9(%arg0: i32) -> (i32, i32, i32) {
    %c0_i32 = arith.constant 0 : i32
    %c0_i32_0 = arith.constant 0 : i32
    %c0_i32_1 = arith.constant 0 : i32
    %c0_i32_2 = arith.constant 0 : i32
    return %c0_i32, %c0_i32_0, %c0_i32_1 : i32, i32, i32
  }
  func.func @transform_10(%arg0: i32) -> (i32, i32, i32) {
    %c0_i32 = arith.constant 0 : i32
    %c0_i32_0 = arith.constant 0 : i32
    %c0_i32_1 = arith.constant 0 : i32
    %c0_i32_2 = arith.constant 0 : i32
    return %c0_i32, %c0_i32_0, %c0_i32_1 : i32, i32, i32
  }
  func.func @transform_11(%arg0: i32) -> (i32, i32) {
    %c0_i32 = arith.constant 0 : i32
    %c0_i32_0 = arith.constant 0 : i32
    %c0_i32_1 = arith.constant 0 : i32
    return %c0_i32, %c0_i32_0 : i32, i32
  }
  func.func @transform_12(%arg0: i32) -> (i32, i32, i32) {
    %c0_i32 = arith.constant 0 : i32
    %c0_i32_0 = arith.constant 0 : i32
    %c0_i32_1 = arith.constant 0 : i32
    %c0_i32_2 = arith.constant 0 : i32
    return %c0_i32, %c0_i32_0, %c0_i32_1 : i32, i32, i32
  }
  func.func @transform_13(%arg0: i32) -> (i32, i32, i32) {
    %c0_i32 = arith.constant 0 : i32
    %c0_i32_0 = arith.constant 0 : i32
    %c0_i32_1 = arith.constant 0 : i32
    %c0_i32_2 = arith.constant 0 : i32
    return %c0_i32, %c0_i32_0, %c0_i32_1 : i32, i32, i32
  }
  func.func @transform_14(%arg0: i32) -> (i32, i32) {
    %c0_i32 = arith.constant 0 : i32
    %c0_i32_0 = arith.constant 0 : i32
    %c0_i32_1 = arith.constant 0 : i32
    return %c0_i32, %c0_i32_0 : i32, i32
  }
  func.func @transform_15(%arg0: i32) -> (i32, i32) {
    %c0_i32 = arith.constant 0 : i32
    %c0_i32_0 = arith.constant 0 : i32
    %c0_i32_1 = arith.constant 0 : i32
    return %c0_i32, %c0_i32_0 : i32, i32
  }
  func.func @transform_16(%arg0: i32) -> (i32, i32) {
    %c0_i32 = arith.constant 0 : i32
    %c0_i32_0 = arith.constant 0 : i32
    %c0_i32_1 = arith.constant 0 : i32
    return %c0_i32, %c0_i32_0 : i32, i32
  }
  func.func @transform_17(%arg0: i32) -> (i32, i32) {
    %c0_i32 = arith.constant 0 : i32
    %c0_i32_0 = arith.constant 0 : i32
    %c0_i32_1 = arith.constant 0 : i32
    return %c0_i32, %c0_i32_0 : i32, i32
  }
  func.func @transform_18(%arg0: i32) -> (i32, i32) {
    %c0_i32 = arith.constant 0 : i32
    %c0_i32_0 = arith.constant 0 : i32
    %c0_i32_1 = arith.constant 0 : i32
    return %c0_i32, %c0_i32_0 : i32, i32
  }
  func.func @transform_19(%arg0: i32) -> (i32, i32, i32) {
    %c0_i32 = arith.constant 0 : i32
    %c0_i32_0 = arith.constant 0 : i32
    %c0_i32_1 = arith.constant 0 : i32
    %c0_i32_2 = arith.constant 0 : i32
    return %c0_i32, %c0_i32_0, %c0_i32_1 : i32, i32, i32
  }
  func.func @transform_20(%arg0: i32) -> (i32, i32) {
    %c0_i32 = arith.constant 0 : i32
    %c0_i32_0 = arith.constant 0 : i32
    %c0_i32_1 = arith.constant 0 : i32
    return %c0_i32, %c0_i32_0 : i32, i32
  }
  func.func @transform_21(%arg0: i32) -> (i32, i32, i32) {
    %c0_i32 = arith.constant 0 : i32
    %c0_i32_0 = arith.constant 0 : i32
    %c0_i32_1 = arith.constant 0 : i32
    %c0_i32_2 = arith.constant 0 : i32
    return %c0_i32, %c0_i32_0, %c0_i32_1 : i32, i32, i32
  }
  func.func @transform_22(%arg0: i32) -> (i32, i32, i32) {
    %c0_i32 = arith.constant 0 : i32
    %c0_i32_0 = arith.constant 0 : i32
    %c0_i32_1 = arith.constant 0 : i32
    %c0_i32_2 = arith.constant 0 : i32
    return %c0_i32, %c0_i32_0, %c0_i32_1 : i32, i32, i32
  }
  func.func @transform_23(%arg0: i32) -> (i32, i32) {
    %c0_i32 = arith.constant 0 : i32
    %c0_i32_0 = arith.constant 0 : i32
    %c0_i32_1 = arith.constant 0 : i32
    return %c0_i32, %c0_i32_0 : i32, i32
  }
  func.func @transform_24(%arg0: i32) -> (i32, i32, i32) {
    %c0_i32 = arith.constant 0 : i32
    %c0_i32_0 = arith.constant 0 : i32
    %c0_i32_1 = arith.constant 0 : i32
    %c0_i32_2 = arith.constant 0 : i32
    return %c0_i32, %c0_i32_0, %c0_i32_1 : i32, i32, i32
  }
  func.func @transform_25(%arg0: i32) -> (i32, i32) {
    %c0_i32 = arith.constant 0 : i32
    %c0_i32_0 = arith.constant 0 : i32
    %c0_i32_1 = arith.constant 0 : i32
    return %c0_i32, %c0_i32_0 : i32, i32
  }
  func.func @transform_26(%arg0: i32) -> (i32, i32, i32) {
    %c0_i32 = arith.constant 0 : i32
    %c0_i32_0 = arith.constant 0 : i32
    %c0_i32_1 = arith.constant 0 : i32
    %c0_i32_2 = arith.constant 0 : i32
    return %c0_i32, %c0_i32_0, %c0_i32_1 : i32, i32, i32
  }
  func.func @transform_27(%arg0: i32) -> (i32, i32, i32) {
    %c0_i32 = arith.constant 0 : i32
    %c0_i32_0 = arith.constant 0 : i32
    %c0_i32_1 = arith.constant 0 : i32
    %c0_i32_2 = arith.constant 0 : i32
    return %c0_i32, %c0_i32_0, %c0_i32_1 : i32, i32, i32
  }
  func.func @transform_28(%arg0: i32) -> (i32, i32) {
    %c0_i32 = arith.constant 0 : i32
    %c0_i32_0 = arith.constant 0 : i32
    %c0_i32_1 = arith.constant 0 : i32
    return %c0_i32, %c0_i32_0 : i32, i32
  }
  func.func @transform_29(%arg0: i32) -> (i32, i32, i32) {
    %c0_i32 = arith.constant 0 : i32
    %c0_i32_0 = arith.constant 0 : i32
    %c0_i32_1 = arith.constant 0 : i32
    %c0_i32_2 = arith.constant 0 : i32
    return %c0_i32, %c0_i32_0, %c0_i32_1 : i32, i32, i32
  }
  func.func @transform_30(%arg0: i32) -> (i32, i32, i32) {
    %c0_i32 = arith.constant 0 : i32
    %c0_i32_0 = arith.constant 0 : i32
    %c0_i32_1 = arith.constant 0 : i32
    %c0_i32_2 = arith.constant 0 : i32
    return %c0_i32, %c0_i32_0, %c0_i32_1 : i32, i32, i32
  }
  func.func @transform_31(%arg0: i32) -> (i32, i32, i32) {
    %c0_i32 = arith.constant 0 : i32
    %c0_i32_0 = arith.constant 0 : i32
    %c0_i32_1 = arith.constant 0 : i32
    %c0_i32_2 = arith.constant 0 : i32
    return %c0_i32, %c0_i32_0, %c0_i32_1 : i32, i32, i32
  }
  func.func @transform_32(%arg0: i32) -> (i32, i32) {
    %c0_i32 = arith.constant 0 : i32
    %c0_i32_0 = arith.constant 0 : i32
    %c0_i32_1 = arith.constant 0 : i32
    return %c0_i32, %c0_i32_0 : i32, i32
  }
  func.func @transform_33(%arg0: i32) -> (i32, i32) {
    %c0_i32 = arith.constant 0 : i32
    %c0_i32_0 = arith.constant 0 : i32
    %c0_i32_1 = arith.constant 0 : i32
    return %c0_i32, %c0_i32_0 : i32, i32
  }
  func.func @transform_34(%arg0: i32) -> (i32, i32) {
    %c0_i32 = arith.constant 0 : i32
    %c0_i32_0 = arith.constant 0 : i32
    %c0_i32_1 = arith.constant 0 : i32
    return %c0_i32, %c0_i32_0 : i32, i32
  }
  func.func @transform_35(%arg0: i32) -> (i32, i32) {
    %c0_i32 = arith.constant 0 : i32
    %c0_i32_0 = arith.constant 0 : i32
    %c0_i32_1 = arith.constant 0 : i32
    return %c0_i32, %c0_i32_0 : i32, i32
  }
  func.func @transform_36(%arg0: i32) -> (i32, i32) {
    %c0_i32 = arith.constant 0 : i32
    %c0_i32_0 = arith.constant 0 : i32
    %c0_i32_1 = arith.constant 0 : i32
    return %c0_i32, %c0_i32_0 : i32, i32
  }
  func.func @transform_37(%arg0: i32) -> (i32, i32) {
    %c0_i32 = arith.constant 0 : i32
    %c0_i32_0 = arith.constant 0 : i32
    %c0_i32_1 = arith.constant 0 : i32
    return %c0_i32, %c0_i32_0 : i32, i32
  }
  func.func @transform_38(%arg0: i32) -> (i32, i32) {
    %c0_i32 = arith.constant 0 : i32
    %c0_i32_0 = arith.constant 0 : i32
    %c0_i32_1 = arith.constant 0 : i32
    return %c0_i32, %c0_i32_0 : i32, i32
  }
  func.func @transform_39(%arg0: i32) -> (i32, i32) {
    %c0_i32 = arith.constant 0 : i32
    %c0_i32_0 = arith.constant 0 : i32
    %c0_i32_1 = arith.constant 0 : i32
    return %c0_i32, %c0_i32_0 : i32, i32
  }
  func.func @transform_40(%arg0: i32) -> (i32, i32) {
    %c0_i32 = arith.constant 0 : i32
    %c0_i32_0 = arith.constant 0 : i32
    %c0_i32_1 = arith.constant 0 : i32
    return %c0_i32, %c0_i32_0 : i32, i32
  }
  func.func @transform_41(%arg0: i32) -> (i32, i32) {
    %c0_i32 = arith.constant 0 : i32
    %c0_i32_0 = arith.constant 0 : i32
    %c0_i32_1 = arith.constant 0 : i32
    return %c0_i32, %c0_i32_0 : i32, i32
  }
  func.func @transform_42(%arg0: i32) -> (i32, i32) {
    %c0_i32 = arith.constant 0 : i32
    %c0_i32_0 = arith.constant 0 : i32
    %c0_i32_1 = arith.constant 0 : i32
    return %c0_i32, %c0_i32_0 : i32, i32
  }
  func.func @transform_43(%arg0: i32) -> (i32, i32) {
    %c0_i32 = arith.constant 0 : i32
    %c0_i32_0 = arith.constant 0 : i32
    %c0_i32_1 = arith.constant 0 : i32
    return %c0_i32, %c0_i32_0 : i32, i32
  }
  func.func @transform_44(%arg0: i32) -> (i32, i32) {
    %c0_i32 = arith.constant 0 : i32
    %c0_i32_0 = arith.constant 0 : i32
    %c0_i32_1 = arith.constant 0 : i32
    return %c0_i32, %c0_i32_0 : i32, i32
  }
  func.func @transform_45(%arg0: i32) -> (i32, i32) {
    %c0_i32 = arith.constant 0 : i32
    %c0_i32_0 = arith.constant 0 : i32
    %c0_i32_1 = arith.constant 0 : i32
    return %c0_i32, %c0_i32_0 : i32, i32
  }
  func.func @transform_46(%arg0: i32) -> (i32, i32) {
    %c0_i32 = arith.constant 0 : i32
    %c0_i32_0 = arith.constant 0 : i32
    %c0_i32_1 = arith.constant 0 : i32
    return %c0_i32, %c0_i32_0 : i32, i32
  }
  func.func @transform_47(%arg0: i32) -> (i32, i32) {
    %c0_i32 = arith.constant 0 : i32
    %c0_i32_0 = arith.constant 0 : i32
    %c0_i32_1 = arith.constant 0 : i32
    return %c0_i32, %c0_i32_0 : i32, i32
  }
  func.func @transform_48(%arg0: i32) -> (i32, i32) {
    %c0_i32 = arith.constant 0 : i32
    %c0_i32_0 = arith.constant 0 : i32
    %c0_i32_1 = arith.constant 0 : i32
    return %c0_i32, %c0_i32_0 : i32, i32
  }
  func.func @transform_49(%arg0: i32) -> (i32, i32) {
    %c0_i32 = arith.constant 0 : i32
    %c0_i32_0 = arith.constant 0 : i32
    %c0_i32_1 = arith.constant 0 : i32
    return %c0_i32, %c0_i32_0 : i32, i32
  }
  func.func @transform_50(%arg0: i32) -> (i32, i32, i32) {
    %c0_i32 = arith.constant 0 : i32
    %c0_i32_0 = arith.constant 0 : i32
    %c0_i32_1 = arith.constant 0 : i32
    return %arg0, %c0_i32, %c0_i32_0 : i32, i32, i32
  }
}

</mosaic_0001>

<bundles_post_ra>
// kernel: oO_net_forward.1
= control target key start
LH: loop header
LB: loop body
LE: loop exit
PB: predicated region body
PF: predicated region fallthrough
CT: control target
= control target key end

     0   :  { %s10624_s6 = smov 1   ;;  %s10625_s10 = smov 2   ;;  %s13439_s0 = inlined_call_operand.smem [shape: u32[51], index: -1, kind: input, shape index: {}] }
   0x1   :  { %s10689_s5 = sld [smem:[%s13439_s0]]   ;;  %s10626_s14 = smov 3  }
   0x2   :  { %s10694_s9 = sld [smem:[%s13439_s0 + %s10624_s6]]   ;;  %s10627_s18 = smov 4  }
   0x3   :  { %s10699_s13 = sld [smem:[%s13439_s0 + %s10625_s10]]   ;;  %s10628_s22 = smov 5  }
   0x4   :  { %s10704_s17 = sld [smem:[%s13439_s0 + %s10626_s14]]   ;;  %s10629_s26 = smov 6  }
   0x5   :  { %s10709_s21 = sld [smem:[%s13439_s0 + %s10627_s18]]   ;;  %s10630_s30 = smov 7  }
   0x6   :  { %s10714_s25 = sld [smem:[%s13439_s0 + %s10628_s22]]   ;;  %s10631_s4 = smov 8  }
   0x7   :  { %13514 = sst [smem:[#allocation8_spill]] %s10689_s5  ;;  %s10632_s10 = smov 9  }
   0x8   :  { %13515 = sst [smem:[#allocation9_spill]] %s10694_s9  ;;  %s10633_s15 = smov 10  }
   0x9   :  { %s10719_s29 = sld [smem:[%s13439_s0 + %s10629_s26]]   ;;  %s10634_s20 = smov 11  }
   0xa   :  { %s10724_s3 = sld [smem:[%s13439_s0 + %s10630_s30]]   ;;  %s10635_s26 = smov 12  }
   0xb   :  { %s10729_s8 = sld [smem:[%s13439_s0 + %s10631_s4]]   ;;  %s10636_s1 = smov 13  }
   0xc   :  { %s10734_s14 = sld [smem:[%s13439_s0 + %s10632_s10]]   ;;  %s10637_s7 = smov 14  }
   0xd   :  { %s10739_s19 = sld [smem:[%s13439_s0 + %s10633_s15]]   ;;  %s10638_s15 = smov 15  }
   0xe   :  { %s10744_s24 = sld [smem:[%s13439_s0 + %s10634_s20]]   ;;  %s10639_s22 = smov 16  }
   0xf   :  { %s10749_s30 = sld [smem:[%s13439_s0 + %s10635_s26]]   ;;  %s10640_s28 = smov 17  }
  0x10   :  { %13516 = sst [smem:[#allocation10_spill]] %s10724_s3 }
  0x11   :  { %s10754_s6 = sld [smem:[%s13439_s0 + %s10636_s1]]  }
  0x12   :  { %s10759_s12 = sld [smem:[%s13439_s0 + %s10637_s7]]   ;;  %s10641_s7 = smov 18  }
  0x13   :  { %s10764_s20 = sld [smem:[%s13439_s0 + %s10638_s15]]   ;;  %s10642_s15 = smov 19  }
  0x14   :  { %s10769_s27 = sld [smem:[%s13439_s0 + %s10639_s22]]   ;;  %s10643_s22 = smov 20  }
  0x15   :  { %s10774_s4 = sld [smem:[%s13439_s0 + %s10640_s28]]   ;;  %s10644_s28 = smov 21  }
  0x18   :  { %13517 = sst [smem:[#allocation11_spill]] %s10759_s12 }
  0x19   :  { %13518 = sst [smem:[#allocation12_spill]] %s10764_s20 }
  0x1a   :  { %13519 = sst [smem:[#allocation13_spill]] %s10769_s27 }
  0x1b   :  { %13520 = sst [smem:[#allocation14_spill]] %s10774_s4 }
  0x1c   :  { %s10779_s12 = sld [smem:[%s13439_s0 + %s10641_s7]]   ;;  %s10645_s7 = smov 22  }
  0x1d   :  { %s10784_s20 = sld [smem:[%s13439_s0 + %s10642_s15]]   ;;  %s10646_s15 = smov 23  }
  0x1e   :  { %s10789_s27 = sld [smem:[%s13439_s0 + %s10643_s22]]   ;;  %s10647_s22 = smov 24  }
  0x1f   :  { %s10794_s4 = sld [smem:[%s13439_s0 + %s10644_s28]]   ;;  %s10648_s28 = smov 25  }
  0x20   :  { %s10804_s9 = sld [smem:[%s13439_s0 + %s10646_s15]]   ;;  %s10650_s15 = smov 27  }
  0x22   :  { %13521 = sst [smem:[#allocation15_spill]] %s10779_s12 }
  0x23   :  { %13522 = sst [smem:[#allocation16_spill]] %s10784_s20 }
  0x24   :  { %13523 = sst [smem:[#allocation17_spill]] %s10789_s27 }
  0x25   :  { %13524 = sst [smem:[#allocation18_spill]] %s10794_s4 }
  0x26   :  { %s10799_s12 = sld [smem:[%s13439_s0 + %s10645_s7]]   ;;  %s10649_s7 = smov 26  }
  0x27   :  { %13526 = sst [smem:[#allocation20_spill]] %s10804_s9 }
  0x28   :  { %s10809_s27 = sld [smem:[%s13439_s0 + %s10647_s22]]   ;;  %s10651_s22 = smov 28  }
  0x29   :  { %s10814_s4 = sld [smem:[%s13439_s0 + %s10648_s28]]   ;;  %s10652_s28 = smov 29  }
  0x2a   :  { %s10824_s9 = sld [smem:[%s13439_s0 + %s10650_s15]]   ;;  %s10654_s15 = smov 31  }
  0x2c   :  { %13525 = sst [smem:[#allocation19_spill]] %s10799_s12 }
  0x2d   :  { %s10819_s12 = sld [smem:[%s13439_s0 + %s10649_s7]]   ;;  %s10653_s7 = smov 30  }
  0x2e   :  { %13527 = sst [smem:[#allocation21_spill]] %s10809_s27 }
  0x2f   :  { %13528 = sst [smem:[#allocation22_spill]] %s10814_s4 }
  0x30   :  { %13530 = sst [smem:[#allocation24_spill]] %s10824_s9 }
  0x31   :  { %s10829_s27 = sld [smem:[%s13439_s0 + %s10651_s22]]   ;;  %s10655_s22 = smov 32  }
  0x32   :  { %s10834_s4 = sld [smem:[%s13439_s0 + %s10652_s28]]   ;;  %s10656_s28 = smov 33  }
  0x33   :  { %13529 = sst [smem:[#allocation23_spill]] %s10819_s12 }
  0x34   :  { %s10839_s12 = sld [smem:[%s13439_s0 + %s10653_s7]]   ;;  %s10657_s7 = smov 34  }
  0x35   :  { %s10844_s9 = sld [smem:[%s13439_s0 + %s10654_s15]]   ;;  %s10658_s15 = smov 35  }
  0x37   :  { %13531 = sst [smem:[#allocation25_spill]] %s10829_s27 }
  0x38   :  { %13532 = sst [smem:[#allocation26_spill]] %s10834_s4 }
  0x39   :  { %s10849_s27 = sld [smem:[%s13439_s0 + %s10655_s22]]   ;;  %s10659_s22 = smov 36  }
  0x3a   :  { %13533 = sst [smem:[#allocation27_spill]] %s10839_s12 }
  0x3b   :  { %13534 = sst [smem:[#allocation28_spill]] %s10844_s9 }
  0x3c   :  { %s10854_s4 = sld [smem:[%s13439_s0 + %s10656_s28]]   ;;  %s10660_s28 = smov 37  }
  0x3d   :  { %s10859_s12 = sld [smem:[%s13439_s0 + %s10657_s7]]   ;;  %s10661_s7 = smov 38  }
  0x3e   :  { %s10864_s9 = sld [smem:[%s13439_s0 + %s10658_s15]]   ;;  %s10662_s15 = smov 39  }
  0x3f   :  { %13535 = sst [smem:[#allocation29_spill]] %s10849_s27 }
  0x40   :  { %s10869_s27 = sld [smem:[%s13439_s0 + %s10659_s22]]   ;;  %s10663_s22 = smov 40  }
  0x42   :  { %13536 = sst [smem:[#allocation30_spill]] %s10854_s4 }
  0x43   :  { %13537 = sst [smem:[#allocation31_spill]] %s10859_s12 }
  0x44   :  { %13538 = sst [smem:[#allocation32_spill]] %s10864_s9 }
  0x45   :  { %s10874_s4 = sld [smem:[%s13439_s0 + %s10660_s28]]   ;;  %s10664_s28 = smov 41  }
  0x46   :  { %13539 = sst [smem:[#allocation33_spill]] %s10869_s27 }
  0x47   :  { %s10879_s12 = sld [smem:[%s13439_s0 + %s10661_s7]]   ;;  %s10665_s7 = smov 42  }
  0x48   :  { %s10884_s9 = sld [smem:[%s13439_s0 + %s10662_s15]]   ;;  %s10666_s15 = smov 43  }
  0x49   :  { %s10889_s27 = sld [smem:[%s13439_s0 + %s10663_s22]]   ;;  %s10667_s22 = smov 44  }
  0x4b   :  { %13540 = sst [smem:[#allocation34_spill]] %s10874_s4 }
  0x4c   :  { %s10894_s4 = sld [smem:[%s13439_s0 + %s10664_s28]]   ;;  %s10668_s28 = smov 45  }
  0x4d   :  { %13541 = sst [smem:[#allocation35_spill]] %s10879_s12 }
  0x4e   :  { %13542 = sst [smem:[#allocation36_spill]] %s10884_s9 }
  0x4f   :  { %13543 = sst [smem:[#allocation37_spill]] %s10889_s27 }
  0x50   :  { %s10899_s12 = sld [smem:[%s13439_s0 + %s10665_s7]]   ;;  %s10669_s7 = smov 46  }
  0x51   :  { %s10904_s9 = sld [smem:[%s13439_s0 + %s10666_s15]]   ;;  %s10670_s15 = smov 47  }
  0x52   :  { %13544 = sst [smem:[#allocation38_spill]] %s10894_s4 }
  0x53   :  { %s10909_s27 = sld [smem:[%s13439_s0 + %s10667_s22]]   ;;  %s10671_s22 = smov 48  }
  0x54   :  { %s10914_s4 = sld [smem:[%s13439_s0 + %s10668_s28]]   ;;  %s10672_s28 = smov 49  }
  0x56   :  { %13545 = sst [smem:[#allocation39_spill]] %s10899_s12 }
  0x57   :  { %13546 = sst [smem:[#allocation40_spill]] %s10904_s9 }
  0x58   :  { %s10919_s12 = sld [smem:[%s13439_s0 + %s10669_s7]]   ;;  %s10673_s7 = smov 50  }
  0x59   :  { %13547 = sst [smem:[#allocation41_spill]] %s10909_s27 }
  0x5a   :  { %13548 = sst [smem:[#allocation42_spill]] %s10914_s4 }
  0x5b   :  { %s10924_s9 = sld [smem:[%s13439_s0 + %s10670_s15]]  }
  0x5c   :  { %s10929_s27 = sld [smem:[%s13439_s0 + %s10671_s22]]  }
  0x5d   :  { %s10934_s4 = sld [smem:[%s13439_s0 + %s10672_s28]]  }
  0x5e   :  { %s10939_s20 = sld [smem:[%s13439_s0 + %s10673_s7]]  }
  0x63   :  { %13549 = sst [smem:[#allocation43_spill]] %s10934_s4 }
  0x64   :  { %106 = vsyncpa [#allocation3], 0 }
  0x65   :  { %107 = vsyncpa [#allocation5], 0  ;;  %s10941_s15 = smov 0  }
  0x66 LB: > { %s13550_s3 = sld [smem:[#allocation10_spill]]  ;;  %s10947_s16 = sadd.s32 4294967295, %s10622_s15   ;;  %s10622_s15 = sphi %s10941_s15, %s113_s15  }
  0x67   : > { %p8684_p0 = scmp.ge.s32.totalorder %s10622_s15, 1  ;;  %p1204_p1 = scmp.lt.s32.totalorder %s10622_s15, 3 }
  0x68   : > { %p13457_p2 = scmp.eq.s32.totalorder %s10947_s16, 0  ;;  %s10674_s18 = smov [#allocation2]  }
  0x69   : > { %p10952_p3 = pnand %p8684_p0, %p1204_p1  ;;  %s1349_s22 = sshll.u32 %s10674_s18, 4  ;;  %s1350_s22 = int_to_ptr.vmem [resolvable:$true] %s1349_s22 }
  0x6a   : > { %s10675_s23 = smov [#allocation4]   ;;  %s10567_s1 = scalar_lea.vmem %s1350_s22, 16 }
  0x6b   : > { %s13551_s0 = scalar_select %p10952_p3, 1, 0 }
  0x6c   : > { %p10300_p4 = pneg %p10952_p3  ;;  %s1366_s26 = sshll.u32 %s10675_s23, 4  ;;  %s1367_s26 = int_to_ptr.vmem [resolvable:$true] %s1366_s26 }
  0x6d   : > { %p10568_p7 = scmp.ne.s32.totalorder %s1350_s22, %s10567_s1  ;;  %s10574_s2 = scalar_lea.vmem %s1350_s22, 32 }
  0x6e   : > { %p10960_p5 = pnand %p13457_p2, %p10300_p4  ;;  %p10575_p10 = scmp.lt.s32.totalorder %s1350_s22, %s1350_s22 }
  0x6f   : > { %p10576_p11 = scmp.lt.s32.totalorder %s10574_s2, %s10567_s1 }
  0x70   : > { %p10558_p6 = pneg %p10960_p5 }
  0x71   : > { %p10577_p12 = por %p10576_p11, %p10575_p10 }
  0x72   : > { %p10570_p8 = pnand %p10568_p7, %p10558_p6 }
  0x74   : > { %p10571_p9 = pneg %p10570_p8 }
  0x76   : > { %p10578_p13 = pnand %p10577_p12, %p10571_p9 }
  0x78   : > { %10581 = shalt.err (!%p10578_p13)
}
  0x79   : > { %10303 = dma.hbm_to_vmem [thread:$0]  (!%p10960_p5), %s10919_s12, 16, %s1350_s22, [#allocation3]  }
  0x7a   : > { %s10593_s7 = scalar_lea.vmem %s1367_s26, 16  ;;  %s10600_s10 = scalar_lea.vmem %s1367_s26, 32 }
  0x7b   : > { %p10594_p0 = scmp.ne.s32.totalorder %s1367_s26, %s10593_s7  ;;  %p10601_p7 = scmp.lt.s32.totalorder %s1367_s26, %s1367_s26 }
  0x7c   : > { %p10602_p8 = scmp.lt.s32.totalorder %s10600_s10, %s10593_s7 }
  0x7d   : > { %p10596_p1 = pnand %p10594_p0, %p10558_p6 }
  0x7e   : > { %p10603_p2 = por %p10602_p8, %p10601_p7 }
  0x7f   : > { %p10597_p4 = pneg %p10596_p1 }
  0x81   : > { %p10604_p3 = pnand %p10603_p2, %p10597_p4 }
  0x83   : > { %10607 = shalt.err (!%p10604_p3)
}
  0x84   : > { %s13553_s4 = sld [smem:[#allocation43_spill]]  ;;  %p13554_p9 = scmp.ne.s32.totalorder %s13551_s0, 0 }
  0x86   : > { %1395 = sbr.rel (%p13554_p9) target bundleno = 5234 (0x1472), region = 220 }
  0x8a   : > { %10306 = dma.hbm_to_vmem [thread:$0]  (!%p10960_p5), %s13553_s4, 16, %s1367_s26, [#allocation5]  }
  0x8b   : > { %p13555_p10 = scmp.eq.s32.totalorder %s10947_s16, 0 }
  0x8d   : > { %10613 = dma.done.wait (%p13555_p10), [#allocation3], 16   ;;  %p13556_p11 = pmov %p13555_p10 }
  0x8e   : > { %p13557_p6 = pmov %p13555_p10 }
  0x8f   : > { %10615 = vsyncadd (%p13556_p11), [#allocation3], 4294967280 }
  0x90   : > { %10617 = dma.done.wait (%p13557_p6), [#allocation5], 16   ;;  %p13558_p12 = pmov %p13557_p6 }
  0x91   : > { %s13559_s5 = sld [smem:[#allocation8_spill]]  ;;  %v13461_v0 = vmov 0.0   ;;  %v13459_v1 = vmov 0   ;;  %p1521_p2 = scmp.lt.s32.totalorder %s10947_s16, 1  ;;  %vm10678_vm0 = vmmov 0   ;;  %vm1657_vm1 = vcmask 1046528  }
  0x92   : > { %10619 = vsyncadd (%p13558_p12), [#allocation5], 4294967280  ;;  %9663 = vmatprep.subr.bf16.mxu1 %v13461_v0  ;;  %1699 = vmatprep.mubr.bf16.mxu0 %v13459_v1  ;;  %v10376_v2 = vld [vmem:[%s10699_s13 + $0x1c] ss:$12 sps:$4 sm:$0x7f]   ;;  %vm1635_vm3 = vcmask 113664  }
  0x93   : > { %9665 = vmatprep.mubr.msk.bf16.mxu1 %vm10678_vm0, %v13461_v0  ;;  %s13767_s16 = smov (!%p1521_p2, %s10947_s16), 1  ;;  %v10378_v3 = vld [vmem:[%s10699_s13 + $0x18] ss:$12 sps:$4 sm:$0x7f]   ;;  %8701 = vmatprep.subr.msk.bf16.mxu0 %vm1657_vm1, %v10376_v2  ;;  %vm1566_vm2 = vsmask.f32 7424 }
  0x94   : > { %s10290_s11 = smul.u32 112, %s13767_s16  ;;  %v10379_v5 = vld [vmem:[%s10699_s13 + $0x20] ss:$12 sps:$4 sm:$0x7f]   ;;  %v1659_v7 = vsel %vm1657_vm1, %v10378_v3, 0  ;;  %vm3333_vm4 = vcmask 1045504  }
  0x95   : > { %1682 = vmatpush1.bf16.msra.mxu0 %v1659_v7  ;;  %v1665_v12 = vsel %vm1657_vm1, %v10379_v5, 0  ;;  %v10380_v21 = vld [vmem:[%s10699_s13 + $0x8] ss:$12 sps:$4 sm:$0x7f]   ;;  %vm3314_vm5 = vcmask 900096   ;;  %vm3865_vm6 = vcmask 523264  }
  0x96   : > { %9664 = vmatpush3.bf16.msra.mxu1 %v1665_v12  ;;  %v1893_v27 = vsel %vm1657_vm1, %v10380_v21, 0  ;;  %v10381_v28 = vld [vmem:[%s10699_s13 + $0x4] ss:$12 sps:$4 sm:$0x7f]   ;;  %v2518_v21 = vld [vmem:[%s10709_s21 + $0xd8] sm:$0xff]  ;;  %vm4674_vm7 = vcmask 375808  }
  0x97   : > { %s10999_s0 = scalar_lea.vmem %s13559_s5, %s10290_s11  ;;  %9693 = vmatprep.subr.bf16.mxu1 %v13461_v0  ;;  %v10383_v30 = vld [vmem:[%s10699_s13] ss:$12 sps:$4 sm:$0x7f]   ;;  %8719 = vmatprep.subr.msk.bf16.mxu0 %vm1657_vm1, %v10381_v28  ;;  %v10384_v5 = vld [vmem:[%s10699_s13 + $0x38] ss:$12 sps:$4 sm:$0x7f]  }
  0x98   : > { %v1536_v4 = vld [vmem:[%s10999_s0] sm:$0xff]  ;;  %v1537_v6 = vld [vmem:[%s10999_s0 + $0x8] sm:$0xff]  ;;  %v1538_v8 = vld [vmem:[%s10999_s0 + $0x10] sm:$0xff]  ;;  %v1887_v34 = vsel %vm1657_vm1, %v10383_v30, 0  ;;  %vm4859_vm8 = vcmask 130048   ;;  %s13732_s18 = sld [smem:[#allocation16_spill]] }
  0x99   : > { %v1539_v9 = vld [vmem:[%s10999_s0 + $0x18] sm:$0xff]  ;;  %v11009_v10 = vpack.c.bf16 %v1537_v6, %v1536_v4  ;;  %v1540_v11 = vld [vmem:[%s10999_s0 + $0x20] sm:$0xff]  ;;  %v1541_v14 = vld [vmem:[%s10999_s0 + $0x28] sm:$0xff]  ;;  %s13733_s22 = sld [smem:[#allocation9_spill]]  ;;  %s10291_s26 = smul.u32 56, %s13767_s16  ;;  %vm5432_vm9 = vcmask 228352  }
  0x9a   : > { %v11013_v13 = vpack.c.bf16 %v1539_v9, %v1538_v8  ;;  %v11018_v17 = vpack.c.bf16 %v1541_v14, %v1540_v11  ;;  %v1542_v25 = vld [vmem:[%s10999_s0 + $0x30] sm:$0xff]  ;;  %v1543_v26 = vld [vmem:[%s10999_s0 + $0x38] sm:$0xff]  ;;  %v1544_v36 = vld [vmem:[%s10999_s0 + $0x40] sm:$0xff]  ;;  %v2154_v8 = vsel %vm1657_vm1, %v10384_v5, 0  ;;  %s13734_s23 = sld [smem:[#allocation13_spill]]  ;;  %vm6068_vm10 = vcmask 441344  }
  0x9b   : > { %v1568_v15 = vshrl.u32 %v11009_v10, 16  ;;  %v1570_v16 = vshll.u32 %v11009_v10, 16  ;;  %v11036_v33 = vpack.c.bf16 %v1543_v26, %v1542_v25  ;;  %v10385_v35 = vld [vmem:[%s10699_s13 + $0x34] ss:$12 sps:$4 sm:$0x7f]   ;;  %v1545_v37 = vld [vmem:[%s10999_s0 + $0x48] sm:$0xff] }
  0x9c   : > { %v1575_v18 = vshll.u32 %v11013_v13, 16  ;;  %v1579_v23 = vshrl.u32 %v11013_v13, 16  ;;  %v1583_v24 = vshll.u32 %v11018_v17, 16  ;;  %v1587_v39 = vshrl.u32 %v11018_v17, 16  ;;  %v1546_v44 = vld [vmem:[%s10999_s0 + $0x50] sm:$0xff]  ;;  %v1547_v45 = vld [vmem:[%s10999_s0 + $0x58] sm:$0xff] }
  0x9d   : > { %v1572_v19 = vrot.slane %v1570_v16, 1  ;;  %v1591_v40 = vshll.u32 %v11036_v33, 16  ;;  %v11053_v43 = vpack.c.bf16 %v1545_v37, %v1544_v36  ;;  %v1595_v47 = vshrl.u32 %v11036_v33, 16  ;;  %v1548_v49 = vld [vmem:[%s10999_s0 + $0x60] sm:$0xff]  ;;  %v1549_v50 = vld [vmem:[%s10999_s0 + $0x68] sm:$0xff]  ;;  %v2522_v16 = vld [vmem:[%s10709_s21 + $0xf8] sm:$0xff] }
  0x9e   : > { %v1577_v20 = vrot.slane %v1575_v18, 1  ;;  %v1585_v32 = vrot.slane %v1583_v24, 1  ;;  %v11067_v53 = vpack.c.bf16 %v1547_v45, %v1546_v44  ;;  %v11069_v54 = vpack.c.bf16 %v1549_v50, %v1548_v49  ;;  %v10387_v6 = vld [vmem:[%s10699_s13 + $0x30] ss:$12 sps:$4 sm:$0x7f]   ;;  %v2520_v18 = vld [vmem:[%s10709_s21 + $0xe8] sm:$0xff] }
  0x9f   : > { %v1573_v22 = vor.u32 %v1572_v19, %v1568_v15  ;;  %v1593_v42 = vrot.slane %v1591_v40, 1  ;;  %v1599_v48 = vshll.u32 %v11053_v43, 16  ;;  %v1603_v56 = vshrl.u32 %v11053_v43, 16  ;;  %v2519_v19 = vld [vmem:[%s10709_s21 + $0xe0] sm:$0xff]  ;;  %v2514_v26 = vld [vmem:[%s10709_s21 + $0xb8] sm:$0xff]  ;;  %v2512_v28 = vld [vmem:[%s10709_s21 + $0xa8] sm:$0xff]  ;;  %s12654_s28 = scalar_lea.vmem %s13733_s22, %s10291_s26 }
  0xa0   : > { %v1581_v31 = vor.u32 %v1579_v23, %v1577_v20  ;;  %v1589_v41 = vor.u32 %v1587_v39, %v1585_v32  ;;  %v1607_v57 = vshll.u32 %v11067_v53, 16  ;;  %v1615_v58 = vshll.u32 %v11069_v54, 16  ;;  %v2516_v23 = vld [vmem:[%s10709_s21 + $0xc8] sm:$0xff]  ;;  %v2515_v24 = vld [vmem:[%s10709_s21 + $0xc0] sm:$0xff]  ;;  %v2506_v36 = vld [vmem:[%s10709_s21 + $0x78] sm:$0xff]  ;;  %s13736_s1 = sld [smem:[#allocation18_spill]] }
  0xa1   : > { %v1578_v29 = vsel %vm1566_vm2, %v1573_v22, %v1577_v20  ;;  %v1597_v51 = vor.u32 %v1595_v47, %v1593_v42  ;;  %v1601_v52 = vrot.slane %v1599_v48, 1  ;;  %v1611_v61 = vshrl.u32 %v11067_v53, 16  ;;  %v2517_v22 = vld [vmem:[%s10709_s21 + $0xd0] sm:$0xff]  ;;  %v2504_v39 = vld [vmem:[%s10709_s21 + $0x68] sm:$0xff]  ;;  %v2503_v40 = vld [vmem:[%s10709_s21 + $0x60] sm:$0xff]  ;;  %s13737_s2 = sld [smem:[#allocation11_spill]] }
  0xa2   : > { %8702 = vmatmul.mubr.msk.bf16.vlgmr.msra.gmra.mxu0 %vm1635_vm3, %v1578_v29  ;;  %9666 = vmatmul.mubr.msk.bf16.vlgmr.msra.gmra.mxu1 %vm1635_vm3, %v1578_v29  ;;  %v1586_v38 = vsel %vm1566_vm2, %v1581_v31, %v1585_v32  ;;  %v1594_v46 = vsel %vm1566_vm2, %v1589_v41, %v1593_v42  ;;  %v1609_v60 = vrot.slane %v1607_v57, 1  ;;  %v1617_v62 = vrot.slane %v1615_v58, 1  ;;  %v2511_v29 = vld [vmem:[%s10709_s21 + $0xa0] sm:$0xff]  ;;  %v2510_v31 = vld [vmem:[%s10709_s21 + $0x98] sm:$0xff]  ;;  %v2509_v32 = vld [vmem:[%s10709_s21 + $0x90] sm:$0xff]  ;;  %s13738_s7 = sld [smem:[#allocation12_spill]] }
  0xa3   : > { %1709 = vmatprep.mubr.bf16.mxu0 %v13459_v1  ;;  %9669 = vmatprep.mubr.msk.bf16.mxu1 %vm10678_vm0, %v13461_v0  ;;  %v1602_v55 = vsel %vm1566_vm2, %v1597_v51, %v1601_v52  ;;  %v1605_v59 = vor.u32 %v1603_v56, %v1601_v52  ;;  %v1619_v4 = vshrl.u32 %v11069_v54, 16  ;;  %v2148_v9 = vsel %vm1657_vm1, %v10387_v6, 0  ;;  %v2505_v37 = vld [vmem:[%s10709_s21 + $0x70] sm:$0xff]  ;;  %v2502_v42 = vld [vmem:[%s10709_s21 + $0x58] sm:$0xff]  ;;  %v2500_v44 = vld [vmem:[%s10709_s21 + $0x48] sm:$0xff]  ;;  %s13739_s10 = sld [smem:[#allocation17_spill]] }
  0xa4   : > { %9694 = vmatpush3.bf16.msra.mxu1 %v1893_v27  ;;  %1910 = vmatpush1.bf16.msra.mxu0 %v1887_v34  ;;  %v1613_v2 = vor.u32 %v1611_v61, %v1609_v60  ;;  %v2100_v11 = vrot.slane %v11009_v10, 1  ;;  %v2101_v12 = vrot.slane %v11013_v13, 1  ;;  %v2103_v15 = vrot.slane %v11018_v17, 1  ;;  %v2513_v27 = vld [vmem:[%s10709_s21 + $0xb0] sm:$0xff]  ;;  %v2508_v34 = vld [vmem:[%s10709_s21 + $0x88] sm:$0xff]  ;;  %v2499_v45 = vld [vmem:[%s10709_s21 + $0x40] sm:$0xff] }
  0xa5   : > { %9723 = vmatprep.subr.bf16.mxu1 %v13461_v0  ;;  %8741 = vmatprep.subr.msk.bf16.mxu0 %vm1657_vm1, %v10385_v35  ;;  %v1610_v63 = vsel %vm1566_vm2, %v1605_v59, %v1609_v60  ;;  %v1621_v7 = vor.u32 %v1619_v4, %v1617_v62  ;;  %v2107_v25 = vrot.slane %v11053_v43, 1  ;;  %v2507_v35 = vld [vmem:[%s10709_s21 + $0x80] sm:$0xff]  ;;  %v2111_v41 = vrot.slane %v11069_v54, 1  ;;  %v2586_v47 = vld [vmem:[%s10709_s21 + $0x2f8] sm:$0xff]  ;;  %v2585_v48 = vld [vmem:[%s10709_s21 + $0x2f0] sm:$0xff]  ;;  %s13740_s11 = sld [smem:[#allocation19_spill]] }
  0xa6   : > { %v1618_v3 = vsel %vm1566_vm2, %v1613_v2, %v1617_v62  ;;  %v2102_v14 = vsel %vm1657_vm1, %v2100_v11, %v2101_v12  ;;  %v2498_v49 = vld [vmem:[%s10709_s21 + $0x38] sm:$0xff]  ;;  %v2584_v50 = vld [vmem:[%s10709_s21 + $0x2e8] sm:$0xff]  ;;  %v2497_v51 = vld [vmem:[%s10709_s21 + $0x30] sm:$0xff]  ;;  %s13741_s0 = sld [smem:[#allocation21_spill]]  ;;  %vm6353_vm11 = vcmask 785408   ;;  %vm6814_vm12 = vcmask 179200  }
  0xa7   : > { %v2583_v52 = vld [vmem:[%s10709_s21 + $0x2e0] sm:$0xff]  ;;  %v2581_v56 = vld [vmem:[%s10709_s21 + $0x2d0] sm:$0xff]  ;;  %v2494_v57 = vld [vmem:[%s10709_s21 + $0x18] sm:$0xff]  ;;  %s13742_s22 = sld [smem:[#allocation20_spill]]  ;;  %vm6982_vm13 = vcmask 64512   ;;  %vm7700_vm14 = vcmask 261120  }
  0xa8   : > { %v2580_v58 = vld [vmem:[%s10709_s21 + $0x2c8] sm:$0xff]  ;;  %v2493_v59 = vld [vmem:[%s10709_s21 + $0x10] sm:$0xff]  ;;  %v2579_v60 = vld [vmem:[%s10709_s21 + $0x2c0] sm:$0xff]  ;;  %s13743_s26 = sld [smem:[#allocation23_spill]]  ;;  %vm8532_vm15 = vcmask 76800  }
  0xa9   : > { %v2492_v61 = vld [vmem:[%s10709_s21 + $0x8] sm:$0xff]  ;;  %v2578_v62 = vld [vmem:[%s10709_s21 + $0x2b8] sm:$0xff]  ;;  %v2577_v2 = vld [vmem:[%s10709_s21 + $0x2b0] sm:$0xff]  ;;  %s13764_s5 = sld [smem:[#allocation42_spill]] }
  0xaa   : > { %8703 = vmatmul.mubr.msk.bf16.gmra.mxu0 %vm1635_vm3, %v1586_v38  ;;  %9670 = vmatmul.mubr.msk.bf16.gmra.mxu1 %vm1635_vm3, %v1586_v38  ;;  %v2576_v4 = vld [vmem:[%s10709_s21 + $0x2a8] sm:$0xff]  ;;  %v2553_v5 = vld [vmem:[%s10709_s21 + $0x1f0] sm:$0xff]  ;;  %v2575_v6 = vld [vmem:[%s10709_s21 + $0x2a0] sm:$0xff] }
  0xab   : > { %1719 = vmatprep.mubr.bf16.mxu0 %v13459_v1  ;;  %9673 = vmatprep.mubr.msk.bf16.mxu1 %vm10678_vm0, %v13461_v0  ;;  %v2573_v11 = vld [vmem:[%s10709_s21 + $0x290] sm:$0xff] }
  0xb2   : > { %8704 = vmatmul.mubr.msk.bf16.gmra.mxu0 %vm1635_vm3, %v1594_v46  ;;  %9674 = vmatmul.mubr.msk.bf16.gmra.mxu1 %vm1635_vm3, %v1594_v46 }
  0xb3   : > { %1729 = vmatprep.mubr.bf16.mxu0 %v13459_v1  ;;  %9677 = vmatprep.mubr.msk.bf16.mxu1 %vm10678_vm0, %v13461_v0 }
  0xba   : > { %8705 = vmatmul.mubr.msk.bf16.gmra.mxu0 %vm1635_vm3, %v1602_v55  ;;  %9678 = vmatmul.mubr.msk.bf16.gmra.mxu1 %vm1635_vm3, %v1602_v55  ;;  %v2495_v55 = vld [vmem:[%s10709_s21 + $0x20] sm:$0xff] }
  0xbb   : > { %1739 = vmatprep.mubr.bf16.mxu0 %v13459_v1  ;;  %9681 = vmatprep.mubr.msk.bf16.mxu1 %vm10678_vm0, %v13461_v0 }
  0xc2   : > { %8706 = vmatmul.mubr.msk.bf16.gmra.mxu0 %vm1635_vm3, %v1610_v63  ;;  %9682 = vmatmul.mubr.msk.bf16.gmra.mxu1 %vm1635_vm3, %v1610_v63  ;;  %v2491_v63 = vld [vmem:[%s10709_s21] sm:$0xff] }
  0xc3   : > { %1749 = vmatprep.mubr.bf16.mxu0 %v13459_v1  ;;  %9685 = vmatprep.mubr.msk.bf16.mxu1 %vm10678_vm0, %v13461_v0 }
  0xca   : > { %8707 = vmatmul.mubr.msk.bf16.gmra.mxu0 %vm1635_vm3, %v1618_v3  ;;  %9686 = vmatmul.mubr.msk.bf16.gmra.mxu1 %vm1635_vm3, %v1618_v3  ;;  %v2554_v3 = vld [vmem:[%s10709_s21 + $0x1f8] sm:$0xff] }
  0xcb   : > { %1759 = vmatprep.mubr.bf16.mxu0 %v13459_v1  ;;  %9689 = vmatprep.mubr.msk.bf16.mxu1 %vm10678_vm0, %v13461_v0 }
  0xd2   : > { %8708 = vmatmul.mubr.msk.bf16.gmra.mxu0 %vm1635_vm3, %v1621_v7  ;;  %9690 = vmatmul.mubr.msk.bf16.gmra.mxu1 %vm1635_vm3, %v1621_v7  ;;  %v2552_v7 = vld [vmem:[%s10709_s21 + $0x1e8] sm:$0xff] }
  0xd3   : > { %1927 = vmatprep.mubr.bf16.mxu0 %v13459_v1  ;;  %9695 = vmatprep.mubr.msk.bf16.mxu1 %vm10678_vm0, %v13461_v0 }
  0xda   : > { %8720 = vmatmul.mubr.msk.bf16.vlgmr.msra.gmra.mxu0 %vm1635_vm3, %v11009_v10  ;;  %9696 = vmatmul.mubr.msk.bf16.vlgmr.msra.gmra.mxu1 %vm1635_vm3, %v11009_v10  ;;  %v2104_v10 = vsel %vm1657_vm1, %v2101_v12, %v2103_v15  ;;  %v2550_v12 = vld [vmem:[%s10709_s21 + $0x1d8] sm:$0xff] }
  0xdb   : > { %1937 = vmatprep.mubr.bf16.mxu0 %v13459_v1  ;;  %9699 = vmatprep.mubr.msk.bf16.mxu1 %vm10678_vm0, %v13461_v0 }
  0xdc   : > { %9724 = vmatpush3.bf16.msra.mxu1 %v2154_v8  ;;  %2171 = vmatpush1.bf16.msra.mxu0 %v2148_v9  ;;  %v2574_v8 = vld [vmem:[%s10709_s21 + $0x298] sm:$0xff]  ;;  %v2551_v9 = vld [vmem:[%s10709_s21 + $0x1e0] sm:$0xff] }
  0xdd   : > { %2587 = vmatprep.subr.mxu0 %v2522_v16  ;;  %2736 = vmatprep.subr.mxu1 %v2586_v47  ;;  %v2570_v16 = vld [vmem:[%s10709_s21 + $0x278] sm:$0xff]  ;;  %v2532_v47 = vld [vmem:[%s10709_s21 + $0x148] sm:$0xff] }
  0xe2   : > { %8721 = vmatmul.mubr.msk.bf16.gmra.mxu0 %vm1635_vm3, %v11013_v13  ;;  %9700 = vmatmul.mubr.msk.bf16.gmra.mxu1 %vm1635_vm3, %v11013_v13  ;;  %v2105_v13 = vrot.slane %v11036_v33, 1 }
  0xe3   : > { %1947 = vmatprep.mubr.bf16.mxu0 %v13459_v1  ;;  %9703 = vmatprep.mubr.msk.bf16.mxu1 %vm10678_vm0, %v13461_v0 }
  0xe4   : > { %v2106_v20 = vsel %vm1657_vm1, %v2103_v15, %v2105_v13  ;;  %v2108_v30 = vsel %vm1657_vm1, %v2105_v13, %v2107_v25  ;;  %v2549_v15 = vld [vmem:[%s10709_s21 + $0x1d0] sm:$0xff]  ;;  %v2548_v13 = vld [vmem:[%s10709_s21 + $0x1c8] sm:$0xff] }
  0xea   : > { %8722 = vmatmul.mubr.msk.bf16.gmra.mxu0 %vm1635_vm3, %v11018_v17  ;;  %9704 = vmatmul.mubr.msk.bf16.gmra.mxu1 %vm1635_vm3, %v11018_v17  ;;  %v2521_v17 = vld [vmem:[%s10709_s21 + $0xf0] sm:$0xff] }
  0xeb   : > { %1957 = vmatprep.mubr.bf16.mxu0 %v13459_v1  ;;  %9707 = vmatprep.mubr.msk.bf16.mxu1 %vm10678_vm0, %v13461_v0 }
  0xf2   : > { %8723 = vmatmul.mubr.msk.bf16.gmra.mxu0 %vm1635_vm3, %v11036_v33  ;;  %9708 = vmatmul.mubr.msk.bf16.gmra.mxu1 %vm1635_vm3, %v11036_v33  ;;  %v2109_v33 = vrot.slane %v11067_v53, 1 }
  0xf3   : > { %1967 = vmatprep.mubr.bf16.mxu0 %v13459_v1  ;;  %9711 = vmatprep.mubr.msk.bf16.mxu1 %vm10678_vm0, %v13461_v0 }
  0xf4   : > { %v2110_v38 = vsel %vm1657_vm1, %v2107_v25, %v2109_v33  ;;  %v2112_v46 = vsel %vm1657_vm1, %v2109_v33, %v2111_v41  ;;  %v2543_v25 = vld [vmem:[%s10709_s21 + $0x1a0] sm:$0xff] }
  0xf5   : > { %v2539_v33 = vld [vmem:[%s10709_s21 + $0x180] sm:$0xff] }
  0xfa   : > { %8724 = vmatmul.mubr.msk.bf16.gmra.mxu0 %vm1635_vm3, %v11053_v43  ;;  %9712 = vmatmul.mubr.msk.bf16.gmra.mxu1 %vm1635_vm3, %v11053_v43  ;;  %v2501_v43 = vld [vmem:[%s10709_s21 + $0x50] sm:$0xff] }
  0xfb   : > { %1977 = vmatprep.mubr.bf16.mxu0 %v13459_v1  ;;  %9715 = vmatprep.mubr.msk.bf16.mxu1 %vm10678_vm0, %v13461_v0 }
 0x102   : > { %8725 = vmatmul.mubr.msk.bf16.gmra.mxu0 %vm1635_vm3, %v11067_v53  ;;  %9716 = vmatmul.mubr.msk.bf16.gmra.mxu1 %vm1635_vm3, %v11067_v53  ;;  %v2496_v53 = vld [vmem:[%s10709_s21 + $0x28] sm:$0xff] }
 0x103   : > { %1987 = vmatprep.mubr.bf16.mxu0 %v13459_v1  ;;  %9719 = vmatprep.mubr.msk.bf16.mxu1 %vm10678_vm0, %v13461_v0 }
 0x10a   : > { %8726 = vmatmul.mubr.msk.bf16.gmra.mxu0 %vm1635_vm3, %v11069_v54  ;;  %9720 = vmatmul.mubr.msk.bf16.gmra.mxu1 %vm1635_vm3, %v11069_v54  ;;  %v2582_v54 = vld [vmem:[%s10709_s21 + $0x2d8] sm:$0xff] }
 0x10b   : > { %2188 = vmatprep.mubr.bf16.mxu0 %v13459_v1  ;;  %9725 = vmatprep.mubr.msk.bf16.mxu1 %vm10678_vm0, %v13461_v0 }
 0x112   : > { %8742 = vmatmul.mubr.msk.bf16.vlgmr.msra.gmra.mxu0 %vm1635_vm3, %v2102_v14  ;;  %9726 = vmatmul.mubr.msk.bf16.vlgmr.msra.gmra.mxu1 %vm1635_vm3, %v2102_v14  ;;  %v2572_v14 = vld [vmem:[%s10709_s21 + $0x288] sm:$0xff] }
 0x113   : > { %2198 = vmatprep.mubr.bf16.mxu0 %v13459_v1  ;;  %9729 = vmatprep.mubr.msk.bf16.mxu1 %vm10678_vm0, %v13461_v0 }
 0x114   : > { %2588 = vmatpush1.msra.mxu0 %v2521_v17  ;;  %2737 = vmatpush1.msra.mxu1 %v2585_v48  ;;  %v2547_v17 = vld [vmem:[%s10709_s21 + $0x1c0] sm:$0xff] }
 0x115   : > { %2589 = vmatprep.subr.mxu0 %v2520_v18  ;;  %2738 = vmatprep.subr.mxu1 %v2584_v50  ;;  %v2569_v18 = vld [vmem:[%s10709_s21 + $0x270] sm:$0xff]  ;;  %v2531_v48 = vld [vmem:[%s10709_s21 + $0x140] sm:$0xff]  ;;  %v2530_v50 = vld [vmem:[%s10709_s21 + $0x138] sm:$0xff] }
 0x116   : > { %2590 = vmatpush1.msra.mxu0 %v2519_v19  ;;  %2739 = vmatpush1.msra.mxu1 %v2583_v52  ;;  %v2546_v19 = vld [vmem:[%s10709_s21 + $0x1b8] sm:$0xff]  ;;  %v2528_v52 = vld [vmem:[%s10709_s21 + $0x128] sm:$0xff] }
 0x117   : > { %2591 = vmatprep.subr.mxu0 %v2518_v21  ;;  %2740 = vmatprep.subr.mxu1 %v2582_v54  ;;  %v2545_v21 = vld [vmem:[%s10709_s21 + $0x1b0] sm:$0xff]  ;;  %v2526_v54 = vld [vmem:[%s10709_s21 + $0x118] sm:$0xff] }
 0x118   : > { %2592 = vmatpush1.msra.mxu0 %v2517_v22  ;;  %2741 = vmatpush1.msra.mxu1 %v2581_v56  ;;  %v2567_v22 = vld [vmem:[%s10709_s21 + $0x260] sm:$0xff]  ;;  %v2524_v56 = vld [vmem:[%s10709_s21 + $0x108] sm:$0xff] }
 0x119   : > { %2593 = vmatprep.subr.mxu0 %v2516_v23  ;;  %2742 = vmatprep.subr.mxu1 %v2580_v58  ;;  %v2544_v23 = vld [vmem:[%s10709_s21 + $0x1a8] sm:$0xff] }
 0x11a   : > { %8743 = vmatmul.mubr.msk.bf16.gmra.mxu0 %vm1635_vm3, %v2104_v10  ;;  %9730 = vmatmul.mubr.msk.bf16.gmra.mxu1 %vm1635_vm3, %v2104_v10  ;;  %v2571_v10 = vld [vmem:[%s10709_s21 + $0x280] sm:$0xff] }
 0x11b   : > { %2208 = vmatprep.mubr.bf16.mxu0 %v13459_v1  ;;  %9733 = vmatprep.mubr.msk.bf16.mxu1 %vm10678_vm0, %v13461_v0 }
 0x11c   : > { %2594 = vmatpush1.msra.mxu0 %v2515_v24  ;;  %2743 = vmatpush1.msra.mxu1 %v2579_v60  ;;  %v2566_v24 = vld [vmem:[%s10709_s21 + $0x258] sm:$0xff] }
 0x11d   : > { %2595 = vmatprep.subr.mxu0 %v2514_v26  ;;  %2744 = vmatprep.subr.mxu1 %v2578_v62  ;;  %v2565_v26 = vld [vmem:[%s10709_s21 + $0x250] sm:$0xff] }
 0x11e   : > { %2596 = vmatpush1.msra.mxu0 %v2513_v27  ;;  %2745 = vmatpush1.msra.mxu1 %v2577_v2  ;;  %v2542_v27 = vld [vmem:[%s10709_s21 + $0x198] sm:$0xff] }
 0x11f   : > { %2597 = vmatprep.subr.mxu0 %v2512_v28  ;;  %2746 = vmatprep.subr.mxu1 %v2576_v4  ;;  %v2564_v28 = vld [vmem:[%s10709_s21 + $0x248] sm:$0xff] }
 0x120   : > { %2598 = vmatpush1.msra.mxu0 %v2511_v29  ;;  %2747 = vmatpush1.msra.mxu1 %v2575_v6  ;;  %v2541_v29 = vld [vmem:[%s10709_s21 + $0x190] sm:$0xff] }
 0x121   : > { %2599 = vmatprep.subr.mxu0 %v2510_v31  ;;  %2748 = vmatprep.subr.mxu1 %v2574_v8  ;;  %v2540_v31 = vld [vmem:[%s10709_s21 + $0x188] sm:$0xff] }
 0x122   : > { %8744 = vmatmul.mubr.msk.bf16.gmra.mxu0 %vm1635_vm3, %v2106_v20  ;;  %9734 = vmatmul.mubr.msk.bf16.gmra.mxu1 %vm1635_vm3, %v2106_v20  ;;  %v2568_v20 = vld [vmem:[%s10709_s21 + $0x268] sm:$0xff] }
 0x123   : > { %2218 = vmatprep.mubr.bf16.mxu0 %v13459_v1  ;;  %9737 = vmatprep.mubr.msk.bf16.mxu1 %vm10678_vm0, %v13461_v0 }
 0x124   : > { %2600 = vmatpush1.msra.mxu0 %v2509_v32  ;;  %2749 = vmatpush1.msra.mxu1 %v2573_v11  ;;  %v2562_v32 = vld [vmem:[%s10709_s21 + $0x238] sm:$0xff] }
 0x125   : > { %2601 = vmatprep.subr.mxu0 %v2508_v34  ;;  %2750 = vmatprep.subr.mxu1 %v2572_v14  ;;  %v2561_v34 = vld [vmem:[%s10709_s21 + $0x230] sm:$0xff] }
 0x126   : > { %2602 = vmatpush1.msra.mxu0 %v2507_v35  ;;  %2751 = vmatpush1.msra.mxu1 %v2571_v10  ;;  %v2538_v35 = vld [vmem:[%s10709_s21 + $0x178] sm:$0xff] }
 0x127   : > { %2603 = vmatprep.subr.mxu0 %v2506_v36  ;;  %2752 = vmatprep.subr.mxu1 %v2570_v16  ;;  %v2560_v36 = vld [vmem:[%s10709_s21 + $0x228] sm:$0xff]  ;;  %v8851_v16 = vld [vmem:[%s10709_s21 + $0x5f8] sm:$0xff] }
 0x128   : > { %2604 = vmatpush1.msra.mxu0 %v2505_v37  ;;  %2753 = vmatpush1.msra.mxu1 %v2569_v18  ;;  %v2537_v37 = vld [vmem:[%s10709_s21 + $0x170] sm:$0xff] }
 0x129   : > { %2605 = vmatprep.subr.mxu0 %v2504_v39  ;;  %2754 = vmatprep.subr.mxu1 %v2568_v20  ;;  %v2536_v39 = vld [vmem:[%s10709_s21 + $0x168] sm:$0xff] }
 0x12a   : > { %8745 = vmatmul.mubr.msk.bf16.gmra.mxu0 %vm1635_vm3, %v2108_v30  ;;  %9738 = vmatmul.mubr.msk.bf16.gmra.mxu1 %vm1635_vm3, %v2108_v30  ;;  %v2563_v30 = vld [vmem:[%s10709_s21 + $0x240] sm:$0xff] }
 0x12b   : > { %2228 = vmatprep.mubr.bf16.mxu0 %v13459_v1  ;;  %9741 = vmatprep.mubr.msk.bf16.mxu1 %vm10678_vm0, %v13461_v0 }
 0x12c   : > { %2606 = vmatpush1.msra.mxu0 %v2503_v40  ;;  %2755 = vmatpush1.msra.mxu1 %v2567_v22  ;;  %v2558_v40 = vld [vmem:[%s10709_s21 + $0x218] sm:$0xff] }
 0x12d   : > { %2607 = vmatprep.subr.mxu0 %v2502_v42  ;;  %2756 = vmatprep.subr.mxu1 %v2566_v24  ;;  %v2557_v42 = vld [vmem:[%s10709_s21 + $0x210] sm:$0xff] }
 0x12e   : > { %2608 = vmatpush1.msra.mxu0 %v2501_v43  ;;  %2757 = vmatpush1.msra.mxu1 %v2565_v26  ;;  %v2534_v43 = vld [vmem:[%s10709_s21 + $0x158] sm:$0xff] }
 0x12f   : > { %2609 = vmatprep.subr.mxu0 %v2500_v44  ;;  %2758 = vmatprep.subr.mxu1 %v2564_v28  ;;  %v2556_v44 = vld [vmem:[%s10709_s21 + $0x208] sm:$0xff] }
 0x130   : > { %2610 = vmatpush1.msra.mxu0 %v2499_v45  ;;  %2759 = vmatpush1.msra.mxu1 %v2563_v30  ;;  %v2533_v45 = vld [vmem:[%s10709_s21 + $0x150] sm:$0xff] }
 0x131   : > { %2611 = vmatprep.subr.mxu0 %v2498_v49  ;;  %2760 = vmatprep.subr.mxu1 %v2562_v32  ;;  %v8787_v49 = vld [vmem:[%s10709_s21 + $0x3f8] sm:$0xff] }
 0x132   : > { %8746 = vmatmul.mubr.msk.bf16.gmra.mxu0 %vm1635_vm3, %v2110_v38  ;;  %9742 = vmatmul.mubr.msk.bf16.gmra.mxu1 %vm1635_vm3, %v2110_v38  ;;  %v2559_v38 = vld [vmem:[%s10709_s21 + $0x220] sm:$0xff] }
 0x133   : > { %2238 = vmatprep.mubr.bf16.mxu0 %v13459_v1  ;;  %9745 = vmatprep.mubr.msk.bf16.mxu1 %vm10678_vm0, %v13461_v0 }
 0x134   : > { %2612 = vmatpush1.msra.mxu0 %v2497_v51  ;;  %2761 = vmatpush1.msra.mxu1 %v2561_v34  ;;  %v2529_v51 = vld [vmem:[%s10709_s21 + $0x130] sm:$0xff] }
 0x135   : > { %2613 = vmatprep.subr.mxu0 %v2496_v53  ;;  %2762 = vmatprep.subr.mxu1 %v2560_v36  ;;  %v2527_v53 = vld [vmem:[%s10709_s21 + $0x120] sm:$0xff] }
 0x136   : > { %2614 = vmatpush1.msra.mxu0 %v2495_v55  ;;  %2763 = vmatpush1.msra.mxu1 %v2559_v38  ;;  %v2525_v55 = vld [vmem:[%s10709_s21 + $0x110] sm:$0xff] }
 0x137   : > { %2615 = vmatprep.subr.mxu0 %v2494_v57  ;;  %2764 = vmatprep.subr.mxu1 %v2558_v40  ;;  %v2523_v57 = vld [vmem:[%s10709_s21 + $0x100] sm:$0xff] }
 0x138   : > { %2616 = vmatpush1.msra.mxu0 %v2493_v59  ;;  %2765 = vmatpush1.msra.mxu1 %v2557_v42 }
 0x139   : > { %2617 = vmatprep.subr.mxu0 %v2492_v61  ;;  %2766 = vmatprep.subr.mxu1 %v2556_v44 }
 0x13a   : > { %8747 = vmatmul.mubr.msk.bf16.gmra.mxu0 %vm1635_vm3, %v2112_v46  ;;  %9746 = vmatmul.mubr.msk.bf16.gmra.mxu1 %vm1635_vm3, %v2112_v46  ;;  %v2555_v46 = vld [vmem:[%s10709_s21 + $0x200] sm:$0xff] }
 0x13b   : > { %2248 = vmatprep.mubr.bf16.mxu0 %v13459_v1  ;;  %9749 = vmatprep.mubr.msk.bf16.mxu1 %vm10678_vm0, %v13461_v0 }
 0x13c   : > { %2618 = vmatpush1.msra.mxu0 %v2491_v63  ;;  %2767 = vmatpush1.msra.mxu1 %v2555_v46 }
 0x13d   : > { %2619 = vmatprep.subr.mxu0 %v2554_v3  ;;  %2982 = vmatprep.subr.mxu1 %v8787_v49 }
 0x13e   : > { %2620 = vmatpush2.msra.mxu0 %v2553_v5 }
 0x13f   : > { %2621 = vmatprep.subr.mxu0 %v2552_v7 }
 0x140   : > { %2622 = vmatpush2.msra.mxu0 %v2551_v9 }
 0x141   : > { %2623 = vmatprep.subr.mxu0 %v2550_v12 }
 0x142   : > { %8748 = vmatmul.mubr.msk.bf16.gmra.mxu0 %vm1635_vm3, %v2111_v41  ;;  %9750 = vmatmul.mubr.msk.bf16.gmra.mxu1 %vm1635_vm3, %v2111_v41  ;;  %v2535_v41 = vld [vmem:[%s10709_s21 + $0x160] sm:$0xff]  ;;  %vm8350_vm3 = vcmask 1043456  }
 0x143   : > { %2624 = vmatpush2.msra.mxu0 %v2549_v15  ;;  %2800 = vmatprep.mubr.f32.mxu1 %v13461_v0 }
 0x144   : > { %2625 = vmatprep.subr.mxu0 %v2548_v13 }
 0x145   : > { %2626 = vmatpush2.msra.mxu0 %v2547_v17 }
 0x146   : > { %2627 = vmatprep.subr.mxu0 %v2546_v19 }
 0x147   : > { %2628 = vmatpush2.msra.mxu0 %v2545_v21 }
 0x148   : > { %2629 = vmatprep.subr.mxu0 %v2544_v23 }
 0x149   : > { %2630 = vmatpush2.msra.mxu0 %v2543_v25 }
 0x14a   : > { %2631 = vmatprep.subr.mxu0 %v2542_v27 }
 0x14b   : > { %2632 = vmatpush2.msra.mxu0 %v2541_v29 }
 0x14c   : > { %2633 = vmatprep.subr.mxu0 %v2540_v31 }
 0x14d   : > { %2634 = vmatpush2.msra.mxu0 %v2539_v33 }
 0x14e   : > { %2635 = vmatprep.subr.mxu0 %v2538_v35 }
 0x14f   : > { %2636 = vmatpush2.msra.mxu0 %v2537_v37 }
 0x150   : > { %2637 = vmatprep.subr.mxu0 %v2536_v39 }
 0x151   : > { %2638 = vmatpush2.msra.mxu0 %v2535_v41 }
 0x152   : > { %2639 = vmatprep.subr.mxu0 %v2534_v43 }
 0x153   : > { %2640 = vmatpush2.msra.mxu0 %v2533_v45 }
 0x154   : > { %2641 = vmatprep.subr.mxu0 %v2532_v47 }
 0x155   : > { %2642 = vmatpush2.msra.mxu0 %v2531_v48 }
 0x156   : > { %2643 = vmatprep.subr.mxu0 %v2530_v50 }
 0x157   : > { %2644 = vmatpush2.msra.mxu0 %v2529_v51 }
 0x158   : > { %2645 = vmatprep.subr.mxu0 %v2528_v52 }
 0x159   : > { %2646 = vmatpush2.msra.mxu0 %v2527_v53 }
 0x15a   : > { %2647 = vmatprep.subr.mxu0 %v2526_v54 }
 0x15b   : > { %2648 = vmatpush2.msra.mxu0 %v2525_v55 }
 0x15c   : > { %2649 = vmatprep.subr.mxu0 %v2524_v56 }
 0x15d   : > { %2650 = vmatpush2.msra.mxu0 %v2523_v57 }
 0x15e   : > { %3131 = vmatprep.subr.mxu0 %v8851_v16 }
 0x162   : > { %v11295_v58 = vpop.f32.mrf.mxu0  ;;  %v11297_v59 = vpop.f32.mrf.mxu1 }
 0x164   : > { %v11299_v60 = vpop.f32.mrf.mxu0  ;;  %v9667_v61 = vpop.f32.mrf.mxu1 }
 0x166   : > { %v11301_v62 = vpop.f32.mrf.mxu0  ;;  %v11303_v63 = vpop.f32.mrf.mxu1 }
 0x168   : > { %v11305_v2 = vpop.f32.mrf.mxu0  ;;  %v9668_v3 = vpop.f32.mrf.mxu1 }
 0x16a   : > { %v11307_v4 = vpop.f32.mrf.mxu0  ;;  %v11309_v5 = vpop.f32.mrf.mxu1 }
 0x16c   : > { %v11311_v6 = vpop.f32.mrf.mxu0  ;;  %v9671_v7 = vpop.f32.mrf.mxu1 }
 0x16e   : > { %v11313_v8 = vpop.f32.mrf.mxu0  ;;  %v11315_v9 = vpop.f32.mrf.mxu1 }
 0x170   : > { %v11317_v11 = vpop.f32.mrf.mxu0  ;;  %v9672_v12 = vpop.f32.mrf.mxu1 }
 0x172   : > { %v11319_v14 = vpop.f32.mrf.mxu0  ;;  %v11321_v15 = vpop.f32.mrf.mxu1 }
 0x174   : > { %v11323_v10 = vpop.f32.mrf.mxu0  ;;  %v9675_v13 = vpop.f32.mrf.mxu1 }
 0x176   : > { %v11326_v17 = vpop.f32.mrf.mxu0  ;;  %v11328_v18 = vpop.f32.mrf.mxu1 }
 0x178   : > { %v11330_v19 = vpop.f32.mrf.mxu0  ;;  %v9676_v20 = vpop.f32.mrf.mxu1 }
 0x17a   : > { %v11332_v21 = vpop.f32.mrf.mxu0  ;;  %v11334_v22 = vpop.f32.mrf.mxu1 }
 0x17c   : > { %v11336_v23 = vpop.f32.mrf.mxu0  ;;  %v9679_v24 = vpop.f32.mrf.mxu1 }
 0x17e   : > { %v11338_v25 = vpop.f32.mrf.mxu0  ;;  %v11340_v26 = vpop.f32.mrf.mxu1 }
 0x17f   : > { %13560 = vst [vmem:[#allocation44_spill] sm:$0xff] %v11340_v26 }
 0x180   : > { %v11342_v27 = vpop.f32.mrf.mxu0  ;;  %v9680_v28 = vpop.f32.mrf.mxu1 }
 0x181   : > { %13561 = vst [vmem:[#allocation45_spill] sm:$0xff] %v11342_v27 }
 0x182   : > { %v11344_v29 = vpop.f32.mrf.mxu0  ;;  %v11346_v30 = vpop.f32.mrf.mxu1 }
 0x183   : > { %13562 = vst [vmem:[#allocation46_spill] sm:$0xff] %v11344_v29  ;;  %13563 = vst [vmem:[#allocation47_spill] sm:$0xff] %v11346_v30 }
 0x184   : > { %v11348_v31 = vpop.f32.mrf.mxu0  ;;  %v9683_v32 = vpop.f32.mrf.mxu1 }
 0x185   : > { %13564 = vst [vmem:[#allocation48_spill] sm:$0xff] %v11348_v31 }
 0x186   : > { %v11350_v33 = vpop.f32.mrf.mxu0  ;;  %v11352_v34 = vpop.f32.mrf.mxu1 }
 0x187   : > { %13565 = vst [vmem:[#allocation49_spill] sm:$0xff] %v11350_v33  ;;  %13566 = vst [vmem:[#allocation50_spill] sm:$0xff] %v11352_v34 }
 0x188   : > { %v11354_v35 = vpop.f32.mrf.mxu0  ;;  %v9684_v36 = vpop.f32.mrf.mxu1 }
 0x189   : > { %13567 = vst [vmem:[#allocation51_spill] sm:$0xff] %v11354_v35 }
 0x18a   : > { %v1751_v37 = vpop.f32.mrf.mxu0  ;;  %v11356_v38 = vpop.f32.mrf.mxu1 }
 0x18b   : > { %13568 = vst [vmem:[#allocation52_spill] sm:$0xff] %v11356_v38 }
 0x18c   : > { %v11358_v39 = vpop.f32.mrf.mxu0  ;;  %v9687_v40 = vpop.f32.mrf.mxu1 }
 0x18d   : > { %13569 = vst [vmem:[#allocation53_spill] sm:$0xff] %v11358_v39 }
 0x18e   : > { %v1755_v41 = vpop.f32.mrf.mxu0  ;;  %v11360_v42 = vpop.f32.mrf.mxu1 }
 0x18f   : > { %13570 = vst [vmem:[#allocation54_spill] sm:$0xff] %v11360_v42 }
 0x190   : > { %v11362_v43 = vpop.f32.mrf.mxu0  ;;  %v9688_v44 = vpop.f32.mrf.mxu1 }
 0x191   : > { %13571 = vst [vmem:[#allocation55_spill] sm:$0xff] %v11362_v43 }
 0x192   : > { %v1761_v45 = vpop.f32.mrf.mxu0  ;;  %v1852_v46 = vpop.f32.mrf.mxu1 }
 0x194   : > { %v11364_v47 = vpop.f32.mrf.mxu0  ;;  %v9691_v48 = vpop.f32.mrf.mxu1 }
 0x195   : > { %13572 = vst [vmem:[#allocation56_spill] sm:$0xff] %v11364_v47 }
 0x196   : > { %v11366_v49 = vpop.f32.mrf.mxu0  ;;  %v11368_v50 = vpop.f32.mrf.mxu1 }
 0x198   : > { %v11370_v51 = vpop.f32.mrf.mxu0  ;;  %v9692_v52 = vpop.f32.mrf.mxu1 }
 0x199   : > { %13573 = vst [vmem:[#allocation57_spill] sm:$0xff] %v11370_v51 }
 0x19a   : > { %v11372_v53 = vpop.f32.mrf.mxu0  ;;  %v11374_v54 = vpop.f32.mrf.mxu1 }
 0x19c   : > { %v11376_v55 = vpop.f32.mrf.mxu0  ;;  %v9697_v56 = vpop.f32.mrf.mxu1 }
 0x19e   : > { %v11378_v57 = vpop.f32.mrf.mxu0  ;;  %v11380_v61 = vpop.f32.mrf.mxu1 }
 0x1a0   : > { %v11382_v3 = vpop.f32.mrf.mxu0  ;;  %v9698_v7 = vpop.f32.mrf.mxu1 }
 0x1a2   : > { %v11384_v12 = vpop.f32.mrf.mxu0  ;;  %v11386_v13 = vpop.f32.mrf.mxu1 }
 0x1a4   : > { %v11388_v16 = vpop.f32.mrf.mxu0  ;;  %v9701_v20 = vpop.f32.mrf.mxu1 }
 0x1a6   : > { %v11390_v24 = vpop.f32.mrf.mxu0  ;;  %v11392_v28 = vpop.f32.mrf.mxu1 }
 0x1a8   : > { %v11394_v32 = vpop.f32.mrf.mxu0  ;;  %v9702_v36 = vpop.f32.mrf.mxu1 }
 0x1aa   : > { %v11396_v40 = vpop.f32.mrf.mxu0  ;;  %v11398_v44 = vpop.f32.mrf.mxu1 }
 0x1ac   : > { %v11400_v48 = vpop.f32.mrf.mxu0  ;;  %v9705_v52 = vpop.f32.mrf.mxu1 }
 0x1ae   : > { %v11402_v56 = vpop.f32.mrf.mxu0  ;;  %v11404_v7 = vpop.f32.mrf.mxu1 }
 0x1b0   : > { %v11406_v1 = vpop.f32.mrf.mxu0  ;;  %v9706_v20 = vpop.f32.mrf.mxu1 }
 0x1b2   : > { %v11408_v0 = vpop.f32.mrf.mxu0  ;;  %v11410_v51 = vpop.f32.mrf.mxu1 }
 0x1b4   : > { %v11412_v47 = vpop.f32.mrf.mxu0  ;;  %v9709_v36 = vpop.f32.mrf.mxu1 }
 0x1b6   : > { %v11414_v43 = vpop.f32.mrf.mxu0  ;;  %v11416_v42 = vpop.f32.mrf.mxu1 }
 0x1b7   : > { %13574 = vst [vmem:[#allocation58_spill] sm:$0xff] %v11416_v42 }
 0x1b8   : > { %v11418_v39 = vpop.f32.mrf.mxu0  ;;  %v9710_v52 = vpop.f32.mrf.mxu1 }
 0x1b9   : > { %13575 = vst [vmem:[#allocation59_spill] sm:$0xff] %v11418_v39  ;;  %v2392_v39 = vlaneseq }
 0x1ba   : > { %v11420_v33 = vpop.f32.mrf.mxu0  ;;  %v11422_v38 = vpop.f32.mrf.mxu1 }
 0x1bb   : > { %13576 = vst [vmem:[#allocation60_spill] sm:$0xff] %v11420_v33  ;;  %13577 = vst [vmem:[#allocation61_spill] sm:$0xff] %v11422_v38 }
 0x1bc   : > { %v11424_v35 = vpop.f32.mrf.mxu0  ;;  %v9713_v20 = vpop.f32.mrf.mxu1 }
 0x1bd   : > { %13578 = vst [vmem:[#allocation62_spill] sm:$0xff] %v11424_v35 }
 0x1be   : > { %v11426_v34 = vpop.f32.mrf.mxu0  ;;  %v11428_v29 = vpop.f32.mrf.mxu1 }
 0x1bf   : > { %13579 = vst [vmem:[#allocation63_spill] sm:$0xff] %v11426_v34  ;;  %13580 = vst [vmem:[#allocation64_spill] sm:$0xff] %v11428_v29 }
 0x1c0   : > { %v11430_v31 = vpop.f32.mrf.mxu0  ;;  %v9714_v36 = vpop.f32.mrf.mxu1 }
 0x1c1   : > { %13581 = vst [vmem:[#allocation65_spill] sm:$0xff] %v11430_v31  ;;  %v11444_v31 = vshrl.u32 %v2392_v39, 7 }
 0x1c2   : > { %v1979_v30 = vpop.f32.mrf.mxu0  ;;  %v11432_v27 = vpop.f32.mrf.mxu1 }
 0x1c3   : > { %13582 = vst [vmem:[#allocation66_spill] sm:$0xff] %v11432_v27  ;;  %v11434_v42 = vadd.f32 %v1979_v30, %v1751_v37  ;;  %13586 = vst [vmem:[#allocation70_spill] sm:$0xff] %v11444_v31 }
 0x1c4   : > { %v11436_v52 = vpop.f32.mrf.mxu0  ;;  %v9717_v33 = vpop.f32.mrf.mxu1 }
 0x1c5   : > { %13583 = vst [vmem:[#allocation67_spill] sm:$0xff] %v11434_v42  ;;  %13584 = vst [vmem:[#allocation68_spill] sm:$0xff] %v11436_v52  ;;  %v13463_v42 = vsub.s32 2, %v11444_v31 }
 0x1c6   : > { %v1983_v38 = vpop.f32.mrf.mxu0  ;;  %v11438_v35 = vpop.f32.mrf.mxu1 }
 0x1c7   : > { %13585 = vst [vmem:[#allocation69_spill] sm:$0xff] %v11438_v35  ;;  %v11440_v20 = vadd.f32 %v1983_v38, %v1755_v41  ;;  %v2390_v38 = vld [vmem:[%s10704_s17] sm:$0x7]  ;;  %v11455_v41 = vsub.s32 0, %v11444_v31 }
 0x1c8   : > { %v11442_v34 = vpop.f32.mrf.mxu0  ;;  %v9718_v29 = vpop.f32.mrf.mxu1 }
 0x1c9   : > { %13588 = vst [vmem:[#allocation72_spill] sm:$0xff] %v11455_v41 }
 0x1ca   : > { %v1989_v36 = vpop.f32.mrf.mxu0  ;;  %v2080_v26 = vpop.f32.mrf.mxu1 }
 0x1cb   : > { %v11446_v27 = vadd.f32 %v1989_v36, %v1761_v45  ;;  %v11448_v30 = vadd.f32 %v2080_v26, %v1852_v46  ;;  %v11464_v26 = vsub.s32 1, %v11444_v31  ;;  %v1930_v36 = vadd.f32 %v11372_v53, %v11295_v58 }
 0x1cc   : > { %v11450_v37 = vpop.f32.mrf.mxu0  ;;  %v9721_v33 = vpop.f32.mrf.mxu1 }
 0x1cd   : > { %13587 = vst [vmem:[#allocation71_spill] sm:$0xff] %v11446_v27  ;;  %13589 = vst [vmem:[#allocation73_spill] sm:$0xff] %v11464_v26  ;;  %v2033_v33 = vadd.f32 %v11374_v54, %v11297_v59  ;;  %v11474_v27 = vrot.slane %v2390_v38, %v13463_v42  ;;  %v11482_v58 = vrot.slane %v2390_v38, %v11464_v26  ;;  %v8836_v26 = vld [vmem:[%s10709_s21 + $0x580] sm:$0xff] }
 0x1ce   : > { %v1993_v52 = vpop.f32.mrf.mxu0  ;;  %v2083_v35 = vpop.f32.mrf.mxu1  ;;  %v1934_v54 = vadd.f32 %v11378_v57, %v11301_v62 }
 0x1cf   : > { %v11458_v29 = vadd.f32 %v1993_v52, %v11366_v49  ;;  %v11461_v39 = vadd.f32 %v2083_v35, %v11368_v50  ;;  %v11477_v35 = vrot.slane %v2390_v38, %v11455_v41  ;;  %v1932_v52 = vadd.f32 %v11376_v55, %v11299_v60 }
 0x1d0   : > { %v11466_v45 = vpop.f32.mrf.mxu0  ;;  %v9722_v46 = vpop.f32.mrf.mxu1  ;;  %v2036_v41 = vadd.f32 %v11380_v61, %v11303_v63  ;;  %v8785_v63 = vld [vmem:[%s10709_s21 + $0x3e8] sm:$0xff]  ;;  %v1940_v61 = vadd.f32 %v11384_v12, %v11307_v4 }
 0x1d1   : > { %13590 = vst [vmem:[#allocation74_spill] sm:$0xff] %v11466_v45 }
 0x1d2   : > { %v2190_v49 = vpop.f32.mrf.mxu0  ;;  %v2293_v50 = vpop.f32.mrf.mxu1 }
 0x1d3   : > { %v2348_v45 = vadd.f32 %v2190_v49, %v1930_v36  ;;  %v2350_v46 = vadd.f32 %v2293_v50, %v2033_v33  ;;  %v1936_v36 = vadd.f32 %v11382_v3, %v11305_v2  ;;  %v8786_v49 = vld [vmem:[%s10709_s21 + $0x3f0] sm:$0xff] }
 0x1d4   : > { %v2192_v53 = vpop.f32.mrf.mxu0  ;;  %v9727_v59 = vpop.f32.mrf.mxu1 }
 0x1d5   : > { %v11487_v42 = vadd.f32 %v11474_v27, %v2350_v46  ;;  %v2349_v31 = vadd.f32 %v2192_v53, %v1932_v52  ;;  %v11492_v60 = vadd.f32 %v11477_v35, %v2348_v45  ;;  %v2041_v45 = vadd.f32 %v11386_v13, %v11309_v5 }
 0x1d6   : > { %v2194_v55 = vpop.f32.mrf.mxu0  ;;  %v2296_v38 = vpop.f32.mrf.mxu1  ;;  %v13591_v13 = vmov 0.0  }
 0x1d7   : > { %v13492_v33 = vmax.f32 %v11487_v42, 0.0  ;;  %v11498_v62 = vadd.f32 %v11482_v58, %v2349_v31  ;;  %v2351_v57 = vadd.f32 %v2194_v55, %v1934_v54  ;;  %v2353_v50 = vadd.f32 %v2296_v38, %v2036_v41  ;;  %v8784_v31 = vld [vmem:[%s10709_s21 + $0x3e0] sm:$0xff]  ;;  %v8783_v54 = vld [vmem:[%s10709_s21 + $0x3d8] sm:$0xff]  ;;  %v8850_v55 = vld [vmem:[%s10709_s21 + $0x5f0] sm:$0xff] }
 0x1d8   : > { %v2196_v52 = vpop.f32.mrf.mxu0  ;;  %v9728_v46 = vpop.f32.mrf.mxu1  ;;  %v1942_v41 = vadd.f32 %v11388_v16, %v11311_v6  ;;  %v13489_v53 = vmax.f32 %v11492_v60, 0.0 }
 0x1d9   : > { %v13493_v2 = vmax.f32 %v11498_v62, 0.0  ;;  %v2352_v3 = vadd.f32 %v2196_v52, %v1936_v36  ;;  %2801 = vmatmul.mubr.f32.vlgmr.msra.gmra.mxu1 %v13492_v33  ;;  %v11514_v59 = vadd.f32 %v11477_v35, %v2351_v57  ;;  %v11517_v4 = vadd.f32 %v11474_v27, %v2353_v50  ;;  %v8849_v36 = vld [vmem:[%s10709_s21 + $0x5e8] sm:$0xff]  ;;  %v8782_v52 = vld [vmem:[%s10709_s21 + $0x3d0] sm:$0xff]  ;;  %v13615_v33 = vld [vmem:[#allocation67_spill] sm:$0xff] }
 0x1da   : > { %2983 = vmatpush1.msra.mxu1 %v8786_v49  ;;  %v2200_v5 = vpop.f32.mrf.mxu0  ;;  %v2301_v12 = vpop.f32.mrf.mxu1  ;;  %2806 = vmatprep.mubr.f32.mxu1 %v13591_v13  ;;  %v1944_v46 = vadd.f32 %v11390_v24, %v11313_v8 }
 0x1db   : > { %v11523_v38 = vadd.f32 %v11482_v58, %v2352_v3  ;;  %v2354_v6 = vadd.f32 %v2200_v5, %v1940_v61  ;;  %v2356_v16 = vadd.f32 %v2301_v12, %v2041_v45  ;;  %2984 = vmatprep.subr.mxu1 %v8785_v63  ;;  %2651 = vmatprep.mubr.f32.mxu0 %v13493_v2  ;;  %v13488_v57 = vmax.f32 %v11517_v4, 0.0  ;;  %v8781_v45 = vld [vmem:[%s10709_s21 + $0x3c8] sm:$0xff] }
 0x1dc   : > { %2985 = vmatpush1.msra.mxu1 %v8784_v31  ;;  %v2202_v49 = vpop.f32.mrf.mxu0  ;;  %v9731_v50 = vpop.f32.mrf.mxu1  ;;  %2652 = vmatmul.mubr.f32.vlgmr.msra.gmra.mxu0 %v13489_v53  ;;  %v2044_v31 = vadd.f32 %v11392_v28, %v11315_v9  ;;  %v13484_v5 = vmax.f32 %v11514_v59, 0.0 }
 0x1dd   : > { %v11535_v61 = vadd.f32 %v11474_v27, %v2356_v16  ;;  %v2355_v63 = vadd.f32 %v2202_v49, %v1942_v41  ;;  %2986 = vmatprep.subr.mxu1 %v8783_v54  ;;  %v13487_v3 = vmax.f32 %v11523_v38, 0.0  ;;  %3132 = vmatpush1.msra.mxu0 %v8850_v55  ;;  %v11543_v12 = vadd.f32 %v11477_v35, %v2354_v6  ;;  %v8780_v41 = vld [vmem:[%s10709_s21 + $0x3c0] sm:$0xff]  ;;  %v8779_v6 = vld [vmem:[%s10709_s21 + $0x3b8] sm:$0xff] }
 0x1de   : > { %2807 = vmatmul.mubr.f32.gmra.mxu1 %v13488_v57  ;;  %v2204_v8 = vpop.f32.mrf.mxu0  ;;  %v2304_v24 = vpop.f32.mrf.mxu1  ;;  %3133 = vmatprep.subr.mxu0 %v8849_v36  ;;  %v1946_v54 = vadd.f32 %v11394_v32, %v11317_v11  ;;  %v8778_v11 = vld [vmem:[%s10709_s21 + $0x3b0] sm:$0xff]  ;;  %v1950_v32 = vadd.f32 %v11396_v40, %v11319_v14  ;;  %v2049_v36 = vadd.f32 %v11398_v44, %v11321_v15  ;;  %v8776_v44 = vld [vmem:[%s10709_s21 + $0x3a0] sm:$0xff] }
 0x1df   : > { %v13483_v55 = vmax.f32 %v11535_v61, 0.0  ;;  %v11552_v9 = vadd.f32 %v11482_v58, %v2355_v63  ;;  %2987 = vmatpush1.msra.mxu1 %v8782_v52  ;;  %v2357_v28 = vadd.f32 %v2204_v8, %v1944_v46  ;;  %2657 = vmatprep.mubr.f32.mxu0 %v13487_v3  ;;  %v2359_v16 = vadd.f32 %v2304_v24, %v2044_v31  ;;  %v8777_v63 = vld [vmem:[%s10709_s21 + $0x3a8] sm:$0xff]  ;;  %v8844_v3 = vld [vmem:[%s10709_s21 + $0x5c0] sm:$0xff] }
 0x1e0   : > { %2988 = vmatprep.subr.mxu1 %v8781_v45  ;;  %v2206_v49 = vpop.f32.mrf.mxu0  ;;  %v9732_v50 = vpop.f32.mrf.mxu1  ;;  %2658 = vmatmul.mubr.f32.gmra.mxu0 %v13484_v5  ;;  %v1952_v45 = vadd.f32 %v11400_v48, %v11323_v10  ;;  %v13480_v31 = vmax.f32 %v11543_v12, 0.0 }
 0x1e1   : > { %v13481_v52 = vmax.f32 %v11552_v9, 0.0  ;;  %2989 = vmatpush1.msra.mxu1 %v8780_v41  ;;  %v2358_v46 = vadd.f32 %v2206_v49, %v1946_v54  ;;  %2812 = vmatprep.mubr.f32.mxu1 %v13591_v13  ;;  %v11571_v8 = vadd.f32 %v11477_v35, %v2357_v28  ;;  %v11574_v14 = vadd.f32 %v11474_v27, %v2359_v16  ;;  %v8775_v41 = vld [vmem:[%s10709_s21 + $0x398] sm:$0xff]  ;;  %v8774_v16 = vld [vmem:[%s10709_s21 + $0x390] sm:$0xff] }
 0x1e2   : > { %2990 = vmatprep.subr.mxu1 %v8779_v6  ;;  %2813 = vmatmul.mubr.f32.gmra.mxu1 %v13483_v55  ;;  %v2210_v15 = vpop.f32.mrf.mxu0  ;;  %v2309_v40 = vpop.f32.mrf.mxu1  ;;  %v1954_v49 = vadd.f32 %v11402_v56, %v11326_v17 }
 0x1e3   : > { %v11580_v24 = vadd.f32 %v11482_v58, %v2358_v46  ;;  %2991 = vmatpush1.msra.mxu1 %v8778_v11  ;;  %v2360_v10 = vadd.f32 %v2210_v15, %v1950_v32  ;;  %v2362_v48 = vadd.f32 %v2309_v40, %v2049_v36  ;;  %2663 = vmatprep.mubr.f32.mxu0 %v13481_v52  ;;  %v13479_v54 = vmax.f32 %v11574_v14, 0.0  ;;  %v8773_v32 = vld [vmem:[%s10709_s21 + $0x388] sm:$0xff] }
 0x1e4   : > { %2992 = vmatprep.subr.mxu1 %v8777_v63  ;;  %v2212_v28 = vpop.f32.mrf.mxu0  ;;  %v9735_v6 = vpop.f32.mrf.mxu1  ;;  %2664 = vmatmul.mubr.f32.gmra.mxu0 %v13480_v31  ;;  %v2052_v46 = vadd.f32 %v11404_v7, %v11328_v18  ;;  %v13472_v63 = vmax.f32 %v11571_v8, 0.0  ;;  %v1956_v40 = vadd.f32 %v11406_v1, %v11330_v19  ;;  %v8770_v1 = vld [vmem:[%s10709_s21 + $0x370] sm:$0xff]  ;;  %v1960_v19 = vadd.f32 %v11408_v0, %v11332_v21  ;;  %v13604_v31 = vld [vmem:[#allocation51_spill] sm:$0xff] }
 0x1e5   : > { %v11592_v50 = vadd.f32 %v11474_v27, %v2362_v48  ;;  %2993 = vmatpush1.msra.mxu1 %v8776_v44  ;;  %v2361_v11 = vadd.f32 %v2212_v28, %v1952_v45  ;;  %2818 = vmatprep.mubr.f32.mxu1 %v13591_v13  ;;  %v13477_v36 = vmax.f32 %v11580_v24, 0.0  ;;  %v11601_v15 = vadd.f32 %v11477_v35, %v2360_v10  ;;  %v8772_v45 = vld [vmem:[%s10709_s21 + $0x380] sm:$0xff]  ;;  %v8771_v10 = vld [vmem:[%s10709_s21 + $0x378] sm:$0xff] }
 0x1e6   : > { %2994 = vmatprep.subr.mxu1 %v8775_v41  ;;  %2819 = vmatmul.mubr.f32.gmra.mxu1 %v13479_v54  ;;  %v2214_v17 = vpop.f32.mrf.mxu0  ;;  %v2312_v56 = vpop.f32.mrf.mxu1  ;;  %v2057_v6 = vadd.f32 %v11410_v51, %v11334_v22  ;;  %v8768_v51 = vld [vmem:[%s10709_s21 + $0x360] sm:$0xff] }
 0x1e7   : > { %v13471_v44 = vmax.f32 %v11592_v50, 0.0  ;;  %v11610_v18 = vadd.f32 %v11482_v58, %v2361_v11  ;;  %2995 = vmatpush1.msra.mxu1 %v8774_v16  ;;  %v2363_v7 = vadd.f32 %v2214_v17, %v1954_v49  ;;  %2669 = vmatprep.mubr.f32.mxu0 %v13477_v36  ;;  %v2365_v48 = vadd.f32 %v2312_v56, %v2052_v46  ;;  %v8769_v49 = vld [vmem:[%s10709_s21 + $0x368] sm:$0xff] }
 0x1e8   : > { %2996 = vmatprep.subr.mxu1 %v8773_v32  ;;  %v2216_v41 = vpop.f32.mrf.mxu0  ;;  %v9736_v28 = vpop.f32.mrf.mxu1  ;;  %2670 = vmatmul.mubr.f32.gmra.mxu0 %v13472_v63  ;;  %v1962_v32 = vadd.f32 %v11412_v47, %v11336_v23  ;;  %v13468_v46 = vmax.f32 %v11601_v15, 0.0 }
 0x1e9   : > { %2997 = vmatpush1.msra.mxu1 %v8772_v45  ;;  %v2364_v16 = vadd.f32 %v2216_v41, %v1956_v40  ;;  %2824 = vmatprep.mubr.f32.mxu1 %v13591_v13  ;;  %v13470_v11 = vmax.f32 %v11610_v18, 0.0  ;;  %v11629_v17 = vadd.f32 %v11477_v35, %v2363_v7  ;;  %v11632_v0 = vadd.f32 %v11474_v27, %v2365_v48  ;;  %v8767_v45 = vld [vmem:[%s10709_s21 + $0x358] sm:$0xff]  ;;  %v8766_v48 = vld [vmem:[%s10709_s21 + $0x350] sm:$0xff] }
 0x1ea   : > { %2998 = vmatprep.subr.mxu1 %v8771_v10  ;;  %2825 = vmatmul.mubr.f32.gmra.mxu1 %v13471_v44  ;;  %v2220_v21 = vpop.f32.mrf.mxu0  ;;  %v2317_v22 = vpop.f32.mrf.mxu1  ;;  %v1964_v41 = vadd.f32 %v11414_v43, %v11338_v25  ;;  %v13597_v44 = vld [vmem:[#allocation61_spill] sm:$0xff] }
 0x1eb   : > { %v11638_v56 = vadd.f32 %v11482_v58, %v2364_v16  ;;  %2999 = vmatpush1.msra.mxu1 %v8770_v1  ;;  %v2366_v23 = vadd.f32 %v2220_v21, %v1960_v19  ;;  %v2368_v47 = vadd.f32 %v2317_v22, %v2057_v6  ;;  %2675 = vmatprep.mubr.f32.mxu0 %v13470_v11  ;;  %v13469_v40 = vmax.f32 %v11632_v0, 0.0  ;;  %v8765_v19 = vld [vmem:[%s10709_s21 + $0x348] sm:$0xff] }
 0x1ec   : > { %3000 = vmatprep.subr.mxu1 %v8769_v49  ;;  %v2222_v7 = vpop.f32.mrf.mxu0  ;;  %v9739_v10 = vpop.f32.mrf.mxu1  ;;  %2676 = vmatmul.mubr.f32.gmra.mxu0 %v13468_v46  ;;  %v13592_v16 = vld [vmem:[#allocation44_spill] sm:$0xff]  ;;  %v13593_v49 = vld [vmem:[#allocation58_spill] sm:$0xff]  ;;  %v13474_v22 = vmax.f32 %v11629_v17, 0.0 }
 0x1ed   : > { %v11650_v28 = vadd.f32 %v11474_v27, %v2368_v47  ;;  %3001 = vmatpush1.msra.mxu1 %v8768_v51  ;;  %v2367_v1 = vadd.f32 %v2222_v7, %v1962_v32  ;;  %2830 = vmatprep.mubr.f32.mxu1 %v13591_v13  ;;  %v13475_v6 = vmax.f32 %v11638_v56, 0.0  ;;  %v2060_v21 = vadd.f32 %v13593_v49, %v13592_v16  ;;  %v8764_v32 = vld [vmem:[%s10709_s21 + $0x340] sm:$0xff]  ;;  %v13594_v51 = vld [vmem:[#allocation45_spill] sm:$0xff] }
 0x1ee   : > { %v11659_v10 = vadd.f32 %v11477_v35, %v2366_v23  ;;  %3002 = vmatprep.subr.mxu1 %v8767_v45  ;;  %2831 = vmatmul.mubr.f32.gmra.mxu1 %v13469_v40  ;;  %v2224_v25 = vpop.f32.mrf.mxu0  ;;  %v2320_v43 = vpop.f32.mrf.mxu1  ;;  %v13595_v47 = vld [vmem:[#allocation59_spill] sm:$0xff] }
 0x1ef   : > { %v1966_v7 = vadd.f32 %v13595_v47, %v13594_v51  ;;  %v13473_v46 = vmax.f32 %v11650_v28, 0.0  ;;  %v11668_v16 = vadd.f32 %v11482_v58, %v2367_v1  ;;  %3003 = vmatpush1.msra.mxu1 %v8766_v48  ;;  %v2369_v23 = vadd.f32 %v2224_v25, %v1964_v41  ;;  %2681 = vmatprep.mubr.f32.mxu0 %v13475_v6  ;;  %v8763_v45 = vld [vmem:[%s10709_s21 + $0x338] sm:$0xff]  ;;  %v8762_v51 = vld [vmem:[%s10709_s21 + $0x330] sm:$0xff]  ;;  %v8761_v48 = vld [vmem:[%s10709_s21 + $0x328] sm:$0xff] }
 0x1f0   : > { %v2371_v49 = vadd.f32 %v2320_v43, %v2060_v21  ;;  %3004 = vmatprep.subr.mxu1 %v8765_v19  ;;  %v2226_v40 = vpop.f32.mrf.mxu0  ;;  %v9740_v11 = vpop.f32.mrf.mxu1  ;;  %2682 = vmatmul.mubr.f32.gmra.mxu0 %v13474_v22  ;;  %v13596_v47 = vld [vmem:[#allocation47_spill] sm:$0xff]  ;;  %v13598_v21 = vld [vmem:[#allocation48_spill] sm:$0xff]  ;;  %v13599_v19 = vld [vmem:[#allocation62_spill] sm:$0xff] }
 0x1f1   : > { %v2065_v63 = vadd.f32 %v13597_v44, %v13596_v47  ;;  %3005 = vmatpush1.msra.mxu1 %v8764_v32  ;;  %v2370_v1 = vadd.f32 %v2226_v40, %v1966_v7  ;;  %2836 = vmatprep.mubr.f32.mxu1 %v13591_v13  ;;  %v13476_v41 = vmax.f32 %v11668_v16, 0.0  ;;  %v1972_v25 = vadd.f32 %v13599_v19, %v13598_v21  ;;  %v8760_v32 = vld [vmem:[%s10709_s21 + $0x320] sm:$0xff] }
 0x1f2   : > { %v13478_v11 = vmax.f32 %v11659_v10, 0.0  ;;  %v11685_v43 = vadd.f32 %v11474_v27, %v2371_v49  ;;  %3006 = vmatprep.subr.mxu1 %v8763_v45  ;;  %2837 = vmatmul.mubr.f32.gmra.mxu1 %v13473_v46  ;;  %v2230_v44 = vpop.f32.mrf.mxu0  ;;  %v2325_v40 = vpop.f32.mrf.mxu1  ;;  %v11691_v7 = vadd.f32 %v11477_v35, %v2369_v23  ;;  %v8759_v45 = vld [vmem:[%s10709_s21 + $0x318] sm:$0xff]  ;;  %v13601_v19 = vld [vmem:[#allocation60_spill] sm:$0xff] }
 0x1f3   : > { %v11694_v47 = vadd.f32 %v11482_v58, %v2370_v1  ;;  %3007 = vmatpush1.msra.mxu1 %v8762_v51  ;;  %v2374_v21 = vadd.f32 %v2325_v40, %v2065_v63  ;;  %2687 = vmatprep.mubr.f32.mxu0 %v13476_v41  ;;  %v13600_v49 = vld [vmem:[#allocation46_spill] sm:$0xff]  ;;  %v13603_v41 = vld [vmem:[#allocation64_spill] sm:$0xff] }
 0x1f4   : > { %v1970_v46 = vadd.f32 %v13601_v19, %v13600_v49  ;;  %v13482_v22 = vmax.f32 %v11685_v43, 0.0  ;;  %3008 = vmatprep.subr.mxu1 %v8761_v48  ;;  %v2232_v6 = vpop.f32.mrf.mxu0  ;;  %v9743_v23 = vpop.f32.mrf.mxu1  ;;  %2688 = vmatmul.mubr.f32.gmra.mxu0 %v13478_v11  ;;  %v8758_v51 = vld [vmem:[%s10709_s21 + $0x310] sm:$0xff]  ;;  %v8757_v49 = vld [vmem:[%s10709_s21 + $0x308] sm:$0xff]  ;;  %v8848_v19 = vld [vmem:[%s10709_s21 + $0x5e0] sm:$0xff] }
 0x1f5   : > { %v13485_v63 = vmax.f32 %v11694_v47, 0.0  ;;  %v11707_v1 = vadd.f32 %v11474_v27, %v2374_v21  ;;  %3009 = vmatpush1.msra.mxu1 %v8760_v32  ;;  %v2373_v40 = vadd.f32 %v2232_v6, %v1972_v25  ;;  %2842 = vmatprep.mubr.f32.mxu1 %v13591_v13  ;;  %v13602_v48 = vld [vmem:[#allocation50_spill] sm:$0xff]  ;;  %v8756_v21 = vld [vmem:[%s10709_s21 + $0x300] sm:$0xff]  ;;  %v13605_v32 = vld [vmem:[#allocation65_spill] sm:$0xff]  ;;  %v13486_v25 = vmax.f32 %v11691_v7, 0.0 }
 0x1f6   : > { %v2068_v23 = vadd.f32 %v13603_v41, %v13602_v48  ;;  %v2372_v36 = vadd.f32 %v2230_v44, %v1970_v46  ;;  %3010 = vmatprep.subr.mxu1 %v8759_v45  ;;  %2843 = vmatmul.mubr.f32.gmra.mxu1 %v13482_v22  ;;  %v2234_v11 = vpop.f32.mrf.mxu0  ;;  %v2328_v54 = vpop.f32.mrf.mxu1  ;;  %v1976_v6 = vadd.f32 %v13605_v32, %v13604_v31  ;;  %v8819_v46 = vld [vmem:[%s10709_s21 + $0x4f8] sm:$0xff]  ;;  %v13606_v32 = vld [vmem:[#allocation52_spill] sm:$0xff] }
 0x1f7   : > { %v13491_v52 = vmax.f32 %v11707_v1, 0.0  ;;  %v11722_v41 = vadd.f32 %v11482_v58, %v2373_v40  ;;  %3011 = vmatpush1.msra.mxu1 %v8758_v51  ;;  %2693 = vmatprep.mubr.f32.mxu0 %v13485_v63  ;;  %v8847_v48 = vld [vmem:[%s10709_s21 + $0x5d8] sm:$0xff]  ;;  %v8818_v51 = vld [vmem:[%s10709_s21 + $0x4f0] sm:$0xff] }
 0x1f8   : > { %v2377_v44 = vadd.f32 %v2328_v54, %v2068_v23  ;;  %3012 = vmatprep.subr.mxu1 %v8757_v49  ;;  %3134 = vmatpush1.msra.mxu0 %v8848_v19  ;;  %v2236_v45 = vpop.f32.mrf.mxu0  ;;  %v9744_v31 = vpop.f32.mrf.mxu1  ;;  %v13607_v22 = vld [vmem:[#allocation66_spill] sm:$0xff]  ;;  %v13608_v63 = vld [vmem:[#allocation49_spill] sm:$0xff]  ;;  %v13609_v54 = vld [vmem:[#allocation63_spill] sm:$0xff]  ;;  %v11737_v19 = vadd.f32 %v11477_v35, %v2372_v36 }
 0x1f9   : > { %v2073_v55 = vadd.f32 %v13607_v22, %v13606_v32  ;;  %3013 = vmatpush1.msra.mxu1 %v8756_v21  ;;  %v2376_v5 = vadd.f32 %v2236_v45, %v1976_v6  ;;  %2694 = vmatmul.mubr.f32.gmra.mxu0 %v13486_v25  ;;  %v8846_v40 = vld [vmem:[%s10709_s21 + $0x5d0] sm:$0xff]  ;;  %v1974_v49 = vadd.f32 %v13609_v54, %v13608_v63  ;;  %v8817_v6 = vld [vmem:[%s10709_s21 + $0x4e8] sm:$0xff]  ;;  %v13490_v31 = vmax.f32 %v11722_v41, 0.0  ;;  %v8816_v63 = vld [vmem:[%s10709_s21 + $0x4e0] sm:$0xff] }
 0x1fa   : > { %v11740_v23 = vadd.f32 %v11474_v27, %v2377_v44  ;;  %2848 = vmatprep.mubr.f32.mxu1 %v13591_v13  ;;  %3014 = vmatprep.subr.mxu1 %v8819_v46  ;;  %v2240_v22 = vpop.f32.mrf.mxu0  ;;  %v2333_v21 = vpop.f32.mrf.mxu1  ;;  %v8845_v45 = vld [vmem:[%s10709_s21 + $0x5c8] sm:$0xff] }
 0x1fb   : > { %3135 = vmatprep.subr.mxu0 %v8847_v48  ;;  %2849 = vmatmul.mubr.f32.gmra.mxu1 %v13491_v52  ;;  %v2380_v36 = vadd.f32 %v2333_v21, %v2073_v55  ;;  %v13610_v32 = vld [vmem:[#allocation53_spill] sm:$0xff]  ;;  %v13611_v44 = vld [vmem:[#allocation68_spill] sm:$0xff]  ;;  %v2375_v25 = vadd.f32 %v2234_v11, %v1974_v49  ;;  %v11752_v46 = vadd.f32 %v11482_v58, %v2376_v5  ;;  %v8815_v55 = vld [vmem:[%s10709_s21 + $0x4d8] sm:$0xff]  ;;  %v13494_v21 = vmax.f32 %v11737_v19, 0.0 }
 0x1fc   : > { %v1982_v54 = vadd.f32 %v13611_v44, %v13610_v32  ;;  %3015 = vmatpush2.msra.mxu1 %v8818_v51  ;;  %3136 = vmatpush1.msra.mxu0 %v8846_v40  ;;  %v2242_v57 = vpop.f32.mrf.mxu0  ;;  %v9747_v53 = vpop.f32.mrf.mxu1  ;;  %v13496_v48 = vmax.f32 %v11740_v23, 0.0  ;;  %v8843_v11 = vld [vmem:[%s10709_s21 + $0x5b8] sm:$0xff]  ;;  %v13613_v49 = vld [vmem:[#allocation69_spill] sm:$0xff]  ;;  %v2378_v2 = vadd.f32 %v2240_v22, %v13615_v33 }
 0x1fd   : > { %3016 = vmatprep.subr.mxu1 %v8817_v6  ;;  %3137 = vmatprep.subr.mxu0 %v8845_v45  ;;  %v13612_v53 = vld [vmem:[#allocation54_spill] sm:$0xff]  ;;  %v11764_v44 = vadd.f32 %v11474_v27, %v2380_v36 }
 0x1fe   : > { %2699 = vmatprep.mubr.f32.mxu0 %v13490_v31  ;;  %3017 = vmatpush2.msra.mxu1 %v8816_v63  ;;  %v2379_v5 = vadd.f32 %v2242_v57, %v1982_v54  ;;  %v2244_v51 = vpop.f32.mrf.mxu0  ;;  %v2336_v40 = vpop.f32.mrf.mxu1  ;;  %v2076_v32 = vadd.f32 %v13613_v49, %v13612_v53  ;;  %v8814_v6 = vld [vmem:[%s10709_s21 + $0x4d0] sm:$0xff]  ;;  %v11770_v31 = vadd.f32 %v11477_v35, %v2375_v25  ;;  %v13495_v57 = vmax.f32 %v11752_v46, 0.0  ;;  %v8813_v63 = vld [vmem:[%s10709_s21 + $0x4c8] sm:$0xff]  ;;  %v8812_v49 = vld [vmem:[%s10709_s21 + $0x4c0] sm:$0xff] }
 0x1ff   : > { %3138 = vmatpush1.msra.mxu0 %v8844_v3  ;;  %2854 = vmatprep.mubr.f32.mxu1 %v13591_v13  ;;  %v8842_v45 = vld [vmem:[%s10709_s21 + $0x5b0] sm:$0xff]  ;;  %v8841_v54 = vld [vmem:[%s10709_s21 + $0x5a8] sm:$0xff]  ;;  %v13614_v25 = vld [vmem:[#allocation55_spill] sm:$0xff] }
 0x200   : > { %2700 = vmatmul.mubr.f32.gmra.mxu0 %v13494_v21  ;;  %3018 = vmatprep.subr.mxu1 %v8815_v55  ;;  %v2246_v36 = vpop.f32.mrf.mxu0  ;;  %v9748_v53 = vpop.f32.mrf.mxu1  ;;  %v2383_v3 = vadd.f32 %v2336_v40, %v2076_v32  ;;  %v1986_v52 = vadd.f32 %v11442_v34, %v13614_v25  ;;  %v11784_v21 = vadd.f32 %v11482_v58, %v2379_v5  ;;  %v8840_v55 = vld [vmem:[%s10709_s21 + $0x5a0] sm:$0xff]  ;;  %v2481_v40 = vmax.f32 %v11764_v44, 0.0  ;;  %v8811_v32 = vld [vmem:[%s10709_s21 + $0x4b8] sm:$0xff] }
 0x201   : > { %3139 = vmatprep.subr.mxu0 %v8843_v11  ;;  %2855 = vmatmul.mubr.f32.gmra.mxu1 %v13496_v48  ;;  %v13497_v34 = vmax.f32 %v11770_v31, 0.0  ;;  %v8839_v22 = vld [vmem:[%s10709_s21 + $0x598] sm:$0xff]  ;;  %v11802_v25 = vadd.f32 %v11477_v35, %v2378_v2  ;;  %v8808_v48 = vld [vmem:[%s10709_s21 + $0x4a0] sm:$0xff] }
 0x202   : > { %3019 = vmatpush2.msra.mxu1 %v8814_v6  ;;  %3140 = vmatpush1.msra.mxu0 %v8842_v45  ;;  %v11787_v53 = vpop.f32.mrf.mxu0  ;;  %v2341_v11 = vpop.f32.mrf.mxu1  ;;  %v2382_v33 = vadd.f32 %v2246_v36, %v1986_v52  ;;  %v11796_v45 = vadd.f32 %v11474_v27, %v2383_v3  ;;  %v8809_v52 = vld [vmem:[%s10709_s21 + $0x4a8] sm:$0xff] }
 0x203   : > { %3020 = vmatprep.subr.mxu1 %v8813_v63  ;;  %3141 = vmatprep.subr.mxu0 %v8841_v54  ;;  %v8810_v63 = vld [vmem:[%s10709_s21 + $0x4b0] sm:$0xff]  ;;  %v8837_v36 = vld [vmem:[%s10709_s21 + $0x588] sm:$0xff]  ;;  %v2386_v2 = vadd.f32 %v2341_v11, %v11448_v30  ;;  %v8807_v30 = vld [vmem:[%s10709_s21 + $0x498] sm:$0xff] }
 0x204   : > { %2705 = vmatprep.mubr.f32.mxu0 %v13495_v57  ;;  %3021 = vmatpush2.msra.mxu1 %v8812_v49  ;;  %v2252_v5 = vpop.f32.mrf.mxu0  ;;  %v9751_v6 = vpop.f32.mrf.mxu1  ;;  %v8838_v54 = vld [vmem:[%s10709_s21 + $0x590] sm:$0xff]  ;;  %v11818_v49 = vadd.f32 %v11482_v58, %v2382_v33  ;;  %v8835_v11 = vld [vmem:[%s10709_s21 + $0x578] sm:$0xff] }
 0x205   : > { %3142 = vmatpush1.msra.mxu0 %v8840_v55  ;;  %2860 = vmatprep.mubr.f32.mxu1 %v13591_v13  ;;  %v13616_v55 = vld [vmem:[#allocation56_spill] sm:$0xff] }
 0x206   : > { %2706 = vmatmul.mubr.f32.gmra.mxu0 %v13497_v34  ;;  %3022 = vmatprep.subr.mxu1 %v8811_v32  ;;  %v2254_v3 = vpop.f32.mrf.mxu0  ;;  %v2344_v6 = vpop.f32.mrf.mxu1  ;;  %v1992_v57 = vadd.f32 %v11450_v37, %v13616_v55  ;;  %v2381_v34 = vadd.f32 %v2244_v51, %v11440_v20  ;;  %v2484_v55 = vmax.f32 %v11796_v45, 0.0  ;;  %v2479_v20 = vmax.f32 %v11802_v25, 0.0 }
 0x207   : > { %3143 = vmatprep.subr.mxu0 %v8839_v22  ;;  %2861 = vmatmul.mubr.f32.gmra.mxu1 %v2481_v40  ;;  %v2387_v32 = vadd.f32 %v2254_v3, %v11458_v29  ;;  %v2389_v37 = vadd.f32 %v2344_v6, %v11461_v39  ;;  %v13617_v51 = vmax.f32 %v11784_v21, 0.0  ;;  %v13618_v3 = vld [vmem:[#allocation57_spill] sm:$0xff]  ;;  %v13619_v6 = vld [vmem:[#allocation74_spill] sm:$0xff] }
 0x208   : > { %3023 = vmatpush2.msra.mxu1 %v8810_v63  ;;  %3144 = vmatpush1.msra.mxu0 %v8838_v54  ;;  %v9752_v22 = vpop.f32.mrf.mxu1  ;;  %v2385_v39 = vadd.f32 %v2252_v5, %v1992_v57  ;;  %v11835_v63 = vadd.f32 %v11474_v27, %v2386_v2  ;;  %v8806_v54 = vld [vmem:[%s10709_s21 + $0x490] sm:$0xff]  ;;  %v8805_v57 = vld [vmem:[%s10709_s21 + $0x488] sm:$0xff]  ;;  %v13620_v2 = vld [vmem:[#allocation71_spill] sm:$0xff] }
 0x209   : > { %3024 = vmatprep.subr.mxu1 %v8809_v52  ;;  %3145 = vmatprep.subr.mxu0 %v8837_v36  ;;  %v11825_v29 = vadd.f32 %v11477_v35, %v2387_v32  ;;  %v11832_v33 = vadd.f32 %v11474_v27, %v2389_v37  ;;  %v8834_v52 = vld [vmem:[%s10709_s21 + $0x570] sm:$0xff]  ;;  %v11841_v36 = vadd.f32 %v11477_v35, %v2381_v34  ;;  %v8833_v5 = vld [vmem:[%s10709_s21 + $0x568] sm:$0xff]  ;;  %v8804_v27 = vld [vmem:[%s10709_s21 + $0x480] sm:$0xff] }
 0x20a   : > { %2711 = vmatprep.mubr.f32.mxu0 %v13617_v51  ;;  %3025 = vmatpush2.msra.mxu1 %v8808_v48  ;;  %v2483_v48 = vmax.f32 %v11818_v49, 0.0  ;;  %v1996_v34 = vadd.f32 %v13619_v6, %v13618_v3  ;;  %v2384_v32 = vadd.f32 %v11787_v53, %v13620_v2  ;;  %v11856_v37 = vadd.f32 %v11482_v58, %v2385_v39  ;;  %v8832_v22 = vld [vmem:[%s10709_s21 + $0x560] sm:$0xff]  ;;  %v8803_v51 = vld [vmem:[%s10709_s21 + $0x478] sm:$0xff]  ;;  %v8829_v3 = vld [vmem:[%s10709_s21 + $0x548] sm:$0xff] }
 0x20b   : > { %3146 = vmatpush1.msra.mxu0 %v8836_v26  ;;  %2866 = vmatprep.mubr.f32.mxu1 %v13591_v13  ;;  %v2256_v26 = vpop.f32.mrf.mxu0  ;;  %v8831_v39 = vld [vmem:[%s10709_s21 + $0x558] sm:$0xff]  ;;  %v8828_v6 = vld [vmem:[%s10709_s21 + $0x540] sm:$0xff] }
 0x20c   : > { %2712 = vmatmul.mubr.f32.gmra.mxu0 %v2479_v20  ;;  %3026 = vmatprep.subr.mxu1 %v8807_v30  ;;  %v2487_v30 = vmax.f32 %v11835_v63, 0.0  ;;  %v2388_v53 = vadd.f32 %v2256_v26, %v1996_v34  ;;  %v8800_v26 = vld [vmem:[%s10709_s21 + $0x460] sm:$0xff]  ;;  %v2490_v34 = vmax.f32 %v11832_v33, 0.0  ;;  %v8799_v2 = vld [vmem:[%s10709_s21 + $0x458] sm:$0xff] }
 0x20d   : > { %3147 = vmatprep.subr.mxu0 %v8835_v11  ;;  %2867 = vmatmul.mubr.f32.gmra.mxu1 %v2484_v55  ;;  %v2482_v11 = vmax.f32 %v11841_v36, 0.0 }
 0x20e   : > { %3027 = vmatpush2.msra.mxu1 %v8806_v54  ;;  %3148 = vmatpush1.msra.mxu0 %v8834_v52  ;;  %v8802_v54 = vld [vmem:[%s10709_s21 + $0x470] sm:$0xff] }
 0x20f   : > { %3028 = vmatprep.subr.mxu1 %v8805_v57  ;;  %3149 = vmatprep.subr.mxu0 %v8833_v5  ;;  %v8830_v52 = vld [vmem:[%s10709_s21 + $0x550] sm:$0xff]  ;;  %v11869_v57 = vadd.f32 %v11477_v35, %v2384_v32  ;;  %v8801_v5 = vld [vmem:[%s10709_s21 + $0x468] sm:$0xff]  ;;  %v11880_v35 = vadd.f32 %v11482_v58, %v2388_v53  ;;  %v8827_v58 = vld [vmem:[%s10709_s21 + $0x538] sm:$0xff] }
 0x210   : > { %2717 = vmatprep.mubr.f32.mxu0 %v2483_v48  ;;  %3029 = vmatpush2.msra.mxu1 %v8804_v27  ;;  %v2486_v27 = vmax.f32 %v11856_v37, 0.0 }
 0x211   : > { %3150 = vmatpush1.msra.mxu0 %v8832_v22  ;;  %2872 = vmatprep.mubr.f32.mxu1 %v13591_v13  ;;  %v2485_v32 = vmax.f32 %v11869_v57, 0.0  ;;  %v8798_v22 = vld [vmem:[%s10709_s21 + $0x450] sm:$0xff]  ;;  %v2489_v53 = vmax.f32 %v11880_v35, 0.0 }
 0x212   : > { %2718 = vmatmul.mubr.f32.gmra.mxu0 %v2482_v11  ;;  %3030 = vmatprep.subr.mxu1 %v8803_v51  ;;  %v8826_v51 = vld [vmem:[%s10709_s21 + $0x530] sm:$0xff] }
 0x213   : > { %3151 = vmatprep.subr.mxu0 %v8831_v39  ;;  %2873 = vmatmul.mubr.f32.gmra.mxu1 %v2487_v30  ;;  %v8797_v39 = vld [vmem:[%s10709_s21 + $0x448] sm:$0xff] }
 0x214   : > { %3031 = vmatpush2.msra.mxu1 %v8802_v54  ;;  %3152 = vmatpush1.msra.mxu0 %v8830_v52  ;;  %v8825_v54 = vld [vmem:[%s10709_s21 + $0x528] sm:$0xff]  ;;  %v8796_v52 = vld [vmem:[%s10709_s21 + $0x440] sm:$0xff] }
 0x215   : > { %3032 = vmatprep.subr.mxu1 %v8801_v5  ;;  %3153 = vmatprep.subr.mxu0 %v8829_v3  ;;  %v8824_v5 = vld [vmem:[%s10709_s21 + $0x520] sm:$0xff]  ;;  %v13621_v3 = vmax.f32 %v11498_v62, 0.0  ;;  %v8821_v62 = vld [vmem:[%s10709_s21 + $0x508] sm:$0xff] }
 0x216   : > { %2723 = vmatprep.mubr.f32.mxu0 %v2486_v27  ;;  %3033 = vmatpush2.msra.mxu1 %v8800_v26  ;;  %v8795_v26 = vld [vmem:[%s10709_s21 + $0x438] sm:$0xff] }
 0x217   : > { %3154 = vmatpush1.msra.mxu0 %v8828_v6  ;;  %2878 = vmatprep.mubr.f32.mxu1 %v13591_v13  ;;  %v13500_v6 = vmax.f32 %v11825_v29, 0.0 }
 0x218   : > { %2724 = vmatmul.mubr.f32.gmra.mxu0 %v2485_v32  ;;  %3034 = vmatprep.subr.mxu1 %v8799_v2  ;;  %v8823_v2 = vld [vmem:[%s10709_s21 + $0x518] sm:$0xff] }
 0x219   : > { %3155 = vmatprep.subr.mxu0 %v8827_v58  ;;  %2879 = vmatmul.mubr.f32.gmra.mxu1 %v2490_v34  ;;  %v8794_v58 = vld [vmem:[%s10709_s21 + $0x430] sm:$0xff] }
 0x21a   : > { %3035 = vmatpush2.msra.mxu1 %v8798_v22  ;;  %3156 = vmatpush1.msra.mxu0 %v8826_v51  ;;  %v8822_v22 = vld [vmem:[%s10709_s21 + $0x510] sm:$0xff]  ;;  %v8793_v51 = vld [vmem:[%s10709_s21 + $0x428] sm:$0xff] }
 0x21b   : > { %3036 = vmatprep.subr.mxu1 %v8797_v39  ;;  %3046 = vmatprep.mubr.f32.mxu1 %v13621_v3  ;;  %v8792_v39 = vld [vmem:[%s10709_s21 + $0x420] sm:$0xff]  ;;  %v8791_v3 = vld [vmem:[%s10709_s21 + $0x418] sm:$0xff] }
 0x21c   : > { %3157 = vmatprep.subr.mxu0 %v8825_v54  ;;  %2729 = vmatprep.mubr.f32.mxu0 %v2489_v53  ;;  %v8820_v54 = vld [vmem:[%s10709_s21 + $0x500] sm:$0xff] }
 0x21d   : > { %3037 = vmatpush2.msra.mxu1 %v8796_v52  ;;  %3158 = vmatpush1.msra.mxu0 %v8824_v5  ;;  %v8790_v52 = vld [vmem:[%s10709_s21 + $0x410] sm:$0xff]  ;;  %v8789_v5 = vld [vmem:[%s10709_s21 + $0x408] sm:$0xff] }
 0x21e   : > { %2730 = vmatmul.mubr.f32.gmra.mxu0 %v13500_v6  ;;  %3038 = vmatprep.subr.mxu1 %v8795_v26  ;;  %v13622_v6 = vmax.f32 %v11487_v42, 0.0  ;;  %v8788_v26 = vld [vmem:[%s10709_s21 + $0x400] sm:$0xff]  ;;  %v13626_v42 = vmax.f32 %v11514_v59, 0.0  ;;  %v13632_v59 = vmax.f32 %v11571_v8, 0.0  ;;  %v13638_v8 = vmax.f32 %v11629_v17, 0.0 }
 0x21f   : > { %3159 = vmatprep.subr.mxu0 %v8823_v2  ;;  %3039 = vmatpush2.msra.mxu1 %v8794_v58  ;;  %v13623_v2 = vmax.f32 %v11492_v60, 0.0  ;;  %v13624_v58 = vmax.f32 %v11517_v4, 0.0  ;;  %v13629_v60 = vmax.f32 %v11543_v12, 0.0  ;;  %v13630_v4 = vmax.f32 %v11574_v14, 0.0 }
 0x220   : > { %3160 = vmatpush1.msra.mxu0 %v8822_v22  ;;  %3040 = vmatprep.subr.mxu1 %v8793_v51  ;;  %v13625_v22 = vmax.f32 %v11523_v38, 0.0  ;;  %v13628_v51 = vmax.f32 %v11552_v9, 0.0  ;;  %v13631_v38 = vmax.f32 %v11580_v24, 0.0  ;;  %v13634_v9 = vmax.f32 %v11610_v18, 0.0 }
 0x221   : > { %3161 = vmatprep.subr.mxu0 %v8821_v62  ;;  %3041 = vmatpush2.msra.mxu1 %v8792_v39  ;;  %v13635_v12 = vmax.f32 %v11601_v15, 0.0  ;;  %v13636_v14 = vmax.f32 %v11632_v0, 0.0  ;;  %v13637_v24 = vmax.f32 %v11638_v56, 0.0  ;;  %v13640_v18 = vmax.f32 %v11668_v16, 0.0 }
 0x222   : > { %3162 = vmatpush1.msra.mxu0 %v8820_v54  ;;  %3195 = vmatprep.mubr.f32.mxu0 %v13591_v13  ;;  %v13641_v15 = vmax.f32 %v11659_v10, 0.0  ;;  %v13642_v0 = vmax.f32 %v11685_v43, 0.0  ;;  %v13643_v56 = vmax.f32 %v11694_v47, 0.0  ;;  %v13644_v17 = vmax.f32 %v11691_v7, 0.0 }
 0x223   : > { %3042 = vmatprep.subr.mxu1 %v8791_v3  ;;  %3196 = vmatmul.mubr.f32.vlgmr.msra.gmra.mxu0 %v13622_v6  ;;  %v13627_v6 = vmax.f32 %v11535_v61, 0.0  ;;  %v13633_v61 = vmax.f32 %v11592_v50, 0.0  ;;  %v13639_v50 = vmax.f32 %v11650_v28, 0.0  ;;  %v13645_v28 = vmax.f32 %v11707_v1, 0.0 }
 0x224   : > { %3043 = vmatpush2.msra.mxu1 %v8790_v52  ;;  %3201 = vmatprep.mubr.f32.mxu0 %v13591_v13  ;;  %v13646_v16 = vmax.f32 %v11722_v41, 0.0  ;;  %v13647_v10 = vmax.f32 %v11737_v19, 0.0  ;;  %v13648_v43 = vmax.f32 %v11740_v23, 0.0  ;;  %v13649_v47 = vmax.f32 %v11752_v46, 0.0 }
 0x225   : > { %3044 = vmatprep.subr.mxu1 %v8789_v5  ;;  %v13650_v7 = vmax.f32 %v11770_v31, 0.0  ;;  %v13651_v1 = vmax.f32 %v11784_v21, 0.0  ;;  %v13652_v41 = vmax.f32 %v11825_v29, 0.0 }
 0x226   : > { %3045 = vmatpush2.msra.mxu1 %v8788_v26 }
 0x227   : > { %3047 = vmatmul.mubr.f32.vlgmr.msra.gmra.mxu1 %v13623_v2  ;;  %3202 = vmatmul.mubr.f32.gmra.mxu0 %v13624_v58 }
 0x228   : > { %3052 = vmatprep.mubr.f32.mxu1 %v13625_v22  ;;  %3207 = vmatprep.mubr.f32.mxu0 %v13591_v13 }
 0x22b   : > { %3053 = vmatmul.mubr.f32.gmra.mxu1 %v13626_v42  ;;  %3208 = vmatmul.mubr.f32.gmra.mxu0 %v13627_v6 }
 0x22c   : > { %3058 = vmatprep.mubr.f32.mxu1 %v13628_v51  ;;  %3213 = vmatprep.mubr.f32.mxu0 %v13591_v13 }
 0x22f   : > { %3059 = vmatmul.mubr.f32.gmra.mxu1 %v13629_v60  ;;  %3214 = vmatmul.mubr.f32.gmra.mxu0 %v13630_v4 }
 0x230   : > { %3064 = vmatprep.mubr.f32.mxu1 %v13631_v38  ;;  %3219 = vmatprep.mubr.f32.mxu0 %v13591_v13 }
 0x233   : > { %3065 = vmatmul.mubr.f32.gmra.mxu1 %v13632_v59  ;;  %3220 = vmatmul.mubr.f32.gmra.mxu0 %v13633_v61 }
 0x234   : > { %3070 = vmatprep.mubr.f32.mxu1 %v13634_v9  ;;  %3225 = vmatprep.mubr.f32.mxu0 %v13591_v13 }
 0x237   : > { %3071 = vmatmul.mubr.f32.gmra.mxu1 %v13635_v12  ;;  %3226 = vmatmul.mubr.f32.gmra.mxu0 %v13636_v14 }
 0x238   : > { %3076 = vmatprep.mubr.f32.mxu1 %v13637_v24  ;;  %3231 = vmatprep.mubr.f32.mxu0 %v13591_v13 }
 0x23b   : > { %3077 = vmatmul.mubr.f32.gmra.mxu1 %v13638_v8  ;;  %3232 = vmatmul.mubr.f32.gmra.mxu0 %v13639_v50 }
 0x23c   : > { %3082 = vmatprep.mubr.f32.mxu1 %v13640_v18  ;;  %3237 = vmatprep.mubr.f32.mxu0 %v13591_v13 }
 0x23f   : > { %3083 = vmatmul.mubr.f32.gmra.mxu1 %v13641_v15  ;;  %3238 = vmatmul.mubr.f32.gmra.mxu0 %v13642_v0 }
 0x240   : > { %3088 = vmatprep.mubr.f32.mxu1 %v13643_v56  ;;  %3243 = vmatprep.mubr.f32.mxu0 %v13591_v13 }
 0x243   : > { %3089 = vmatmul.mubr.f32.gmra.mxu1 %v13644_v17  ;;  %3244 = vmatmul.mubr.f32.gmra.mxu0 %v13645_v28 }
 0x244   : > { %3094 = vmatprep.mubr.f32.mxu1 %v13646_v16  ;;  %3249 = vmatprep.mubr.f32.mxu0 %v13591_v13 }
 0x247   : > { %3095 = vmatmul.mubr.f32.gmra.mxu1 %v13647_v10  ;;  %3250 = vmatmul.mubr.f32.gmra.mxu0 %v13648_v43 }
 0x248   : > { %3100 = vmatprep.mubr.f32.mxu1 %v13649_v47  ;;  %3255 = vmatprep.mubr.f32.mxu0 %v13591_v13 }
 0x24b   : > { %3101 = vmatmul.mubr.f32.gmra.mxu1 %v13650_v7  ;;  %3256 = vmatmul.mubr.f32.gmra.mxu0 %v2481_v40 }
 0x24c   : > { %3106 = vmatprep.mubr.f32.mxu1 %v13651_v1  ;;  %3261 = vmatprep.mubr.f32.mxu0 %v13591_v13 }
 0x24f   : > { %3107 = vmatmul.mubr.f32.gmra.mxu1 %v2479_v20  ;;  %3262 = vmatmul.mubr.f32.gmra.mxu0 %v2484_v55 }
 0x250   : > { %3112 = vmatprep.mubr.f32.mxu1 %v2483_v48  ;;  %3267 = vmatprep.mubr.f32.mxu0 %v13591_v13 }
 0x253   : > { %3113 = vmatmul.mubr.f32.gmra.mxu1 %v2482_v11  ;;  %3268 = vmatmul.mubr.f32.gmra.mxu0 %v2487_v30 }
 0x254   : > { %3118 = vmatprep.mubr.f32.mxu1 %v2486_v27  ;;  %3273 = vmatprep.mubr.f32.mxu0 %v13591_v13 }
 0x257   : > { %3119 = vmatmul.mubr.f32.gmra.mxu1 %v2485_v32  ;;  %3274 = vmatmul.mubr.f32.gmra.mxu0 %v2490_v34 }
 0x258   : > { %3124 = vmatprep.mubr.f32.mxu1 %v2489_v53  ;;  %3404 = vmatprep.mubr.f32.mxu0 %v13591_v13 }
 0x25b   : > { %3125 = vmatmul.mubr.f32.gmra.mxu1 %v13652_v41 }
 0x25c   : > { %3530 = vmatprep.mubr.f32.mxu1 %v13591_v13 }
 0x299   : > { %v2802_v19 = vpop.f32.mrf.mxu1 }
 0x29b   : > { %v12018_v23 = vpop.f32.mrf.mxu1 }
 0x29c   : > { %13653 = vst [vmem:[#allocation44_spill] sm:$0xff] %v12018_v23  ;;  %v2653_v31 = vpop.f32.mrf.mxu0 }
 0x29d   : > { %v12020_v46 = vadd.f32 %v2802_v19, %v2653_v31 }
 0x29e   : > { %v2808_v21 = vpop.f32.mrf.mxu1  ;;  %v12022_v44 = vpop.f32.mrf.mxu0 }
 0x29f   : > { %13654 = vst [vmem:[#allocation58_spill] sm:$0xff] %v12022_v44 }
 0x2a0   : > { %v2810_v40 = vpop.f32.mrf.mxu1  ;;  %v2659_v45 = vpop.f32.mrf.mxu0 }
 0x2a1   : > { %v12024_v25 = vadd.f32 %v2808_v21, %v2659_v45 }
 0x2a2   : > { %v2814_v49 = vpop.f32.mrf.mxu1  ;;  %v2661_v55 = vpop.f32.mrf.mxu0 }
 0x2a3   : > { %v12026_v20 = vadd.f32 %v2810_v40, %v2661_v55 }
 0x2a4   : > { %v12028_v29 = vpop.f32.mrf.mxu1  ;;  %v2665_v33 = vpop.f32.mrf.mxu0 }
 0x2a5   : > { %13655 = vst [vmem:[#allocation45_spill] sm:$0xff] %v12028_v29  ;;  %v12030_v63 = vadd.f32 %v2814_v49, %v2665_v33 }
 0x2a6   : > { %v2820_v36 = vpop.f32.mrf.mxu1  ;;  %v12032_v48 = vpop.f32.mrf.mxu0 }
 0x2a7   : > { %13656 = vst [vmem:[#allocation59_spill] sm:$0xff] %v12032_v48 }
 0x2a8   : > { %v2822_v37 = vpop.f32.mrf.mxu1  ;;  %v2671_v30 = vpop.f32.mrf.mxu0 }
 0x2a9   : > { %v12034_v11 = vadd.f32 %v2820_v36, %v2671_v30 }
 0x2aa   : > { %v2826_v57 = vpop.f32.mrf.mxu1  ;;  %v2673_v27 = vpop.f32.mrf.mxu0 }
 0x2ab   : > { %13657 = vst [vmem:[#allocation47_spill] sm:$0xff] %v12034_v11  ;;  %v12036_v35 = vadd.f32 %v2822_v37, %v2673_v27 }
 0x2ac   : > { %v12038_v34 = vpop.f32.mrf.mxu1  ;;  %v2677_v32 = vpop.f32.mrf.mxu0 }
 0x2ad   : > { %13658 = vst [vmem:[#allocation61_spill] sm:$0xff] %v12036_v35  ;;  %13659 = vst [vmem:[#allocation48_spill] sm:$0xff] %v12038_v34  ;;  %v12040_v53 = vadd.f32 %v2826_v57, %v2677_v32 }
 0x2ae   : > { %v2832_v62 = vpop.f32.mrf.mxu1  ;;  %v12042_v39 = vpop.f32.mrf.mxu0 }
 0x2af   : > { %13660 = vst [vmem:[#allocation62_spill] sm:$0xff] %v12040_v53  ;;  %13661 = vst [vmem:[#allocation46_spill] sm:$0xff] %v12042_v39 }
 0x2b0   : > { %v12044_v54 = vpop.f32.mrf.mxu1  ;;  %v2683_v3 = vpop.f32.mrf.mxu0 }
 0x2b1   : > { %13662 = vst [vmem:[#allocation60_spill] sm:$0xff] %v12044_v54  ;;  %v12046_v52 = vadd.f32 %v2832_v62, %v2683_v3 }
 0x2b2   : > { %v2838_v5 = vpop.f32.mrf.mxu1  ;;  %v12048_v26 = vpop.f32.mrf.mxu0 }
 0x2b3   : > { %13663 = vst [vmem:[#allocation50_spill] sm:$0xff] %v12046_v52  ;;  %13664 = vst [vmem:[#allocation64_spill] sm:$0xff] %v12048_v26 }
 0x2b4   : > { %v12050_v2 = vpop.f32.mrf.mxu1  ;;  %v2689_v58 = vpop.f32.mrf.mxu0 }
 0x2b5   : > { %13665 = vst [vmem:[#allocation51_spill] sm:$0xff] %v12050_v2  ;;  %v12052_v22 = vadd.f32 %v2838_v5, %v2689_v58 }
 0x2b6   : > { %v2844_v42 = vpop.f32.mrf.mxu1  ;;  %v12054_v6 = vpop.f32.mrf.mxu0 }
 0x2b7   : > { %13666 = vst [vmem:[#allocation65_spill] sm:$0xff] %v12052_v22  ;;  %13667 = vst [vmem:[#allocation52_spill] sm:$0xff] %v12054_v6 }
 0x2b8   : > { %v12056_v51 = vpop.f32.mrf.mxu1 }
 0x2b9   : > { %v2695_v60 = vpop.f32.mrf.mxu0 }
 0x2ba   : > { %v12058_v4 = vadd.f32 %v2844_v42, %v2695_v60 }
 0x2bb   : > { %v2850_v38 = vpop.f32.mrf.mxu1  ;;  %v12060_v59 = vpop.f32.mrf.mxu0 }
 0x2bc   : > { %13668 = vst [vmem:[#allocation66_spill] sm:$0xff] %v12058_v4 }
 0x2bd   : > { %v12062_v61 = vpop.f32.mrf.mxu1 }
 0x2c0   : > { %v2701_v9 = vpop.f32.mrf.mxu0 }
 0x2c1   : > { %v12064_v12 = vadd.f32 %v2850_v38, %v2701_v9  ;;  %v2856_v14 = vpop.f32.mrf.mxu1 }
 0x2c2   : > { %v12066_v24 = vpop.f32.mrf.mxu0 }
 0x2c3   : > { %13669 = vst [vmem:[#allocation49_spill] sm:$0xff] %v12064_v12  ;;  %v12068_v8 = vpop.f32.mrf.mxu1 }
 0x2c6   : > { %v2707_v50 = vpop.f32.mrf.mxu0 }
 0x2c7   : > { %v12070_v18 = vadd.f32 %v2856_v14, %v2707_v50  ;;  %v2862_v15 = vpop.f32.mrf.mxu1 }
 0x2c8   : > { %v12072_v0 = vpop.f32.mrf.mxu0 }
 0x2c9   : > { %v12074_v56 = vpop.f32.mrf.mxu1 }
 0x2cc   : > { %v2713_v17 = vpop.f32.mrf.mxu0 }
 0x2cd   : > { %v12076_v28 = vadd.f32 %v2862_v15, %v2713_v17  ;;  %v2868_v10 = vpop.f32.mrf.mxu1 }
 0x2ce   : > { %v12078_v16 = vpop.f32.mrf.mxu0 }
 0x2cf   : > { %v12082_v7 = vpop.f32.mrf.mxu1 }
 0x2d2   : > { %v2719_v43 = vpop.f32.mrf.mxu0 }
 0x2d3   : > { %v12080_v47 = vadd.f32 %v2868_v10, %v2719_v43  ;;  %v2874_v41 = vpop.f32.mrf.mxu1 }
 0x2d4   : > { %v12084_v1 = vpop.f32.mrf.mxu0 }
 0x2d5   : > { %v12090_v40 = vpop.f32.mrf.mxu1 }
 0x2d8   : > { %v2725_v19 = vpop.f32.mrf.mxu0 }
 0x2d9   : > { %v12086_v31 = vadd.f32 %v2874_v41, %v2725_v19  ;;  %v12096_v55 = vpop.f32.mrf.mxu1 }
 0x2da   : > { %v12088_v21 = vpop.f32.mrf.mxu0 }
 0x2db   : > { %v12098_v36 = vpop.f32.mrf.mxu1 }
 0x2de   : > { %v12092_v45 = vpop.f32.mrf.mxu0 }
 0x2df   : > { %v2881_v4 = vadd.f32 %v12096_v55, %v12092_v45 }
 0x2e0   : > { %v12094_v49 = vpop.f32.mrf.mxu0 }
 0x2e3   : > { %v3197_v33 = vpop.f32.mrf.mxu0 }
 0x2e5   : > { %v12100_v37 = vpop.f32.mrf.mxu0 }
 0x2e6   : > { %13670 = vst [vmem:[#allocation63_spill] sm:$0xff] %v12100_v37 }
 0x2e7   : > { %v3048_v30 = vpop.f32.mrf.mxu1  ;;  %v3203_v57 = vpop.f32.mrf.mxu0 }
 0x2e8   : > { %v3198_v27 = vadd.f32 %v3197_v33, %v3048_v30 }
 0x2e9   : > { %v12102_v32 = vpop.f32.mrf.mxu1  ;;  %v3205_v62 = vpop.f32.mrf.mxu0 }
 0x2ea   : > { %13671 = vst [vmem:[#allocation53_spill] sm:$0xff] %v12102_v32  ;;  %v12105_v3 = vmax.f32 %v12020_v46, %v3198_v27 }
 0x2eb   : > { %v3054_v5 = vpop.f32.mrf.mxu1  ;;  %v3209_v58 = vpop.f32.mrf.mxu0 }
 0x2ec   : > { %13672 = vst [vmem:[#allocation68_spill] sm:$0xff] %v12105_v3  ;;  %v3204_v42 = vadd.f32 %v3203_v57, %v3054_v5 }
 0x2ed   : > { %v3056_v60 = vpop.f32.mrf.mxu1  ;;  %v12107_v38 = vpop.f32.mrf.mxu0 }
 0x2ee   : > { %13673 = vst [vmem:[#allocation54_spill] sm:$0xff] %v12107_v38  ;;  %v12110_v9 = vmax.f32 %v12024_v25, %v3204_v42  ;;  %v3206_v14 = vadd.f32 %v3205_v62, %v3056_v60 }
 0x2ef   : > { %v3060_v50 = vpop.f32.mrf.mxu1  ;;  %v12112_v15 = vpop.f32.mrf.mxu0 }
 0x2f0   : > { %13674 = vst [vmem:[#allocation69_spill] sm:$0xff] %v12110_v9  ;;  %13675 = vst [vmem:[#allocation55_spill] sm:$0xff] %v12112_v15  ;;  %v12115_v17 = vmax.f32 %v12026_v20, %v3206_v14  ;;  %v3210_v10 = vadd.f32 %v3209_v58, %v3060_v50 }
 0x2f1   : > { %v12117_v43 = vpop.f32.mrf.mxu1  ;;  %v12119_v46 = vpop.f32.mrf.mxu0 }
 0x2f2   : > { %13676 = vst [vmem:[#allocation67_spill] sm:$0xff] %v12115_v17  ;;  %13677 = vst [vmem:[#allocation56_spill] sm:$0xff] %v12117_v43  ;;  %v12122_v41 = vmax.f32 %v12030_v63, %v3210_v10 }
 0x2f3   : > { %13678 = vst [vmem:[#allocation57_spill] sm:$0xff] %v12119_v46  ;;  %v12124_v19 = vpop.f32.mrf.mxu1  ;;  %v12126_v33 = vpop.f32.mrf.mxu0 }
 0x2f4   : > { %13679 = vst [vmem:[#allocation74_spill] sm:$0xff] %v12122_v41  ;;  %13680 = vst [vmem:[#allocation71_spill] sm:$0xff] %v12124_v19 }
 0x2f5   : > { %13681 = vst [vmem:[#allocation75_spill] sm:$0xff] %v12126_v33  ;;  %v12128_v25 = vpop.f32.mrf.mxu1  ;;  %v12130_v30 = vpop.f32.mrf.mxu0 }
 0x2f6   : > { %13682 = vst [vmem:[#allocation76_spill] sm:$0xff] %v12128_v25  ;;  %13683 = vst [vmem:[#allocation77_spill] sm:$0xff] %v12130_v30 }
 0x2f7   : > { %v12132_v57 = vpop.f32.mrf.mxu1  ;;  %v12134_v20 = vpop.f32.mrf.mxu0 }
 0x2f8   : > { %13684 = vst [vmem:[#allocation78_spill] sm:$0xff] %v12132_v57  ;;  %13685 = vst [vmem:[#allocation79_spill] sm:$0xff] %v12134_v20 }
 0x2f9   : > { %v12136_v27 = vpop.f32.mrf.mxu1  ;;  %v12138_v62 = vpop.f32.mrf.mxu0 }
 0x2fa   : > { %13686 = vst [vmem:[#allocation80_spill] sm:$0xff] %v12136_v27  ;;  %13687 = vst [vmem:[#allocation81_spill] sm:$0xff] %v12138_v62  ;;  %v2883_v27 = vadd.f32 %v12098_v36, %v12094_v49  ;;  %v13697_v49 = vld [vmem:[#allocation66_spill] sm:$0xff]  ;;  %v13698_v36 = vld [vmem:[#allocation64_spill] sm:$0xff] }
 0x2fb   : > { %v12140_v5 = vpop.f32.mrf.mxu1  ;;  %v12142_v63 = vpop.f32.mrf.mxu0 }
 0x2fc   : > { %13688 = vst [vmem:[#allocation82_spill] sm:$0xff] %v12140_v5  ;;  %v2877_v5 = vadd.f32 %v12090_v40, %v12088_v21 }
 0x2fd   : > { %v12144_v58 = vpop.f32.mrf.mxu1  ;;  %v12146_v42 = vpop.f32.mrf.mxu0 }
 0x2fe   : > { %13689 = vst [vmem:[#allocation83_spill] sm:$0xff] %v12144_v58 }
 0x2ff   : > { %v12148_v60 = vpop.f32.mrf.mxu1  ;;  %v12150_v14 = vpop.f32.mrf.mxu0  ;;  %v13696_v21 = vld [vmem:[#allocation79_spill] sm:$0xff] }
 0x301   : > { %v12152_v50 = vpop.f32.mrf.mxu1  ;;  %v12154_v10 = vpop.f32.mrf.mxu0 }
 0x303   : > { %v12156_v13 = vpop.f32.mrf.mxu1  ;;  %v3245_v3 = vpop.f32.mrf.mxu0 }
 0x305   : > { %v12158_v9 = vpop.f32.mrf.mxu1  ;;  %v3247_v17 = vpop.f32.mrf.mxu0 }
 0x307   : > { %v3096_v41 = vpop.f32.mrf.mxu1  ;;  %v3251_v23 = vpop.f32.mrf.mxu0 }
 0x309   : > { %v3098_v44 = vpop.f32.mrf.mxu1  ;;  %v3253_v37 = vpop.f32.mrf.mxu0 }
 0x30b   : > { %v3102_v32 = vpop.f32.mrf.mxu1  ;;  %v3257_v11 = vpop.f32.mrf.mxu0 }
 0x30d   : > { %v3104_v35 = vpop.f32.mrf.mxu1  ;;  %v3259_v29 = vpop.f32.mrf.mxu0 }
 0x30f   : > { %v3108_v48 = vpop.f32.mrf.mxu1  ;;  %v3263_v53 = vpop.f32.mrf.mxu0 }
 0x311   : > { %v3110_v38 = vpop.f32.mrf.mxu1  ;;  %v3265_v43 = vpop.f32.mrf.mxu0 }
 0x313   : > { %v3114_v52 = vpop.f32.mrf.mxu1  ;;  %v3269_v15 = vpop.f32.mrf.mxu0 }
 0x314   : > { %v3264_v2 = vadd.f32 %v3263_v53, %v3114_v52  ;;  %v2865_v53 = vadd.f32 %v12074_v56, %v12078_v16  ;;  %v3254_v52 = vadd.f32 %v3253_v37, %v3104_v35  ;;  %v2853_v35 = vadd.f32 %v12062_v61, %v12066_v24  ;;  %v13690_v56 = vld [vmem:[#allocation49_spill] sm:$0xff]  ;;  %v13699_v37 = vld [vmem:[#allocation60_spill] sm:$0xff] }
 0x315   : > { %v3116_v19 = vpop.f32.mrf.mxu1  ;;  %v3271_v46 = vpop.f32.mrf.mxu0  ;;  %v3234_v24 = vadd.f32 %v12142_v63, %v12148_v60  ;;  %v13710_v63 = vld [vmem:[#allocation55_spill] sm:$0xff] }
 0x316   : > { %v3266_v62 = vadd.f32 %v3265_v43, %v3116_v19  ;;  %v13703_v43 = vld [vmem:[#allocation75_spill] sm:$0xff] }
 0x317   : > { %v3120_v25 = vpop.f32.mrf.mxu1  ;;  %v3275_v34 = vpop.f32.mrf.mxu0 }
 0x318   : > { %v3270_v20 = vadd.f32 %v3269_v15, %v3120_v25  ;;  %v13706_v25 = vld [vmem:[#allocation48_spill] sm:$0xff] }
 0x319   : > { %v3122_v39 = vpop.f32.mrf.mxu1  ;;  %v3277_v33 = vpop.f32.mrf.mxu0 }
 0x31a   : > { %v3272_v54 = vadd.f32 %v3271_v46, %v3122_v39  ;;  %v3258_v39 = vadd.f32 %v3257_v11, %v3108_v48  ;;  %v3304_v45 = vmax.f32 %v12086_v31, %v3270_v20  ;;  %v2859_v48 = vadd.f32 %v12068_v8, %v12072_v0  ;;  %v13708_v20 = vld [vmem:[#allocation57_spill] sm:$0xff] }
 0x31b   : > { %v3126_v22 = vpop.f32.mrf.mxu1  ;;  %v3248_v11 = vadd.f32 %v3247_v17, %v3098_v44  ;;  %v3240_v44 = vadd.f32 %v12150_v14, %v12156_v13  ;;  %v2847_v8 = vadd.f32 %v12056_v51, %v12060_v59  ;;  %v3236_v0 = vadd.f32 %v12146_v42, %v12152_v50  ;;  %v13691_v13 = vld [vmem:[#allocation52_spill] sm:$0xff]  ;;  %v13695_v59 = vld [vmem:[#allocation82_spill] sm:$0xff] }
 0x31c   : > { %v3276_v57 = vadd.f32 %v3275_v34, %v3126_v22  ;;  %v2871_v34 = vadd.f32 %v12082_v7, %v12084_v1  ;;  %v3260_v22 = vadd.f32 %v3259_v29, %v3110_v38  ;;  %v3305_v12 = vmax.f32 %v2877_v5, %v3272_v54  ;;  %v13694_v1 = vld [vmem:[#allocation81_spill] sm:$0xff]  ;;  %v13702_v17 = vld [vmem:[#allocation78_spill] sm:$0xff]  ;;  %v13709_v5 = vld [vmem:[#allocation71_spill] sm:$0xff] }
 0x31d   : > { %v3128_v30 = vpop.f32.mrf.mxu1  ;;  %v3252_v29 = vadd.f32 %v3251_v23, %v3102_v32  ;;  %v3302_v54 = vmax.f32 %v12080_v47, %v3264_v2  ;;  %v3300_v7 = vmax.f32 %v12076_v28, %v3258_v39  ;;  %v3242_v23 = vadd.f32 %v12154_v10, %v12158_v9  ;;  %v13693_v47 = vld [vmem:[#allocation83_spill] sm:$0xff]  ;;  %v13701_v38 = vld [vmem:[#allocation77_spill] sm:$0xff]  ;;  %v13711_v42 = vld [vmem:[#allocation50_spill] sm:$0xff] }
 0x31e   : > { %v3278_v26 = vadd.f32 %v3277_v33, %v3128_v30  ;;  %v3306_v6 = vmax.f32 %v2881_v4, %v3276_v57  ;;  %v3301_v4 = vmax.f32 %v2865_v53, %v3260_v22  ;;  %v3299_v2 = vmax.f32 %v2859_v48, %v3254_v52  ;;  %v13705_v33 = vld [vmem:[#allocation46_spill] sm:$0xff]  ;;  %v13707_v57 = vld [vmem:[#allocation76_spill] sm:$0xff]  ;;  %v13716_v53 = vld [vmem:[#allocation45_spill] sm:$0xff] }
 0x31f   : > { %v3297_v61 = vmax.f32 %v2853_v35, %v3248_v11  ;;  %v3230_v31 = vadd.f32 %v13694_v1, %v13693_v47  ;;  %v3295_v51 = vmax.f32 %v2847_v8, %v3242_v23  ;;  %v3228_v40 = vadd.f32 %v13696_v21, %v13695_v59  ;;  %v13712_v14 = vld [vmem:[#allocation56_spill] sm:$0xff]  ;;  %v13713_v50 = vld [vmem:[#allocation54_spill] sm:$0xff]  ;;  %v13719_v11 = vld [vmem:[#allocation53_spill] sm:$0xff] }
 0x320   : > { %v3307_v58 = vmax.f32 %v2883_v27, %v3278_v26  ;;  %v3303_v26 = vmax.f32 %v2871_v34, %v3266_v62  ;;  %v3294_v55 = vmax.f32 %v13697_v49, %v3240_v44  ;;  %v2835_v32 = vadd.f32 %v13699_v37, %v13698_v36  ;;  %v13714_v22 = vld [vmem:[#allocation62_spill] sm:$0xff]  ;;  %v13722_v23 = vld [vmem:[#allocation44_spill] sm:$0xff]  ;;  %v13724_v8 = vld [vmem:[#allocation67_spill] sm:$0xff] }
 0x321   : > { %v3222_v46 = vadd.f32 %v13703_v43, %v13702_v17  ;;  %v2829_v30 = vadd.f32 %v13706_v25, %v13705_v33  ;;  %v3218_v27 = vadd.f32 %v13708_v20, %v13707_v57  ;;  %v3290_v60 = vmax.f32 %v13711_v42, %v3228_v40  ;;  %v13721_v35 = vld [vmem:[#allocation58_spill] sm:$0xff]  ;;  %v3309_v1 = vld [vmem:[%s10714_s25 + $0x8] sm:$0xff] }
 0x322   : > { %8852 = vmatprep.subr.msk.mxu0 %vm3333_vm4, %v3307_v58  ;;  %8866 = vmatprep.subr.msk.mxu1 %vm3333_vm4, %v3307_v58  ;;  %v3291_v62 = vmax.f32 %v2835_v32, %v3230_v31  ;;  %v3216_v58 = vadd.f32 %v13710_v63, %v13709_v5  ;;  %v3212_v10 = vadd.f32 %v13713_v50, %v13712_v14  ;;  %v13723_v44 = vld [vmem:[#allocation74_spill] sm:$0xff]  ;;  %v13727_v47 = vmov 0.0   ;;  %v10405_v59 = vld [vmem:[%s13550_s3 + $0x124] ss:$8 sps:$4 sm:$0xff]   ;;  %v10391_v21 = vld [vmem:[%s13550_s3 + $0x60] ss:$8 sps:$4 sm:$0xff]  }
 0x323   : > { %8853 = vmatpush1.msk.msra.mxu0 %vm3333_vm4, %v3306_v6  ;;  %8867 = vmatpush1.msk.msra.mxu1 %vm3333_vm4, %v3306_v6  ;;  %v3246_v6 = vadd.f32 %v3245_v3, %v3096_v41  ;;  %v13700_v3 = vld [vmem:[#allocation80_spill] sm:$0xff]  ;;  %v13704_v41 = vld [vmem:[#allocation65_spill] sm:$0xff]  ;;  %v3288_v39 = vmax.f32 %v13714_v22, %v3222_v46  ;;  %v8861_v31 = vld [vmem:[%s10714_s25 + $0x38] sm:$0xff] }
 0x324   : > { %3346 = vmatprep.subr.mxu0 %v3305_v12  ;;  %3472 = vmatprep.subr.mxu1 %v3305_v12  ;;  %v3298_v12 = vmax.f32 %v12070_v18, %v3252_v29  ;;  %v13692_v18 = vld [vmem:[#allocation51_spill] sm:$0xff]  ;;  %v3224_v9 = vadd.f32 %v13701_v38, %v13700_v3  ;;  %v3292_v19 = vmax.f32 %v13704_v41, %v3234_v24  ;;  %v8860_v24 = vld [vmem:[%s10714_s25 + $0x30] sm:$0xff]  ;;  %v10417_v17 = vld [vmem:[%s13550_s3 + $0x104] ss:$8 sps:$4 sm:$0xff]  }
 0x325   : > { %3347 = vmatpush1.msra.mxu0 %v3304_v45  ;;  %3473 = vmatpush1.msra.mxu1 %v3304_v45  ;;  %v3296_v28 = vmax.f32 %v13690_v56, %v3246_v6  ;;  %v2841_v16 = vadd.f32 %v13692_v18, %v13691_v13  ;;  %v13715_v45 = vld [vmem:[#allocation59_spill] sm:$0xff]  ;;  %v13726_v13 = vld [vmem:[#allocation68_spill] sm:$0xff]  ;;  %v10388_v18 = vld [vmem:[%s13550_s3 + $0x70] ss:$8 sps:$4 sm:$0xff]  }
 0x326   : > { %3348 = vmatprep.subr.mxu0 %v3303_v26  ;;  %3474 = vmatprep.subr.mxu1 %v3303_v26  ;;  %v3289_v34 = vmax.f32 %v2829_v30, %v3224_v9  ;;  %v2817_v52 = vadd.f32 %v13716_v53, %v13715_v45  ;;  %v13717_v26 = vld [vmem:[#allocation61_spill] sm:$0xff]  ;;  %v10390_v56 = vld [vmem:[%s13550_s3 + $0x74] ss:$8 sps:$4 sm:$0xff]   ;;  %v10403_v40 = vld [vmem:[%s13550_s3 + $0x120] ss:$8 sps:$4 sm:$0xff]  }
 0x327   : > { %3349 = vmatpush1.msra.mxu0 %v3302_v54  ;;  %3475 = vmatpush1.msra.mxu1 %v3302_v54  ;;  %v3293_v15 = vmax.f32 %v2841_v16, %v3236_v0  ;;  %v3287_v29 = vmax.f32 %v13717_v26, %v3218_v27  ;;  %v13718_v54 = vld [vmem:[#allocation47_spill] sm:$0xff]  ;;  %v13725_v0 = vld [vmem:[#allocation69_spill] sm:$0xff] }
 0x328   : > { %3350 = vmatprep.subr.mxu0 %v3301_v4  ;;  %3476 = vmatprep.subr.mxu1 %v3301_v4  ;;  %v3286_v48 = vmax.f32 %v13718_v54, %v3216_v58  ;;  %v13720_v4 = vld [vmem:[#allocation63_spill] sm:$0xff]  ;;  %v10397_v16 = vld [vmem:[%s13550_s3 + $0x130] ss:$8 sps:$4 sm:$0xff]   ;;  %v8863_v9 = vld [vmem:[%s10714_s25 + $0x48] sm:$0xff] }
 0x329   : > { %3351 = vmatpush1.msra.mxu0 %v3300_v7  ;;  %3477 = vmatpush1.msra.mxu1 %v3300_v7  ;;  %v3200_v6 = vadd.f32 %v13720_v4, %v13719_v11  ;;  %v3285_v7 = vmax.f32 %v2817_v52, %v3212_v10  ;;  %v3310_v49 = vld [vmem:[%s10714_s25 + $0x10] sm:$0xff]  ;;  %v3311_v38 = vld [vmem:[%s10714_s25 + $0x18] sm:$0xff]  ;;  %v10400_v43 = vld [vmem:[%s13550_s3 + $0x40] ss:$8 sps:$4 sm:$0xff]  }
 0x32a   : > { %3352 = vmatprep.subr.mxu0 %v3299_v2  ;;  %3478 = vmatprep.subr.mxu1 %v3299_v2  ;;  %v2805_v2 = vadd.f32 %v13722_v23, %v13721_v35  ;;  %v10396_v36 = vld [vmem:[%s13550_s3 + $0x54] ss:$8 sps:$4 sm:$0xff]   ;;  %v10394_v32 = vld [vmem:[%s13550_s3 + $0x50] ss:$8 sps:$4 sm:$0xff]   ;;  %v10415_v46 = vld [vmem:[%s13550_s3 + $0x100] ss:$8 sps:$4 sm:$0xff]  }
 0x32b   : > { %3353 = vmatpush1.msra.mxu0 %v3298_v12  ;;  %3479 = vmatpush1.msra.mxu1 %v3298_v12  ;;  %v10411_v37 = vld [vmem:[%s13550_s3 + $0x114] ss:$8 sps:$4 sm:$0xff]   ;;  %v10409_v3 = vld [vmem:[%s13550_s3 + $0x110] ss:$8 sps:$4 sm:$0xff]   ;;  %v3312_v41 = vld [vmem:[%s10714_s25 + $0x20] sm:$0xff] }
 0x32c   : > { %3354 = vmatprep.subr.mxu0 %v3297_v61  ;;  %3480 = vmatprep.subr.mxu1 %v3297_v61  ;;  %v3281_v12 = vmax.f32 %v2805_v2, %v3200_v6  ;;  %v3308_v61 = vld [vmem:[%s10714_s25] sm:$0xff]  ;;  %v10408_v33 = vld [vmem:[%s13550_s3 + $0x34] ss:$8 sps:$4 sm:$0xff]   ;;  %v10406_v30 = vld [vmem:[%s13550_s3 + $0x30] ss:$8 sps:$4 sm:$0xff]  }
 0x32d   : > { %3355 = vmatpush1.msra.mxu0 %v3296_v28  ;;  %3481 = vmatpush1.msra.mxu1 %v3296_v28  ;;  %v10399_v28 = vld [vmem:[%s13550_s3 + $0x134] ss:$8 sps:$4 sm:$0xff]   ;;  %v10421_v57 = vld [vmem:[%s13550_s3 + $0xf0] ss:$8 sps:$4 sm:$0xff]   ;;  %v3313_v20 = vld [vmem:[%s10714_s25 + $0x28] sm:$0xff] }
 0x32e   : > { %3356 = vmatprep.subr.mxu0 %v3295_v51  ;;  %3482 = vmatprep.subr.mxu1 %v3295_v51  ;;  %v10393_v51 = vld [vmem:[%s13550_s3 + $0x64] ss:$8 sps:$4 sm:$0xff]   ;;  %v10423_v25 = vld [vmem:[%s13550_s3 + $0xf4] ss:$8 sps:$4 sm:$0xff]   ;;  %v10412_v5 = vld [vmem:[%s13550_s3 + $0x20] ss:$8 sps:$4 sm:$0xff]  }
 0x32f   : > { %3357 = vmatpush1.msra.mxu0 %v3294_v55  ;;  %3483 = vmatpush1.msra.mxu1 %v3294_v55  ;;  %v8862_v55 = vld [vmem:[%s10714_s25 + $0x40] sm:$0xff]  ;;  %v8865_v27 = vld [vmem:[%s10714_s25 + $0x58] sm:$0xff] }
 0x330   : > { %3358 = vmatprep.subr.mxu0 %v3293_v15  ;;  %3484 = vmatprep.subr.mxu1 %v3293_v15  ;;  %v10402_v15 = vld [vmem:[%s13550_s3 + $0x44] ss:$8 sps:$4 sm:$0xff]   ;;  %v10420_v63 = vld [vmem:[%s13550_s3 + $0x14] ss:$8 sps:$4 sm:$0xff]   ;;  %v10418_v58 = vld [vmem:[%s13550_s3 + $0x10] ss:$8 sps:$4 sm:$0xff]  }
 0x331   : > { %3359 = vmatpush1.msra.mxu0 %v3292_v19  ;;  %3485 = vmatpush1.msra.mxu1 %v3292_v19  ;;  %v8864_v19 = vld [vmem:[%s10714_s25 + $0x50] sm:$0xff]  ;;  %v10426_v42 = vld [vmem:[%s13550_s3 + $0x4] ss:$8 sps:$4 sm:$0xff]   ;;  %v10427_v10 = vld [vmem:[%s13550_s3 + $0xe0] ss:$8 sps:$4 sm:$0xff]  }
 0x332   : > { %3360 = vmatprep.subr.mxu0 %v3291_v62  ;;  %3486 = vmatprep.subr.mxu1 %v3291_v62  ;;  %v10414_v62 = vld [vmem:[%s13550_s3 + $0x24] ss:$8 sps:$4 sm:$0xff]   ;;  %v10432_v50 = vld [vmem:[%s13550_s3 + $0xb4] ss:$8 sps:$4 sm:$0xff]   ;;  %v10433_v45 = vld [vmem:[%s13550_s3 + $0xd0] ss:$8 sps:$4 sm:$0xff]  }
 0x333   : > { %3361 = vmatpush1.msra.mxu0 %v3290_v60  ;;  %3487 = vmatpush1.msra.mxu1 %v3290_v60  ;;  %v10424_v60 = vld [vmem:[%s13550_s3] ss:$8 sps:$4 sm:$0xff]   ;;  %v10429_v14 = vld [vmem:[%s13550_s3 + $0xe4] ss:$8 sps:$4 sm:$0xff]   ;;  %v10435_v22 = vld [vmem:[%s13550_s3 + $0xd4] ss:$8 sps:$4 sm:$0xff]  }
 0x334   : > { %3362 = vmatprep.subr.mxu0 %v3289_v34  ;;  %3488 = vmatprep.subr.mxu1 %v3289_v34  ;;  %v10430_v34 = vld [vmem:[%s13550_s3 + $0xb0] ss:$8 sps:$4 sm:$0xff]   ;;  %v10436_v53 = vld [vmem:[%s13550_s3 + $0xa0] ss:$8 sps:$4 sm:$0xff]   ;;  %v10441_v52 = vld [vmem:[%s13550_s3 + $0xc4] ss:$8 sps:$4 sm:$0xff]  }
 0x335   : > { %3363 = vmatpush1.msra.mxu0 %v3288_v39  ;;  %3489 = vmatpush1.msra.mxu1 %v3288_v39  ;;  %v10438_v39 = vld [vmem:[%s13550_s3 + $0xa4] ss:$8 sps:$4 sm:$0xff]   ;;  %v10444_v26 = vld [vmem:[%s13550_s3 + $0x94] ss:$8 sps:$4 sm:$0xff]   ;;  %v10442_v54 = vld [vmem:[%s13550_s3 + $0x90] ss:$8 sps:$4 sm:$0xff]  }
 0x336   : > { %3364 = vmatprep.subr.mxu0 %v3287_v29  ;;  %3490 = vmatprep.subr.mxu1 %v3287_v29  ;;  %v10439_v29 = vld [vmem:[%s13550_s3 + $0xc0] ss:$8 sps:$4 sm:$0xff]   ;;  %v10450_v11 = vld [vmem:[%s13550_s3 + $0x84] ss:$8 sps:$4 sm:$0xff]   ;;  %v10445_v4 = vld [vmem:[%s13550_s3 + $0x170] ss:$8 sps:$4 sm:$0xff]  }
 0x337   : > { %3365 = vmatpush1.msra.mxu0 %v3286_v48  ;;  %3491 = vmatpush1.msra.mxu1 %v3286_v48  ;;  %v10447_v48 = vld [vmem:[%s13550_s3 + $0x174] ss:$8 sps:$4 sm:$0xff]   ;;  %v10448_v6 = vld [vmem:[%s13550_s3 + $0x80] ss:$8 sps:$4 sm:$0xff]   ;;  %v10454_v2 = vld [vmem:[%s13550_s3 + $0x150] ss:$8 sps:$4 sm:$0xff]  }
 0x338   : > { %3366 = vmatprep.subr.mxu0 %v3285_v7  ;;  %3492 = vmatprep.subr.mxu1 %v3285_v7  ;;  %v10453_v7 = vld [vmem:[%s13550_s3 + $0x164] ss:$8 sps:$4 sm:$0xff]   ;;  %v10451_v35 = vld [vmem:[%s13550_s3 + $0x160] ss:$8 sps:$4 sm:$0xff]   ;;  %v10456_v23 = vld [vmem:[%s13550_s3 + $0x154] ss:$8 sps:$4 sm:$0xff]  }
 0x339   : > { %3367 = vmatpush1.msra.mxu0 %v13723_v44  ;;  %3493 = vmatpush1.msra.mxu1 %v13723_v44  ;;  %v10459_v44 = vld [vmem:[%s13550_s3 + $0x144] ss:$8 sps:$4 sm:$0xff]  }
 0x33a   : > { %3368 = vmatprep.subr.mxu0 %v13724_v8  ;;  %3494 = vmatprep.subr.mxu1 %v13724_v8  ;;  %v10462_v8 = vld [vmem:[%s13550_s3 + $0x1f4] ss:$8 sps:$4 sm:$0xff]  }
 0x33b   : > { %3369 = vmatpush1.msra.mxu0 %v13725_v0  ;;  %3495 = vmatpush1.msra.mxu1 %v13725_v0  ;;  %v3579_v0 = vld [vmem:[%s10719_s29] sm:$0xf] }
 0x33c   : > { %3370 = vmatprep.subr.mxu0 %v3281_v12  ;;  %3496 = vmatprep.subr.mxu1 %v3281_v12  ;;  %v10457_v12 = vld [vmem:[%s13550_s3 + $0x140] ss:$8 sps:$4 sm:$0xff]  }
 0x33d   : > { %3371 = vmatpush1.msra.mxu0 %v13726_v13  ;;  %3497 = vmatpush1.msra.mxu1 %v13726_v13  ;;  %v13729_v13 = vld [vmem:[#allocation70_spill] sm:$0xff] }
 0x33e   : > { %8854 = vmatmul.mubr.msk.f32.vlgmr.msra.gmra.mxu0 %vm3314_vm5, %v3308_v61  ;;  %8868 = vmatmul.mubr.msk.f32.vlgmr.msra.gmra.mxu1 %vm3314_vm5, %v8860_v24  ;;  %v13728_v61 = vld [vmem:[#allocation72_spill] sm:$0xff] }
 0x33f   : > { %3410 = vmatprep.mubr.f32.mxu0 %v13727_v47  ;;  %3536 = vmatprep.mubr.f32.mxu1 %v13727_v47  ;;  %v3584_v24 = vrot.slane %v3579_v0, %v13728_v61 }
 0x340   : > { %4064 = vmatprep.subr.bf16.mxu1 %v10390_v56  ;;  %3875 = vmatprep.subr.bf16.mxu0 %v10399_v28 }
 0x341   : > { %4065 = vmatpush1.bf16.msra.mxu1 %v10388_v18  ;;  %3876 = vmatpush1.bf16.msra.mxu0 %v10397_v16  ;;  %v13730_v18 = vsub.s32 2, %v13729_v13 }
 0x342   : > { %8855 = vmatmul.mubr.msk.f32.gmra.mxu0 %vm3314_vm5, %v3309_v1  ;;  %8869 = vmatmul.mubr.msk.f32.gmra.mxu1 %vm3314_vm5, %v8861_v31  ;;  %v3617_v1 = vsub.s32 3, %v13729_v13 }
 0x343   : > { %3416 = vmatprep.mubr.f32.mxu0 %v13727_v47  ;;  %3542 = vmatprep.mubr.f32.mxu1 %v13727_v47  ;;  %v3588_v16 = vrot.slane %v3579_v0, %v13730_v18 }
 0x344   : > { %4066 = vmatprep.subr.bf16.mxu1 %v10393_v51  ;;  %3877 = vmatprep.subr.bf16.mxu0 %v10405_v59  ;;  %v12322_v59 = vrot.slane %v3584_v24, %v13728_v61 }
 0x345   : > { %4067 = vmatpush1.bf16.msra.mxu1 %v10391_v21  ;;  %3878 = vmatpush1.bf16.msra.mxu0 %v10403_v40  ;;  %v13731_v21 = vld [vmem:[#allocation73_spill] sm:$0xff] }
 0x346   : > { %8856 = vmatmul.mubr.msk.f32.gmra.mxu0 %vm3314_vm5, %v3310_v49  ;;  %8870 = vmatmul.mubr.msk.f32.gmra.mxu1 %vm3314_vm5, %v8862_v55  ;;  %v3614_v40 = vrot.slane %v3579_v0, %v13731_v21 }
 0x347   : > { %3422 = vmatprep.mubr.f32.mxu0 %v13727_v47  ;;  %3548 = vmatprep.mubr.f32.mxu1 %v13727_v47 }
 0x348   : > { %4068 = vmatprep.subr.bf16.mxu1 %v10396_v36  ;;  %3879 = vmatprep.subr.bf16.mxu0 %v10411_v37  ;;  %v12326_v36 = vrot.slane %v3588_v16, %v13728_v61  ;;  %v3618_v37 = vrot.slane %v3579_v0, %v3617_v1 }
 0x349   : > { %4069 = vmatpush1.bf16.msra.mxu1 %v10394_v32  ;;  %3880 = vmatpush1.bf16.msra.mxu0 %v10409_v3 }
 0x34a   : > { %8857 = vmatmul.mubr.msk.f32.gmra.mxu0 %vm3314_vm5, %v3311_v38  ;;  %8871 = vmatmul.mubr.msk.f32.gmra.mxu1 %vm3314_vm5, %v8863_v9 }
 0x34b   : > { %3428 = vmatprep.mubr.f32.mxu0 %v13727_v47  ;;  %3554 = vmatprep.mubr.f32.mxu1 %v13727_v47 }
 0x34c   : > { %4070 = vmatprep.subr.bf16.mxu1 %v10402_v15  ;;  %3881 = vmatprep.subr.bf16.mxu0 %v10417_v17 }
 0x34d   : > { %4071 = vmatpush1.bf16.msra.mxu1 %v10400_v43  ;;  %3882 = vmatpush1.bf16.msra.mxu0 %v10415_v46 }
 0x34e   : > { %8858 = vmatmul.mubr.msk.f32.gmra.mxu0 %vm3314_vm5, %v3312_v41  ;;  %8872 = vmatmul.mubr.msk.f32.gmra.mxu1 %vm3314_vm5, %v8864_v19  ;;  %v12331_v41 = vrot.slane %v3614_v40, %v13731_v21 }
 0x34f   : > { %3434 = vmatprep.mubr.f32.mxu0 %v13727_v47  ;;  %3560 = vmatprep.mubr.f32.mxu1 %v13727_v47 }
 0x350   : > { %4072 = vmatprep.subr.bf16.mxu1 %v10408_v33  ;;  %3883 = vmatprep.subr.bf16.mxu0 %v10423_v25  ;;  %v12335_v33 = vrot.slane %v3618_v37, %v13731_v21 }
 0x351   : > { %4073 = vmatpush1.bf16.msra.mxu1 %v10406_v30  ;;  %3884 = vmatpush1.bf16.msra.mxu0 %v10421_v57 }
 0x352   : > { %8859 = vmatmul.mubr.msk.f32.gmra.mxu0 %vm3314_vm5, %v3313_v20  ;;  %8873 = vmatmul.mubr.msk.f32.gmra.mxu1 %vm3314_vm5, %v8865_v27  ;;  %vm8346_vm5 = vcmask 31744  }
 0x353   : > { %4074 = vmatprep.subr.bf16.mxu1 %v10414_v62  ;;  %3885 = vmatprep.subr.bf16.mxu0 %v10429_v14 }
 0x355   : > { %4075 = vmatpush1.bf16.msra.mxu1 %v10412_v5  ;;  %3886 = vmatpush1.bf16.msra.mxu0 %v10427_v10 }
 0x356   : > { %4076 = vmatprep.subr.bf16.mxu1 %v10420_v63  ;;  %3887 = vmatprep.subr.bf16.mxu0 %v10435_v22 }
 0x359   : > { %4077 = vmatpush1.bf16.msra.mxu1 %v10418_v58  ;;  %3888 = vmatpush1.bf16.msra.mxu0 %v10433_v45 }
 0x35a   : > { %4078 = vmatprep.subr.bf16.mxu1 %v10426_v42  ;;  %3889 = vmatprep.subr.bf16.mxu0 %v10441_v52 }
 0x35d   : > { %4079 = vmatpush1.bf16.msra.mxu1 %v10424_v60  ;;  %3890 = vmatpush1.bf16.msra.mxu0 %v10439_v29 }
 0x35e   : > { %4088 = vmatprep.subr.bf16.mxu1 %v10432_v50  ;;  %3899 = vmatprep.subr.bf16.mxu0 %v10447_v48 }
 0x361   : > { %4089 = vmatpush2.bf16.msra.mxu1 %v10430_v34  ;;  %3900 = vmatpush2.bf16.msra.mxu0 %v10445_v4 }
 0x362   : > { %4090 = vmatprep.subr.bf16.mxu1 %v10438_v39  ;;  %3901 = vmatprep.subr.bf16.mxu0 %v10453_v7 }
 0x365   : > { %4091 = vmatpush2.bf16.msra.mxu1 %v10436_v53  ;;  %3902 = vmatpush2.bf16.msra.mxu0 %v10451_v35 }
 0x366   : > { %4092 = vmatprep.subr.bf16.mxu1 %v10444_v26  ;;  %3903 = vmatprep.subr.bf16.mxu0 %v10456_v23 }
 0x369   : > { %4093 = vmatpush2.bf16.msra.mxu1 %v10442_v54  ;;  %3904 = vmatpush2.bf16.msra.mxu0 %v10454_v2 }
 0x36a   : > { %4094 = vmatprep.subr.bf16.mxu1 %v10450_v11  ;;  %3905 = vmatprep.subr.bf16.mxu0 %v10459_v44 }
 0x36d   : > { %4095 = vmatpush2.bf16.msra.mxu1 %v10448_v6  ;;  %3906 = vmatpush2.bf16.msra.mxu0 %v10457_v12 }
 0x36e   : > { %4300 = vmatprep.subr.bf16.mxu0 %v10462_v8 }
 0x3fe   : > { %v3406_v56 = vpop.f32.mrf.mxu0  ;;  %v3532_v28 = vpop.f32.mrf.mxu1 }
 0x3ff   : > { %v3567_v49 = vmax.f32 %v3406_v56, %v3532_v28 }
 0x400   : > { %v3408_v31 = vpop.f32.mrf.mxu0  ;;  %v3534_v51 = vpop.f32.mrf.mxu1 }
 0x401   : > { %v3568_v55 = vmax.f32 %v3408_v31, %v3534_v51  ;;  %v3599_v46 = vmul.f32 %v12322_v59, %v3567_v49 }
 0x402   : > { %v3412_v32 = vpop.f32.mrf.mxu0  ;;  %v3538_v3 = vpop.f32.mrf.mxu1 }
 0x403   : > { %v3569_v38 = vmax.f32 %v3412_v32, %v3538_v3  ;;  %v3600_v19 = vmul.f32 %v12326_v36, %v3568_v55  ;;  %v3629_v42 = vadd.f32 %v12331_v41, %v3599_v46 }
 0x404   : > { %v3414_v9 = vpop.f32.mrf.mxu0  ;;  %v3540_v15 = vpop.f32.mrf.mxu1 }
 0x405   : > { %v3601_v17 = vmul.f32 %v12322_v59, %v3569_v38  ;;  %v3570_v43 = vmax.f32 %v3414_v9, %v3540_v15  ;;  %v3630_v60 = vadd.f32 %v12335_v33, %v3600_v19 }
 0x406   : > { %v3418_v25 = vpop.f32.mrf.mxu0  ;;  %v3544_v30 = vpop.f32.mrf.mxu1 }
 0x407   : > { %v3602_v57 = vmul.f32 %v12326_v36, %v3570_v43  ;;  %v3631_v20 = vadd.f32 %v12331_v41, %v3601_v17  ;;  %v3571_v27 = vmax.f32 %v3418_v25, %v3544_v30  ;;  %v10460_v30 = vld [vmem:[%s13550_s3 + $0x1f0] ss:$8 sps:$4 sm:$0xff]  }
 0x408   : > { %v3420_v62 = vpop.f32.mrf.mxu0  ;;  %v3546_v5 = vpop.f32.mrf.mxu1 }
 0x409   : > { %v3632_v63 = vadd.f32 %v12335_v33, %v3602_v57  ;;  %v3572_v58 = vmax.f32 %v3420_v62, %v3546_v5  ;;  %v12342_v10 = vpack.c.bf16 %v3631_v20, %v3629_v42  ;;  %v3603_v34 = vmul.f32 %v12322_v59, %v3571_v27  ;;  %v10465_v5 = vld [vmem:[%s13550_s3 + $0x1e4] ss:$8 sps:$4 sm:$0xff]  }
 0x40a   : > { %v3424_v14 = vpop.f32.mrf.mxu0  ;;  %v3550_v50 = vpop.f32.mrf.mxu1 }
 0x40b   : > { %v3573_v22 = vmax.f32 %v3424_v14, %v3550_v50  ;;  %v12345_v53 = vpack.c.bf16 %v3632_v63, %v3630_v60  ;;  %v3604_v52 = vmul.f32 %v12326_v36, %v3572_v58  ;;  %v3699_v7 = vshll.u32 %v12342_v10, 16  ;;  %v10463_v58 = vld [vmem:[%s13550_s3 + $0x1e0] ss:$8 sps:$4 sm:$0xff]   ;;  %v10468_v60 = vld [vmem:[%s13550_s3 + $0x1d4] ss:$8 sps:$4 sm:$0xff]  }
 0x40c   : > { %v3426_v39 = vpop.f32.mrf.mxu0  ;;  %v3552_v45 = vpop.f32.mrf.mxu1  ;;  %v3633_v35 = vadd.f32 %v12331_v41, %v3603_v34  ;;  %v3697_v15 = vshrl.u32 %v12342_v10, 16 }
 0x40d   : > { %v3574_v26 = vmax.f32 %v3426_v39, %v3552_v45  ;;  %v3605_v29 = vmul.f32 %v12322_v59, %v3573_v22  ;;  %8949 = vmatprep.mubr.msk.bf16.mxu1 %vm3865_vm6, %v12345_v53  ;;  %v3711_v11 = vshll.u32 %v12345_v53, 16  ;;  %v3634_v12 = vadd.f32 %v12335_v33, %v3604_v52  ;;  %v10466_v45 = vld [vmem:[%s13550_s3 + $0x1d0] ss:$8 sps:$4 sm:$0xff]  }
 0x40e   : > { %v3430_v54 = vpop.f32.mrf.mxu0  ;;  %v3556_v48 = vpop.f32.mrf.mxu1  ;;  %4097 = vmatmul.mubr.bf16.vlgmr.msra.gmra.mxu1 %v12342_v10  ;;  %v3709_v49 = vshrl.u32 %v12345_v53, 16  ;;  %v3701_v55 = vrot.slane %v3699_v7, 1 }
 0x40f   : > { %v3606_v4 = vmul.f32 %v12326_v36, %v3574_v26  ;;  %v3575_v6 = vmax.f32 %v3430_v54, %v3556_v48  ;;  %v3635_v23 = vadd.f32 %v12331_v41, %v3605_v29  ;;  %v3713_v18 = vrot.slane %v3711_v11, 1  ;;  %v10471_v29 = vld [vmem:[%s13550_s3 + $0x1c4] ss:$8 sps:$4 sm:$0xff]  }
 0x410   : > { %v3432_v2 = vpop.f32.mrf.mxu0  ;;  %v3558_v44 = vpop.f32.mrf.mxu1  ;;  %v3702_v57 = vor.u32 %v3701_v55, %v3697_v15  ;;  %v4426_v15 = vld [vmem:[%s10734_s14 + $0x78] sm:$0xff] }
 0x411   : > { %v3636_v8 = vadd.f32 %v12335_v33, %v3606_v4  ;;  %v3607_v0 = vmul.f32 %v12322_v59, %v3575_v6  ;;  %v3576_v24 = vmax.f32 %v3432_v2, %v3558_v44  ;;  %v12360_v56 = vpack.c.bf16 %v3635_v23, %v3633_v35  ;;  %v10469_v4 = vld [vmem:[%s13550_s3 + $0x1c0] ss:$8 sps:$4 sm:$0xff]   ;;  %v10474_v6 = vld [vmem:[%s13550_s3 + $0x1b4] ss:$8 sps:$4 sm:$0xff]   ;;  %v10472_v23 = vld [vmem:[%s13550_s3 + $0x1b0] ss:$8 sps:$4 sm:$0xff]  }
 0x412   : > { %v3436_v28 = vpop.f32.mrf.mxu0  ;;  %v3562_v13 = vpop.f32.mrf.mxu1  ;;  %v3714_v17 = vor.u32 %v3713_v18, %v3709_v49  ;;  %v4161_v2 = vrot.slane %v12345_v53, 1  ;;  %v10477_v44 = vld [vmem:[%s13550_s3 + $0x1a4] ss:$8 sps:$4 sm:$0xff]   ;;  %v10484_v18 = vld [vmem:[%s13550_s3 + $0x230] ss:$8 sps:$4 sm:$0xff]  }
 0x413   : > { %v3608_v16 = vmul.f32 %v12326_v36, %v3576_v24  ;;  %v3577_v1 = vmax.f32 %v3436_v28, %v3562_v13  ;;  %v12363_v31 = vpack.c.bf16 %v3636_v8, %v3634_v12  ;;  %v3704_v37 = vshll.u32 %v12360_v56, 16  ;;  %v10475_v8 = vld [vmem:[%s13550_s3 + $0x1a0] ss:$8 sps:$4 sm:$0xff]   ;;  %v10478_v24 = vld [vmem:[%s13550_s3 + $0x190] ss:$8 sps:$4 sm:$0xff]  }
 0x414   : > { %v3438_v51 = vpop.f32.mrf.mxu0  ;;  %v3564_v40 = vpop.f32.mrf.mxu1  ;;  %v3637_v32 = vadd.f32 %v12331_v41, %v3607_v0  ;;  %v3720_v50 = vshrl.u32 %v12360_v56, 16  ;;  %v10480_v0 = vld [vmem:[%s13550_s3 + $0x194] ss:$8 sps:$4 sm:$0xff]   ;;  %v10483_v53 = vld [vmem:[%s13550_s3 + $0x184] ss:$8 sps:$4 sm:$0xff]   ;;  %v4159_v55 = vrot.slane %v12360_v56, 1 }
 0x415   : > { %v3609_v3 = vmul.f32 %v12322_v59, %v3577_v1  ;;  %v3578_v38 = vmax.f32 %v3438_v51, %v3564_v40  ;;  %8950 = vmatprep.mubr.msk.bf16.mxu1 %vm3865_vm6, %v12363_v31  ;;  %v3716_v9 = vshll.u32 %v12363_v31, 16  ;;  %v3706_v43 = vrot.slane %v3704_v37, 1  ;;  %v10481_v28 = vld [vmem:[%s13550_s3 + $0x180] ss:$8 sps:$4 sm:$0xff]   ;;  %v10486_v13 = vld [vmem:[%s13550_s3 + $0x234] ss:$8 sps:$4 sm:$0xff]  }
 0x416   : > { %v3638_v46 = vadd.f32 %v12335_v33, %v3608_v16  ;;  %4107 = vmatmul.mubr.bf16.gmra.mxu1 %v12360_v56  ;;  %v3728_v42 = vshrl.u32 %v12363_v31, 16  ;;  %v4162_v35 = vrot.slane %v12363_v31, 1  ;;  %v10489_v16 = vld [vmem:[%s13550_s3 + $0x224] ss:$8 sps:$4 sm:$0xff]   ;;  %v10487_v1 = vld [vmem:[%s13550_s3 + $0x220] ss:$8 sps:$4 sm:$0xff]  }
 0x417   : > { %v3639_v19 = vadd.f32 %v12331_v41, %v3609_v3  ;;  %v3610_v25 = vmul.f32 %v12326_v36, %v3578_v38  ;;  %v3718_v59 = vrot.slane %v3716_v9, 1  ;;  %v3707_v41 = vsel %vm1566_vm2, %v3702_v57, %v3706_v43  ;;  %v10492_v31 = vld [vmem:[%s13550_s3 + $0x214] ss:$8 sps:$4 sm:$0xff]   ;;  %v10490_v51 = vld [vmem:[%s13550_s3 + $0x210] ss:$8 sps:$4 sm:$0xff]  }
 0x418   : > { %v3722_v52 = vor.u32 %v3720_v50, %v3706_v43  ;;  %v4163_v12 = vsel %vm1657_vm1, %v4161_v2, %v4162_v35  ;;  %v10495_v40 = vld [vmem:[%s13550_s3 + $0x204] ss:$8 sps:$4 sm:$0xff]   ;;  %v10493_v49 = vld [vmem:[%s13550_s3 + $0x200] ss:$8 sps:$4 sm:$0xff]   ;;  %v4425_v43 = vld [vmem:[%s10734_s14 + $0x70] sm:$0xff]  ;;  %s8693_s3 = sshll.u32 %s13767_s16, 2 }
 0x419   : > { %v12378_v20 = vpack.c.bf16 %v3639_v19, %v3637_v32  ;;  %v3640_v27 = vadd.f32 %v12335_v33, %v3610_v25  ;;  %v3719_v62 = vsel %vm1566_vm2, %v3714_v17, %v3718_v59  ;;  %v3730_v22 = vor.u32 %v3728_v42, %v3718_v59  ;;  %v4441_v17 = vld [vmem:[%s10734_s14 + $0xf0] sm:$0xff]  ;;  %v4424_v19 = vld [vmem:[%s10734_s14 + $0x68] sm:$0xff]  ;;  %v4439_v25 = vld [vmem:[%s10734_s14 + $0xe0] sm:$0xff]  ;;  %s13344_s4 = scalar_lea.vmem %s10939_s20, %s8693_s3  ;;  %s13759_s3 = sld [smem:[#allocation41_spill]] }
 0x41a   : > { %8922 = vmatprep.mubr.msk.bf16.mxu0 %vm3865_vm6, %v3719_v62  ;;  %v4158_v32 = vrot.slane %v12342_v10, 1  ;;  %v4442_v10 = vld [vmem:[%s10734_s14 + $0xf8] sm:$0xff]  ;;  %v4423_v59 = vld [vmem:[%s10734_s14 + $0x60] sm:$0xff]  ;;  %v4436_v62 = vld [vmem:[%s10734_s14 + $0xc8] sm:$0xff]  ;;  %8531 = vst [vmem:[%s13344_s4] sm:$0xf] %v13727_v47  ;;  %s13760_s16 = sld [smem:[#allocation38_spill]] }
 0x41b   : > { %v12385_v63 = vpack.c.bf16 %v3640_v27, %v3638_v46  ;;  %3908 = vmatmul.mubr.bf16.vlgmr.msra.gmra.mxu0 %v3707_v41  ;;  %v3724_v36 = vshll.u32 %v12378_v20, 16  ;;  %v3736_v11 = vshrl.u32 %v12378_v20, 16  ;;  %v4164_v9 = vrot.slane %v12378_v20, 1  ;;  %9314 = vmatprep.subr.mxu1 %v4442_v10  ;;  %v4440_v46 = vld [vmem:[%s10734_s14 + $0xe8] sm:$0xff]  ;;  %v4422_v57 = vld [vmem:[%s10734_s14 + $0x58] sm:$0xff]  ;;  %v4421_v27 = vld [vmem:[%s10734_s14 + $0x50] sm:$0xff] }
 0x41c   : > { %4301 = vmatpush1.bf16.msra.mxu0 %v10460_v30  ;;  %v4160_v3 = vsel %vm1657_vm1, %v4158_v32, %v4159_v55  ;;  %9315 = vmatpush3.msra.mxu1 %v4426_v15  ;;  %v4438_v30 = vld [vmem:[%s10734_s14 + $0xd8] sm:$0xff]  ;;  %v4435_v41 = vld [vmem:[%s10734_s14 + $0xc0] sm:$0xff]  ;;  %v4433_v42 = vld [vmem:[%s10734_s14 + $0xb0] sm:$0xff] }
 0x41d   : > { %4302 = vmatprep.subr.bf16.mxu0 %v10465_v5  ;;  %v3732_v33 = vshll.u32 %v12385_v63, 16  ;;  %v3739_v14 = vshrl.u32 %v12385_v63, 16  ;;  %8951 = vmatprep.mubr.msk.bf16.mxu1 %vm3865_vm6, %v12385_v63  ;;  %v3726_v34 = vrot.slane %v3724_v36, 1  ;;  %v4166_v37 = vrot.slane %v12385_v63, 1  ;;  %v4420_v5 = vld [vmem:[%s10734_s14 + $0x48] sm:$0xff]  ;;  %v4419_v63 = vld [vmem:[%s10734_s14 + $0x40] sm:$0xff] }
 0x41e   : > { %4117 = vmatmul.mubr.bf16.gmra.mxu1 %v12378_v20  ;;  %v4165_v56 = vsel %vm1657_vm1, %v4159_v55, %v4164_v9  ;;  %9316 = vmatprep.subr.mxu1 %v4441_v17  ;;  %v4437_v20 = vld [vmem:[%s10734_s14 + $0xd0] sm:$0xff]  ;;  %v4434_v36 = vld [vmem:[%s10734_s14 + $0xb8] sm:$0xff]  ;;  %v4431_v50 = vld [vmem:[%s10734_s14 + $0xa0] sm:$0xff] }
 0x41f   : > { %v3734_v39 = vrot.slane %v3732_v33, 1  ;;  %v3727_v48 = vsel %vm1566_vm2, %v3722_v52, %v3726_v34  ;;  %v3738_v7 = vor.u32 %v3736_v11, %v3726_v34  ;;  %v4167_v38 = vsel %vm1657_vm1, %v4162_v35, %v4166_v37  ;;  %9317 = vmatpush3.msra.mxu1 %v4425_v43  ;;  %v4417_v33 = vld [vmem:[%s10734_s14 + $0x30] sm:$0xff]  ;;  %v4415_v34 = vld [vmem:[%s10734_s14 + $0x20] sm:$0xff]  ;;  %v9034_v11 = vld [vmem:[%s10734_s14 + $0x1f8] sm:$0xff] }
 0x420   : > { %4303 = vmatpush1.bf16.msra.mxu0 %v10463_v58  ;;  %9318 = vmatprep.subr.mxu1 %v4440_v46  ;;  %v4418_v58 = vld [vmem:[%s10734_s14 + $0x38] sm:$0xff]  ;;  %v4413_v52 = vld [vmem:[%s10734_s14 + $0x10] sm:$0xff] }
 0x421   : > { %v3735_v26 = vsel %vm1566_vm2, %v3730_v22, %v3734_v39  ;;  %4304 = vmatprep.subr.bf16.mxu0 %v10468_v60  ;;  %v3741_v54 = vor.u32 %v3739_v14, %v3734_v39  ;;  %9319 = vmatpush3.msra.mxu1 %v4424_v19  ;;  %v4432_v60 = vld [vmem:[%s10734_s14 + $0xa8] sm:$0xff]  ;;  %v4430_v22 = vld [vmem:[%s10734_s14 + $0x98] sm:$0xff] }
 0x422   : > { %8923 = vmatprep.mubr.msk.bf16.mxu0 %vm3865_vm6, %v3735_v26  ;;  %9320 = vmatprep.subr.mxu1 %v4439_v25  ;;  %v4416_v14 = vld [vmem:[%s10734_s14 + $0x28] sm:$0xff]  ;;  %v4414_v39 = vld [vmem:[%s10734_s14 + $0x18] sm:$0xff] }
 0x423   : > { %3918 = vmatmul.mubr.bf16.gmra.mxu0 %v3727_v48  ;;  %9321 = vmatpush3.msra.mxu1 %v4423_v59  ;;  %v4428_v26 = vld [vmem:[%s10734_s14 + $0x88] sm:$0xff]  ;;  %v4411_v48 = vld [vmem:[%s10734_s14] sm:$0xff] }
 0x424   : > { %4305 = vmatpush1.bf16.msra.mxu0 %v10466_v45  ;;  %8924 = vmatprep.mubr.msk.bf16.mxu0 %vm3865_vm6, %v3741_v54  ;;  %v4429_v45 = vld [vmem:[%s10734_s14 + $0x90] sm:$0xff]  ;;  %v4427_v54 = vld [vmem:[%s10734_s14 + $0x80] sm:$0xff] }
 0x425   : > { %4306 = vmatprep.subr.bf16.mxu0 %v10471_v29  ;;  %9322 = vmatprep.subr.mxu1 %v4438_v30  ;;  %v4412_v29 = vld [vmem:[%s10734_s14 + $0x8] sm:$0xff] }
 0x426   : > { %9323 = vmatpush3.msra.mxu1 %v4422_v57 }
 0x427   : > { %9324 = vmatprep.subr.mxu1 %v4437_v20 }
 0x428   : > { %4307 = vmatpush1.bf16.msra.mxu0 %v10469_v4  ;;  %9325 = vmatpush3.msra.mxu1 %v4421_v27 }
 0x429   : > { %4308 = vmatprep.subr.bf16.mxu0 %v10474_v6  ;;  %9326 = vmatprep.subr.mxu1 %v4436_v62 }
 0x42a   : > { %9327 = vmatpush3.msra.mxu1 %v4420_v5 }
 0x42b   : > { %3928 = vmatmul.mubr.bf16.gmra.mxu0 %v3738_v7  ;;  %9328 = vmatprep.subr.mxu1 %v4435_v41 }
 0x42c   : > { %4309 = vmatpush1.bf16.msra.mxu0 %v10472_v23  ;;  %9000 = vmatprep.mubr.msk.bf16.mxu0 %vm3865_vm6, %v4163_v12 }
 0x42d   : > { %4310 = vmatprep.subr.bf16.mxu0 %v10477_v44  ;;  %9329 = vmatpush3.msra.mxu1 %v4419_v63  ;;  %v9018_v63 = vld [vmem:[%s10734_s14 + $0x178] sm:$0xff] }
 0x42e   : > { %9330 = vmatprep.subr.mxu1 %v4434_v36 }
 0x42f   : > { %9331 = vmatpush3.msra.mxu1 %v4418_v58 }
 0x430   : > { %4311 = vmatpush1.bf16.msra.mxu0 %v10475_v8  ;;  %9332 = vmatprep.subr.mxu1 %v4433_v42 }
 0x431   : > { %4312 = vmatprep.subr.bf16.mxu0 %v10480_v0  ;;  %9333 = vmatpush3.msra.mxu1 %v4417_v33  ;;  %v9033_v33 = vld [vmem:[%s10734_s14 + $0x1f0] sm:$0xff] }
 0x432   : > { %9334 = vmatprep.subr.mxu1 %v4432_v60 }
 0x433   : > { %9335 = vmatpush3.msra.mxu1 %v4416_v14  ;;  %v9017_v14 = vld [vmem:[%s10734_s14 + $0x170] sm:$0xff] }
 0x434   : > { %4313 = vmatpush1.bf16.msra.mxu0 %v10478_v24  ;;  %9336 = vmatprep.subr.mxu1 %v4431_v50 }
 0x435   : > { %4314 = vmatprep.subr.bf16.mxu0 %v10483_v53  ;;  %9337 = vmatpush3.msra.mxu1 %v4415_v34 }
 0x436   : > { %9338 = vmatprep.subr.mxu1 %v4430_v22 }
 0x437   : > { %9339 = vmatpush3.msra.mxu1 %v4414_v39  ;;  %v9032_v39 = vld [vmem:[%s10734_s14 + $0x1e8] sm:$0xff] }
 0x438   : > { %4315 = vmatpush1.bf16.msra.mxu0 %v10481_v28  ;;  %9340 = vmatprep.subr.mxu1 %v4429_v45 }
 0x439   : > { %4324 = vmatprep.subr.bf16.mxu0 %v10486_v13  ;;  %9341 = vmatpush3.msra.mxu1 %v4413_v52 }
 0x43a   : > { %9342 = vmatprep.subr.mxu1 %v4428_v26 }
 0x43b   : > { %9343 = vmatpush3.msra.mxu1 %v4412_v29 }
 0x43c   : > { %4325 = vmatpush2.bf16.msra.mxu0 %v10484_v18  ;;  %9344 = vmatprep.subr.mxu1 %v4427_v54  ;;  %v9016_v54 = vld [vmem:[%s10734_s14 + $0x168] sm:$0xff] }
 0x43d   : > { %4326 = vmatprep.subr.bf16.mxu0 %v10489_v16  ;;  %9345 = vmatpush3.msra.mxu1 %v4411_v48 }
 0x43e   : > { %9364 = vmatprep.subr.mxu1 %v9034_v11 }
 0x440   : > { %4327 = vmatpush2.bf16.msra.mxu0 %v10487_v1  ;;  %v4375_v1 = vld [vmem:[%s10729_s8] sm:$0x3] }
 0x441   : > { %4328 = vmatprep.subr.bf16.mxu0 %v10492_v31  ;;  %v12475_v55 = vrot.slane %v4375_v1, %v13728_v61 }
 0x444   : > { %4329 = vmatpush2.bf16.msra.mxu0 %v10490_v51 }
 0x445   : > { %4330 = vmatprep.subr.bf16.mxu0 %v10495_v40 }
 0x448   : > { %4331 = vmatpush2.bf16.msra.mxu0 %v10493_v49 }
 0x44b   : > { %4333 = vmatmul.mubr.bf16.vlgmr.msra.gmra.mxu0 %v4160_v3  ;;  %v12478_v3 = vrot.slane %v4375_v1, %v13731_v21 }
 0x44c   : > { %9001 = vmatprep.mubr.msk.bf16.mxu0 %vm3865_vm6, %v4167_v38 }
 0x453   : > { %4343 = vmatmul.mubr.bf16.gmra.mxu0 %v4165_v56 }
 0x454   : > { %9002 = vmatprep.mubr.msk.bf16.mxu0 %vm3865_vm6, %v4166_v37 }
 0x45b   : > { %4353 = vmatmul.mubr.bf16.gmra.mxu0 %v4164_v9 }
 0x4ce   : > { %v4098_v44 = vpop.f32.mrf.mxu1 }
 0x4d0   : > { %v4100_v8 = vpop.f32.mrf.mxu1 }
 0x4d2   : > { %v4102_v24 = vpop.f32.mrf.mxu1 }
 0x4d4   : > { %v4104_v28 = vpop.f32.mrf.mxu1 }
 0x4d6   : > { %v4108_v18 = vpop.f32.mrf.mxu1 }
 0x4d8   : > { %v4110_v31 = vpop.f32.mrf.mxu1 }
 0x4da   : > { %v4112_v38 = vpop.f32.mrf.mxu1 }
 0x4db   : > { %v3909_v4 = vpop.f32.mrf.mxu0 }
 0x4dc   : > { %v4099_v40 = vadd.f32 %v4098_v44, %v3909_v4  ;;  %v4114_v25 = vpop.f32.mrf.mxu1 }
 0x4dd   : > { %v3911_v6 = vpop.f32.mrf.mxu0 }
 0x4de   : > { %v4101_v37 = vadd.f32 %v4100_v8, %v3911_v6  ;;  %v4118_v27 = vpop.f32.mrf.mxu1  ;;  %v9031_v6 = vld [vmem:[%s10734_s14 + $0x1e0] sm:$0xff] }
 0x4df   : > { %v3913_v7 = vpop.f32.mrf.mxu0 }
 0x4e0   : > { %v4103_v56 = vadd.f32 %v4102_v24, %v3913_v7  ;;  %v4120_v45 = vpop.f32.mrf.mxu1 }
 0x4e1   : > { %v3915_v35 = vpop.f32.mrf.mxu0 }
 0x4e2   : > { %v4105_v43 = vadd.f32 %v4104_v28, %v3915_v35  ;;  %v9015_v35 = vld [vmem:[%s10734_s14 + $0x160] sm:$0xff]  ;;  %v4122_v8 = vpop.f32.mrf.mxu1 }
 0x4e3   : > { %v3919_v23 = vpop.f32.mrf.mxu0 }
 0x4e4   : > { %v4109_v30 = vadd.f32 %v4108_v18, %v3919_v23  ;;  %v9014_v18 = vld [vmem:[%s10734_s14 + $0x158] sm:$0xff] }
 0x4e5   : > { %v3921_v2 = vpop.f32.mrf.mxu0 }
 0x4e6   : > { %v4111_v36 = vadd.f32 %v4110_v31, %v3921_v2 }
 0x4e7   : > { %v3923_v12 = vpop.f32.mrf.mxu0 }
 0x4e8   : > { %v4113_v50 = vadd.f32 %v4112_v38, %v3923_v12  ;;  %v9030_v12 = vld [vmem:[%s10734_s14 + $0x1d8] sm:$0xff] }
 0x4e9   : > { %v3925_v0 = vpop.f32.mrf.mxu0 }
 0x4ea   : > { %v4115_v48 = vadd.f32 %v4114_v25, %v3925_v0 }
 0x4eb   : > { %v3929_v53 = vpop.f32.mrf.mxu0 }
 0x4ec   : > { %v4119_v23 = vadd.f32 %v4118_v27, %v3929_v53  ;;  %v9011_v27 = vld [vmem:[%s10734_s14 + $0x140] sm:$0xff] }
 0x4ed   : > { %v12467_v13 = vpop.f32.mrf.mxu0 }
 0x4ee   : > { %v4121_v1 = vadd.f32 %v4120_v45, %v12467_v13 }
 0x4ef   : > { %v12469_v16 = vpop.f32.mrf.mxu0 }
 0x4f1   : > { %v12472_v51 = vpop.f32.mrf.mxu0 }
 0x50b   : > { %v4334_v49 = vpop.f32.mrf.mxu0 }
 0x50c   : > { %v4363_v32 = vadd.f32 %v4334_v49, %v4099_v40  ;;  %v9029_v40 = vld [vmem:[%s10734_s14 + $0x1d0] sm:$0xff] }
 0x50d   : > { %v4336_v9 = vpop.f32.mrf.mxu0 }
 0x50e   : > { %v4364_v10 = vadd.f32 %v4336_v9, %v4101_v37  ;;  %v12481_v15 = vadd.f32 %v12475_v55, %v4363_v32  ;;  %v9013_v37 = vld [vmem:[%s10734_s14 + $0x150] sm:$0xff]  ;;  %v4123_v32 = vadd.f32 %v4122_v8, %v12469_v16  ;;  %v9028_v9 = vld [vmem:[%s10734_s14 + $0x1c8] sm:$0xff] }
 0x50f   : > { %v4338_v17 = vpop.f32.mrf.mxu0 }
 0x510   : > { %v12484_v46 = vadd.f32 %v12478_v3, %v4364_v10  ;;  %v4365_v19 = vadd.f32 %v4338_v17, %v4103_v56  ;;  %v4399_v62 = vmax.f32 %v12481_v15, 0.0  ;;  %v4124_v56 = vpop.f32.mrf.mxu1  ;;  %v4672_v15 = vld [vmem:[%s10739_s19] sm:$0xff] }
 0x511   : > { %v4340_v59 = vpop.f32.mrf.mxu0  ;;  %v4125_v25 = vadd.f32 %v4124_v56, %v12472_v51  ;;  %9765 = vmatprep.mubr.msk.f32.mxu0 %vm4674_vm7, %v4672_v15  ;;  %v10496_v15 = vld [vmem:[%s10754_s6 + $0x78] sm:$0xff]  }
 0x512   : > { %v4400_v57 = vmax.f32 %v12484_v46, 0.0  ;;  %v4366_v20 = vadd.f32 %v4340_v59, %v4105_v43  ;;  %v12489_v5 = vadd.f32 %v12475_v55, %v4365_v19  ;;  %v9012_v19 = vld [vmem:[%s10734_s14 + $0x148] sm:$0xff] }
 0x513   : > { %v4344_v41 = vpop.f32.mrf.mxu0 }
 0x514   : > { %v12493_v58 = vadd.f32 %v12478_v3, %v4366_v20  ;;  %v4367_v42 = vadd.f32 %v4344_v41, %v4109_v30  ;;  %4507 = vmatprep.mubr.f32.mxu1 %v4400_v57  ;;  %v4401_v52 = vmax.f32 %v12489_v5, 0.0  ;;  %v9027_v30 = vld [vmem:[%s10734_s14 + $0x1c0] sm:$0xff] }
 0x515   : > { %v4346_v60 = vpop.f32.mrf.mxu0  ;;  %4508 = vmatmul.mubr.f32.vlgmr.msra.gmra.mxu1 %v4399_v62 }
 0x516   : > { %v4402_v34 = vmax.f32 %v12493_v58, 0.0  ;;  %v4368_v22 = vadd.f32 %v4346_v60, %v4111_v36  ;;  %9365 = vmatpush3.msra.mxu1 %v9018_v63  ;;  %v12505_v26 = vadd.f32 %v12475_v55, %v4367_v42  ;;  %v9026_v63 = vld [vmem:[%s10734_s14 + $0x1b8] sm:$0xff] }
 0x517   : > { %9366 = vmatprep.subr.mxu1 %v9033_v33  ;;  %v4348_v29 = vpop.f32.mrf.mxu0  ;;  %v9010_v33 = vld [vmem:[%s10734_s14 + $0x138] sm:$0xff] }
 0x518   : > { %v12509_v11 = vadd.f32 %v12478_v3, %v4368_v22  ;;  %v4369_v4 = vadd.f32 %v4348_v29, %v4113_v50  ;;  %9367 = vmatpush3.msra.mxu1 %v9017_v14  ;;  %4512 = vmatprep.mubr.f32.mxu1 %v4402_v34  ;;  %v4403_v0 = vmax.f32 %v12505_v26, 0.0  ;;  %v9025_v14 = vld [vmem:[%s10734_s14 + $0x1b0] sm:$0xff]  ;;  %v9007_v29 = vld [vmem:[%s10734_s14 + $0x120] sm:$0xff] }
 0x519   : > { %9368 = vmatprep.subr.mxu1 %v9032_v39  ;;  %v4350_v7 = vpop.f32.mrf.mxu0  ;;  %4513 = vmatmul.mubr.f32.gmra.mxu1 %v4401_v52  ;;  %v9009_v50 = vld [vmem:[%s10734_s14 + $0x130] sm:$0xff]  ;;  %v9024_v39 = vld [vmem:[%s10734_s14 + $0x1a8] sm:$0xff] }
 0x51a   : > { %v4404_v2 = vmax.f32 %v12509_v11, 0.0  ;;  %v4370_v44 = vadd.f32 %v4350_v7, %v4115_v48  ;;  %9369 = vmatpush3.msra.mxu1 %v9016_v54  ;;  %v12521_v24 = vadd.f32 %v12475_v55, %v4369_v4  ;;  %v9022_v54 = vld [vmem:[%s10734_s14 + $0x198] sm:$0xff]  ;;  %v9021_v4 = vld [vmem:[%s10734_s14 + $0x190] sm:$0xff]  ;;  %v9020_v7 = vld [vmem:[%s10734_s14 + $0x188] sm:$0xff] }
 0x51b   : > { %9370 = vmatprep.subr.mxu1 %v9031_v6  ;;  %v4354_v28 = vpop.f32.mrf.mxu0  ;;  %v9006_v48 = vld [vmem:[%s10734_s14 + $0x118] sm:$0xff]  ;;  %v9005_v6 = vld [vmem:[%s10734_s14 + $0x110] sm:$0xff] }
 0x51c   : > { %v12526_v53 = vadd.f32 %v12478_v3, %v4370_v44  ;;  %v4371_v31 = vadd.f32 %v4354_v28, %v4119_v23  ;;  %9371 = vmatpush3.msra.mxu1 %v9015_v35  ;;  %4517 = vmatprep.mubr.f32.mxu1 %v4404_v2  ;;  %v4405_v10 = vmax.f32 %v12521_v24, 0.0  ;;  %v9004_v35 = vld [vmem:[%s10734_s14 + $0x108] sm:$0xff]  ;;  %v9019_v23 = vld [vmem:[%s10734_s14 + $0x180] sm:$0xff] }
 0x51d   : > { %9372 = vmatprep.subr.mxu1 %v9030_v12  ;;  %v4356_v49 = vpop.f32.mrf.mxu0  ;;  %4518 = vmatmul.mubr.f32.gmra.mxu1 %v4403_v0  ;;  %v9003_v44 = vld [vmem:[%s10734_s14 + $0x100] sm:$0xff] }
 0x51e   : > { %v4406_v13 = vmax.f32 %v12526_v53, 0.0  ;;  %v4372_v38 = vadd.f32 %v4356_v49, %v4121_v1  ;;  %9373 = vmatpush3.msra.mxu1 %v9014_v18  ;;  %v12539_v17 = vadd.f32 %v12475_v55, %v4371_v31 }
 0x51f   : > { %9374 = vmatprep.subr.mxu1 %v9029_v40  ;;  %v4358_v43 = vpop.f32.mrf.mxu0 }
 0x520   : > { %v12544_v16 = vadd.f32 %v12478_v3, %v4372_v38  ;;  %v4373_v59 = vadd.f32 %v4358_v43, %v4123_v32  ;;  %9375 = vmatpush3.msra.mxu1 %v9013_v37  ;;  %4522 = vmatprep.mubr.f32.mxu1 %v4406_v13  ;;  %v4407_v36 = vmax.f32 %v12539_v17, 0.0 }
 0x521   : > { %9376 = vmatprep.subr.mxu1 %v9028_v9  ;;  %v4360_v20 = vpop.f32.mrf.mxu0  ;;  %4523 = vmatmul.mubr.f32.gmra.mxu1 %v4405_v10 }
 0x522   : > { %v4408_v51 = vmax.f32 %v12544_v16, 0.0  ;;  %v4374_v41 = vadd.f32 %v4360_v20, %v4125_v25  ;;  %9377 = vmatpush3.msra.mxu1 %v9012_v19  ;;  %v4397_v42 = vadd.f32 %v12475_v55, %v4373_v59  ;;  %v9008_v55 = vld [vmem:[%s10734_s14 + $0x128] sm:$0xff] }
 0x523   : > { %9378 = vmatprep.subr.mxu1 %v9027_v30 }
 0x524   : > { %v4398_v60 = vadd.f32 %v12478_v3, %v4374_v41  ;;  %9379 = vmatpush3.msra.mxu1 %v9011_v27  ;;  %4527 = vmatprep.mubr.f32.mxu1 %v4408_v51  ;;  %v4409_v45 = vmax.f32 %v4397_v42, 0.0  ;;  %v9023_v3 = vld [vmem:[%s10734_s14 + $0x1a0] sm:$0xff] }
 0x525   : > { %9380 = vmatprep.subr.mxu1 %v9026_v63  ;;  %4528 = vmatmul.mubr.f32.gmra.mxu1 %v4407_v36 }
 0x526   : > { %v4410_v22 = vmax.f32 %v4398_v60, 0.0  ;;  %9381 = vmatpush3.msra.mxu1 %v9010_v33  ;;  %v4673_v33 = vld [vmem:[%s10739_s19 + $0x8] sm:$0xff]  ;;  %v9038_v60 = vld [vmem:[%s10739_s19 + $0x10] sm:$0xff] }
 0x527   : > { %9382 = vmatprep.subr.mxu1 %v9025_v14  ;;  %v9039_v14 = vld [vmem:[%s10739_s19 + $0x18] sm:$0xff] }
 0x528   : > { %9383 = vmatpush3.msra.mxu1 %v9009_v50  ;;  %4532 = vmatprep.mubr.f32.mxu1 %v4410_v22 }
 0x529   : > { %9384 = vmatprep.subr.mxu1 %v9024_v39  ;;  %4533 = vmatmul.mubr.f32.gmra.mxu1 %v4409_v45 }
 0x52a   : > { %9385 = vmatpush3.msra.mxu1 %v9008_v55  ;;  %4635 = vmatprep.mubr.f32.mxu1 %v4400_v57 }
 0x52b   : > { %9386 = vmatprep.subr.mxu1 %v9023_v3 }
 0x52c   : > { %9387 = vmatpush3.msra.mxu1 %v9007_v29 }
 0x52d   : > { %9388 = vmatprep.subr.mxu1 %v9022_v54 }
 0x52e   : > { %9389 = vmatpush3.msra.mxu1 %v9006_v48 }
 0x52f   : > { %9390 = vmatprep.subr.mxu1 %v9021_v4 }
 0x530   : > { %9391 = vmatpush3.msra.mxu1 %v9005_v6 }
 0x531   : > { %9392 = vmatprep.subr.mxu1 %v9020_v7 }
 0x532   : > { %9393 = vmatpush3.msra.mxu1 %v9004_v35 }
 0x533   : > { %9394 = vmatprep.subr.mxu1 %v9019_v23  ;;  %v4858_v23 = vld [vmem:[%s10749_s30] sm:$0xff] }
 0x534   : > { %9395 = vmatpush3.msra.mxu1 %v9003_v44  ;;  %v9044_v44 = vld [vmem:[%s10749_s30 + $0x8] sm:$0xff] }
 0x535   : > { %4636 = vmatmul.mubr.f32.vlgmr.msra.gmra.mxu1 %v4399_v62  ;;  %9790 = vmatprep.subr.mxu1 %v13727_v47 }
 0x536   : > { %4640 = vmatprep.mubr.f32.mxu1 %v4402_v34 }
 0x539   : > { %4641 = vmatmul.mubr.f32.gmra.mxu1 %v4401_v52 }
 0x53a   : > { %4645 = vmatprep.mubr.f32.mxu1 %v4404_v2 }
 0x53d   : > { %4646 = vmatmul.mubr.f32.gmra.mxu1 %v4403_v0 }
 0x53e   : > { %4650 = vmatprep.mubr.f32.mxu1 %v4406_v13 }
 0x541   : > { %4651 = vmatmul.mubr.f32.gmra.mxu1 %v4405_v10 }
 0x542   : > { %4655 = vmatprep.mubr.f32.mxu1 %v4408_v51 }
 0x545   : > { %4656 = vmatmul.mubr.f32.gmra.mxu1 %v4407_v36 }
 0x546   : > { %4660 = vmatprep.mubr.f32.mxu1 %v4410_v22  ;;  %v4845_v22 = vld [vmem:[%s10744_s24] sm:$0x3] }
 0x547   : > { %v4855_v29 = vrot.slane %v4845_v22, %v13731_v21 }
 0x549   : > { %4661 = vmatmul.mubr.f32.gmra.mxu1 %v4409_v45  ;;  %v4849_v45 = vrot.slane %v4845_v22, %v13728_v61 }
 0x54a   : > { %9794 = vmatprep.mubr.msk.f32.mxu1 %vm10678_vm0, %v13727_v47 }
 0x5d5   : > { %v9346_v46 = vpop.f32.mrf.mxu1 }
 0x5d7   : > { %v9347_v57 = vpop.f32.mrf.mxu1 }
 0x5d8   : > { %v9348_v63 = vadd.f32 %v9347_v57, %v9346_v46  ;;  %v10497_v46 = vld [vmem:[%s10754_s6 + $0x38] sm:$0xff]   ;;  %v10498_v57 = vld [vmem:[%s10754_s6 + $0x70] sm:$0xff]  }
 0x5d9   : > { %v9349_v62 = vpop.f32.mrf.mxu1 }
 0x5db   : > { %v9350_v5 = vpop.f32.mrf.mxu1 }
 0x5dc   : > { %v9351_v27 = vadd.f32 %v9350_v5, %v9349_v62  ;;  %v10499_v62 = vld [vmem:[%s10754_s6 + $0x30] sm:$0xff]   ;;  %v10500_v5 = vld [vmem:[%s10754_s6 + $0x68] sm:$0xff]  }
 0x5dd   : > { %v9352_v58 = vpop.f32.mrf.mxu1 }
 0x5df   : > { %v9353_v34 = vpop.f32.mrf.mxu1 }
 0x5e0   : > { %v9354_v59 = vadd.f32 %v9353_v34, %v9352_v58  ;;  %v10501_v58 = vld [vmem:[%s10754_s6 + $0x28] sm:$0xff]   ;;  %v10502_v34 = vld [vmem:[%s10754_s6 + $0x60] sm:$0xff]  }
 0x5e1   : > { %v9355_v52 = vpop.f32.mrf.mxu1 }
 0x5e3   : > { %v9356_v26 = vpop.f32.mrf.mxu1 }
 0x5e4   : > { %v9357_v19 = vadd.f32 %v9356_v26, %v9355_v52  ;;  %v10503_v52 = vld [vmem:[%s10754_s6 + $0x20] sm:$0xff]   ;;  %v10504_v26 = vld [vmem:[%s10754_s6 + $0x58] sm:$0xff]  }
 0x5e5   : > { %v9358_v11 = vpop.f32.mrf.mxu1 }
 0x5e7   : > { %v9359_v2 = vpop.f32.mrf.mxu1 }
 0x5e8   : > { %v9360_v10 = vadd.f32 %v9359_v2, %v9358_v11  ;;  %v10505_v11 = vld [vmem:[%s10754_s6 + $0x18] sm:$0xff]   ;;  %v10506_v2 = vld [vmem:[%s10754_s6 + $0x50] sm:$0xff]  }
 0x5e9   : > { %v9361_v12 = vpop.f32.mrf.mxu1 }
 0x5eb   : > { %v9362_v8 = vpop.f32.mrf.mxu1 }
 0x5ec   : > { %v9363_v38 = vadd.f32 %v9362_v8, %v9361_v12  ;;  %v10507_v12 = vld [vmem:[%s10754_s6 + $0x10] sm:$0xff]   ;;  %v10508_v8 = vld [vmem:[%s10754_s6 + $0x48] sm:$0xff]  }
 0x5f5   : > { %v9396_v0 = vpop.f32.mrf.mxu1 }
 0x5f7   : > { %v9397_v24 = vpop.f32.mrf.mxu1 }
 0x5f8   : > { %v9398_v51 = vadd.f32 %v9397_v24, %v9396_v0  ;;  %v10509_v0 = vld [vmem:[%s10754_s6 + $0x8] sm:$0xff]   ;;  %v10510_v24 = vld [vmem:[%s10754_s6 + $0x40] sm:$0xff]  }
 0x5f9   : > { %v9399_v28 = vpop.f32.mrf.mxu1 }
 0x5fa   : > { %v4666_v42 = vmax.f32 %v9348_v63, %v9398_v51  ;;  %v10517_v63 = vld [vmem:[%s13732_s18 + $0x20] ss:$8 sps:$4 sm:$0xff]  }
 0x5fb   : > { %v9400_v18 = vpop.f32.mrf.mxu1 }
 0x5fc   : > { %v9401_v30 = vadd.f32 %v9400_v18, %v9399_v28  ;;  %v10511_v28 = vld [vmem:[%s10754_s6] sm:$0xff]   ;;  %v10513_v18 = vld [vmem:[%s13732_s18 + $0x34] ss:$8 sps:$4 sm:$0x3f]  }
 0x5fd   : > { %v9402_v1 = vpop.f32.mrf.mxu1 }
 0x5fe   : > { %v4667_v36 = vmax.f32 %v9351_v27, %v9401_v30  ;;  %v5367_v30 = vld [vmem:[%s12654_s28 + $0x20] sm:$0xff] }
 0x5ff   : > { %v9403_v53 = vpop.f32.mrf.mxu1 }
 0x600   : > { %v9404_v25 = vadd.f32 %v9403_v53, %v9402_v1  ;;  %v5363_v1 = vld [vmem:[%s12654_s28] sm:$0xff]  ;;  %v5364_v53 = vld [vmem:[%s12654_s28 + $0x8] sm:$0xff] }
 0x601   : > { %v9405_v31 = vpop.f32.mrf.mxu1 }
 0x602   : > { %v4668_v41 = vmax.f32 %v9354_v59, %v9404_v25  ;;  %v10519_v59 = vld [vmem:[%s13732_s18 + $0x24] ss:$8 sps:$4 sm:$0xff]  }
 0x603   : > { %v9406_v40 = vpop.f32.mrf.mxu1 }
 0x604   : > { %v9407_v17 = vadd.f32 %v9406_v40, %v9405_v31  ;;  %v12658_v31 = vpack.c.bf16 %v5364_v53, %v5363_v1  ;;  %v5365_v40 = vld [vmem:[%s12654_s28 + $0x10] sm:$0xff]  ;;  %v9145_v53 = vld [vmem:[%s13736_s1 + $0x138] sm:$0xff] }
 0x605   : > { %v9408_v49 = vpop.f32.mrf.mxu1 }
 0x606   : > { %v4669_v20 = vmax.f32 %v9357_v19, %v9407_v17 }
 0x607   : > { %v9409_v37 = vpop.f32.mrf.mxu1 }
 0x608   : > { %v9410_v9 = vadd.f32 %v9409_v37, %v9408_v49  ;;  %v5366_v49 = vld [vmem:[%s12654_s28 + $0x18] sm:$0xff] }
 0x609   : > { %v9411_v32 = vpop.f32.mrf.mxu1  ;;  %v12662_v37 = vpack.c.bf16 %v5366_v49, %v5365_v40  ;;  %v9144_v40 = vld [vmem:[%s13736_s1 + $0x130] sm:$0xff]  ;;  %v9143_v49 = vld [vmem:[%s13736_s1 + $0x128] sm:$0xff] }
 0x60a   : > { %v4670_v16 = vmax.f32 %v9360_v10, %v9410_v9  ;;  %v5384_v10 = vshrl.u32 %v12658_v31, 16 }
 0x60b   : > { %v9412_v13 = vpop.f32.mrf.mxu1  ;;  %v5395_v22 = vshrl.u32 %v12662_v37, 16 }
 0x60c   : > { %v9413_v56 = vadd.f32 %v9412_v13, %v9411_v32  ;;  %v5386_v32 = vshll.u32 %v12658_v31, 16  ;;  %v10515_v13 = vld [vmem:[%s13732_s18 + $0x30] ss:$8 sps:$4 sm:$0x3f]  }
 0x60e   : > { %v4671_v43 = vmax.f32 %v9363_v38, %v9413_v56  ;;  %v10512_v56 = vld [vmem:[%s13734_s23 + $0x38] sm:$0xff]   ;;  %v5388_v17 = vrot.slane %v5386_v32, 1  ;;  %v9142_v32 = vld [vmem:[%s13736_s1 + $0x120] sm:$0xff] }
 0x610   : > { %9753 = vmatprep.subr.msk.mxu0 %vm3333_vm4, %v4671_v43 }
 0x611   : > { %9754 = vmatpush3.msk.msra.mxu0 %vm3333_vm4, %v4671_v43 }
 0x612   : > { %9755 = vmatprep.subr.mxu0 %v4670_v16 }
 0x613   : > { %9756 = vmatpush3.msra.mxu0 %v4670_v16 }
 0x614   : > { %9757 = vmatprep.subr.mxu0 %v4669_v20 }
 0x615   : > { %9758 = vmatpush3.msra.mxu0 %v4669_v20 }
 0x616   : > { %9759 = vmatprep.subr.mxu0 %v4668_v41 }
 0x617   : > { %9760 = vmatpush3.msra.mxu0 %v4668_v41 }
 0x618   : > { %9761 = vmatprep.subr.mxu0 %v4667_v36 }
 0x619   : > { %9762 = vmatpush3.msra.mxu0 %v4667_v36 }
 0x61a   : > { %9763 = vmatprep.subr.mxu0 %v4666_v42 }
 0x61b   : > { %9764 = vmatpush3.msra.mxu0 %v4666_v42 }
 0x61c   : > { %9768 = vmatprep.subr.msk.mxu0 %vm3333_vm4, %v4671_v43  ;;  %9766 = vmatmul.mubr.msk.f32.vlgmr.msra.gmra.mxu0 %vm4674_vm7, %v4673_v33 }
 0x61d   : > { %9769 = vmatpush3.msk.msra.mxu0 %vm3333_vm4, %v4671_v43  ;;  %9780 = vmatprep.mubr.msk.f32.mxu0 %vm4674_vm7, %v9038_v60  ;;  %v5391_v43 = vshll.u32 %v12662_v37, 16  ;;  %v13735_v60 = vmov 0  }
 0x61e   : > { %9770 = vmatprep.subr.mxu0 %v4670_v16 }
 0x61f   : > { %9771 = vmatpush3.msra.mxu0 %v4670_v16  ;;  %v5446_v16 = vsel %vm3333_vm4, %v10515_v13, 0  ;;  %v9141_v13 = vld [vmem:[%s13736_s1 + $0x118] sm:$0xff] }
 0x620   : > { %9772 = vmatprep.subr.mxu0 %v4669_v20 }
 0x621   : > { %9773 = vmatpush3.msra.mxu0 %v4669_v20  ;;  %v5368_v20 = vld [vmem:[%s12654_s28 + $0x28] sm:$0xff] }
 0x622   : > { %9774 = vmatprep.subr.mxu0 %v4668_v41  ;;  %v12675_v33 = vpack.c.bf16 %v5368_v20, %v5367_v30 }
 0x623   : > { %9775 = vmatpush3.msra.mxu0 %v4668_v41  ;;  %v10516_v41 = vld [vmem:[%s13734_s23 + $0x30] sm:$0xff]  }
 0x624   : > { %9776 = vmatprep.subr.mxu0 %v4667_v36 }
 0x625   : > { %9777 = vmatpush3.msra.mxu0 %v4667_v36  ;;  %v5389_v36 = vor.u32 %v5388_v17, %v5384_v10  ;;  %v9137_v10 = vld [vmem:[%s13736_s1 + $0xf8] sm:$0xff]  ;;  %v9136_v17 = vld [vmem:[%s13736_s1 + $0xf0] sm:$0xff] }
 0x626   : > { %9778 = vmatprep.subr.mxu0 %v4666_v42 }
 0x627   : > { %9779 = vmatpush3.msra.mxu0 %v4666_v42  ;;  %v5393_v42 = vrot.slane %v5391_v43, 1  ;;  %v9135_v43 = vld [vmem:[%s13736_s1 + $0xe8] sm:$0xff] }
 0x628   : > { %9781 = vmatmul.mubr.msk.f32.vlgmr.msra.gmra.mxu0 %vm4674_vm7, %v9039_v14  ;;  %9783 = vmatprep.subr.mxu0 %v13727_v47  ;;  %v10520_v14 = vld [vmem:[%s13734_s23 + $0x28] sm:$0xff]  }
 0x629   : > { %9787 = vmatprep.mubr.msk.f32.mxu0 %vm10678_vm0, %v13727_v47 }
 0x6dc   : > { %v9767_v50 = vpop.f32.mrf.mxu0 }
 0x6de   : > { %v4750_v39 = vpop.f32.mrf.mxu0 }
 0x6e8   : > { %v9782_v55 = vpop.f32.mrf.mxu0 }
 0x6e9   : > { %v4844_v3 = vmax.f32 %v9767_v50, %v9782_v55  ;;  %v5394_v50 = vsel %vm1566_vm2, %v5389_v36, %v5393_v42  ;;  %v5397_v55 = vor.u32 %v5395_v22, %v5393_v42 }
 0x6ea   : > { %v4834_v54 = vpop.f32.mrf.mxu0 }
 0x6eb   : > { %v4851_v48 = vmul.f32 %v4849_v45, %v4844_v3  ;;  %v4843_v4 = vmax.f32 %v4750_v39, %v4834_v54  ;;  %v5399_v39 = vshll.u32 %v12675_v33, 16 }
 0x6ed   : > { %v4857_v6 = vadd.f32 %v4855_v29, %v4851_v48  ;;  %v4850_v7 = vmul.f32 %v4849_v45, %v4843_v4  ;;  %v10521_v45 = vld [vmem:[%s13734_s23 + $0x20] sm:$0xff]   ;;  %v5401_v3 = vrot.slane %v5399_v39, 1  ;;  %v5369_v48 = vld [vmem:[%s12654_s28 + $0x30] sm:$0xff]  ;;  %s13744_s28 = sld [smem:[#allocation22_spill]] }
 0x6ee   : > { %v12697_v4 = vpack.c.bf16 %v5369_v48, %v5369_v48 }
 0x6ef   : > { %v4856_v35 = vadd.f32 %v4855_v29, %v4850_v7  ;;  %9784 = vmatpush3.msra.mxu0 %v4857_v6  ;;  %9791 = vmatpush3.msra.mxu1 %v4857_v6  ;;  %v10522_v29 = vld [vmem:[%s13734_s23 + $0x18] sm:$0xff]   ;;  %v5402_v54 = vsel %vm1566_vm2, %v5397_v55, %v5401_v3  ;;  %v5403_v6 = vshrl.u32 %v12675_v33, 16 }
 0x6f0   : > { %9785 = vmatprep.subr.mxu0 %v13727_v47  ;;  %9792 = vmatprep.subr.mxu1 %v13727_v47  ;;  %v5407_v7 = vshll.u32 %v12697_v4, 16 }
 0x6f1   : > { %9786 = vmatpush3.msra.mxu0 %v4856_v35  ;;  %9793 = vmatpush3.msra.mxu1 %v4856_v35  ;;  %v5405_v35 = vor.u32 %v5403_v6, %v5401_v3 }
 0x6f2   : > { %9788 = vmatmul.mubr.msk.f32.vlgmr.msra.gmra.mxu0 %vm4859_vm8, %v4858_v23  ;;  %9795 = vmatmul.mubr.msk.f32.vlgmr.msra.gmra.mxu1 %vm4859_vm8, %v9044_v44  ;;  %v5409_v23 = vrot.slane %v5407_v7, 1  ;;  %v10523_v44 = vld [vmem:[%s13734_s23 + $0x10] sm:$0xff]  }
 0x6f3   : > { %9797 = vmatprep.subr.bf16.mxu0 %v13727_v47  ;;  %9817 = vmatprep.subr.bf16.mxu1 %v13727_v47 }
 0x6f4   : > { %9798 = vmatpush3.bf16.msra.mxu0 %v10496_v15  ;;  %9818 = vmatpush3.bf16.msra.mxu1 %v10497_v46  ;;  %v5410_v15 = vsel %vm1566_vm2, %v5405_v35, %v5409_v23  ;;  %v10524_v46 = vld [vmem:[%s13734_s23 + $0x8] sm:$0xff]  }
 0x6f5   : > { %9799 = vmatprep.subr.bf16.mxu0 %v13727_v47  ;;  %9819 = vmatprep.subr.bf16.mxu1 %v13727_v47  ;;  %v10534_v35 = vld [vmem:[%s13732_s18 + $0x4] ss:$8 sps:$4 sm:$0xff]  }
 0x6f6   : > { %9813 = vmatprep.mubr.msk.bf16.mxu0 %vm10678_vm0, %v13727_v47  ;;  %9833 = vmatprep.mubr.msk.bf16.mxu1 %vm10678_vm0, %v13727_v47 }
 0x6f8   : > { %9800 = vmatpush3.bf16.msra.mxu0 %v10498_v57  ;;  %9820 = vmatpush3.bf16.msra.mxu1 %v10499_v62  ;;  %v5411_v57 = vshrl.u32 %v12697_v4, 16 }
 0x6f9   : > { %9801 = vmatprep.subr.bf16.mxu0 %v13727_v47  ;;  %9821 = vmatprep.subr.bf16.mxu1 %v13727_v47 }
 0x6fa   : > { %v5413_v62 = vor.u32 %v5411_v57, %v5409_v23  ;;  %v10532_v23 = vld [vmem:[%s13732_s18] ss:$8 sps:$4 sm:$0xff]  }
 0x6fb   : > { %v5800_v57 = vld [vmem:[%s13736_s1 + $0x60] sm:$0xff] }
 0x6fc   : > { %9802 = vmatpush3.bf16.msra.mxu0 %v10500_v5  ;;  %9822 = vmatpush3.bf16.msra.mxu1 %v10501_v58  ;;  %v10529_v5 = vld [vmem:[%s13732_s18 + $0x54] ss:$8 sps:$4 sm:$0x3f]   ;;  %v10531_v58 = vld [vmem:[%s13732_s18 + $0x50] ss:$8 sps:$4 sm:$0x3f]  }
 0x6fd   : > { %9803 = vmatprep.subr.bf16.mxu0 %v13727_v47  ;;  %9823 = vmatprep.subr.bf16.mxu1 %v13727_v47 }
 0x700   : > { %9804 = vmatpush3.bf16.msra.mxu0 %v10502_v34  ;;  %9824 = vmatpush3.bf16.msra.mxu1 %v10503_v52  ;;  %v10525_v34 = vld [vmem:[%s13734_s23] sm:$0xff]   ;;  %v5672_v52 = vsel %vm3333_vm4, %v10531_v58, 0 }
 0x701   : > { %9805 = vmatprep.subr.bf16.mxu0 %v13727_v47  ;;  %9825 = vmatprep.subr.bf16.mxu1 %v13727_v47 }
 0x704   : > { %9806 = vmatpush3.bf16.msra.mxu0 %v10504_v26  ;;  %9826 = vmatpush3.bf16.msra.mxu1 %v10505_v11  ;;  %v10526_v26 = vld [vmem:[%s13732_s18 + $0x14] ss:$8 sps:$4 sm:$0x3f]   ;;  %v10535_v11 = vld [vmem:[%s13732_s18 + $0x40] ss:$8 sps:$4 sm:$0xff]  }
 0x705   : > { %9807 = vmatprep.subr.bf16.mxu0 %v13727_v47  ;;  %9827 = vmatprep.subr.bf16.mxu1 %v13727_v47 }
 0x708   : > { %9808 = vmatpush3.bf16.msra.mxu0 %v10506_v2  ;;  %9828 = vmatpush3.bf16.msra.mxu1 %v10507_v12  ;;  %v10537_v2 = vld [vmem:[%s13732_s18 + $0x44] ss:$8 sps:$4 sm:$0xff]   ;;  %v5634_v12 = vrot.slane %v12658_v31, 1 }
 0x709   : > { %9809 = vmatprep.subr.bf16.mxu0 %v13727_v47  ;;  %9829 = vmatprep.subr.bf16.mxu1 %v13727_v47 }
 0x70c   : > { %9810 = vmatpush3.bf16.msra.mxu0 %v10508_v8  ;;  %9830 = vmatpush3.bf16.msra.mxu1 %v10509_v0  ;;  %v5635_v8 = vrot.slane %v12662_v37, 1 }
 0x70d   : > { %9811 = vmatprep.subr.bf16.mxu0 %v13727_v47  ;;  %9831 = vmatprep.subr.bf16.mxu1 %v13727_v47 }
 0x70e   : > { %v5636_v0 = vsel %vm1657_vm1, %v5634_v12, %v5635_v8  ;;  %v5792_v12 = vld [vmem:[%s13736_s1 + $0x20] sm:$0xff] }
 0x710   : > { %9812 = vmatpush3.bf16.msra.mxu0 %v10510_v24  ;;  %9832 = vmatpush3.bf16.msra.mxu1 %v10511_v28  ;;  %v5637_v24 = vrot.slane %v12675_v33, 1 }
 0x711   : > { %9837 = vmatprep.subr.bf16.mxu0 %v13727_v47  ;;  %9096 = vmatprep.subr.msk.bf16.mxu1 %vm3333_vm4, %v10513_v18  ;;  %v5639_v18 = vrot.slane %v12697_v4, 1 }
 0x712   : > { %v5638_v28 = vsel %vm1657_vm1, %v5635_v8, %v5637_v24  ;;  %v5790_v8 = vld [vmem:[%s13736_s1 + $0x10] sm:$0xff] }
 0x713   : > { %v5640_v1 = vsel %vm1657_vm1, %v5637_v24, %v5639_v18 }
 0x7b2   : > { %v4929_v38 = vpop.f32.mrf.mxu0  ;;  %v5021_v9 = vpop.f32.mrf.mxu1 }
 0x7b3   : > { %v4949_v19 = vpack.c.bf16 %v4929_v38, %v4929_v38  ;;  %v5042_v25 = vpack.c.bf16 %v5021_v9, %v5021_v9  ;;  %v9140_v38 = vld [vmem:[%s13736_s1 + $0x110] sm:$0xff]  ;;  %v9139_v9 = vld [vmem:[%s13736_s1 + $0x108] sm:$0xff] }
 0x7b4   : > { %v9789_v27 = vpop.f32.mrf.mxu0  ;;  %v9796_v51 = vpop.f32.mrf.mxu1 }
 0x7b5   : > { %9814 = vmatmul.mubr.bf16.vlgmr.msra.gmra.mxu0 %v5042_v25  ;;  %9834 = vmatmul.mubr.bf16.vlgmr.msra.gmra.mxu1 %v4949_v19  ;;  %v9134_v19 = vld [vmem:[%s13736_s1 + $0xe0] sm:$0xff]  ;;  %v9133_v25 = vld [vmem:[%s13736_s1 + $0xd8] sm:$0xff] }
 0x7b6   : > { %9838 = vmatpush3.bf16.msra.mxu0 %v10512_v56  ;;  %5464 = vmatpush1.bf16.msra.mxu1 %v5446_v16  ;;  %v9138_v56 = vld [vmem:[%s13736_s1 + $0x100] sm:$0xff]  ;;  %v9132_v16 = vld [vmem:[%s13736_s1 + $0xd0] sm:$0xff] }
 0x7b7   : > { %9839 = vmatprep.subr.bf16.mxu0 %v13727_v47  ;;  %5465 = vmatprep.subr.bf16.mxu1 %v10519_v59  ;;  %v9131_v59 = vld [vmem:[%s13736_s1 + $0xc8] sm:$0xff]  ;;  %v9078_v27 = vld [vmem:[%s13737_s2] ss:$0 sm:$0xff]  ;;  %s13745_s2 = sld [smem:[#allocation24_spill]] }
 0x7b8   : > { %5483 = vmatprep.mubr.bf16.mxu1 %v13735_v60  ;;  %9853 = vmatprep.mubr.msk.bf16.mxu0 %vm10678_vm0, %v13727_v47  ;;  %v5228_v51 = vld [vmem:[%s13738_s7] sm:$0x3]  ;;  %s13746_s7 = sld [smem:[#allocation27_spill]] }
 0x7ba   : > { %9840 = vmatpush3.bf16.msra.mxu0 %v10516_v41  ;;  %5466 = vmatpush1.bf16.msra.mxu1 %v10517_v63 }
 0x7bb   : > { %9841 = vmatprep.subr.bf16.mxu0 %v13727_v47  ;;  %9118 = vmatprep.subr.msk.bf16.mxu1 %vm3333_vm4, %v10529_v5  ;;  %v5797_v5 = vld [vmem:[%s13736_s1 + $0x48] sm:$0xff] }
 0x7bd   : > { %9097 = vmatmul.mubr.msk.bf16.vlgmr.msra.gmra.mxu1 %vm5432_vm9, %v5394_v50 }
 0x7be   : > { %9842 = vmatpush3.bf16.msra.mxu0 %v10520_v14  ;;  %5493 = vmatprep.mubr.bf16.mxu1 %v13735_v60  ;;  %v5232_v14 = vrot.slane %v5228_v51, %v13728_v61 }
 0x7bf   : > { %9843 = vmatprep.subr.bf16.mxu0 %v13727_v47  ;;  %5690 = vmatpush1.bf16.msra.mxu1 %v5672_v52 }
 0x7c0   : > { %5691 = vmatprep.subr.bf16.mxu1 %v10537_v2 }
 0x7c2   : > { %9844 = vmatpush3.bf16.msra.mxu0 %v10521_v45  ;;  %v5237_v45 = vrot.slane %v5228_v51, %v13731_v21  ;;  %v9150_v51 = vld [vmem:[%s13736_s1 + $0x160] sm:$0xff] }
 0x7c3   : > { %9845 = vmatprep.subr.bf16.mxu0 %v13727_v47  ;;  %5692 = vmatpush1.bf16.msra.mxu1 %v10535_v11  ;;  %v5793_v11 = vld [vmem:[%s13736_s1 + $0x28] sm:$0xff] }
 0x7c4   : > { %5958 = vmatprep.subr.mxu1 %v13727_v47 }
 0x7c5   : > { %9098 = vmatmul.mubr.msk.bf16.gmra.mxu1 %vm5432_vm9, %v5402_v54  ;;  %v10528_v54 = vld [vmem:[%s13732_s18 + $0x10] ss:$8 sps:$4 sm:$0x3f]  }
 0x7c6   : > { %9846 = vmatpush3.bf16.msra.mxu0 %v10522_v29  ;;  %5503 = vmatprep.mubr.bf16.mxu1 %v13735_v60  ;;  %v5549_v7 = vsel %vm3333_vm4, %v10528_v54, 0 }
 0x7c7   : > { %9847 = vmatprep.subr.bf16.mxu0 %v13727_v47 }
 0x7ca   : > { %9848 = vmatpush3.bf16.msra.mxu0 %v10523_v44  ;;  %v5803_v44 = vld [vmem:[%s13736_s1 + $0x78] sm:$0xff] }
 0x7cb   : > { %9849 = vmatprep.subr.bf16.mxu0 %v13727_v47 }
 0x7cd   : > { %9099 = vmatmul.mubr.msk.bf16.gmra.mxu1 %vm5432_vm9, %v5410_v15  ;;  %v5802_v15 = vld [vmem:[%s13736_s1 + $0x70] sm:$0xff] }
 0x7ce   : > { %5513 = vmatprep.mubr.bf16.mxu1 %v13735_v60  ;;  %9850 = vmatpush3.bf16.msra.mxu0 %v10524_v46  ;;  %v5801_v46 = vld [vmem:[%s13736_s1 + $0x68] sm:$0xff] }
 0x7cf   : > { %9851 = vmatprep.subr.bf16.mxu0 %v13727_v47 }
 0x7d2   : > { %9852 = vmatpush3.bf16.msra.mxu0 %v10525_v34  ;;  %v5796_v34 = vld [vmem:[%s13736_s1 + $0x40] sm:$0xff] }
 0x7d3   : > { %9105 = vmatprep.subr.msk.bf16.mxu0 %vm3333_vm4, %v10526_v26  ;;  %v5794_v26 = vld [vmem:[%s13736_s1 + $0x30] sm:$0xff] }
 0x7d5   : > { %9100 = vmatmul.mubr.msk.bf16.gmra.mxu1 %vm5432_vm9, %v5413_v62  ;;  %v5799_v62 = vld [vmem:[%s13736_s1 + $0x58] sm:$0xff] }
 0x7d6   : > { %5709 = vmatprep.mubr.bf16.mxu1 %v13735_v60 }
 0x7dd   : > { %9119 = vmatmul.mubr.msk.bf16.vlgmr.msra.gmra.mxu1 %vm5432_vm9, %v5636_v0  ;;  %v5789_v0 = vld [vmem:[%s13736_s1 + $0x8] sm:$0xff] }
 0x7de   : > { %5719 = vmatprep.mubr.bf16.mxu1 %v13735_v60  ;;  %5959 = vmatpush1.msra.mxu1 %v9145_v53 }
 0x7df   : > { %5960 = vmatprep.subr.mxu1 %v13727_v47 }
 0x7e0   : > { %5961 = vmatpush1.msra.mxu1 %v9144_v40 }
 0x7e1   : > { %5962 = vmatprep.subr.mxu1 %v13727_v47 }
 0x7e2   : > { %5963 = vmatpush1.msra.mxu1 %v9143_v49 }
 0x7e3   : > { %5964 = vmatprep.subr.mxu1 %v13727_v47 }
 0x7e4   : > { %5965 = vmatpush1.msra.mxu1 %v9142_v32 }
 0x7e5   : > { %9120 = vmatmul.mubr.msk.bf16.gmra.mxu1 %vm5432_vm9, %v5638_v28  ;;  %5966 = vmatprep.subr.mxu1 %v13727_v47 }
 0x7e6   : > { %5729 = vmatprep.mubr.bf16.mxu1 %v13735_v60  ;;  %5967 = vmatpush1.msra.mxu1 %v9141_v13 }
 0x7e7   : > { %5968 = vmatprep.subr.mxu1 %v13727_v47 }
 0x7e8   : > { %5969 = vmatpush1.msra.mxu1 %v9140_v38  ;;  %v5788_v38 = vld [vmem:[%s13736_s1] sm:$0xff] }
 0x7e9   : > { %5970 = vmatprep.subr.mxu1 %v13727_v47 }
 0x7ea   : > { %5971 = vmatpush1.msra.mxu1 %v9139_v9  ;;  %v9130_v9 = vld [vmem:[%s13736_s1 + $0xc0] sm:$0xff] }
 0x7eb   : > { %5972 = vmatprep.subr.mxu1 %v13727_v47 }
 0x7ec   : > { %5973 = vmatpush1.msra.mxu1 %v9138_v56 }
 0x7ed   : > { %9121 = vmatmul.mubr.msk.bf16.gmra.mxu1 %vm5432_vm9, %v5640_v1  ;;  %5974 = vmatprep.subr.mxu1 %v13727_v47 }
 0x7ee   : > { %5739 = vmatprep.mubr.bf16.mxu1 %v13735_v60  ;;  %5975 = vmatpush1.msra.mxu1 %v9137_v10  ;;  %v5811_v10 = vld [vmem:[%s13736_s1 + $0xb8] sm:$0xff] }
 0x7ef   : > { %5976 = vmatprep.subr.mxu1 %v13727_v47 }
 0x7f0   : > { %5977 = vmatpush1.msra.mxu1 %v9136_v17  ;;  %v9153_v17 = vld [vmem:[%s13736_s1 + $0x178] sm:$0xff] }
 0x7f1   : > { %5978 = vmatprep.subr.mxu1 %v13727_v47 }
 0x7f2   : > { %5979 = vmatpush1.msra.mxu1 %v9135_v43 }
 0x7f3   : > { %5980 = vmatprep.subr.mxu1 %v13727_v47 }
 0x7f4   : > { %5981 = vmatpush1.msra.mxu1 %v9134_v19  ;;  %v5810_v19 = vld [vmem:[%s13736_s1 + $0xb0] sm:$0xff] }
 0x7f5   : > { %9122 = vmatmul.mubr.msk.bf16.gmra.mxu1 %vm5432_vm9, %v5639_v18  ;;  %5982 = vmatprep.subr.mxu1 %v13727_v47 }
 0x7f6   : > { %5983 = vmatpush1.msra.mxu1 %v9133_v25  ;;  %v9152_v25 = vld [vmem:[%s13736_s1 + $0x170] sm:$0xff] }
 0x7f7   : > { %5984 = vmatprep.subr.mxu1 %v13727_v47 }
 0x7f8   : > { %5985 = vmatpush1.msra.mxu1 %v9132_v16 }
 0x7f9   : > { %5986 = vmatprep.subr.mxu1 %v13727_v47 }
 0x7fa   : > { %5987 = vmatpush1.msra.mxu1 %v9131_v59  ;;  %v5809_v59 = vld [vmem:[%s13736_s1 + $0xa8] sm:$0xff] }
 0x7fb   : > { %5988 = vmatprep.subr.mxu1 %v13727_v47 }
 0x7fc   : > { %5989 = vmatpush1.msra.mxu1 %v9130_v9 }
 0x7fd   : > { %6006 = vmatprep.subr.mxu1 %v13727_v47 }
 0x7fe   : > { %6007 = vmatpush2.msra.mxu1 %v9153_v17 }
 0x7ff   : > { %6008 = vmatprep.subr.mxu1 %v13727_v47 }
 0x800   : > { %6009 = vmatpush2.msra.mxu1 %v9152_v25 }
 0x801   : > { %6010 = vmatprep.subr.mxu1 %v13727_v47 }
 0x875   : > { %v5125_v30 = vpop.f32.mrf.mxu0  ;;  %v5213_v20 = vpop.f32.mrf.mxu1 }
 0x876   : > { %v5214_v41 = vadd.f32 %v5213_v20, %v5125_v30  ;;  %v9151_v30 = vld [vmem:[%s13736_s1 + $0x168] sm:$0xff] }
 0x877   : > { %v9815_v63 = vpop.f32.mrf.mxu0  ;;  %v9835_v36 = vpop.f32.mrf.mxu1  ;;  %6011 = vmatpush2.msra.mxu1 %v9151_v30 }
 0x878   : > { %v5226_v42 = vadd.f32 %v9078_v27, %v5214_v41  ;;  %6012 = vmatprep.subr.mxu1 %v13727_v47  ;;  %v5808_v27 = vld [vmem:[%s13736_s1 + $0xa0] sm:$0xff]  ;;  %v5807_v63 = vld [vmem:[%s13736_s1 + $0x98] sm:$0xff] }
 0x879   : > { %v5128_v50 = vpop.f32.mrf.mxu0  ;;  %v5216_v22 = vpop.f32.mrf.mxu1  ;;  %6013 = vmatpush2.msra.mxu1 %v9150_v51  ;;  %v9149_v36 = vld [vmem:[%s13736_s1 + $0x158] sm:$0xff] }
 0x87a   : > { %v5227_v39 = vmax.f32 %v5226_v42, 0.0  ;;  %6014 = vmatprep.subr.mxu1 %v13727_v47  ;;  %v9148_v50 = vld [vmem:[%s13736_s1 + $0x150] sm:$0xff] }
 0x87b   : > { %v9816_v55 = vpop.f32.mrf.mxu0  ;;  %v9836_v3 = vpop.f32.mrf.mxu1  ;;  %6015 = vmatpush2.msra.mxu1 %v9149_v36 }
 0x87c   : > { %v5233_v29 = vmul.f32 %v5232_v14, %v5227_v39  ;;  %6016 = vmatprep.subr.mxu1 %v13727_v47  ;;  %v5806_v14 = vld [vmem:[%s13736_s1 + $0x90] sm:$0xff]  ;;  %v5805_v39 = vld [vmem:[%s13736_s1 + $0x88] sm:$0xff]  ;;  %v5804_v3 = vld [vmem:[%s13736_s1 + $0x80] sm:$0xff] }
 0x87d   : > { %v12793_v58 = vpop.f32.mrf.mxu1  ;;  %6017 = vmatpush2.msra.mxu1 %v9148_v50 }
 0x87e   : > { %v5238_v48 = vadd.f32 %v5237_v45, %v5233_v29  ;;  %6018 = vmatprep.subr.mxu1 %v13727_v47  ;;  %v9147_v45 = vld [vmem:[%s13736_s1 + $0x148] sm:$0xff]  ;;  %v9146_v29 = vld [vmem:[%s13736_s1 + $0x140] sm:$0xff] }
 0x87f   : > { %v12801_v52 = vpop.f32.mrf.mxu1  ;;  %6019 = vmatpush2.msra.mxu1 %v9147_v45 }
 0x880   : > { %v5255_v6 = vpack.c.bf16 %v5238_v48, %v5238_v48  ;;  %6020 = vmatprep.subr.mxu1 %v13727_v47 }
 0x881   : > { %v12808_v2 = vpop.f32.mrf.mxu1  ;;  %6021 = vmatpush2.msra.mxu1 %v9146_v29 }
 0x882   : > { %9854 = vmatmul.mubr.bf16.vlgmr.msra.gmra.mxu0 %v5255_v6  ;;  %9880 = vmatprep.subr.mxu1 %v13727_v47 }
 0x883   : > { %5567 = vmatpush1.bf16.msra.mxu0 %v5549_v7  ;;  %5586 = vmatprep.mubr.bf16.mxu0 %v13735_v60 }
 0x884   : > { %5568 = vmatprep.subr.bf16.mxu0 %v10534_v35 }
 0x887   : > { %5569 = vmatpush1.bf16.msra.mxu0 %v10532_v23 }
 0x888   : > { %5833 = vmatprep.subr.mxu0 %v13727_v47 }
 0x88a   : > { %9106 = vmatmul.mubr.msk.bf16.vlgmr.msra.gmra.mxu0 %vm5432_vm9, %v12658_v31  ;;  %v5798_v31 = vld [vmem:[%s13736_s1 + $0x50] sm:$0xff] }
 0x88b   : > { %5596 = vmatprep.mubr.bf16.mxu0 %v13735_v60  ;;  %5834 = vmatpush1.msra.mxu0 %v5803_v44 }
 0x88c   : > { %5835 = vmatprep.subr.mxu0 %v13727_v47 }
 0x88d   : > { %5836 = vmatpush1.msra.mxu0 %v5802_v15 }
 0x88e   : > { %5837 = vmatprep.subr.mxu0 %v13727_v47 }
 0x88f   : > { %5838 = vmatpush1.msra.mxu0 %v5801_v46 }
 0x890   : > { %5839 = vmatprep.subr.mxu0 %v13727_v47 }
 0x891   : > { %5840 = vmatpush1.msra.mxu0 %v5800_v57 }
 0x892   : > { %9107 = vmatmul.mubr.msk.bf16.gmra.mxu0 %vm5432_vm9, %v12662_v37  ;;  %5841 = vmatprep.subr.mxu0 %v13727_v47  ;;  %v5795_v37 = vld [vmem:[%s13736_s1 + $0x38] sm:$0xff] }
 0x893   : > { %5606 = vmatprep.mubr.bf16.mxu0 %v13735_v60  ;;  %5842 = vmatpush1.msra.mxu0 %v5799_v62 }
 0x894   : > { %5843 = vmatprep.subr.mxu0 %v13727_v47 }
 0x895   : > { %5844 = vmatpush1.msra.mxu0 %v5798_v31 }
 0x896   : > { %5845 = vmatprep.subr.mxu0 %v13727_v47 }
 0x897   : > { %5846 = vmatpush1.msra.mxu0 %v5797_v5 }
 0x898   : > { %5847 = vmatprep.subr.mxu0 %v13727_v47 }
 0x899   : > { %5848 = vmatpush1.msra.mxu0 %v5796_v34 }
 0x89a   : > { %9108 = vmatmul.mubr.msk.bf16.gmra.mxu0 %vm5432_vm9, %v12675_v33  ;;  %5849 = vmatprep.subr.mxu0 %v13727_v47  ;;  %v5791_v33 = vld [vmem:[%s13736_s1 + $0x18] sm:$0xff]  ;;  %s13755_s1 = sld [smem:[#allocation31_spill]] }
 0x89b   : > { %5616 = vmatprep.mubr.bf16.mxu0 %v13735_v60  ;;  %5850 = vmatpush1.msra.mxu0 %v5795_v37  ;;  %v12816_v60 = vpop.f32.mrf.mxu1 }
 0x89c   : > { %5851 = vmatprep.subr.mxu0 %v13727_v47 }
 0x89d   : > { %5852 = vmatpush1.msra.mxu0 %v5794_v26  ;;  %v12822_v24 = vpop.f32.mrf.mxu1 }
 0x89e   : > { %5853 = vmatprep.subr.mxu0 %v13727_v47 }
 0x89f   : > { %5854 = vmatpush1.msra.mxu0 %v5793_v11  ;;  %v5762_v11 = vld [vmem:[%s13739_s10] sm:$0x3]  ;;  %s13747_s10 = sld [smem:[#allocation25_spill]] }
 0x8a0   : > { %5855 = vmatprep.subr.mxu0 %v13727_v47 }
 0x8a1   : > { %5856 = vmatpush1.msra.mxu0 %v5792_v12 }
 0x8a2   : > { %9109 = vmatmul.mubr.msk.bf16.gmra.mxu0 %vm5432_vm9, %v12697_v4  ;;  %5857 = vmatprep.subr.mxu0 %v13727_v47  ;;  %v12826_v4 = vpop.f32.mrf.mxu1 }
 0x8a3   : > { %5858 = vmatpush1.msra.mxu0 %v5791_v33 }
 0x8a4   : > { %5859 = vmatprep.subr.mxu0 %v13727_v47  ;;  %v12828_v28 = vpop.f32.mrf.mxu1 }
 0x8a5   : > { %5860 = vmatpush1.msra.mxu0 %v5790_v8  ;;  %v12900_v8 = vrot.slane %v5762_v11, %v13731_v21 }
 0x8a6   : > { %5861 = vmatprep.subr.mxu0 %v13727_v47  ;;  %v12830_v18 = vpop.f32.mrf.mxu1 }
 0x8a7   : > { %5862 = vmatpush1.msra.mxu0 %v5789_v0 }
 0x8a8   : > { %5863 = vmatprep.subr.mxu0 %v13727_v47  ;;  %v12832_v1 = vpop.f32.mrf.mxu1 }
 0x8a9   : > { %5864 = vmatpush1.msra.mxu0 %v5788_v38  ;;  %v12904_v38 = vrot.slane %v5762_v11, %v13728_v61 }
 0x8aa   : > { %v12834_v53 = vpop.f32.mrf.mxu1  ;;  %5881 = vmatprep.subr.mxu0 %v13727_v47 }
 0x8ab   : > { %5882 = vmatpush2.msra.mxu0 %v5811_v10 }
 0x8ac   : > { %v12836_v40 = vpop.f32.mrf.mxu1  ;;  %5883 = vmatprep.subr.mxu0 %v13727_v47 }
 0x8ad   : > { %5884 = vmatpush2.msra.mxu0 %v5810_v19 }
 0x8ae   : > { %v12838_v49 = vpop.f32.mrf.mxu1  ;;  %5885 = vmatprep.subr.mxu0 %v13727_v47 }
 0x8af   : > { %5886 = vmatpush2.msra.mxu0 %v5809_v59 }
 0x8b0   : > { %v12840_v32 = vpop.f32.mrf.mxu1  ;;  %5887 = vmatprep.subr.mxu0 %v13727_v47 }
 0x8b1   : > { %5888 = vmatpush2.msra.mxu0 %v5808_v27 }
 0x8b2   : > { %v12842_v13 = vpop.f32.mrf.mxu1  ;;  %5889 = vmatprep.subr.mxu0 %v13727_v47 }
 0x8b3   : > { %5890 = vmatpush2.msra.mxu0 %v5807_v63 }
 0x8b4   : > { %v5519_v56 = vpop.f32.mrf.mxu1  ;;  %5891 = vmatprep.subr.mxu0 %v13727_v47 }
 0x8b5   : > { %5892 = vmatpush2.msra.mxu0 %v5806_v14 }
 0x8b6   : > { %v5520_v43 = vpop.f32.mrf.mxu1  ;;  %5893 = vmatprep.subr.mxu0 %v13727_v47 }
 0x8b7   : > { %5894 = vmatpush2.msra.mxu0 %v5805_v39 }
 0x8b8   : > { %v12854_v16 = vpop.f32.mrf.mxu1  ;;  %5895 = vmatprep.subr.mxu0 %v13727_v47 }
 0x8b9   : > { %5896 = vmatpush2.msra.mxu0 %v5804_v3 }
 0x8ba   : > { %v5713_v20 = vpop.f32.mrf.mxu1  ;;  %9857 = vmatprep.subr.mxu0 %v13727_v47 }
 0x8bc   : > { %v5715_v41 = vpop.f32.mrf.mxu1 }
 0x8be   : > { %v5717_v42 = vpop.f32.mrf.mxu1 }
 0x8c0   : > { %v5721_v22 = vpop.f32.mrf.mxu1 }
 0x8c2   : > { %v5723_v55 = vpop.f32.mrf.mxu1 }
 0x8c4   : > { %v5725_v54 = vpop.f32.mrf.mxu1 }
 0x8c6   : > { %v5727_v48 = vpop.f32.mrf.mxu1 }
 0x8c8   : > { %v12882_v6 = vpop.f32.mrf.mxu1 }
 0x8ca   : > { %v12884_v7 = vpop.f32.mrf.mxu1 }
 0x8cc   : > { %v12886_v35 = vpop.f32.mrf.mxu1 }
 0x8ce   : > { %v12888_v23 = vpop.f32.mrf.mxu1 }
 0x8d0   : > { %v12890_v44 = vpop.f32.mrf.mxu1 }
 0x8d2   : > { %v12892_v15 = vpop.f32.mrf.mxu1 }
 0x8d4   : > { %v5745_v46 = vpop.f32.mrf.mxu1 }
 0x8d6   : > { %v5746_v57 = vpop.f32.mrf.mxu1 }
 0x942   : > { %v12894_v62 = vpop.f32.mrf.mxu0 }
 0x944   : > { %v9855_v31 = vpop.f32.mrf.mxu0 }
 0x946   : > { %v5348_v5 = vpop.f32.mrf.mxu0 }
 0x948   : > { %v9856_v34 = vpop.f32.mrf.mxu0 }
 0x94a   : > { %v5588_v37 = vpop.f32.mrf.mxu0 }
 0x94b   : > { %v5589_v26 = vadd.f32 %v5588_v37, %v12793_v58 }
 0x94c   : > { %v5590_v12 = vpop.f32.mrf.mxu0 }
 0x94d   : > { %v5591_v33 = vadd.f32 %v5590_v12, %v12801_v52  ;;  %v5748_v0 = vadd.f32 %v12854_v16, %v5589_v26 }
 0x94e   : > { %v5592_v9 = vpop.f32.mrf.mxu0 }
 0x94f   : > { %v5593_v56 = vadd.f32 %v5592_v9, %v12808_v2  ;;  %v5749_v10 = vadd.f32 %v5713_v20, %v5591_v33  ;;  %v5774_v19 = vadd.f32 %v12904_v38, %v5748_v0 }
 0x950   : > { %v5594_v17 = vpop.f32.mrf.mxu0 }
 0x951   : > { %v5775_v43 = vadd.f32 %v12900_v8, %v5749_v10  ;;  %v5595_v58 = vadd.f32 %v5594_v17, %v12816_v60  ;;  %v5750_v52 = vadd.f32 %v5715_v41, %v5593_v56 }
 0x952   : > { %v5598_v25 = vpop.f32.mrf.mxu0 }
 0x953   : > { %v5599_v59 = vadd.f32 %v5598_v25, %v12822_v24  ;;  %v5751_v30 = vadd.f32 %v5717_v42, %v5595_v58  ;;  %9123 = vmatprep.mubr.msk.f32.mxu0 %vm3865_vm6, %v5775_v43  ;;  %9154 = vmatprep.mubr.msk.f32.mxu1 %vm3865_vm6, %v5775_v43  ;;  %v5776_v60 = vadd.f32 %v12904_v38, %v5750_v52 }
 0x954   : > { %v5600_v16 = vpop.f32.mrf.mxu0  ;;  %5898 = vmatmul.mubr.f32.vlgmr.msra.gmra.mxu0 %v5774_v19  ;;  %6023 = vmatmul.mubr.f32.vlgmr.msra.gmra.mxu1 %v5774_v19 }
 0x955   : > { %v5777_v2 = vadd.f32 %v12900_v8, %v5751_v30  ;;  %v5601_v20 = vadd.f32 %v5600_v16, %v12826_v4  ;;  %v5752_v27 = vadd.f32 %v5721_v22, %v5599_v59 }
 0x956   : > { %v5602_v51 = vpop.f32.mrf.mxu0 }
 0x957   : > { %v5603_v41 = vadd.f32 %v5602_v51, %v12828_v28  ;;  %v5753_v63 = vadd.f32 %v5723_v55, %v5601_v20  ;;  %9124 = vmatprep.mubr.msk.f32.mxu0 %vm3865_vm6, %v5777_v2  ;;  %9155 = vmatprep.mubr.msk.f32.mxu1 %vm3865_vm6, %v5777_v2  ;;  %v5778_v4 = vadd.f32 %v12904_v38, %v5752_v27 }
 0x958   : > { %v5604_v24 = vpop.f32.mrf.mxu0  ;;  %5903 = vmatmul.mubr.f32.gmra.mxu0 %v5776_v60  ;;  %6028 = vmatmul.mubr.f32.gmra.mxu1 %v5776_v60 }
 0x959   : > { %v5779_v36 = vadd.f32 %v12900_v8, %v5753_v63  ;;  %v5605_v42 = vadd.f32 %v5604_v24, %v12830_v18  ;;  %v5754_v14 = vadd.f32 %v5725_v54, %v5603_v41 }
 0x95a   : > { %v5608_v50 = vpop.f32.mrf.mxu0 }
 0x95b   : > { %v5609_v22 = vadd.f32 %v5608_v50, %v12832_v1  ;;  %v5755_v39 = vadd.f32 %v5727_v48, %v5605_v42  ;;  %9125 = vmatprep.mubr.msk.f32.mxu0 %vm3865_vm6, %v5779_v36  ;;  %9156 = vmatprep.mubr.msk.f32.mxu1 %vm3865_vm6, %v5779_v36  ;;  %v5780_v18 = vadd.f32 %v12904_v38, %v5754_v14 }
 0x95c   : > { %v5610_v28 = vpop.f32.mrf.mxu0  ;;  %5908 = vmatmul.mubr.f32.gmra.mxu0 %v5778_v4  ;;  %6033 = vmatmul.mubr.f32.gmra.mxu1 %v5778_v4 }
 0x95d   : > { %v5781_v45 = vadd.f32 %v12900_v8, %v5755_v39  ;;  %v5611_v55 = vadd.f32 %v5610_v28, %v12834_v53  ;;  %v5756_v3 = vadd.f32 %v12882_v6, %v5609_v22 }
 0x95e   : > { %v5612_v29 = vpop.f32.mrf.mxu0 }
 0x95f   : > { %v5613_v54 = vadd.f32 %v5612_v29, %v12836_v40  ;;  %v5757_v1 = vadd.f32 %v12884_v7, %v5611_v55  ;;  %9126 = vmatprep.mubr.msk.f32.mxu0 %vm3865_vm6, %v5781_v45  ;;  %9157 = vmatprep.mubr.msk.f32.mxu1 %vm3865_vm6, %v5781_v45  ;;  %v5782_v57 = vadd.f32 %v12904_v38, %v5756_v3  ;;  %v6065_v45 = vld [vmem:[%s13740_s11] sm:$0xff]  ;;  %v9165_v55 = vld [vmem:[%s13740_s11 + $0x18] sm:$0xff]  ;;  %v6067_v29 = vld [vmem:[%s13740_s11 + $0x10] sm:$0xff] }
 0x960   : > { %v5614_v48 = vpop.f32.mrf.mxu0  ;;  %5913 = vmatmul.mubr.f32.gmra.mxu0 %v5780_v18  ;;  %6038 = vmatmul.mubr.f32.gmra.mxu1 %v5780_v18  ;;  %v6066_v18 = vld [vmem:[%s13740_s11 + $0x8] sm:$0xff]  ;;  %v9166_v3 = vld [vmem:[%s13740_s11 + $0x20] sm:$0xff] }
 0x961   : > { %v5783_v46 = vadd.f32 %v12900_v8, %v5757_v1  ;;  %v5615_v53 = vadd.f32 %v5614_v48, %v12838_v49  ;;  %v5758_v6 = vadd.f32 %v12886_v35, %v5613_v54  ;;  %v9167_v54 = vld [vmem:[%s13740_s11 + $0x28] sm:$0xff]  ;;  %v10544_v48 = vld [vmem:[%s13741_s0 + $0x20] sm:$0xff]  }
 0x962   : > { %v5618_v31 = vpop.f32.mrf.mxu0  ;;  %v10542_v1 = vld [vmem:[%s13741_s0 + $0x28] sm:$0xff]  }
 0x963   : > { %v5619_v40 = vadd.f32 %v5618_v31, %v12840_v32  ;;  %v5759_v7 = vadd.f32 %v12888_v23, %v5615_v53  ;;  %9127 = vmatprep.mubr.msk.f32.mxu0 %vm3865_vm6, %v5783_v46  ;;  %9158 = vmatprep.mubr.msk.f32.mxu1 %vm3865_vm6, %v5783_v46  ;;  %v5784_v37 = vadd.f32 %v12904_v38, %v5758_v6  ;;  %v10538_v46 = vld [vmem:[%s13741_s0 + $0x58] sm:$0xff]   ;;  %v10547_v6 = vld [vmem:[%s13741_s0 + $0x10] sm:$0xff]   ;;  %v10540_v31 = vld [vmem:[%s13741_s0 + $0x48] sm:$0xff]  }
 0x964   : > { %v5620_v5 = vpop.f32.mrf.mxu0  ;;  %5918 = vmatmul.mubr.f32.gmra.mxu0 %v5782_v57  ;;  %6043 = vmatmul.mubr.f32.gmra.mxu1 %v5782_v57  ;;  %v10546_v53 = vld [vmem:[%s13741_s0 + $0x18] sm:$0xff]   ;;  %v10539_v57 = vld [vmem:[%s13741_s0 + $0x50] sm:$0xff]  }
 0x965   : > { %v5785_v34 = vadd.f32 %v12900_v8, %v5759_v7  ;;  %v5621_v49 = vadd.f32 %v5620_v5, %v12842_v13  ;;  %v5760_v35 = vadd.f32 %v12890_v44, %v5619_v40  ;;  %v10541_v40 = vld [vmem:[%s13741_s0 + $0x40] sm:$0xff]   ;;  %v10549_v7 = vld [vmem:[%s13741_s0 + $0x8] sm:$0xff]   ;;  %v10543_v5 = vld [vmem:[%s13741_s0 + $0x38] sm:$0xff]  }
 0x966   : > { %v5622_v26 = vpop.f32.mrf.mxu0 }
 0x967   : > { %v5761_v32 = vadd.f32 %v12892_v15, %v5621_v49  ;;  %9128 = vmatprep.mubr.msk.f32.mxu0 %vm3865_vm6, %v5785_v34  ;;  %9159 = vmatprep.mubr.msk.f32.mxu1 %vm3865_vm6, %v5785_v34  ;;  %v5786_v12 = vadd.f32 %v12904_v38, %v5760_v35  ;;  %v10551_v34 = vld [vmem:[%s13741_s0] sm:$0xff]   ;;  %v10545_v49 = vld [vmem:[%s13741_s0 + $0x30] sm:$0xff]  }
 0x968   : > { %5923 = vmatmul.mubr.f32.gmra.mxu0 %v5784_v37  ;;  %6048 = vmatmul.mubr.f32.gmra.mxu1 %v5784_v37  ;;  %v5623_v23 = vpop.f32.mrf.mxu0  ;;  %v10548_v37 = vld [vmem:[%s13741_s0 + $0x88] sm:$0xff]  }
 0x969   : > { %v5787_v11 = vadd.f32 %v12900_v8, %v5761_v32  ;;  %v6260_v32 = vld [vmem:[%s13742_s22] sm:$0x3]  ;;  %s13748_s22 = sld [smem:[#allocation26_spill]] }
 0x96b   : > { %9129 = vmatprep.mubr.msk.f32.mxu0 %vm3865_vm6, %v5787_v11  ;;  %9160 = vmatprep.mubr.msk.f32.mxu1 %vm3865_vm6, %v5787_v11 }
 0x96c   : > { %5928 = vmatmul.mubr.f32.gmra.mxu0 %v5786_v12  ;;  %6053 = vmatmul.mubr.f32.gmra.mxu1 %v5786_v12 }
 0x96d   : > { %9871 = vmatprep.mubr.msk.f32.mxu0 %vm10678_vm0, %v13727_v47  ;;  %9894 = vmatprep.mubr.msk.f32.mxu1 %vm10678_vm0, %v13727_v47 }
 0xa14   : > { %v5899_v13 = vpop.f32.mrf.mxu0  ;;  %v6024_v44 = vpop.f32.mrf.mxu1 }
 0xa15   : > { %v6058_v28 = vmax.f32 %v5899_v13, %v6024_v44  ;;  %v6264_v44 = vrot.slane %v6260_v32, %v13728_v61 }
 0xa16   : > { %v5901_v15 = vpop.f32.mrf.mxu0  ;;  %v6026_v33 = vpop.f32.mrf.mxu1 }
 0xa18   : > { %v5904_v0 = vpop.f32.mrf.mxu0  ;;  %v6029_v8 = vpop.f32.mrf.mxu1 }
 0xa19   : > { %v6059_v39 = vmax.f32 %v5904_v0, %v6029_v8 }
 0xa1a   : > { %v5906_v9 = vpop.f32.mrf.mxu0  ;;  %v6031_v38 = vpop.f32.mrf.mxu1 }
 0xa1c   : > { %v5909_v56 = vpop.f32.mrf.mxu0  ;;  %v6034_v10 = vpop.f32.mrf.mxu1 }
 0xa1d   : > { %v6060_v22 = vmax.f32 %v5909_v56, %v6034_v10  ;;  %v6271_v56 = vrot.slane %v6260_v32, %v13731_v21  ;;  %v6624_v32 = vld [vmem:[%s13743_s26 + $0x38] sm:$0xff] }
 0xa1e   : > { %v5911_v17 = vpop.f32.mrf.mxu0  ;;  %v6036_v43 = vpop.f32.mrf.mxu1 }
 0xa20   : > { %v5914_v58 = vpop.f32.mrf.mxu0  ;;  %v6039_v19 = vpop.f32.mrf.mxu1 }
 0xa21   : > { %v6061_v50 = vmax.f32 %v5914_v58, %v6039_v19 }
 0xa22   : > { %v5916_v52 = vpop.f32.mrf.mxu0  ;;  %v6041_v25 = vpop.f32.mrf.mxu1 }
 0xa24   : > { %v5919_v59 = vpop.f32.mrf.mxu0  ;;  %v6044_v30 = vpop.f32.mrf.mxu1 }
 0xa25   : > { %v6062_v14 = vmax.f32 %v5919_v59, %v6044_v30 }
 0xa26   : > { %v5921_v16 = vpop.f32.mrf.mxu0  ;;  %v6046_v2 = vpop.f32.mrf.mxu1 }
 0xa28   : > { %v5924_v20 = vpop.f32.mrf.mxu0  ;;  %v6049_v60 = vpop.f32.mrf.mxu1 }
 0xa29   : > { %v6063_v4 = vmax.f32 %v5924_v20, %v6049_v60 }
 0xa2a   : > { %v5926_v27 = vpop.f32.mrf.mxu0  ;;  %v6051_v51 = vpop.f32.mrf.mxu1 }
 0xa2c   : > { %v5929_v41 = vpop.f32.mrf.mxu0  ;;  %v6054_v63 = vpop.f32.mrf.mxu1 }
 0xa2d   : > { %v6064_v24 = vmax.f32 %v5929_v41, %v6054_v63  ;;  %v6632_v63 = vld [vmem:[%s13743_s26 + $0x78] sm:$0xff] }
 0xa2e   : > { %v5931_v36 = vpop.f32.mrf.mxu0  ;;  %v6056_v42 = vpop.f32.mrf.mxu1 }
 0xa2f   : > { %9858 = vmatpush3.msk.msra.mxu0 %vm3333_vm4, %v6064_v24  ;;  %9881 = vmatpush3.msk.msra.mxu1 %vm3333_vm4, %v6064_v24  ;;  %v6631_v42 = vld [vmem:[%s13743_s26 + $0x70] sm:$0xff] }
 0xa30   : > { %9859 = vmatprep.subr.mxu0 %v13727_v47  ;;  %9882 = vmatprep.subr.mxu1 %v13727_v47 }
 0xa31   : > { %9860 = vmatpush3.msra.mxu0 %v6063_v4  ;;  %9883 = vmatpush3.msra.mxu1 %v6063_v4 }
 0xa32   : > { %9861 = vmatprep.subr.mxu0 %v13727_v47  ;;  %9884 = vmatprep.subr.mxu1 %v13727_v47 }
 0xa33   : > { %9862 = vmatpush3.msra.mxu0 %v6062_v14  ;;  %9885 = vmatpush3.msra.mxu1 %v6062_v14 }
 0xa34   : > { %9863 = vmatprep.subr.mxu0 %v13727_v47  ;;  %9886 = vmatprep.subr.mxu1 %v13727_v47 }
 0xa35   : > { %9864 = vmatpush3.msra.mxu0 %v6061_v50  ;;  %9887 = vmatpush3.msra.mxu1 %v6061_v50 }
 0xa36   : > { %9865 = vmatprep.subr.mxu0 %v13727_v47  ;;  %9888 = vmatprep.subr.mxu1 %v13727_v47 }
 0xa37   : > { %9866 = vmatpush3.msra.mxu0 %v6060_v22  ;;  %9889 = vmatpush3.msra.mxu1 %v6060_v22 }
 0xa38   : > { %9867 = vmatprep.subr.mxu0 %v13727_v47  ;;  %9890 = vmatprep.subr.mxu1 %v13727_v47 }
 0xa39   : > { %9868 = vmatpush3.msra.mxu0 %v6059_v39  ;;  %9891 = vmatpush3.msra.mxu1 %v6059_v39  ;;  %v6630_v39 = vld [vmem:[%s13743_s26 + $0x68] sm:$0xff] }
 0xa3a   : > { %9869 = vmatprep.subr.mxu0 %v13727_v47  ;;  %9892 = vmatprep.subr.mxu1 %v13727_v47 }
 0xa3b   : > { %9870 = vmatpush3.msra.mxu0 %v6058_v28  ;;  %9893 = vmatpush3.msra.mxu1 %v6058_v28 }
 0xa3c   : > { %9872 = vmatmul.mubr.msk.f32.vlgmr.msra.gmra.mxu0 %vm6068_vm10, %v6065_v45  ;;  %9895 = vmatmul.mubr.msk.f32.vlgmr.msra.gmra.mxu1 %vm6068_vm10, %v9165_v55  ;;  %v10550_v55 = vld [vmem:[%s13741_s0 + $0x80] sm:$0xff]  }
 0xa3d   : > { %9874 = vmatprep.mubr.msk.f32.mxu0 %vm10678_vm0, %v13727_v47  ;;  %9897 = vmatprep.mubr.msk.f32.mxu1 %vm10678_vm0, %v13727_v47 }
 0xa3e   : > { %9919 = vmatprep.subr.bf16.mxu1 %v10542_v1  ;;  %9903 = vmatprep.subr.bf16.mxu0 %v10538_v46 }
 0xa3f   : > { %9920 = vmatpush3.bf16.msra.mxu1 %v10542_v1  ;;  %9904 = vmatpush3.bf16.msra.mxu0 %v10538_v46  ;;  %v10552_v1 = vld [vmem:[%s13741_s0 + $0x78] sm:$0xff]   ;;  %v10553_v46 = vld [vmem:[%s13741_s0 + $0x70] sm:$0xff]  }
 0xa40   : > { %9875 = vmatmul.mubr.msk.f32.gmra.mxu0 %vm6068_vm10, %v6066_v18  ;;  %9898 = vmatmul.mubr.msk.f32.gmra.mxu1 %vm6068_vm10, %v9166_v3  ;;  %v6629_v3 = vld [vmem:[%s13743_s26 + $0x60] sm:$0xff] }
 0xa41   : > { %9877 = vmatprep.mubr.msk.f32.mxu0 %vm10678_vm0, %v13727_v47  ;;  %9900 = vmatprep.mubr.msk.f32.mxu1 %vm10678_vm0, %v13727_v47 }
 0xa42   : > { %9921 = vmatprep.subr.bf16.mxu1 %v10544_v48  ;;  %9905 = vmatprep.subr.bf16.mxu0 %v10539_v57 }
 0xa43   : > { %9922 = vmatpush3.bf16.msra.mxu1 %v10544_v48  ;;  %9906 = vmatpush3.bf16.msra.mxu0 %v10539_v57  ;;  %v6627_v48 = vld [vmem:[%s13743_s26 + $0x50] sm:$0xff]  ;;  %v10555_v57 = vld [vmem:[%s13741_s0 + $0x60] sm:$0xff]  }
 0xa44   : > { %9878 = vmatmul.mubr.msk.f32.gmra.mxu0 %vm6068_vm10, %v6067_v29  ;;  %9901 = vmatmul.mubr.msk.f32.gmra.mxu1 %vm6068_vm10, %v9167_v54  ;;  %v6628_v54 = vld [vmem:[%s13743_s26 + $0x58] sm:$0xff] }
 0xa45   : > { %9923 = vmatprep.subr.bf16.mxu1 %v10546_v53  ;;  %9907 = vmatprep.subr.bf16.mxu0 %v10540_v31 }
 0xa47   : > { %9924 = vmatpush3.bf16.msra.mxu1 %v10546_v53  ;;  %9908 = vmatpush3.bf16.msra.mxu0 %v10540_v31  ;;  %v10554_v53 = vld [vmem:[%s13741_s0 + $0x68] sm:$0xff]   ;;  %v9235_v31 = vld [vmem:[%s13743_s26 + $0xf0] sm:$0xff]  ;;  %s13751_s0 = sld [smem:[#allocation15_spill]] }
 0xa48   : > { %9925 = vmatprep.subr.bf16.mxu1 %v10547_v6  ;;  %9909 = vmatprep.subr.bf16.mxu0 %v10541_v40 }
 0xa4b   : > { %9926 = vmatpush3.bf16.msra.mxu1 %v10547_v6  ;;  %9910 = vmatpush3.bf16.msra.mxu0 %v10541_v40  ;;  %v9236_v6 = vld [vmem:[%s13743_s26 + $0xf8] sm:$0xff]  ;;  %v9234_v40 = vld [vmem:[%s13743_s26 + $0xe8] sm:$0xff] }
 0xa4c   : > { %9927 = vmatprep.subr.bf16.mxu1 %v10549_v7  ;;  %9911 = vmatprep.subr.bf16.mxu0 %v10543_v5 }
 0xa4f   : > { %9928 = vmatpush3.bf16.msra.mxu1 %v10549_v7  ;;  %9912 = vmatpush3.bf16.msra.mxu0 %v10543_v5  ;;  %v9233_v7 = vld [vmem:[%s13743_s26 + $0xe0] sm:$0xff]  ;;  %v9232_v5 = vld [vmem:[%s13743_s26 + $0xd8] sm:$0xff] }
 0xa50   : > { %9929 = vmatprep.subr.bf16.mxu1 %v10551_v34  ;;  %9913 = vmatprep.subr.bf16.mxu0 %v10545_v49 }
 0xa53   : > { %9930 = vmatpush3.bf16.msra.mxu1 %v10551_v34  ;;  %9914 = vmatpush3.bf16.msra.mxu0 %v10545_v49  ;;  %v9231_v34 = vld [vmem:[%s13743_s26 + $0xd0] sm:$0xff]  ;;  %v6626_v49 = vld [vmem:[%s13743_s26 + $0x48] sm:$0xff] }
 0xa54   : > { %9951 = vmatprep.subr.mxu1 %v13727_v47  ;;  %9935 = vmatprep.subr.bf16.mxu0 %v10548_v37 }
 0xafc   : > { %v6147_v35 = vpop.f32.mrf.mxu0  ;;  %v6240_v26 = vpop.f32.mrf.mxu1 }
 0xafd   : > { %v6254_v23 = vmax.f32 %v6147_v35, %v6240_v26  ;;  %v6625_v35 = vld [vmem:[%s13743_s26 + $0x40] sm:$0xff] }
 0xafe   : > { %v9873_v11 = vpop.f32.mrf.mxu0  ;;  %v9896_v12 = vpop.f32.mrf.mxu1  ;;  %v9229_v26 = vld [vmem:[%s13743_s26 + $0xc0] sm:$0xff] }
 0xaff   : > { %v6257_v13 = vmax.f32 %v6254_v23, 0.0  ;;  %v9228_v23 = vld [vmem:[%s13743_s26 + $0xb8] sm:$0xff]  ;;  %v6623_v11 = vld [vmem:[%s13743_s26 + $0x30] sm:$0xff] }
 0xb00   : > { %v6152_v15 = vpop.f32.mrf.mxu0  ;;  %v6245_v33 = vpop.f32.mrf.mxu1  ;;  %v9227_v12 = vld [vmem:[%s13743_s26 + $0xb0] sm:$0xff] }
 0xb01   : > { %v6255_v0 = vmax.f32 %v6152_v15, %v6245_v33  ;;  %v6265_v38 = vmul.f32 %v6264_v44, %v6257_v13  ;;  %v6622_v13 = vld [vmem:[%s13743_s26 + $0x28] sm:$0xff]  ;;  %v6621_v15 = vld [vmem:[%s13743_s26 + $0x20] sm:$0xff] }
 0xb02   : > { %v9876_v8 = vpop.f32.mrf.mxu0  ;;  %v9899_v9 = vpop.f32.mrf.mxu1  ;;  %v9225_v33 = vld [vmem:[%s13743_s26 + $0xa0] sm:$0xff] }
 0xb03   : > { %v6258_v10 = vmax.f32 %v6255_v0, 0.0  ;;  %v6272_v59 = vadd.f32 %v6271_v56, %v6265_v38  ;;  %v6620_v0 = vld [vmem:[%s13743_s26 + $0x18] sm:$0xff]  ;;  %v6619_v9 = vld [vmem:[%s13743_s26 + $0x10] sm:$0xff] }
 0xb04   : > { %v6157_v17 = vpop.f32.mrf.mxu0  ;;  %v6250_v43 = vpop.f32.mrf.mxu1  ;;  %v9224_v8 = vld [vmem:[%s13743_s26 + $0x98] sm:$0xff]  ;;  %v9223_v38 = vld [vmem:[%s13743_s26 + $0x90] sm:$0xff] }
 0xb05   : > { %v6266_v58 = vmul.f32 %v6264_v44, %v6258_v10  ;;  %v6256_v19 = vmax.f32 %v6157_v17, %v6250_v43  ;;  %v9222_v10 = vld [vmem:[%s13743_s26 + $0x88] sm:$0xff]  ;;  %v6617_v17 = vld [vmem:[%s13743_s26] sm:$0xff] }
 0xb06   : > { %v9879_v52 = vpop.f32.mrf.mxu0  ;;  %v9902_v25 = vpop.f32.mrf.mxu1  ;;  %v9221_v43 = vld [vmem:[%s13743_s26 + $0x80] sm:$0xff] }
 0xb07   : > { %v6273_v30 = vadd.f32 %v6271_v56, %v6266_v58  ;;  %v6259_v16 = vmax.f32 %v6256_v19, 0.0 }
 0xb09   : > { %v6287_v2 = vpack.c.bf16 %v6273_v30, %v6272_v59  ;;  %v6267_v20 = vmul.f32 %v6264_v44, %v6259_v16  ;;  %v9226_v44 = vld [vmem:[%s13743_s26 + $0xa8] sm:$0xff] }
 0xb0b   : > { %v6274_v60 = vadd.f32 %v6271_v56, %v6267_v20  ;;  %v6305_v27 = vshll.u32 %v6287_v2, 16  ;;  %9931 = vmatprep.mubr.msk.bf16.mxu1 %vm6353_vm11, %v6287_v2  ;;  %v6303_v24 = vshrl.u32 %v6287_v2, 16  ;;  %v6511_v18 = vrot.slane %v6287_v2, 1  ;;  %v6618_v56 = vld [vmem:[%s13743_s26 + $0x8] sm:$0xff] }
 0xb0d   : > { %v6288_v51 = vpack.c.bf16 %v6274_v60, %v6274_v60  ;;  %v6307_v41 = vrot.slane %v6305_v27, 1 }
 0xb0f   : > { %v6310_v36 = vshll.u32 %v6288_v51, 16  ;;  %9932 = vmatmul.mubr.msk.bf16.vlgmr.msra.gmra.mxu1 %vm6353_vm11, %v6288_v51  ;;  %v6308_v4 = vor.u32 %v6307_v41, %v6303_v24  ;;  %v6314_v50 = vshrl.u32 %v6288_v51, 16  ;;  %v6512_v22 = vrot.slane %v6288_v51, 1  ;;  %v9220_v41 = vld [vmem:[%s13744_s28] ss:$0 sm:$0xff]  ;;  %s13749_s28 = sld [smem:[#allocation28_spill]] }
 0xb10   : > { %9952 = vmatpush3.msra.mxu1 %v6632_v63  ;;  %9983 = vmatprep.mubr.msk.f32.mxu1 %vm10678_vm0, %v13727_v47 }
 0xb11   : > { %v6312_v14 = vrot.slane %v6310_v36, 1  ;;  %9953 = vmatprep.subr.mxu1 %v13727_v47  ;;  %v6513_v29 = vsel %vm1657_vm1, %v6511_v18, %v6512_v22  ;;  %vm8195_vm1 = vcmask 1041408  }
 0xb12   : > { %9954 = vmatpush3.msra.mxu1 %v6631_v42 }
 0xb13   : > { %v6313_v28 = vsel %vm1566_vm2, %v6308_v4, %v6312_v14  ;;  %v6316_v45 = vor.u32 %v6314_v50, %v6312_v14  ;;  %9955 = vmatprep.subr.mxu1 %v13727_v47  ;;  %vm8191_vm2 = vcmask 80896  }
 0xb14   : > { %9915 = vmatprep.mubr.msk.bf16.mxu0 %vm6353_vm11, %v6313_v28  ;;  %9956 = vmatpush3.msra.mxu1 %v6630_v39 }
 0xb15   : > { %9916 = vmatmul.mubr.msk.bf16.vlgmr.msra.gmra.mxu0 %vm6353_vm11, %v6316_v45  ;;  %9957 = vmatprep.subr.mxu1 %v13727_v47 }
 0xb16   : > { %9936 = vmatpush3.bf16.msra.mxu0 %v10548_v37  ;;  %9947 = vmatprep.mubr.msk.bf16.mxu0 %vm6353_vm11, %v6513_v29  ;;  %v9230_v37 = vld [vmem:[%s13743_s26 + $0xc8] sm:$0xff] }
 0xb17   : > { %9937 = vmatprep.subr.bf16.mxu0 %v10550_v55  ;;  %9958 = vmatpush3.msra.mxu1 %v6629_v3 }
 0xb18   : > { %9959 = vmatprep.subr.mxu1 %v13727_v47 }
 0xb19   : > { %9960 = vmatpush3.msra.mxu1 %v6628_v54 }
 0xb1a   : > { %9938 = vmatpush3.bf16.msra.mxu0 %v10550_v55  ;;  %9961 = vmatprep.subr.mxu1 %v13727_v47 }
 0xb1b   : > { %9939 = vmatprep.subr.bf16.mxu0 %v10552_v1  ;;  %9962 = vmatpush3.msra.mxu1 %v6627_v48 }
 0xb1c   : > { %9963 = vmatprep.subr.mxu1 %v13727_v47 }
 0xb1d   : > { %9964 = vmatpush3.msra.mxu1 %v6626_v49  ;;  %v9251_v49 = vld [vmem:[%s13746_s7 + $0x70] sm:$0xff] }
 0xb1e   : > { %9940 = vmatpush3.bf16.msra.mxu0 %v10552_v1  ;;  %9965 = vmatprep.subr.mxu1 %v13727_v47 }
 0xb1f   : > { %9941 = vmatprep.subr.bf16.mxu0 %v10553_v46  ;;  %9966 = vmatpush3.msra.mxu1 %v6625_v35  ;;  %v9249_v35 = vld [vmem:[%s13746_s7 + $0x60] sm:$0xff] }
 0xb20   : > { %9967 = vmatprep.subr.mxu1 %v13727_v47 }
 0xb21   : > { %9968 = vmatpush3.msra.mxu1 %v6624_v32  ;;  %v9247_v32 = vld [vmem:[%s13746_s7 + $0x50] sm:$0xff] }
 0xb22   : > { %9942 = vmatpush3.bf16.msra.mxu0 %v10553_v46  ;;  %9969 = vmatprep.subr.mxu1 %v13727_v47 }
 0xb23   : > { %9943 = vmatprep.subr.bf16.mxu0 %v10554_v53  ;;  %9970 = vmatpush3.msra.mxu1 %v6623_v11 }
 0xb24   : > { %9971 = vmatprep.subr.mxu1 %v13727_v47 }
 0xb25   : > { %9972 = vmatpush3.msra.mxu1 %v6622_v13 }
 0xb26   : > { %9944 = vmatpush3.bf16.msra.mxu0 %v10554_v53  ;;  %9973 = vmatprep.subr.mxu1 %v13727_v47 }
 0xb27   : > { %9945 = vmatprep.subr.bf16.mxu0 %v10555_v57  ;;  %9974 = vmatpush3.msra.mxu1 %v6621_v15 }
 0xb28   : > { %9975 = vmatprep.subr.mxu1 %v13727_v47 }
 0xb29   : > { %9976 = vmatpush3.msra.mxu1 %v6620_v0 }
 0xb2a   : > { %9946 = vmatpush3.bf16.msra.mxu0 %v10555_v57  ;;  %9977 = vmatprep.subr.mxu1 %v13727_v47 }
 0xb2b   : > { %9992 = vmatprep.subr.mxu0 %v13727_v47  ;;  %9978 = vmatpush3.msra.mxu1 %v6619_v9 }
 0xb2c   : > { %9979 = vmatprep.subr.mxu1 %v13727_v47 }
 0xb2d   : > { %9948 = vmatmul.mubr.msk.bf16.vlgmr.msra.gmra.mxu0 %vm6353_vm11, %v6512_v22  ;;  %9980 = vmatpush3.msra.mxu1 %v6618_v56  ;;  %v13132_v56 = vld [vmem:[%s13748_s22] sm:$0xf] }
 0xb2e   : > { %9993 = vmatpush3.msra.mxu0 %v9236_v6  ;;  %10024 = vmatprep.mubr.msk.f32.mxu0 %vm10678_vm0, %v13727_v47 }
 0xb2f   : > { %9994 = vmatprep.subr.mxu0 %v13727_v47  ;;  %9981 = vmatprep.subr.mxu1 %v13727_v47 }
 0xb30   : > { %9995 = vmatpush3.msra.mxu0 %v9235_v31  ;;  %9982 = vmatpush3.msra.mxu1 %v6617_v17  ;;  %v7136_v17 = vld [vmem:[%s13746_s7 + $0x38] sm:$0xff] }
 0xb31   : > { %9996 = vmatprep.subr.mxu0 %v13727_v47  ;;  %10033 = vmatprep.subr.mxu1 %v13727_v47 }
 0xb32   : > { %9997 = vmatpush3.msra.mxu0 %v9234_v40 }
 0xb33   : > { %9998 = vmatprep.subr.mxu0 %v13727_v47 }
 0xb34   : > { %9999 = vmatpush3.msra.mxu0 %v9233_v7  ;;  %v6813_v7 = vld [vmem:[%s13745_s2] sm:$0xff] }
 0xb35   : > { %10000 = vmatprep.subr.mxu0 %v13727_v47 }
 0xb36   : > { %10001 = vmatpush3.msra.mxu0 %v9232_v5  ;;  %v9239_v5 = vld [vmem:[%s13745_s2 + $0x8] sm:$0xff]  ;;  %s13758_s2 = sld [smem:[#allocation35_spill]] }
 0xb37   : > { %10002 = vmatprep.subr.mxu0 %v13727_v47 }
 0xb38   : > { %10003 = vmatpush3.msra.mxu0 %v9231_v34  ;;  %v9252_v34 = vld [vmem:[%s13746_s7 + $0x78] sm:$0xff] }
 0xb39   : > { %10004 = vmatprep.subr.mxu0 %v13727_v47 }
 0xb3a   : > { %10005 = vmatpush3.msra.mxu0 %v9230_v37  ;;  %v9250_v37 = vld [vmem:[%s13746_s7 + $0x68] sm:$0xff] }
 0xb3b   : > { %10006 = vmatprep.subr.mxu0 %v13727_v47 }
 0xb3c   : > { %10007 = vmatpush3.msra.mxu0 %v9229_v26  ;;  %v9248_v26 = vld [vmem:[%s13746_s7 + $0x58] sm:$0xff] }
 0xb3d   : > { %10008 = vmatprep.subr.mxu0 %v13727_v47 }
 0xb3e   : > { %10009 = vmatpush3.msra.mxu0 %v9228_v23 }
 0xb3f   : > { %10010 = vmatprep.subr.mxu0 %v13727_v47 }
 0xb40   : > { %10011 = vmatpush3.msra.mxu0 %v9227_v12  ;;  %v6968_v12 = vld [vmem:[%s13747_s10] sm:$0x3]  ;;  %s13750_s10 = sld [smem:[#allocation14_spill]] }
 0xb41   : > { %10012 = vmatprep.subr.mxu0 %v13727_v47  ;;  %v6972_v15 = vrot.slane %v6968_v12, %v13728_v61 }
 0xb42   : > { %10013 = vmatpush3.msra.mxu0 %v9226_v44 }
 0xb43   : > { %10014 = vmatprep.subr.mxu0 %v13727_v47 }
 0xb44   : > { %10015 = vmatpush3.msra.mxu0 %v9225_v33 }
 0xb45   : > { %10016 = vmatprep.subr.mxu0 %v13727_v47 }
 0xb46   : > { %10017 = vmatpush3.msra.mxu0 %v9224_v8  ;;  %v6977_v8 = vrot.slane %v6968_v12, %v13731_v21 }
 0xb47   : > { %10018 = vmatprep.subr.mxu0 %v13727_v47 }
 0xb48   : > { %10019 = vmatpush3.msra.mxu0 %v9223_v38 }
 0xb49   : > { %10020 = vmatprep.subr.mxu0 %v13727_v47 }
 0xb4a   : > { %10021 = vmatpush3.msra.mxu0 %v9222_v10  ;;  %v13140_v10 = vld [vmem:[%s13748_s22 + $0x4] sm:$0xf] }
 0xb4b   : > { %10022 = vmatprep.subr.mxu0 %v13727_v47 }
 0xb4c   : > { %10023 = vmatpush3.msra.mxu0 %v9221_v43  ;;  %v7135_v43 = vld [vmem:[%s13746_s7 + $0x30] sm:$0xff] }
 0xb4d   : > { %10061 = vmatprep.subr.mxu0 %v13727_v47 }
 0xbcf   : > { %v9933_v58 = vpop.f32.mrf.mxu1 }
 0xbd1   : > { %v6482_v19 = vpop.f32.mrf.mxu1 }
 0xbd3   : > { %v9934_v52 = vpop.f32.mrf.mxu1 }
 0xbd4   : > { %v7132_v52 = vld [vmem:[%s13746_s7 + $0x18] sm:$0xff] }
 0xbd5   : > { %v9917_v25 = vpop.f32.mrf.mxu0  ;;  %v6485_v51 = vpop.f32.mrf.mxu1 }
 0xbd6   : > { %v6491_v4 = vadd.f32 %v9933_v58, %v9917_v25  ;;  %v7134_v58 = vld [vmem:[%s13746_s7 + $0x28] sm:$0xff]  ;;  %v7131_v25 = vld [vmem:[%s13746_s7 + $0x10] sm:$0xff] }
 0xbd7   : > { %v6394_v59 = vpop.f32.mrf.mxu0 }
 0xbd8   : > { %v6483_v20 = vadd.f32 %v6482_v19, %v6394_v59  ;;  %v7133_v19 = vld [vmem:[%s13746_s7 + $0x20] sm:$0xff]  ;;  %v7130_v59 = vld [vmem:[%s13746_s7 + $0x8] sm:$0xff] }
 0xbd9   : > { %v9918_v30 = vpop.f32.mrf.mxu0 }
 0xbda   : > { %v7129_v30 = vld [vmem:[%s13746_s7] sm:$0xff] }
 0xbdb   : > { %v6397_v16 = vpop.f32.mrf.mxu0 }
 0xbdc   : > { %v6486_v24 = vadd.f32 %v6485_v51, %v6397_v16  ;;  %v9246_v16 = vld [vmem:[%s13746_s7 + $0x48] sm:$0xff]  ;;  %v9079_v51 = vld [vmem:[%s13750_s10] ss:$0 sm:$0xff]  ;;  %s13753_s10 = sld [smem:[#allocation32_spill]] }
 0xbed   : > { %v9949_v2 = vpop.f32.mrf.mxu0 }
 0xbee   : > { %v6606_v50 = vadd.f32 %v9949_v2, %v6491_v4  ;;  %v9245_v2 = vld [vmem:[%s13746_s7 + $0x40] sm:$0xff]  ;;  %v9261_v4 = vld [vmem:[%s13749_s28 + $0x70] sm:$0xff] }
 0xbef   : > { %v6590_v60 = vpop.f32.mrf.mxu0 }
 0xbf0   : > { %v6604_v27 = vadd.f32 %v6590_v60, %v6483_v20  ;;  %v6616_v39 = vadd.f32 %v9220_v41, %v6606_v50  ;;  %v7299_v20 = vld [vmem:[%s13749_s28 + $0x38] sm:$0xff]  ;;  %v5352_v50 = vld [vmem:[%s13751_s0] sm:$0x3]  ;;  %s13752_s0 = sld [smem:[#allocation29_spill]] }
 0xbf1   : > { %v9950_v63 = vpop.f32.mrf.mxu0 }
 0xbf2   : > { %v6614_v36 = vadd.f32 %v9220_v41, %v6604_v27  ;;  %v7298_v27 = vld [vmem:[%s13749_s28 + $0x30] sm:$0xff]  ;;  %v9262_v63 = vld [vmem:[%s13749_s28 + $0x78] sm:$0xff] }
 0xbf3   : > { %v6593_v42 = vpop.f32.mrf.mxu0 }
 0xbf4   : > { %v6605_v14 = vadd.f32 %v6593_v42, %v6486_v24  ;;  %9984 = vmatmul.mubr.f32.vlgmr.msra.gmra.mxu1 %v6614_v36  ;;  %10025 = vmatmul.mubr.f32.vlgmr.msra.gmra.mxu0 %v6614_v36  ;;  %v7297_v24 = vld [vmem:[%s13749_s28 + $0x28] sm:$0xff]  ;;  %v5346_v42 = vadd.f32 %v9079_v51, %v12894_v62  ;;  %v7295_v62 = vld [vmem:[%s13749_s28 + $0x18] sm:$0xff] }
 0xbf5   : > { %9986 = vmatprep.mubr.msk.f32.mxu1 %vm10678_vm0, %v13727_v47  ;;  %10027 = vmatprep.mubr.msk.f32.mxu0 %vm10678_vm0, %v13727_v47 }
 0xbf6   : > { %v6615_v22 = vadd.f32 %v9220_v41, %v6605_v14  ;;  %10062 = vmatpush3.msra.mxu0 %v9252_v34  ;;  %v7296_v14 = vld [vmem:[%s13749_s28 + $0x20] sm:$0xff]  ;;  %v13247_v34 = vld [vmem:[%s13752_s0 + $0x18] sm:$0xff] }
 0xbf7   : > { %10063 = vmatprep.subr.mxu0 %v13727_v47 }
 0xbf8   : > { %9987 = vmatmul.mubr.f32.gmra.mxu1 %v6615_v22  ;;  %10028 = vmatmul.mubr.f32.gmra.mxu0 %v6615_v22 }
 0xbf9   : > { %9989 = vmatprep.mubr.msk.f32.mxu1 %vm10678_vm0, %v13727_v47  ;;  %10030 = vmatprep.mubr.msk.f32.mxu0 %vm10678_vm0, %v13727_v47 }
 0xbfa   : > { %10064 = vmatpush3.msra.mxu0 %v9251_v49  ;;  %v13252_v49 = vld [vmem:[%s13752_s0 + $0x10] sm:$0xff] }
 0xbfb   : > { %10065 = vmatprep.subr.mxu0 %v13727_v47 }
 0xbfc   : > { %9990 = vmatmul.mubr.f32.gmra.mxu1 %v6616_v39  ;;  %10031 = vmatmul.mubr.f32.gmra.mxu0 %v6616_v39  ;;  %v9260_v39 = vld [vmem:[%s13749_s28 + $0x68] sm:$0xff] }
 0xbfd   : > { %10039 = vmatprep.mubr.msk.f32.mxu1 %vm10678_vm0, %v13727_v47  ;;  %10077 = vmatprep.mubr.msk.f32.mxu0 %vm10678_vm0, %v13727_v47 }
 0xbfe   : > { %10066 = vmatpush3.msra.mxu0 %v9250_v37  ;;  %v13257_v37 = vld [vmem:[%s13752_s0 + $0x8] sm:$0xff] }
 0xbff   : > { %10067 = vmatprep.subr.mxu0 %v13727_v47 }
 0xc00   : > { %10068 = vmatpush3.msra.mxu0 %v9249_v35  ;;  %v13261_v35 = vld [vmem:[%s13752_s0] sm:$0xff] }
 0xc01   : > { %10069 = vmatprep.subr.mxu0 %v13727_v47 }
 0xc02   : > { %10070 = vmatpush3.msra.mxu0 %v9248_v26 }
 0xc03   : > { %10071 = vmatprep.subr.mxu0 %v13727_v47 }
 0xc04   : > { %10072 = vmatpush3.msra.mxu0 %v9247_v32 }
 0xc05   : > { %10073 = vmatprep.subr.mxu0 %v13727_v47 }
 0xc06   : > { %10074 = vmatpush3.msra.mxu0 %v9246_v16 }
 0xc07   : > { %10075 = vmatprep.subr.mxu0 %v13727_v47 }
 0xc08   : > { %10076 = vmatpush3.msra.mxu0 %v9245_v2 }
 0xc09   : > { %10099 = vmatprep.subr.mxu0 %v13727_v47 }
 0xcb4   : > { %v6699_v28 = vpop.f32.mrf.mxu1  ;;  %v6796_v45 = vpop.f32.mrf.mxu0 }
 0xcb5   : > { %v6810_v40 = vmax.f32 %v6699_v28, %v6796_v45  ;;  %v5351_v28 = vmax.f32 %v5346_v42, 0.0  ;;  %v5356_v45 = vrot.slane %v5352_v50, %v13728_v61 }
 0xcb6   : > { %v9985_v55 = vpop.f32.mrf.mxu1  ;;  %v10026_v18 = vpop.f32.mrf.mxu0 }
 0xcb7   : > { %v9259_v55 = vld [vmem:[%s13749_s28 + $0x60] sm:$0xff]  ;;  %v7294_v18 = vld [vmem:[%s13749_s28 + $0x10] sm:$0xff] }
 0xcb8   : > { %v6704_v3 = vpop.f32.mrf.mxu1  ;;  %v6801_v29 = vpop.f32.mrf.mxu0 }
 0xcb9   : > { %v6811_v31 = vmax.f32 %v6704_v3, %v6801_v29  ;;  %v9258_v3 = vld [vmem:[%s13749_s28 + $0x58] sm:$0xff]  ;;  %v7293_v29 = vld [vmem:[%s13749_s28 + $0x8] sm:$0xff] }
 0xcba   : > { %v9988_v54 = vpop.f32.mrf.mxu1  ;;  %v10029_v1 = vpop.f32.mrf.mxu0 }
 0xcbb   : > { %v5357_v54 = vmul.f32 %v5356_v45, %v5351_v28  ;;  %v5361_v1 = vrot.slane %v5352_v50, %v13731_v21 }
 0xcbc   : > { %v6709_v48 = vpop.f32.mrf.mxu1  ;;  %v6806_v46 = vpop.f32.mrf.mxu0 }
 0xcbd   : > { %v6812_v53 = vmax.f32 %v6709_v48, %v6806_v46  ;;  %v9257_v48 = vld [vmem:[%s13749_s28 + $0x50] sm:$0xff]  ;;  %v7292_v46 = vld [vmem:[%s13749_s28] sm:$0xff] }
 0xcbe   : > { %v9991_v57 = vpop.f32.mrf.mxu1  ;;  %v10032_v6 = vpop.f32.mrf.mxu0 }
 0xcbf   : > { %10034 = vmatpush3.msk.msra.mxu1 %vm3333_vm4, %v6812_v53  ;;  %v5362_v57 = vadd.f32 %v5361_v1, %v5357_v54  ;;  %v9255_v6 = vld [vmem:[%s13749_s28 + $0x40] sm:$0xff] }
 0xcc0   : > { %10035 = vmatprep.subr.mxu1 %v13727_v47 }
 0xcc1   : > { %10036 = vmatpush3.msra.mxu1 %v6811_v31 }
 0xcc2   : > { %10037 = vmatprep.subr.mxu1 %v13727_v47 }
 0xcc3   : > { %10038 = vmatpush3.msra.mxu1 %v6810_v40 }
 0xcc4   : > { %10042 = vmatprep.subr.mxu1 %v13727_v47  ;;  %10040 = vmatmul.mubr.msk.f32.vlgmr.msra.gmra.mxu1 %vm6814_vm12, %v6813_v7  ;;  %v13237_v7 = vld [vmem:[%s13752_s0 + $0x28] sm:$0xff] }
 0xcc5   : > { %10043 = vmatpush3.msk.msra.mxu1 %vm3333_vm4, %v6812_v53  ;;  %10048 = vmatprep.mubr.msk.f32.mxu1 %vm10678_vm0, %v13727_v47  ;;  %v9256_v53 = vld [vmem:[%s13749_s28 + $0x48] sm:$0xff]  ;;  %vm8537_vm4 = vcmask 158800  }
 0xcc6   : > { %10044 = vmatprep.subr.mxu1 %v13727_v47 }
 0xcc7   : > { %10045 = vmatpush3.msra.mxu1 %v6811_v31  ;;  %v13218_v31 = vld [vmem:[%s13752_s0 + $0x38] sm:$0xff] }
 0xcc8   : > { %10046 = vmatprep.subr.mxu1 %v13727_v47 }
 0xcc9   : > { %10047 = vmatpush3.msra.mxu1 %v6810_v40  ;;  %v13226_v40 = vld [vmem:[%s13752_s0 + $0x30] sm:$0xff] }
 0xcca   : > { %10049 = vmatmul.mubr.msk.f32.vlgmr.msra.gmra.mxu1 %vm6814_vm12, %v9239_v5  ;;  %10051 = vmatprep.subr.mxu1 %v13727_v47  ;;  %v13242_v5 = vld [vmem:[%s13752_s0 + $0x20] sm:$0xff]  ;;  %s13754_s0 = sld [smem:[#allocation30_spill]] }
 0xccb   : > { %10053 = vmatprep.mubr.msk.f32.mxu1 %vm10678_vm0, %v13727_v47 }
 0xd84   : > { %v6887_v23 = vpop.f32.mrf.mxu1 }
 0xd86   : > { %v10041_v11 = vpop.f32.mrf.mxu1 }
 0xd8a   : > { %v6962_v13 = vpop.f32.mrf.mxu1 }
 0xd8b   : > { %v6966_v44 = vmax.f32 %v6887_v23, %v6962_v13 }
 0xd8c   : > { %v10050_v33 = vpop.f32.mrf.mxu1 }
 0xd8d   : > { %v6967_v0 = vmax.f32 %v6966_v44, 0.0 }
 0xd8f   : > { %v6973_v9 = vmul.f32 %v6972_v15, %v6967_v0 }
 0xd91   : > { %v6978_v38 = vadd.f32 %v6977_v8, %v6973_v9 }
 0xd93   : > { %10052 = vmatpush3.msra.mxu1 %v6978_v38 }
 0xd94   : > { %10054 = vmatmul.mubr.msk.f32.vlgmr.msra.gmra.mxu1 %vm6982_vm13, %v13132_v56  ;;  %10056 = vmatprep.subr.mxu1 %v13727_v47 }
 0xd95   : > { %10057 = vmatpush3.msra.mxu1 %v6978_v38  ;;  %10058 = vmatprep.mubr.msk.f32.mxu1 %vm10678_vm0, %v13727_v47 }
 0xd96   : > { %10080 = vmatprep.subr.mxu1 %v13727_v47 }
 0xd98   : > { %10059 = vmatmul.mubr.msk.f32.vlgmr.msra.gmra.mxu1 %vm6982_vm13, %v13140_v10 }
 0xd99   : > { %10081 = vmatpush3.msra.mxu1 %v7136_v17  ;;  %10096 = vmatprep.mubr.msk.f32.mxu1 %vm10678_vm0, %v13727_v47 }
 0xd9a   : > { %10082 = vmatprep.subr.mxu1 %v13727_v47 }
 0xd9b   : > { %10083 = vmatpush3.msra.mxu1 %v7135_v43  ;;  %v7692_v43 = vld [vmem:[%s13753_s10 + $0x18] sm:$0xff] }
 0xd9c   : > { %10084 = vmatprep.subr.mxu1 %v13727_v47 }
 0xd9d   : > { %10085 = vmatpush3.msra.mxu1 %v7134_v58  ;;  %v7691_v58 = vld [vmem:[%s13753_s10 + $0x10] sm:$0xff] }
 0xd9e   : > { %10086 = vmatprep.subr.mxu1 %v13727_v47 }
 0xd9f   : > { %10087 = vmatpush3.msra.mxu1 %v7133_v19  ;;  %v7690_v19 = vld [vmem:[%s13753_s10 + $0x8] sm:$0xff] }
 0xda0   : > { %10088 = vmatprep.subr.mxu1 %v13727_v47 }
 0xda1   : > { %10089 = vmatpush3.msra.mxu1 %v7132_v52  ;;  %v7689_v52 = vld [vmem:[%s13753_s10] sm:$0xff] }
 0xda2   : > { %10090 = vmatprep.subr.mxu1 %v13727_v47 }
 0xda3   : > { %10091 = vmatpush3.msra.mxu1 %v7131_v25  ;;  %v13287_v25 = vld [vmem:[%s13754_s0] ss:$0 sm:$0xff]  ;;  %s13757_s0 = sld [smem:[#allocation33_spill]] }
 0xda4   : > { %10092 = vmatprep.subr.mxu1 %v13727_v47 }
 0xda5   : > { %10093 = vmatpush3.msra.mxu1 %v7130_v59  ;;  %v7678_v59 = vld [vmem:[%s13755_s1] sm:$0x3]  ;;  %s13756_s1 = sld [smem:[#allocation34_spill]] }
 0xda6   : > { %10094 = vmatprep.subr.mxu1 %v13727_v47  ;;  %v13292_v2 = vrot.slane %v7678_v59, %v13728_v61 }
 0xda7   : > { %10095 = vmatpush3.msra.mxu1 %v7129_v30 }
 0xda8   : > { %10118 = vmatprep.subr.mxu1 %v13727_v47 }
 0xdab   : > { %v7927_v42 = vld [vmem:[%s13756_s1 + $0x20] sm:$0xff]  ;;  %v7924_v50 = vld [vmem:[%s13756_s1 + $0x8] sm:$0xff] }
 0xe54   : > { %v7052_v60 = vpop.f32.mrf.mxu1 }
 0xe55   : > { %10097 = vmatmul.mubr.msk.f32.vlgmr.msra.gmra.mxu1 %vm3865_vm6, %v7052_v60 }
 0xe56   : > { %10119 = vmatpush3.msra.mxu1 %v7299_v20  ;;  %v10055_v41 = vpop.f32.mrf.mxu1  ;;  %10134 = vmatprep.mubr.msk.f32.mxu1 %vm10678_vm0, %v13727_v47 }
 0xe57   : > { %10120 = vmatprep.subr.mxu1 %v13727_v47 }
 0xe58   : > { %10121 = vmatpush3.msra.mxu1 %v7298_v27  ;;  %v7125_v36 = vpop.f32.mrf.mxu1  ;;  %v13295_v27 = vrot.slane %v7678_v59, %v13731_v21 }
 0xe59   : > { %10122 = vmatprep.subr.mxu1 %v13727_v47  ;;  %10078 = vmatmul.mubr.msk.f32.vlgmr.msra.gmra.mxu0 %vm3865_vm6, %v7125_v36 }
 0xe5a   : > { %10100 = vmatpush3.msra.mxu0 %v9262_v63  ;;  %10123 = vmatpush3.msra.mxu1 %v7297_v24  ;;  %v10060_v22 = vpop.f32.mrf.mxu1  ;;  %v7930_v63 = vld [vmem:[%s13756_s1 + $0x38] sm:$0xff]  ;;  %v7929_v24 = vld [vmem:[%s13756_s1 + $0x30] sm:$0xff] }
 0xe5b   : > { %10101 = vmatprep.subr.mxu0 %v13727_v47  ;;  %10124 = vmatprep.subr.mxu1 %v13727_v47  ;;  %v7923_v22 = vld [vmem:[%s13756_s1] sm:$0xff] }
 0xe5c   : > { %10102 = vmatpush3.msra.mxu0 %v9261_v4  ;;  %10125 = vmatpush3.msra.mxu1 %v7296_v14  ;;  %v7926_v4 = vld [vmem:[%s13756_s1 + $0x18] sm:$0xff]  ;;  %v7925_v14 = vld [vmem:[%s13756_s1 + $0x10] sm:$0xff] }
 0xe5d   : > { %10103 = vmatprep.subr.mxu0 %v13727_v47  ;;  %10126 = vmatprep.subr.mxu1 %v13727_v47 }
 0xe5e   : > { %10104 = vmatpush3.msra.mxu0 %v9260_v39  ;;  %10127 = vmatpush3.msra.mxu1 %v7295_v62  ;;  %v13349_v39 = vld [vmem:[%s13757_s0] ss:$0 sm:$0xff]  ;;  %s13761_s0 = sld [smem:[#allocation40_spill]] }
 0xe5f   : > { %10105 = vmatprep.subr.mxu0 %v13727_v47  ;;  %10128 = vmatprep.subr.mxu1 %v13727_v47 }
 0xe60   : > { %10106 = vmatpush3.msra.mxu0 %v9259_v55  ;;  %10129 = vmatpush3.msra.mxu1 %v7294_v18 }
 0xe61   : > { %10107 = vmatprep.subr.mxu0 %v13727_v47  ;;  %10130 = vmatprep.subr.mxu1 %v13727_v47 }
 0xe62   : > { %10108 = vmatpush3.msra.mxu0 %v9258_v3  ;;  %10131 = vmatpush3.msra.mxu1 %v7293_v29 }
 0xe63   : > { %10109 = vmatprep.subr.mxu0 %v13727_v47  ;;  %10132 = vmatprep.subr.mxu1 %v13727_v47 }
 0xe64   : > { %10110 = vmatpush3.msra.mxu0 %v9257_v48  ;;  %10133 = vmatpush3.msra.mxu1 %v7292_v46  ;;  %v7938_v48 = vld [vmem:[%s13758_s2 + $0x38] sm:$0xff]  ;;  %v7937_v46 = vld [vmem:[%s13758_s2 + $0x30] sm:$0xff] }
 0xe65   : > { %10111 = vmatprep.subr.mxu0 %v13727_v47  ;;  %10142 = vmatprep.subr.mxu1 %v13727_v47 }
 0xe66   : > { %10112 = vmatpush3.msra.mxu0 %v9256_v53  ;;  %10135 = vmatmul.mubr.msk.f32.vlgmr.msra.gmra.mxu1 %vm3865_vm6, %v7052_v60  ;;  %v7936_v53 = vld [vmem:[%s13758_s2 + $0x28] sm:$0xff] }
 0xe67   : > { %10143 = vmatpush3.msra.mxu1 %v5362_v57  ;;  %10113 = vmatprep.subr.mxu0 %v13727_v47 }
 0xe68   : > { %10114 = vmatpush3.msra.mxu0 %v9255_v6  ;;  %10115 = vmatprep.mubr.msk.f32.mxu0 %vm10678_vm0, %v13727_v47  ;;  %v7934_v6 = vld [vmem:[%s13758_s2 + $0x18] sm:$0xff] }
 0xe69   : > { %10116 = vmatmul.mubr.msk.f32.vlgmr.msra.gmra.mxu0 %vm3865_vm6, %v7125_v36  ;;  %10137 = vmatprep.subr.mxu0 %v13727_v47  ;;  %v7928_v36 = vld [vmem:[%s13756_s1 + $0x28] sm:$0xff]  ;;  %s13762_s1 = sld [smem:[#allocation36_spill]] }
 0xe6a   : > { %10138 = vmatpush3.msra.mxu0 %v5362_v57  ;;  %10139 = vmatprep.mubr.msk.f32.mxu0 %vm10678_vm0, %v13727_v47  ;;  %v7935_v57 = vld [vmem:[%s13758_s2 + $0x20] sm:$0xff] }
 0xe6b   : > { %10144 = vmatprep.mubr.msk.f32.mxu1 %vm10678_vm0, %v13727_v47  ;;  %10147 = vmatprep.subr.mxu0 %v13727_v47 }
 0xe6c   : > { %10145 = vmatmul.mubr.msk.f32.vlgmr.msra.gmra.mxu1 %vm6982_vm13, %v13140_v10  ;;  %10166 = vmatprep.subr.mxu1 %v13727_v47 }
 0xe6d   : > { %10140 = vmatmul.mubr.msk.f32.vlgmr.msra.gmra.mxu0 %vm6982_vm13, %v13132_v56  ;;  %10174 = vmatprep.mubr.msk.f32.mxu1 %vm10678_vm0, %v13727_v47 }
 0xe6e   : > { %10148 = vmatpush3.msra.mxu0 %v13218_v31  ;;  %10163 = vmatprep.mubr.msk.f32.mxu0 %vm10678_vm0, %v13727_v47 }
 0xe6f   : > { %10149 = vmatprep.subr.mxu0 %v13727_v47  ;;  %10167 = vmatpush3.msra.mxu1 %v7692_v43 }
 0xe70   : > { %10150 = vmatpush3.msra.mxu0 %v13226_v40  ;;  %10168 = vmatprep.subr.mxu1 %v13727_v47 }
 0xe71   : > { %10151 = vmatprep.subr.mxu0 %v13727_v47  ;;  %10169 = vmatpush3.msra.mxu1 %v7691_v58 }
 0xe72   : > { %10152 = vmatpush3.msra.mxu0 %v13237_v7  ;;  %10170 = vmatprep.subr.mxu1 %v13727_v47 }
 0xe73   : > { %10153 = vmatprep.subr.mxu0 %v13727_v47  ;;  %10171 = vmatpush3.msra.mxu1 %v7690_v19 }
 0xe74   : > { %10154 = vmatpush3.msra.mxu0 %v13242_v5  ;;  %10172 = vmatprep.subr.mxu1 %v13727_v47 }
 0xe75   : > { %10155 = vmatprep.subr.mxu0 %v13727_v47  ;;  %10173 = vmatpush3.msra.mxu1 %v7689_v52 }
 0xe76   : > { %10156 = vmatpush3.msra.mxu0 %v13247_v34  ;;  %10177 = vmatprep.subr.mxu1 %v13727_v47 }
 0xe77   : > { %10157 = vmatprep.subr.mxu0 %v13727_v47 }
 0xe78   : > { %10158 = vmatpush3.msra.mxu0 %v13252_v49 }
 0xe79   : > { %10159 = vmatprep.subr.mxu0 %v13727_v47 }
 0xe7a   : > { %10160 = vmatpush3.msra.mxu0 %v13257_v37 }
 0xe7b   : > { %10161 = vmatprep.subr.mxu0 %v13727_v47 }
 0xe7c   : > { %10162 = vmatpush3.msra.mxu0 %v13261_v35 }
 0xe7d   : > { %10196 = vmatprep.subr.mxu0 %v13727_v47 }
 0xf15   : > { %v7288_v26 = vpop.f32.mrf.mxu1 }
 0xf17   : > { %v10098_v32 = vpop.f32.mrf.mxu1 }
 0xf18   : > { %v8104_v32 = vld [vmem:[%s13760_s16 + $0x28] sm:$0xff] }
 0xf19   : > { %v7215_v23 = vpop.f32.mrf.mxu0 }
 0xf1a   : > { %v7289_v0 = vadd.f32 %v7288_v26, %v7215_v23  ;;  %v8105_v26 = vld [vmem:[%s13760_s16 + $0x30] sm:$0xff]  ;;  %v8103_v23 = vld [vmem:[%s13760_s16 + $0x20] sm:$0xff] }
 0xf1b   : > { %v10079_v11 = vpop.f32.mrf.mxu0 }
 0xf1c   : > { %v8102_v11 = vld [vmem:[%s13760_s16 + $0x18] sm:$0xff] }
 0xf26   : > { %v7445_v12 = vpop.f32.mrf.mxu1 }
 0xf28   : > { %v10136_v13 = vpop.f32.mrf.mxu1 }
 0xf29   : > { %v7375_v44 = vpop.f32.mrf.mxu0  ;;  %v8100_v13 = vld [vmem:[%s13760_s16 + $0x8] sm:$0xff] }
 0xf2a   : > { %v7446_v15 = vadd.f32 %v7445_v12, %v7375_v44  ;;  %v8101_v12 = vld [vmem:[%s13760_s16 + $0x10] sm:$0xff]  ;;  %v8099_v44 = vld [vmem:[%s13760_s16] sm:$0xff] }
 0xf2b   : > { %v10117_v33 = vpop.f32.mrf.mxu0 }
 0xf2c   : > { %v7585_v8 = vpop.f32.mrf.mxu1 }
 0xf2d   : > { %v7515_v9 = vpop.f32.mrf.mxu0  ;;  %v13266_v38 = vadd.f32 %v7585_v8, %v7446_v15 }
 0xf2e   : > { %v13268_v56 = vadd.f32 %v7515_v9, %v7289_v0  ;;  %v10146_v10 = vpop.f32.mrf.mxu1  ;;  %v8188_v0 = vld [vmem:[%s13761_s0 + $0x8] sm:$0x3]  ;;  %v8187_v9 = vld [vmem:[%s13761_s0] sm:$0xff] }
 0xf2f   : > { %v10141_v17 = vpop.f32.mrf.mxu0 }
 0xf30   : > { %10164 = vmatmul.mubr.msk.f32.vlgmr.msra.gmra.mxu0 %vm3865_vm6, %v13268_v56 }
 0xf31   : > { %10204 = vmatprep.mubr.msk.f32.mxu0 %vm10678_vm0, %v13727_v47  ;;  %10197 = vmatpush3.msra.mxu0 %v7692_v43 }
 0xf32   : > { %10198 = vmatprep.subr.mxu0 %v13727_v47 }
 0xf33   : > { %10199 = vmatpush3.msra.mxu0 %v7691_v58 }
 0xf34   : > { %10200 = vmatprep.subr.mxu0 %v13727_v47 }
 0xf35   : > { %10201 = vmatpush3.msra.mxu0 %v7690_v19 }
 0xf36   : > { %10202 = vmatprep.subr.mxu0 %v13727_v47 }
 0xf37   : > { %10203 = vmatpush3.msra.mxu0 %v7689_v52 }
 0xf38   : > { %10207 = vmatprep.subr.mxu0 %v13727_v47 }
 0xff0   : > { %v7673_v30 = vpop.f32.mrf.mxu0 }
 0xff1   : > { %v7674_v16 = vadd.f32 %v13287_v25, %v7673_v30 }
 0xff2   : > { %v10165_v20 = vpop.f32.mrf.mxu0 }
 0xff3   : > { %v7677_v60 = vmax.f32 %v7674_v16, 0.0  ;;  %v8345_v16 = vld [vmem:[%s13764_s5] sm:$0xf]  ;;  %s10680_s5 = smov 20  }
 0xff5   : > { %v7683_v51 = vmul.f32 %v13292_v2, %v7677_v60 }
 0xff7   : > { %v7688_v41 = vadd.f32 %v13295_v27, %v7683_v51 }
 0xff9   : > { %10175 = vmatmul.mubr.msk.f32.vlgmr.msra.gmra.mxu1 %vm7700_vm14, %v7688_v41 }
 0xffa   : > { %10178 = vmatpush3.msra.mxu1 %v13218_v31  ;;  %10193 = vmatprep.mubr.msk.f32.mxu1 %vm10678_vm0, %v13727_v47 }
 0xffb   : > { %10179 = vmatprep.subr.mxu1 %v13727_v47 }
 0xffc   : > { %10180 = vmatpush3.msra.mxu1 %v13226_v40  ;;  %v7933_v40 = vld [vmem:[%s13758_s2 + $0x10] sm:$0xff] }
 0xffd   : > { %10181 = vmatprep.subr.mxu1 %v13727_v47 }
 0xffe   : > { %10182 = vmatpush3.msra.mxu1 %v13237_v7 }
 0xfff   : > { %10183 = vmatprep.subr.mxu1 %v13727_v47 }
0x1000   : > { %10184 = vmatpush3.msra.mxu1 %v13242_v5  ;;  %v7932_v5 = vld [vmem:[%s13758_s2 + $0x8] sm:$0xff] }
0x1001   : > { %10185 = vmatprep.subr.mxu1 %v13727_v47 }
0x1002   : > { %10186 = vmatpush3.msra.mxu1 %v13247_v34  ;;  %v7931_v34 = vld [vmem:[%s13758_s2] sm:$0xff]  ;;  %s13763_s2 = sld [smem:[#allocation37_spill]] }
0x1003   : > { %10187 = vmatprep.subr.mxu1 %v13727_v47 }
0x1004   : > { %10188 = vmatpush3.msra.mxu1 %v13252_v49  ;;  %v8190_v49 = vld [vmem:[%s13759_s3 + $0x8] sm:$0x3] }
0x1005   : > { %10189 = vmatprep.subr.mxu1 %v13727_v47 }
0x1006   : > { %10190 = vmatpush3.msra.mxu1 %v13257_v37  ;;  %v8189_v37 = vld [vmem:[%s13759_s3] sm:$0xff]  ;;  %s10679_s3 = smov 10  }
0x1007   : > { %10191 = vmatprep.subr.mxu1 %v13727_v47 }
0x1008   : > { %10192 = vmatpush3.msra.mxu1 %v13261_v35  ;;  %v8106_v35 = vld [vmem:[%s13760_s16 + $0x38] sm:$0xff]  ;;  %v8088_v10 = vld [vmem:[%s13763_s2] sm:$0x3] }
0x1009   : > { %10194 = vmatmul.mubr.msk.f32.vlgmr.msra.gmra.mxu1 %vm3865_vm6, %v13266_v38  ;;  %10226 = vmatprep.subr.mxu1 %v13727_v47  ;;  %v8092_v19 = vrot.slane %v8088_v10, %v13728_v61 }
0x100a   : > { %10227 = vmatpush3.msra.mxu1 %v7930_v63  ;;  %10242 = vmatprep.mubr.msk.f32.mxu1 %vm10678_vm0, %v13727_v47 }
0x100b   : > { %10228 = vmatprep.subr.mxu1 %v13727_v47 }
0x100c   : > { %10229 = vmatpush3.msra.mxu1 %v7929_v24 }
0x100d   : > { %10230 = vmatprep.subr.mxu1 %v13727_v47 }
0x100e   : > { %10231 = vmatpush3.msra.mxu1 %v7928_v36 }
0x100f   : > { %10232 = vmatprep.subr.mxu1 %v13727_v47 }
0x1010   : > { %10233 = vmatpush3.msra.mxu1 %v7927_v42 }
0x1011   : > { %10234 = vmatprep.subr.mxu1 %v13727_v47 }
0x1012   : > { %10235 = vmatpush3.msra.mxu1 %v7926_v4  ;;  %v8446_v4 = vld [vmem:[%s10929_s27 + $0x8] sm:$0xf] }
0x1013   : > { %10236 = vmatprep.subr.mxu1 %v13727_v47 }
0x1014   : > { %10237 = vmatpush3.msra.mxu1 %v7925_v14  ;;  %v8445_v14 = vld [vmem:[%s10929_s27] sm:$0xff] }
0x1015   : > { %10238 = vmatprep.subr.mxu1 %v13727_v47 }
0x1016   : > { %10239 = vmatpush3.msra.mxu1 %v7924_v50 }
0x1017   : > { %10240 = vmatprep.subr.mxu1 %v13727_v47 }
0x1018   : > { %10241 = vmatpush3.msra.mxu1 %v7923_v22  ;;  %v9284_v22 = vld [vmem:[#allocation2] ss:$0 sm:$0xff] }
0x1019   : > { %10243 = vmatmul.mubr.msk.f32.vlgmr.msra.gmra.mxu1 %vm3865_vm6, %v13268_v56  ;;  %10264 = vmatprep.subr.mxu1 %v13727_v47  ;;  %v9275_v56 = vld [vmem:[%s13762_s1] ss:$0 sm:$0xff] }
0x101a   : > { %10268 = vmatprep.mubr.msk.f32.mxu1 %vm10678_vm0, %v13727_v47  ;;  %10265 = vmatpush3.msk.msra.mxu1 %vm8195_vm1, %v8190_v49 }
0x101b   : > { %10266 = vmatprep.subr.mxu1 %v13727_v47 }
0x101c   : > { %10267 = vmatpush3.msra.mxu1 %v8189_v37 }
0x101d   : > { %10271 = vmatprep.subr.mxu1 %v13727_v47 }
0x10b9   : > { %v7770_v62 = vpop.f32.mrf.mxu1 }
0x10ba   : > { %v13352_v28 = vadd.f32 %v13349_v39, %v7770_v62 }
0x10bb   : > { %v10176_v45 = vpop.f32.mrf.mxu1 }
0x10bc   : > { %8533 = vst.msk [vmem:[%s13344_s4] sm:$0xf] %vm8532_vm15, %v13352_v28 }
0x10c9   : > { %v7843_v55 = vpop.f32.mrf.mxu1 }
0x10ca   : > { %v7844_v18 = vadd.f32 %v13287_v25, %v7843_v55  ;;  %v8097_v25 = vrot.slane %v8088_v10, %v13731_v21 }
0x10cb   : > { %v10195_v3 = vpop.f32.mrf.mxu1 }
0x10cc   : > { %v7847_v29 = vmax.f32 %v7844_v18, 0.0 }
0x10ce   : > { %v7848_v54 = vmul.f32 %v7847_v29, %v13292_v2 }
0x10d0   : > { %v7849_v1 = vadd.f32 %v7848_v54, %v13295_v27 }
0x10d2   : > { %10205 = vmatmul.mubr.msk.f32.vlgmr.msra.gmra.mxu0 %vm7700_vm14, %v7849_v1  ;;  %v9285_v1 = vld [vmem:[#allocation4] ss:$0 sm:$0xff] }
0x10d3   : > { %10208 = vmatpush3.msra.mxu0 %v7938_v48  ;;  %10223 = vmatprep.mubr.msk.f32.mxu0 %vm10678_vm0, %v13727_v47 }
0x10d4   : > { %10209 = vmatprep.subr.mxu0 %v13727_v47 }
0x10d5   : > { %10210 = vmatpush3.msra.mxu0 %v7937_v46 }
0x10d6   : > { %10211 = vmatprep.subr.mxu0 %v13727_v47 }
0x10d7   : > { %10212 = vmatpush3.msra.mxu0 %v7936_v53 }
0x10d8   : > { %10213 = vmatprep.subr.mxu0 %v13727_v47 }
0x10d9   : > { %10214 = vmatpush3.msra.mxu0 %v7935_v57  ;;  %v13370_v31 = vpop.f32.mrf.mxu1 }
0x10da   : > { %10215 = vmatprep.subr.mxu0 %v13727_v47 }
0x10db   : > { %10216 = vmatpush3.msra.mxu0 %v7934_v6  ;;  %v10244_v7 = vpop.f32.mrf.mxu1 }
0x10dc   : > { %10217 = vmatprep.subr.mxu0 %v13727_v47 }
0x10dd   : > { %10218 = vmatpush3.msra.mxu0 %v7933_v40 }
0x10de   : > { %10219 = vmatprep.subr.mxu0 %v13727_v47 }
0x10df   : > { %10220 = vmatpush3.msra.mxu0 %v7932_v5 }
0x10e0   : > { %10221 = vmatprep.subr.mxu0 %v13727_v47 }
0x10e1   : > { %10222 = vmatpush3.msra.mxu0 %v7931_v34 }
0x10e2   : > { %10224 = vmatmul.mubr.msk.f32.vlgmr.msra.gmra.mxu0 %vm3865_vm6, %v13266_v38  ;;  %10245 = vmatprep.subr.mxu0 %v13727_v47 }
0x10e3   : > { %10261 = vmatprep.mubr.msk.f32.mxu0 %vm10678_vm0, %v13727_v47  ;;  %10246 = vmatpush3.msra.mxu0 %v8106_v35 }
0x10e4   : > { %10247 = vmatprep.subr.mxu0 %v13727_v47 }
0x10e5   : > { %10248 = vmatpush3.msra.mxu0 %v8105_v26 }
0x10e6   : > { %10249 = vmatprep.subr.mxu0 %v13727_v47 }
0x10e7   : > { %10250 = vmatpush3.msra.mxu0 %v8104_v32 }
0x10e8   : > { %10251 = vmatprep.subr.mxu0 %v13727_v47 }
0x10e9   : > { %10252 = vmatpush3.msra.mxu0 %v8103_v23 }
0x10ea   : > { %10253 = vmatprep.subr.mxu0 %v13727_v47 }
0x10eb   : > { %10254 = vmatpush3.msra.mxu0 %v8102_v11 }
0x10ec   : > { %10255 = vmatprep.subr.mxu0 %v13727_v47 }
0x10ed   : > { %10256 = vmatpush3.msra.mxu0 %v8101_v12 }
0x10ee   : > { %10257 = vmatprep.subr.mxu0 %v13727_v47 }
0x10ef   : > { %10258 = vmatpush3.msra.mxu0 %v8100_v13 }
0x10f0   : > { %10259 = vmatprep.subr.mxu0 %v13727_v47 }
0x10f1   : > { %10260 = vmatpush3.msra.mxu0 %v8099_v44 }
0x1192   : > { %v7919_v15 = vpop.f32.mrf.mxu0 }
0x1193   : > { %v7920_v33 = vadd.f32 %v13349_v39, %v7919_v15  ;;  %v8434_v39 = vld [vmem:[%s10924_s9] sm:$0x3] }
0x1194   : > { %v10206_v8 = vpop.f32.mrf.mxu0  ;;  %v8438_v55 = vrot.slane %v8434_v39, %v13728_v61  ;;  %v8443_v3 = vrot.slane %v8434_v39, %v13731_v21 }
0x1195   : > { %8534 = vrot.lane.b32.xlu0 %v7920_v33, %s10679_s3  ;;  %10269 = vmatmul.mubr.msk.f32.vlgmr.msra.gmra.mxu1 %vm8191_vm2, %v7920_v33  ;;  %s13765_s3 = sld [smem:[#allocation39_spill]] }
0x1196   : > { %10272 = vmatpush3.msk.msra.mxu1 %vm8195_vm1, %v8188_v0  ;;  %10275 = vmatprep.mubr.msk.f32.mxu1 %vm10678_vm0, %v13727_v47 }
0x1197   : > { %10273 = vmatprep.subr.mxu1 %v13727_v47 }
0x1198   : > { %10274 = vmatpush3.msra.mxu1 %v8187_v9 }
0x1199   : > { %10276 = vmatmul.mubr.msk.f32.vlgmr.msra.gmra.mxu1 %vm8191_vm2, %v13352_v28  ;;  %10278 = vmatprep.subr.mxu1 %v13727_v47 }
0x119a   : > { %10280 = vmatprep.mubr.msk.f32.mxu1 %vm10678_vm0, %v13727_v47  ;;  %10279 = vmatpush3.msk.msra.mxu1 %vm8350_vm3, %v8345_v16 }
0x119b   : > { %10283 = vmatprep.subr.mxu1 %v13727_v47  ;;  %v9276_v63 = vld [vmem:[%s13765_s3] ss:$0 sm:$0xff] }
0x11a2   : > { %v8005_v38 = vpop.f32.mrf.mxu0 }
0x11a3   : > { %v8076_v17 = vadd.f32 %v13370_v31, %v8005_v38 }
0x11a4   : > { %v10225_v43 = vpop.f32.mrf.mxu0 }
0x11a5   : > { %v8086_v58 = vadd.f32 %v9275_v56, %v8076_v17 }
0x11a7   : > { %v8087_v52 = vmax.f32 %v8086_v58, 0.0 }
0x11a9   : > { %v8093_v59 = vmul.f32 %v8092_v19, %v8087_v52 }
0x11ab   : > { %v8098_v30 = vadd.f32 %v8097_v25, %v8093_v59 }
0x11ad   : > { %10262 = vmatmul.mubr.msk.f32.vlgmr.msra.gmra.mxu0 %vm3865_vm6, %v8098_v30  ;;  %vm8543_vm6 = vcmask 175264  }
0x1207   : > { %v8535_v2 = vpop.permute.xlu0 %8534 }
0x1208   : > { %8538 = vst.msk [vmem:[%s13344_s4] sm:$0xf] %vm8537_vm4, %v8535_v2 }
0x1255   : > { %v8265_v20 = vpop.f32.mrf.mxu1 }
0x1257   : > { %v10270_v60 = vpop.f32.mrf.mxu1 }
0x1259   : > { %v8341_v27 = vpop.f32.mrf.mxu1 }
0x125a   : > { %v8342_v51 = vadd.f32 %v8341_v27, %v8265_v20 }
0x125b   : > { %v10277_v41 = vpop.f32.mrf.mxu1 }
0x126d   : > { %v8183_v24 = vpop.f32.mrf.mxu0 }
0x126e   : > { %v8184_v36 = vadd.f32 %v9276_v63, %v8183_v24 }
0x126f   : > { %v10263_v42 = vpop.f32.mrf.mxu0 }
0x1270   : > { %10281 = vmatmul.mubr.msk.f32.vlgmr.msra.gmra.mxu1 %vm8346_vm5, %v8184_v36 }
0x1271   : > { %10287 = vmatprep.mubr.msk.f32.mxu1 %vm10678_vm0, %v13727_v47  ;;  %10284 = vmatpush3.msk.msra.mxu1 %vm8350_vm3, %v8446_v4  ;;  %vm8454_vm0 = vcmask 97280  }
0x1272   : > { %10285 = vmatprep.subr.mxu1 %v13727_v47 }
0x1273   : > { %10286 = vmatpush3.msra.mxu1 %v8445_v14 }
0x1330   : > { %v8420_v50 = vpop.f32.mrf.mxu1 }
0x1331   : > { %v8424_v62 = vadd.f32 %v8420_v50, %v8342_v51 }
0x1332   : > { %v10282_v28 = vpop.f32.mrf.mxu1 }
0x1333   : > { %v8432_v45 = vadd.f32 %v9284_v22, %v8424_v62 }
0x1335   : > { %v8433_v18 = vmax.f32 %v8432_v45, 0.0 }
0x1337   : > { %v8439_v29 = vmul.f32 %v8438_v55, %v8433_v18 }
0x1339   : > { %v8444_v54 = vadd.f32 %v8443_v3, %v8439_v29 }
0x133b   : > { %10288 = vmatmul.mubr.msk.f32.vlgmr.msra.gmra.mxu1 %vm8454_vm0, %v8444_v54 }
0x13fb   : > { %v8527_v47 = vpop.f32.mrf.mxu1 }
0x13fc   : > { %v8528_v48 = vadd.f32 %v9285_v1, %v8527_v47 }
0x13fd   : > { %v10289_v46 = vpop.f32.mrf.mxu1 }
0x13fe   : > { %8540 = vrot.lane.b32.xlu0 %v8528_v48, %s10680_s5 }
0x1470   : > { %v8541_v53 = vpop.permute.xlu0 %8540 }
0x1471   : > { %8544 = vst.msk [vmem:[%s13344_s4] sm:$0xf] %vm8543_vm6, %v8541_v53 }
0x1472 PF: > { %s113_s15 = sadd.s32 1, %s10622_s15  }
0x1473   : > { %p110_p3 = scmp.ge.s32.totalorder %s113_s15, 4  }
0x1475   :  { %112 = sbr.rel (!%p110_p3) target bundleno = 102 (0x66), region = 333 }
0x147a   :  { %8564 = vsyncpa [#allocation3], 1 }
0x147b   :  { %8566 = vsyncpa [#allocation3 + $0x1], 1 }
0x147c   :  { %8567 = vsyncpa [#allocation5], 1 }

</bundles_post_ra>
